<compile_context>
chip_gen: v5e
topology: v5e:2x2
jax: 0.10.0
libtpu: 0.0.40
codegen_flags: <defaults>
</compile_context>

<pallas_src>
import math

import jax
import jax.numpy as jnp
from jax.experimental import pallas as pl
from jax.experimental.pallas import tpu as pltpu  # noqa: F401  (not required for these no-grid kernels)

# ---- small, forward-consistent configuration --------------------------------
B           = 2
IN_CH       = 4
FREQ        = 16                       # module default 256, scaled down
TIME        = 32
POOL        = [(2, 2), (2, 2), (2, 2), (1, 1)]   # (freq_pool, time_pool) per block
FILTERS     = [8, 16, 32, 64]
RNN_SIZE    = 32
N_RNN       = 3
FC_SIZE     = 64
OUT_CLASSES = 14
DOA_OUT     = OUT_CLASSES * 3          # 42   -> "sed" head output size (module quirk)
SED_OUT     = DOA_OUT * 3              # 126  -> "doa" head output size (module quirk)
FREQ_POOL_TOT = math.prod(p[0] for p in POOL)          # 8
TIME_POOL_TOT = math.prod(p[1] for p in POOL)          # 8
TIME_POOLED   = TIME // TIME_POOL_TOT                  # 4
RNN_IN        = FILTERS[-1] * (FREQ // FREQ_POOL_TOT)  # 128 (analog of hardcoded 1024)


def _sigmoid(x):
    # sigmoid(x) = 0.5*(tanh(x/2)+1): single EUP tanh, no divide on the GRU critical path
    return 0.5 * (jnp.tanh(0.5 * x) + 1.0)


# ---------------- fused conv3x3 + bias + BN + ReLU + maxpool kernel -----------
def _conv_block_kernel(x_ref, w_ref, b_ref, sc_ref, sh_ref, o_ref):
    # x_ref: (PE, Np, 9*Cin) -- PE = pool window elements (ph*pw), Np = B*Fo*To
    # w_ref: (9*Cin, Cout); b/sc/sh: (1, Cout)
    pooled = None
    for e in range(x_ref.shape[0]):                       # static, <= 4
        y = jnp.dot(x_ref[e], w_ref[...], preferred_element_type=jnp.float32)
        y = jnp.maximum((y + b_ref[...]) * sc_ref[...] + sh_ref[...], 0.0)
        pooled = y if pooled is None else jnp.maximum(pooled, y)
    o_ref[...] = pooled


def conv_block(x, w, b, sc, sh, ph, pw):
    """x: (B, F, T, Cin) -> (B, F//ph, T//pw, Cout). One single-step pallas_call."""
    bq, f, t, cin = x.shape
    cout = w.shape[-1]
    assert f % ph == 0 and t % pw == 0
    xp = jnp.pad(x, ((0, 0), (1, 1), (1, 1), (0, 0)))
    # im2col: column index = (ky*3+kx)*Cin + ci  <->  rows of w
    cols = jnp.concatenate(
        [xp[:, ky:ky + f, kx:kx + t, :] for ky in range(3) for kx in range(3)],
        axis=-1)                                          # (B, F, T, 9*Cin)
    fo, to = f // ph, t // pw
    # group rows by pooling window element so the kernel pools via elementwise max
    cols = cols.reshape(bq, fo, ph, to, pw, 9 * cin)
    cols = jnp.transpose(cols, (2, 4, 0, 1, 3, 5)).reshape(ph * pw, bq * fo * to, 9 * cin)
    y = pl.pallas_call(
        _conv_block_kernel,
        out_shape=jax.ShapeDtypeStruct((bq * fo * to, cout), jnp.float32),
    )(cols, w, b, sc, sh)
    return y.reshape(bq, fo, to, cout)


# ------------- fused 3-layer bidirectional GRU + both FC heads kernel ---------
def _rnn_head_kernel(x_ref,
                     wi0, wh0, bi0, bh0,
                     wi1, wh1, bi1, bh1,
                     wi2, wh2, bi2, bh2,
                     shw, shb, sow, sob,
                     dhw, dhb, dow, dob,
                     sed_ref, doa_ref):
    # x_ref: (T, B, D); wi: (D, 6H) [fwd r|z|n | bwd r|z|n]; wh: (2, H, 3H);
    # bi: (1, 6H); bh: (2, 1, 3H).  Gate order (r, z, n) as in torch.
    t_steps, bq, _ = x_ref.shape
    hdim = wh0.shape[1]

    def gru_bidir(xs, wi_ref, wh_ref, bi_ref, bh_ref):
        # hoisted input projection for BOTH directions: one (T*B, D)@(D, 6H) matmul
        x2d = jnp.concatenate(xs, axis=0)                               # (T*B, D)
        xg = jnp.dot(x2d, wi_ref[...], preferred_element_type=jnp.float32) + bi_ref[...]
        xg_t = [xg[t * bq:(t + 1) * bq, :] for t in range(t_steps)]     # static slices

        def run(direction, order, goff):
            whd = wh_ref[direction]                                     # (H, 3H)
            bhd = bh_ref[direction]                                     # (1, 3H)
            h = jnp.zeros((bq, hdim), jnp.float32)
            outs = [None] * t_steps
            for t in order:                                             # fully unrolled
                g = xg_t[t]
                hh = jnp.dot(h, whd, preferred_element_type=jnp.float32) + bhd
                r = _sigmoid(g[:, goff:goff + hdim] + hh[:, 0:hdim])
                z = _sigmoid(g[:, goff + hdim:goff + 2 * hdim] + hh[:, hdim:2 * hdim])
                n = jnp.tanh(g[:, goff + 2 * hdim:goff + 3 * hdim]
                             + r * hh[:, 2 * hdim:3 * hdim])
                h = (1.0 - z) * n + z * h
                outs[t] = h
            return outs

        of = run(0, range(t_steps), 0)
        ob = run(1, range(t_steps - 1, -1, -1), 3 * hdim)
        return [jnp.concatenate([of[t], ob[t]], axis=-1) for t in range(t_steps)]

    xs = [x_ref[t] for t in range(t_steps)]                             # T x (B, D)
    for layer in ((wi0, wh0, bi0, bh0), (wi1, wh1, bi1, bh1), (wi2, wh2, bi2, bh2)):
        xs = gru_bidir(xs, *layer)

    # rows ordered (b major, t minor) == torch batch_first view (B*T, 2H)
    rows = jnp.concatenate(
        [xs[t][b:b + 1, :] for b in range(bq) for t in range(t_steps)], axis=0)

    def mlp(h, hw_ref, hb_ref, ow_ref, ob_ref):
        for i in range(hw_ref.shape[0]):                                # 3 hidden layers
            h = jnp.maximum(
                jnp.dot(h, hw_ref[i], preferred_element_type=jnp.float32) + hb_ref[i], 0.0)
        return jnp.dot(h, ow_ref[...], preferred_element_type=jnp.float32) + ob_ref[...]

    sed_ref[...] = _sigmoid(mlp(rows, shw, shb, sow, sob))
    doa_ref[...] = jnp.tanh(mlp(rows, dhw, dhb, dow, dob))


def rnn_and_heads(h_tbd, params):
    """h_tbd: (T, B, D) -> (sed (B*T, 42), doa (B*T, 126)) in one pallas_call."""
    t_steps, bq, _ = h_tbd.shape
    args = [h_tbd]
    for layer in params["rnn"]:
        args += list(layer)
    args += list(params["sed"]) + list(params["doa"])
    return pl.pallas_call(
        _rnn_head_kernel,
        out_shape=(jax.ShapeDtypeStruct((bq * t_steps, DOA_OUT), jnp.float32),
                   jax.ShapeDtypeStruct((bq * t_steps, SED_OUT), jnp.float32)),
    )(*args)


# --------------------------------- full forward -------------------------------
def seldnet_forward(x_nchw, params):
    x = jnp.transpose(x_nchw, (0, 2, 3, 1)).astype(jnp.float32)     # (B, F, T, C)

    # CNN blocks: Conv3x3(pad=1) -> BN -> ReLU -> MaxPool -> Dropout(eval=id), all fused
    for (w, b, sc, sh), (ph, pw) in zip(params["cnn"], POOL):
        x = conv_block(x, w, b, sc, sh, ph, pw)

    bq, f4, t4, c4 = x.shape
    # torch: x.permute(0, 3, 1, 2).reshape(B, time_pooled, C * F)
    feat = jnp.transpose(x, (0, 2, 3, 1)).reshape(bq, t4, c4 * f4)    # (B, T, D)
    h = jnp.transpose(feat, (1, 0, 2))                                # (T, B, D)

    sed, doa = rnn_and_heads(h, params)
    return sed.reshape(bq, t4, DOA_OUT), doa.reshape(bq, t4, SED_OUT)


# --------------------------- deterministic parameters --------------------------
def init_params(key):
    it = iter(jax.random.split(key, 64))

    def rnd(shape, scale):
        return jax.random.uniform(next(it), shape, jnp.float32, -scale, scale)

    params = {"cnn": [], "rnn": []}
    in_ch = IN_CH
    for c in FILTERS:
        k = 1.0 / math.sqrt(in_ch * 9)
        # row index (ky*3+kx)*in_ch + ci corresponds to torch conv weight[:, ci, ky, kx]
        w = rnd((9 * in_ch, c), k)
        bias = rnd((1, c), k)
        gamma = 1.0 + rnd((1, c), 0.1)
        beta = rnd((1, c), 0.1)
        run_mean = rnd((1, c), 0.1)
        run_var = 1.0 + rnd((1, c), 0.1)
        bn_scale = gamma / jnp.sqrt(run_var + 1e-5)      # eval-mode BN folding
        bn_shift = beta - run_mean * bn_scale
        params["cnn"].append((w, bias, bn_scale, bn_shift))
        in_ch = c

    d = RNN_IN
    for _ in range(N_RNN):
        k = 1.0 / math.sqrt(RNN_SIZE)
        wi = rnd((d, 6 * RNN_SIZE), k)                   # W_ih^T, [fwd r|z|n | bwd r|z|n]
        wh = rnd((2, RNN_SIZE, 3 * RNN_SIZE), k)         # W_hh^T per direction, gates r|z|n
        bi = rnd((1, 6 * RNN_SIZE), k)
        bh = rnd((2, 1, 3 * RNN_SIZE), k)
        params["rnn"].append((wi, wh, bi, bh))
        d = 2 * RNN_SIZE

    assert 2 * RNN_SIZE == FC_SIZE                       # lets the 3 hidden FC layers stack

    def head(out_dim):
        k1 = 1.0 / math.sqrt(2 * RNN_SIZE)
        kf = 1.0 / math.sqrt(FC_SIZE)
        hw = jnp.stack([rnd((2 * RNN_SIZE, FC_SIZE), k1),
                        rnd((FC_SIZE, FC_SIZE), kf),
                        rnd((FC_SIZE, FC_SIZE), kf)], axis=0)
        hb = jnp.stack([rnd((1, FC_SIZE), k1),
                        rnd((1, FC_SIZE), kf),
                        rnd((1, FC_SIZE), kf)], axis=0)
        return (hw, hb, rnd((FC_SIZE, out_dim), kf), rnd((1, out_dim), kf))

    params["sed"] = head(DOA_OUT)
    params["doa"] = head(SED_OUT)
    return params


if __name__ == "__main__":
    key = jax.random.PRNGKey(0)
    pkey, xkey = jax.random.split(key)
    params = init_params(pkey)
    x = jax.random.normal(xkey, (B, IN_CH, FREQ, TIME), jnp.float32)   # NCHW like torch
    fwd = jax.jit(seldnet_forward)
    sed, doa = fwd(x, params)
    jax.block_until_ready((sed, doa))
    assert sed.shape == (B, TIME_POOLED, DOA_OUT)
    assert doa.shape == (B, TIME_POOLED, SED_OUT)
    assert bool(jnp.all(jnp.isfinite(sed))) and bool(jnp.all(jnp.isfinite(doa)))
    print("KERNEL_OK")
</pallas_src>

<mosaic_0001>
module attributes {stable_mosaic.version = 11 : i64} {
  func.func @_conv_block_kernel(%arg0: memref<4x256x36xf32, #tpu.memory_space<vmem>>, %arg1: memref<36x8xf32, #tpu.memory_space<vmem>>, %arg2: memref<1x8xf32, #tpu.memory_space<vmem>>, %arg3: memref<1x8xf32, #tpu.memory_space<vmem>>, %arg4: memref<1x8xf32, #tpu.memory_space<vmem>>, %arg5: memref<256x8xf32, #tpu.memory_space<vmem>>) attributes {dimension_semantics = [], scalar_prefetch = 0 : i64, scratch_operands = 0 : i64, tpu.core_type = #tpu.core_type<tc>} {
    %c0 = arith.constant 0 : index
    %c0_0 = arith.constant 0 : index
    %c0_1 = arith.constant 0 : index
    %0 = vector.load %arg0[%c0, %c0_0, %c0_1] : memref<4x256x36xf32, #tpu.memory_space<vmem>>, vector<1x256x36xf32>
    %1 = vector.shape_cast %0 : vector<1x256x36xf32> to vector<256x36xf32>
    %c0_2 = arith.constant 0 : index
    %c0_3 = arith.constant 0 : index
    %2 = vector.load %arg1[%c0_2, %c0_3] : memref<36x8xf32, #tpu.memory_space<vmem>>, vector<36x8xf32>
    %cst = arith.constant dense<0.000000e+00> : vector<256x8xf32>
    %3 = tpu.matmul %1, %2, %cst {dimension_numbers = #tpu.dot_dimension_numbers<[1], [0], [0], [1], [0, 0, 1, 1], [], []>} : vector<256x36xf32>, vector<36x8xf32>, vector<256x8xf32> -> vector<256x8xf32>
    %c0_4 = arith.constant 0 : index
    %c0_5 = arith.constant 0 : index
    %4 = vector.load %arg2[%c0_4, %c0_5] : memref<1x8xf32, #tpu.memory_space<vmem>>, vector<1x8xf32>
    %5 = vector.broadcast %4 : vector<1x8xf32> to vector<256x8xf32>
    %6 = arith.addf %3, %5 : vector<256x8xf32>
    %c0_6 = arith.constant 0 : index
    %c0_7 = arith.constant 0 : index
    %7 = vector.load %arg3[%c0_6, %c0_7] : memref<1x8xf32, #tpu.memory_space<vmem>>, vector<1x8xf32>
    %8 = vector.broadcast %7 : vector<1x8xf32> to vector<256x8xf32>
    %9 = arith.mulf %6, %8 : vector<256x8xf32>
    %c0_8 = arith.constant 0 : index
    %c0_9 = arith.constant 0 : index
    %10 = vector.load %arg4[%c0_8, %c0_9] : memref<1x8xf32, #tpu.memory_space<vmem>>, vector<1x8xf32>
    %11 = vector.broadcast %10 : vector<1x8xf32> to vector<256x8xf32>
    %12 = arith.addf %9, %11 : vector<256x8xf32>
    %cst_10 = arith.constant 0.000000e+00 : f32
    %13 = vector.broadcast %cst_10 : f32 to vector<256x8xf32>
    %14 = arith.maximumf %12, %13 : vector<256x8xf32>
    %c1 = arith.constant 1 : index
    %c0_11 = arith.constant 0 : index
    %c0_12 = arith.constant 0 : index
    %15 = vector.load %arg0[%c1, %c0_11, %c0_12] : memref<4x256x36xf32, #tpu.memory_space<vmem>>, vector<1x256x36xf32>
    %16 = vector.shape_cast %15 : vector<1x256x36xf32> to vector<256x36xf32>
    %c0_13 = arith.constant 0 : index
    %c0_14 = arith.constant 0 : index
    %17 = vector.load %arg1[%c0_13, %c0_14] : memref<36x8xf32, #tpu.memory_space<vmem>>, vector<36x8xf32>
    %cst_15 = arith.constant dense<0.000000e+00> : vector<256x8xf32>
    %18 = tpu.matmul %16, %17, %cst_15 {dimension_numbers = #tpu.dot_dimension_numbers<[1], [0], [0], [1], [0, 0, 1, 1], [], []>} : vector<256x36xf32>, vector<36x8xf32>, vector<256x8xf32> -> vector<256x8xf32>
    %c0_16 = arith.constant 0 : index
    %c0_17 = arith.constant 0 : index
    %19 = vector.load %arg2[%c0_16, %c0_17] : memref<1x8xf32, #tpu.memory_space<vmem>>, vector<1x8xf32>
    %20 = vector.broadcast %19 : vector<1x8xf32> to vector<256x8xf32>
    %21 = arith.addf %18, %20 : vector<256x8xf32>
    %c0_18 = arith.constant 0 : index
    %c0_19 = arith.constant 0 : index
    %22 = vector.load %arg3[%c0_18, %c0_19] : memref<1x8xf32, #tpu.memory_space<vmem>>, vector<1x8xf32>
    %23 = vector.broadcast %22 : vector<1x8xf32> to vector<256x8xf32>
    %24 = arith.mulf %21, %23 : vector<256x8xf32>
    %c0_20 = arith.constant 0 : index
    %c0_21 = arith.constant 0 : index
    %25 = vector.load %arg4[%c0_20, %c0_21] : memref<1x8xf32, #tpu.memory_space<vmem>>, vector<1x8xf32>
    %26 = vector.broadcast %25 : vector<1x8xf32> to vector<256x8xf32>
    %27 = arith.addf %24, %26 : vector<256x8xf32>
    %cst_22 = arith.constant 0.000000e+00 : f32
    %28 = vector.broadcast %cst_22 : f32 to vector<256x8xf32>
    %29 = arith.maximumf %27, %28 : vector<256x8xf32>
    %30 = arith.maximumf %14, %29 : vector<256x8xf32>
    %c2 = arith.constant 2 : index
    %c0_23 = arith.constant 0 : index
    %c0_24 = arith.constant 0 : index
    %31 = vector.load %arg0[%c2, %c0_23, %c0_24] : memref<4x256x36xf32, #tpu.memory_space<vmem>>, vector<1x256x36xf32>
    %32 = vector.shape_cast %31 : vector<1x256x36xf32> to vector<256x36xf32>
    %c0_25 = arith.constant 0 : index
    %c0_26 = arith.constant 0 : index
    %33 = vector.load %arg1[%c0_25, %c0_26] : memref<36x8xf32, #tpu.memory_space<vmem>>, vector<36x8xf32>
    %cst_27 = arith.constant dense<0.000000e+00> : vector<256x8xf32>
    %34 = tpu.matmul %32, %33, %cst_27 {dimension_numbers = #tpu.dot_dimension_numbers<[1], [0], [0], [1], [0, 0, 1, 1], [], []>} : vector<256x36xf32>, vector<36x8xf32>, vector<256x8xf32> -> vector<256x8xf32>
    %c0_28 = arith.constant 0 : index
    %c0_29 = arith.constant 0 : index
    %35 = vector.load %arg2[%c0_28, %c0_29] : memref<1x8xf32, #tpu.memory_space<vmem>>, vector<1x8xf32>
    %36 = vector.broadcast %35 : vector<1x8xf32> to vector<256x8xf32>
    %37 = arith.addf %34, %36 : vector<256x8xf32>
    %c0_30 = arith.constant 0 : index
    %c0_31 = arith.constant 0 : index
    %38 = vector.load %arg3[%c0_30, %c0_31] : memref<1x8xf32, #tpu.memory_space<vmem>>, vector<1x8xf32>
    %39 = vector.broadcast %38 : vector<1x8xf32> to vector<256x8xf32>
    %40 = arith.mulf %37, %39 : vector<256x8xf32>
    %c0_32 = arith.constant 0 : index
    %c0_33 = arith.constant 0 : index
    %41 = vector.load %arg4[%c0_32, %c0_33] : memref<1x8xf32, #tpu.memory_space<vmem>>, vector<1x8xf32>
    %42 = vector.broadcast %41 : vector<1x8xf32> to vector<256x8xf32>
    %43 = arith.addf %40, %42 : vector<256x8xf32>
    %cst_34 = arith.constant 0.000000e+00 : f32
    %44 = vector.broadcast %cst_34 : f32 to vector<256x8xf32>
    %45 = arith.maximumf %43, %44 : vector<256x8xf32>
    %46 = arith.maximumf %30, %45 : vector<256x8xf32>
    %c3 = arith.constant 3 : index
    %c0_35 = arith.constant 0 : index
    %c0_36 = arith.constant 0 : index
    %47 = vector.load %arg0[%c3, %c0_35, %c0_36] : memref<4x256x36xf32, #tpu.memory_space<vmem>>, vector<1x256x36xf32>
    %48 = vector.shape_cast %47 : vector<1x256x36xf32> to vector<256x36xf32>
    %c0_37 = arith.constant 0 : index
    %c0_38 = arith.constant 0 : index
    %49 = vector.load %arg1[%c0_37, %c0_38] : memref<36x8xf32, #tpu.memory_space<vmem>>, vector<36x8xf32>
    %cst_39 = arith.constant dense<0.000000e+00> : vector<256x8xf32>
    %50 = tpu.matmul %48, %49, %cst_39 {dimension_numbers = #tpu.dot_dimension_numbers<[1], [0], [0], [1], [0, 0, 1, 1], [], []>} : vector<256x36xf32>, vector<36x8xf32>, vector<256x8xf32> -> vector<256x8xf32>
    %c0_40 = arith.constant 0 : index
    %c0_41 = arith.constant 0 : index
    %51 = vector.load %arg2[%c0_40, %c0_41] : memref<1x8xf32, #tpu.memory_space<vmem>>, vector<1x8xf32>
    %52 = vector.broadcast %51 : vector<1x8xf32> to vector<256x8xf32>
    %53 = arith.addf %50, %52 : vector<256x8xf32>
    %c0_42 = arith.constant 0 : index
    %c0_43 = arith.constant 0 : index
    %54 = vector.load %arg3[%c0_42, %c0_43] : memref<1x8xf32, #tpu.memory_space<vmem>>, vector<1x8xf32>
    %55 = vector.broadcast %54 : vector<1x8xf32> to vector<256x8xf32>
    %56 = arith.mulf %53, %55 : vector<256x8xf32>
    %c0_44 = arith.constant 0 : index
    %c0_45 = arith.constant 0 : index
    %57 = vector.load %arg4[%c0_44, %c0_45] : memref<1x8xf32, #tpu.memory_space<vmem>>, vector<1x8xf32>
    %58 = vector.broadcast %57 : vector<1x8xf32> to vector<256x8xf32>
    %59 = arith.addf %56, %58 : vector<256x8xf32>
    %cst_46 = arith.constant 0.000000e+00 : f32
    %60 = vector.broadcast %cst_46 : f32 to vector<256x8xf32>
    %61 = arith.maximumf %59, %60 : vector<256x8xf32>
    %62 = arith.maximumf %46, %61 : vector<256x8xf32>
    %c0_47 = arith.constant 0 : index
    %c0_48 = arith.constant 0 : index
    %63 = vector.load %arg5[%c0_47, %c0_48] : memref<256x8xf32, #tpu.memory_space<vmem>>, vector<256x8xf32>
    tpu.vector_store %arg5[%c0_47, %c0_48], %62 {strides = array<i32>} : memref<256x8xf32, #tpu.memory_space<vmem>>, vector<256x8xf32>,
    return
  }
}

module attributes {stable_mosaic.version = 11 : i64} {
  func.func @_conv_block_kernel(%arg0: memref<4x64x72xf32, #tpu.memory_space<vmem>>, %arg1: memref<72x16xf32, #tpu.memory_space<vmem>>, %arg2: memref<1x16xf32, #tpu.memory_space<vmem>>, %arg3: memref<1x16xf32, #tpu.memory_space<vmem>>, %arg4: memref<1x16xf32, #tpu.memory_space<vmem>>, %arg5: memref<64x16xf32, #tpu.memory_space<vmem>>) attributes {dimension_semantics = [], scalar_prefetch = 0 : i64, scratch_operands = 0 : i64, tpu.core_type = #tpu.core_type<tc>} {
    %c0 = arith.constant 0 : index
    %c0_0 = arith.constant 0 : index
    %c0_1 = arith.constant 0 : index
    %0 = vector.load %arg0[%c0, %c0_0, %c0_1] : memref<4x64x72xf32, #tpu.memory_space<vmem>>, vector<1x64x72xf32>
    %1 = vector.shape_cast %0 : vector<1x64x72xf32> to vector<64x72xf32>
    %c0_2 = arith.constant 0 : index
    %c0_3 = arith.constant 0 : index
    %2 = vector.load %arg1[%c0_2, %c0_3] : memref<72x16xf32, #tpu.memory_space<vmem>>, vector<72x16xf32>
    %cst = arith.constant dense<0.000000e+00> : vector<64x16xf32>
    %3 = tpu.matmul %1, %2, %cst {dimension_numbers = #tpu.dot_dimension_numbers<[1], [0], [0], [1], [0, 0, 1, 1], [], []>} : vector<64x72xf32>, vector<72x16xf32>, vector<64x16xf32> -> vector<64x16xf32>
    %c0_4 = arith.constant 0 : index
    %c0_5 = arith.constant 0 : index
    %4 = vector.load %arg2[%c0_4, %c0_5] : memref<1x16xf32, #tpu.memory_space<vmem>>, vector<1x16xf32>
    %5 = vector.broadcast %4 : vector<1x16xf32> to vector<64x16xf32>
    %6 = arith.addf %3, %5 : vector<64x16xf32>
    %c0_6 = arith.constant 0 : index
    %c0_7 = arith.constant 0 : index
    %7 = vector.load %arg3[%c0_6, %c0_7] : memref<1x16xf32, #tpu.memory_space<vmem>>, vector<1x16xf32>
    %8 = vector.broadcast %7 : vector<1x16xf32> to vector<64x16xf32>
    %9 = arith.mulf %6, %8 : vector<64x16xf32>
    %c0_8 = arith.constant 0 : index
    %c0_9 = arith.constant 0 : index
    %10 = vector.load %arg4[%c0_8, %c0_9] : memref<1x16xf32, #tpu.memory_space<vmem>>, vector<1x16xf32>
    %11 = vector.broadcast %10 : vector<1x16xf32> to vector<64x16xf32>
    %12 = arith.addf %9, %11 : vector<64x16xf32>
    %cst_10 = arith.constant 0.000000e+00 : f32
    %13 = vector.broadcast %cst_10 : f32 to vector<64x16xf32>
    %14 = arith.maximumf %12, %13 : vector<64x16xf32>
    %c1 = arith.constant 1 : index
    %c0_11 = arith.constant 0 : index
    %c0_12 = arith.constant 0 : index
    %15 = vector.load %arg0[%c1, %c0_11, %c0_12] : memref<4x64x72xf32, #tpu.memory_space<vmem>>, vector<1x64x72xf32>
    %16 = vector.shape_cast %15 : vector<1x64x72xf32> to vector<64x72xf32>
    %c0_13 = arith.constant 0 : index
    %c0_14 = arith.constant 0 : index
    %17 = vector.load %arg1[%c0_13, %c0_14] : memref<72x16xf32, #tpu.memory_space<vmem>>, vector<72x16xf32>
    %cst_15 = arith.constant dense<0.000000e+00> : vector<64x16xf32>
    %18 = tpu.matmul %16, %17, %cst_15 {dimension_numbers = #tpu.dot_dimension_numbers<[1], [0], [0], [1], [0, 0, 1, 1], [], []>} : vector<64x72xf32>, vector<72x16xf32>, vector<64x16xf32> -> vector<64x16xf32>
    %c0_16 = arith.constant 0 : index
    %c0_17 = arith.constant 0 : index
    %19 = vector.load %arg2[%c0_16, %c0_17] : memref<1x16xf32, #tpu.memory_space<vmem>>, vector<1x16xf32>
    %20 = vector.broadcast %19 : vector<1x16xf32> to vector<64x16xf32>
    %21 = arith.addf %18, %20 : vector<64x16xf32>
    %c0_18 = arith.constant 0 : index
    %c0_19 = arith.constant 0 : index
    %22 = vector.load %arg3[%c0_18, %c0_19] : memref<1x16xf32, #tpu.memory_space<vmem>>, vector<1x16xf32>
    %23 = vector.broadcast %22 : vector<1x16xf32> to vector<64x16xf32>
    %24 = arith.mulf %21, %23 : vector<64x16xf32>
    %c0_20 = arith.constant 0 : index
    %c0_21 = arith.constant 0 : index
    %25 = vector.load %arg4[%c0_20, %c0_21] : memref<1x16xf32, #tpu.memory_space<vmem>>, vector<1x16xf32>
    %26 = vector.broadcast %25 : vector<1x16xf32> to vector<64x16xf32>
    %27 = arith.addf %24, %26 : vector<64x16xf32>
    %cst_22 = arith.constant 0.000000e+00 : f32
    %28 = vector.broadcast %cst_22 : f32 to vector<64x16xf32>
    %29 = arith.maximumf %27, %28 : vector<64x16xf32>
    %30 = arith.maximumf %14, %29 : vector<64x16xf32>
    %c2 = arith.constant 2 : index
    %c0_23 = arith.constant 0 : index
    %c0_24 = arith.constant 0 : index
    %31 = vector.load %arg0[%c2, %c0_23, %c0_24] : memref<4x64x72xf32, #tpu.memory_space<vmem>>, vector<1x64x72xf32>
    %32 = vector.shape_cast %31 : vector<1x64x72xf32> to vector<64x72xf32>
    %c0_25 = arith.constant 0 : index
    %c0_26 = arith.constant 0 : index
    %33 = vector.load %arg1[%c0_25, %c0_26] : memref<72x16xf32, #tpu.memory_space<vmem>>, vector<72x16xf32>
    %cst_27 = arith.constant dense<0.000000e+00> : vector<64x16xf32>
    %34 = tpu.matmul %32, %33, %cst_27 {dimension_numbers = #tpu.dot_dimension_numbers<[1], [0], [0], [1], [0, 0, 1, 1], [], []>} : vector<64x72xf32>, vector<72x16xf32>, vector<64x16xf32> -> vector<64x16xf32>
    %c0_28 = arith.constant 0 : index
    %c0_29 = arith.constant 0 : index
    %35 = vector.load %arg2[%c0_28, %c0_29] : memref<1x16xf32, #tpu.memory_space<vmem>>, vector<1x16xf32>
    %36 = vector.broadcast %35 : vector<1x16xf32> to vector<64x16xf32>
    %37 = arith.addf %34, %36 : vector<64x16xf32>
    %c0_30 = arith.constant 0 : index
    %c0_31 = arith.constant 0 : index
    %38 = vector.load %arg3[%c0_30, %c0_31] : memref<1x16xf32, #tpu.memory_space<vmem>>, vector<1x16xf32>
    %39 = vector.broadcast %38 : vector<1x16xf32> to vector<64x16xf32>
    %40 = arith.mulf %37, %39 : vector<64x16xf32>
    %c0_32 = arith.constant 0 : index
    %c0_33 = arith.constant 0 : index
    %41 = vector.load %arg4[%c0_32, %c0_33] : memref<1x16xf32, #tpu.memory_space<vmem>>, vector<1x16xf32>
    %42 = vector.broadcast %41 : vector<1x16xf32> to vector<64x16xf32>
    %43 = arith.addf %40, %42 : vector<64x16xf32>
    %cst_34 = arith.constant 0.000000e+00 : f32
    %44 = vector.broadcast %cst_34 : f32 to vector<64x16xf32>
    %45 = arith.maximumf %43, %44 : vector<64x16xf32>
    %46 = arith.maximumf %30, %45 : vector<64x16xf32>
    %c3 = arith.constant 3 : index
    %c0_35 = arith.constant 0 : index
    %c0_36 = arith.constant 0 : index
    %47 = vector.load %arg0[%c3, %c0_35, %c0_36] : memref<4x64x72xf32, #tpu.memory_space<vmem>>, vector<1x64x72xf32>
    %48 = vector.shape_cast %47 : vector<1x64x72xf32> to vector<64x72xf32>
    %c0_37 = arith.constant 0 : index
    %c0_38 = arith.constant 0 : index
    %49 = vector.load %arg1[%c0_37, %c0_38] : memref<72x16xf32, #tpu.memory_space<vmem>>, vector<72x16xf32>
    %cst_39 = arith.constant dense<0.000000e+00> : vector<64x16xf32>
    %50 = tpu.matmul %48, %49, %cst_39 {dimension_numbers = #tpu.dot_dimension_numbers<[1], [0], [0], [1], [0, 0, 1, 1], [], []>} : vector<64x72xf32>, vector<72x16xf32>, vector<64x16xf32> -> vector<64x16xf32>
    %c0_40 = arith.constant 0 : index
    %c0_41 = arith.constant 0 : index
    %51 = vector.load %arg2[%c0_40, %c0_41] : memref<1x16xf32, #tpu.memory_space<vmem>>, vector<1x16xf32>
    %52 = vector.broadcast %51 : vector<1x16xf32> to vector<64x16xf32>
    %53 = arith.addf %50, %52 : vector<64x16xf32>
    %c0_42 = arith.constant 0 : index
    %c0_43 = arith.constant 0 : index
    %54 = vector.load %arg3[%c0_42, %c0_43] : memref<1x16xf32, #tpu.memory_space<vmem>>, vector<1x16xf32>
    %55 = vector.broadcast %54 : vector<1x16xf32> to vector<64x16xf32>
    %56 = arith.mulf %53, %55 : vector<64x16xf32>
    %c0_44 = arith.constant 0 : index
    %c0_45 = arith.constant 0 : index
    %57 = vector.load %arg4[%c0_44, %c0_45] : memref<1x16xf32, #tpu.memory_space<vmem>>, vector<1x16xf32>
    %58 = vector.broadcast %57 : vector<1x16xf32> to vector<64x16xf32>
    %59 = arith.addf %56, %58 : vector<64x16xf32>
    %cst_46 = arith.constant 0.000000e+00 : f32
    %60 = vector.broadcast %cst_46 : f32 to vector<64x16xf32>
    %61 = arith.maximumf %59, %60 : vector<64x16xf32>
    %62 = arith.maximumf %46, %61 : vector<64x16xf32>
    %c0_47 = arith.constant 0 : index
    %c0_48 = arith.constant 0 : index
    %63 = vector.load %arg5[%c0_47, %c0_48] : memref<64x16xf32, #tpu.memory_space<vmem>>, vector<64x16xf32>
    tpu.vector_store %arg5[%c0_47, %c0_48], %62 {strides = array<i32>} : memref<64x16xf32, #tpu.memory_space<vmem>>, vector<64x16xf32>,
    return
  }
}

module attributes {stable_mosaic.version = 11 : i64} {
  func.func @_conv_block_kernel(%arg0: memref<4x16x144xf32, #tpu.memory_space<vmem>>, %arg1: memref<144x32xf32, #tpu.memory_space<vmem>>, %arg2: memref<1x32xf32, #tpu.memory_space<vmem>>, %arg3: memref<1x32xf32, #tpu.memory_space<vmem>>, %arg4: memref<1x32xf32, #tpu.memory_space<vmem>>, %arg5: memref<16x32xf32, #tpu.memory_space<vmem>>) attributes {dimension_semantics = [], scalar_prefetch = 0 : i64, scratch_operands = 0 : i64, tpu.core_type = #tpu.core_type<tc>} {
    %c0 = arith.constant 0 : index
    %c0_0 = arith.constant 0 : index
    %c0_1 = arith.constant 0 : index
    %0 = vector.load %arg0[%c0, %c0_0, %c0_1] : memref<4x16x144xf32, #tpu.memory_space<vmem>>, vector<1x16x144xf32>
    %1 = vector.shape_cast %0 : vector<1x16x144xf32> to vector<16x144xf32>
    %c0_2 = arith.constant 0 : index
    %c0_3 = arith.constant 0 : index
    %2 = vector.load %arg1[%c0_2, %c0_3] : memref<144x32xf32, #tpu.memory_space<vmem>>, vector<144x32xf32>
    %cst = arith.constant dense<0.000000e+00> : vector<16x32xf32>
    %3 = tpu.matmul %1, %2, %cst {dimension_numbers = #tpu.dot_dimension_numbers<[1], [0], [0], [1], [0, 0, 1, 1], [], []>} : vector<16x144xf32>, vector<144x32xf32>, vector<16x32xf32> -> vector<16x32xf32>
    %c0_4 = arith.constant 0 : index
    %c0_5 = arith.constant 0 : index
    %4 = vector.load %arg2[%c0_4, %c0_5] : memref<1x32xf32, #tpu.memory_space<vmem>>, vector<1x32xf32>
    %5 = vector.broadcast %4 : vector<1x32xf32> to vector<16x32xf32>
    %6 = arith.addf %3, %5 : vector<16x32xf32>
    %c0_6 = arith.constant 0 : index
    %c0_7 = arith.constant 0 : index
    %7 = vector.load %arg3[%c0_6, %c0_7] : memref<1x32xf32, #tpu.memory_space<vmem>>, vector<1x32xf32>
    %8 = vector.broadcast %7 : vector<1x32xf32> to vector<16x32xf32>
    %9 = arith.mulf %6, %8 : vector<16x32xf32>
    %c0_8 = arith.constant 0 : index
    %c0_9 = arith.constant 0 : index
    %10 = vector.load %arg4[%c0_8, %c0_9] : memref<1x32xf32, #tpu.memory_space<vmem>>, vector<1x32xf32>
    %11 = vector.broadcast %10 : vector<1x32xf32> to vector<16x32xf32>
    %12 = arith.addf %9, %11 : vector<16x32xf32>
    %cst_10 = arith.constant 0.000000e+00 : f32
    %13 = vector.broadcast %cst_10 : f32 to vector<16x32xf32>
    %14 = arith.maximumf %12, %13 : vector<16x32xf32>
    %c1 = arith.constant 1 : index
    %c0_11 = arith.constant 0 : index
    %c0_12 = arith.constant 0 : index
    %15 = vector.load %arg0[%c1, %c0_11, %c0_12] : memref<4x16x144xf32, #tpu.memory_space<vmem>>, vector<1x16x144xf32>
    %16 = vector.shape_cast %15 : vector<1x16x144xf32> to vector<16x144xf32>
    %c0_13 = arith.constant 0 : index
    %c0_14 = arith.constant 0 : index
    %17 = vector.load %arg1[%c0_13, %c0_14] : memref<144x32xf32, #tpu.memory_space<vmem>>, vector<144x32xf32>
    %cst_15 = arith.constant dense<0.000000e+00> : vector<16x32xf32>
    %18 = tpu.matmul %16, %17, %cst_15 {dimension_numbers = #tpu.dot_dimension_numbers<[1], [0], [0], [1], [0, 0, 1, 1], [], []>} : vector<16x144xf32>, vector<144x32xf32>, vector<16x32xf32> -> vector<16x32xf32>
    %c0_16 = arith.constant 0 : index
    %c0_17 = arith.constant 0 : index
    %19 = vector.load %arg2[%c0_16, %c0_17] : memref<1x32xf32, #tpu.memory_space<vmem>>, vector<1x32xf32>
    %20 = vector.broadcast %19 : vector<1x32xf32> to vector<16x32xf32>
    %21 = arith.addf %18, %20 : vector<16x32xf32>
    %c0_18 = arith.constant 0 : index
    %c0_19 = arith.constant 0 : index
    %22 = vector.load %arg3[%c0_18, %c0_19] : memref<1x32xf32, #tpu.memory_space<vmem>>, vector<1x32xf32>
    %23 = vector.broadcast %22 : vector<1x32xf32> to vector<16x32xf32>
    %24 = arith.mulf %21, %23 : vector<16x32xf32>
    %c0_20 = arith.constant 0 : index
    %c0_21 = arith.constant 0 : index
    %25 = vector.load %arg4[%c0_20, %c0_21] : memref<1x32xf32, #tpu.memory_space<vmem>>, vector<1x32xf32>
    %26 = vector.broadcast %25 : vector<1x32xf32> to vector<16x32xf32>
    %27 = arith.addf %24, %26 : vector<16x32xf32>
    %cst_22 = arith.constant 0.000000e+00 : f32
    %28 = vector.broadcast %cst_22 : f32 to vector<16x32xf32>
    %29 = arith.maximumf %27, %28 : vector<16x32xf32>
    %30 = arith.maximumf %14, %29 : vector<16x32xf32>
    %c2 = arith.constant 2 : index
    %c0_23 = arith.constant 0 : index
    %c0_24 = arith.constant 0 : index
    %31 = vector.load %arg0[%c2, %c0_23, %c0_24] : memref<4x16x144xf32, #tpu.memory_space<vmem>>, vector<1x16x144xf32>
    %32 = vector.shape_cast %31 : vector<1x16x144xf32> to vector<16x144xf32>
    %c0_25 = arith.constant 0 : index
    %c0_26 = arith.constant 0 : index
    %33 = vector.load %arg1[%c0_25, %c0_26] : memref<144x32xf32, #tpu.memory_space<vmem>>, vector<144x32xf32>
    %cst_27 = arith.constant dense<0.000000e+00> : vector<16x32xf32>
    %34 = tpu.matmul %32, %33, %cst_27 {dimension_numbers = #tpu.dot_dimension_numbers<[1], [0], [0], [1], [0, 0, 1, 1], [], []>} : vector<16x144xf32>, vector<144x32xf32>, vector<16x32xf32> -> vector<16x32xf32>
    %c0_28 = arith.constant 0 : index
    %c0_29 = arith.constant 0 : index
    %35 = vector.load %arg2[%c0_28, %c0_29] : memref<1x32xf32, #tpu.memory_space<vmem>>, vector<1x32xf32>
    %36 = vector.broadcast %35 : vector<1x32xf32> to vector<16x32xf32>
    %37 = arith.addf %34, %36 : vector<16x32xf32>
    %c0_30 = arith.constant 0 : index
    %c0_31 = arith.constant 0 : index
    %38 = vector.load %arg3[%c0_30, %c0_31] : memref<1x32xf32, #tpu.memory_space<vmem>>, vector<1x32xf32>
    %39 = vector.broadcast %38 : vector<1x32xf32> to vector<16x32xf32>
    %40 = arith.mulf %37, %39 : vector<16x32xf32>
    %c0_32 = arith.constant 0 : index
    %c0_33 = arith.constant 0 : index
    %41 = vector.load %arg4[%c0_32, %c0_33] : memref<1x32xf32, #tpu.memory_space<vmem>>, vector<1x32xf32>
    %42 = vector.broadcast %41 : vector<1x32xf32> to vector<16x32xf32>
    %43 = arith.addf %40, %42 : vector<16x32xf32>
    %cst_34 = arith.constant 0.000000e+00 : f32
    %44 = vector.broadcast %cst_34 : f32 to vector<16x32xf32>
    %45 = arith.maximumf %43, %44 : vector<16x32xf32>
    %46 = arith.maximumf %30, %45 : vector<16x32xf32>
    %c3 = arith.constant 3 : index
    %c0_35 = arith.constant 0 : index
    %c0_36 = arith.constant 0 : index
    %47 = vector.load %arg0[%c3, %c0_35, %c0_36] : memref<4x16x144xf32, #tpu.memory_space<vmem>>, vector<1x16x144xf32>
    %48 = vector.shape_cast %47 : vector<1x16x144xf32> to vector<16x144xf32>
    %c0_37 = arith.constant 0 : index
    %c0_38 = arith.constant 0 : index
    %49 = vector.load %arg1[%c0_37, %c0_38] : memref<144x32xf32, #tpu.memory_space<vmem>>, vector<144x32xf32>
    %cst_39 = arith.constant dense<0.000000e+00> : vector<16x32xf32>
    %50 = tpu.matmul %48, %49, %cst_39 {dimension_numbers = #tpu.dot_dimension_numbers<[1], [0], [0], [1], [0, 0, 1, 1], [], []>} : vector<16x144xf32>, vector<144x32xf32>, vector<16x32xf32> -> vector<16x32xf32>
    %c0_40 = arith.constant 0 : index
    %c0_41 = arith.constant 0 : index
    %51 = vector.load %arg2[%c0_40, %c0_41] : memref<1x32xf32, #tpu.memory_space<vmem>>, vector<1x32xf32>
    %52 = vector.broadcast %51 : vector<1x32xf32> to vector<16x32xf32>
    %53 = arith.addf %50, %52 : vector<16x32xf32>
    %c0_42 = arith.constant 0 : index
    %c0_43 = arith.constant 0 : index
    %54 = vector.load %arg3[%c0_42, %c0_43] : memref<1x32xf32, #tpu.memory_space<vmem>>, vector<1x32xf32>
    %55 = vector.broadcast %54 : vector<1x32xf32> to vector<16x32xf32>
    %56 = arith.mulf %53, %55 : vector<16x32xf32>
    %c0_44 = arith.constant 0 : index
    %c0_45 = arith.constant 0 : index
    %57 = vector.load %arg4[%c0_44, %c0_45] : memref<1x32xf32, #tpu.memory_space<vmem>>, vector<1x32xf32>
    %58 = vector.broadcast %57 : vector<1x32xf32> to vector<16x32xf32>
    %59 = arith.addf %56, %58 : vector<16x32xf32>
    %cst_46 = arith.constant 0.000000e+00 : f32
    %60 = vector.broadcast %cst_46 : f32 to vector<16x32xf32>
    %61 = arith.maximumf %59, %60 : vector<16x32xf32>
    %62 = arith.maximumf %46, %61 : vector<16x32xf32>
    %c0_47 = arith.constant 0 : index
    %c0_48 = arith.constant 0 : index
    %63 = vector.load %arg5[%c0_47, %c0_48] : memref<16x32xf32, #tpu.memory_space<vmem>>, vector<16x32xf32>
    tpu.vector_store %arg5[%c0_47, %c0_48], %62 {strides = array<i32>} : memref<16x32xf32, #tpu.memory_space<vmem>>, vector<16x32xf32>,
    return
  }
}

module attributes {stable_mosaic.version = 11 : i64} {
  func.func @_conv_block_kernel(%arg0: memref<1x16x288xf32, #tpu.memory_space<vmem>>, %arg1: memref<288x64xf32, #tpu.memory_space<vmem>>, %arg2: memref<1x64xf32, #tpu.memory_space<vmem>>, %arg3: memref<1x64xf32, #tpu.memory_space<vmem>>, %arg4: memref<1x64xf32, #tpu.memory_space<vmem>>, %arg5: memref<16x64xf32, #tpu.memory_space<vmem>>) attributes {dimension_semantics = [], scalar_prefetch = 0 : i64, scratch_operands = 0 : i64, tpu.core_type = #tpu.core_type<tc>} {
    %c0 = arith.constant 0 : index
    %c0_0 = arith.constant 0 : index
    %c0_1 = arith.constant 0 : index
    %0 = vector.load %arg0[%c0, %c0_0, %c0_1] : memref<1x16x288xf32, #tpu.memory_space<vmem>>, vector<1x16x288xf32>
    %1 = vector.shape_cast %0 : vector<1x16x288xf32> to vector<16x288xf32>
    %c0_2 = arith.constant 0 : index
    %c0_3 = arith.constant 0 : index
    %2 = vector.load %arg1[%c0_2, %c0_3] : memref<288x64xf32, #tpu.memory_space<vmem>>, vector<288x64xf32>
    %cst = arith.constant dense<0.000000e+00> : vector<16x64xf32>
    %3 = tpu.matmul %1, %2, %cst {dimension_numbers = #tpu.dot_dimension_numbers<[1], [0], [0], [1], [0, 0, 1, 1], [], []>} : vector<16x288xf32>, vector<288x64xf32>, vector<16x64xf32> -> vector<16x64xf32>
    %c0_4 = arith.constant 0 : index
    %c0_5 = arith.constant 0 : index
    %4 = vector.load %arg2[%c0_4, %c0_5] : memref<1x64xf32, #tpu.memory_space<vmem>>, vector<1x64xf32>
    %5 = vector.broadcast %4 : vector<1x64xf32> to vector<16x64xf32>
    %6 = arith.addf %3, %5 : vector<16x64xf32>
    %c0_6 = arith.constant 0 : index
    %c0_7 = arith.constant 0 : index
    %7 = vector.load %arg3[%c0_6, %c0_7] : memref<1x64xf32, #tpu.memory_space<vmem>>, vector<1x64xf32>
    %8 = vector.broadcast %7 : vector<1x64xf32> to vector<16x64xf32>
    %9 = arith.mulf %6, %8 : vector<16x64xf32>
    %c0_8 = arith.constant 0 : index
    %c0_9 = arith.constant 0 : index
    %10 = vector.load %arg4[%c0_8, %c0_9] : memref<1x64xf32, #tpu.memory_space<vmem>>, vector<1x64xf32>
    %11 = vector.broadcast %10 : vector<1x64xf32> to vector<16x64xf32>
    %12 = arith.addf %9, %11 : vector<16x64xf32>
    %cst_10 = arith.constant 0.000000e+00 : f32
    %13 = vector.broadcast %cst_10 : f32 to vector<16x64xf32>
    %14 = arith.maximumf %12, %13 : vector<16x64xf32>
    %c0_11 = arith.constant 0 : index
    %c0_12 = arith.constant 0 : index
    %15 = vector.load %arg5[%c0_11, %c0_12] : memref<16x64xf32, #tpu.memory_space<vmem>>, vector<16x64xf32>
    tpu.vector_store %arg5[%c0_11, %c0_12], %14 {strides = array<i32>} : memref<16x64xf32, #tpu.memory_space<vmem>>, vector<16x64xf32>,
    return
  }
}

module attributes {stable_mosaic.version = 11 : i64} {
  func.func @_rnn_head_kernel(%arg0: memref<4x2x128xf32, #tpu.memory_space<vmem>>, %arg1: memref<128x192xf32, #tpu.memory_space<vmem>>, %arg2: memref<2x32x96xf32, #tpu.memory_space<vmem>>, %arg3: memref<1x192xf32, #tpu.memory_space<vmem>>, %arg4: memref<2x1x96xf32, #tpu.memory_space<vmem>>, %arg5: memref<64x192xf32, #tpu.memory_space<vmem>>, %arg6: memref<2x32x96xf32, #tpu.memory_space<vmem>>, %arg7: memref<1x192xf32, #tpu.memory_space<vmem>>, %arg8: memref<2x1x96xf32, #tpu.memory_space<vmem>>, %arg9: memref<64x192xf32, #tpu.memory_space<vmem>>, %arg10: memref<2x32x96xf32, #tpu.memory_space<vmem>>, %arg11: memref<1x192xf32, #tpu.memory_space<vmem>>, %arg12: memref<2x1x96xf32, #tpu.memory_space<vmem>>, %arg13: memref<3x64x64xf32, #tpu.memory_space<vmem>>, %arg14: memref<3x1x64xf32, #tpu.memory_space<vmem>>, %arg15: memref<64x42xf32, #tpu.memory_space<vmem>>, %arg16: memref<1x42xf32, #tpu.memory_space<vmem>>, %arg17: memref<3x64x64xf32, #tpu.memory_space<vmem>>, %arg18: memref<3x1x64xf32, #tpu.memory_space<vmem>>, %arg19: memref<64x126xf32, #tpu.memory_space<vmem>>, %arg20: memref<1x126xf32, #tpu.memory_space<vmem>>, %arg21: memref<8x42xf32, #tpu.memory_space<vmem>>, %arg22: memref<8x126xf32, #tpu.memory_space<vmem>>) attributes {dimension_semantics = [], scalar_prefetch = 0 : i64, scratch_operands = 0 : i64, tpu.core_type = #tpu.core_type<tc>} {
    %c0 = arith.constant 0 : index
    %c0_0 = arith.constant 0 : index
    %c0_1 = arith.constant 0 : index
    %0 = vector.load %arg0[%c0, %c0_0, %c0_1] : memref<4x2x128xf32, #tpu.memory_space<vmem>>, vector<1x2x128xf32>
    %1 = vector.shape_cast %0 : vector<1x2x128xf32> to vector<2x128xf32>
    %c1 = arith.constant 1 : index
    %c0_2 = arith.constant 0 : index
    %c0_3 = arith.constant 0 : index
    %2 = vector.load %arg0[%c1, %c0_2, %c0_3] : memref<4x2x128xf32, #tpu.memory_space<vmem>>, vector<1x2x128xf32>
    %3 = vector.shape_cast %2 : vector<1x2x128xf32> to vector<2x128xf32>
    %c2 = arith.constant 2 : index
    %c0_4 = arith.constant 0 : index
    %c0_5 = arith.constant 0 : index
    %4 = vector.load %arg0[%c2, %c0_4, %c0_5] : memref<4x2x128xf32, #tpu.memory_space<vmem>>, vector<1x2x128xf32>
    %5 = vector.shape_cast %4 : vector<1x2x128xf32> to vector<2x128xf32>
    %c3 = arith.constant 3 : index
    %c0_6 = arith.constant 0 : index
    %c0_7 = arith.constant 0 : index
    %6 = vector.load %arg0[%c3, %c0_6, %c0_7] : memref<4x2x128xf32, #tpu.memory_space<vmem>>, vector<1x2x128xf32>
    %7 = vector.shape_cast %6 : vector<1x2x128xf32> to vector<2x128xf32>
    %8 = tpu.concatenate %1, %3, %5, %7 in 0 : vector<2x128xf32>, vector<2x128xf32>, vector<2x128xf32>, vector<2x128xf32> -> vector<8x128xf32>
    %c0_8 = arith.constant 0 : index
    %c0_9 = arith.constant 0 : index
    %9 = vector.load %arg1[%c0_8, %c0_9] : memref<128x192xf32, #tpu.memory_space<vmem>>, vector<128x192xf32>
    %cst = arith.constant dense<0.000000e+00> : vector<8x192xf32>
    %10 = tpu.matmul %8, %9, %cst {dimension_numbers = #tpu.dot_dimension_numbers<[1], [0], [0], [1], [0, 0, 1, 1], [], []>} : vector<8x128xf32>, vector<128x192xf32>, vector<8x192xf32> -> vector<8x192xf32>
    %c0_10 = arith.constant 0 : index
    %c0_11 = arith.constant 0 : index
    %11 = vector.load %arg3[%c0_10, %c0_11] : memref<1x192xf32, #tpu.memory_space<vmem>>, vector<1x192xf32>
    %12 = vector.broadcast %11 : vector<1x192xf32> to vector<8x192xf32>
    %13 = arith.addf %10, %12 : vector<8x192xf32>
    %14 = vector.extract_strided_slice %13 {offsets = [0, 0], sizes = [2, 192], strides = [1, 1]} : vector<8x192xf32> to vector<2x192xf32>
    %15 = vector.extract_strided_slice %13 {offsets = [2, 0], sizes = [2, 192], strides = [1, 1]} : vector<8x192xf32> to vector<2x192xf32>
    %16 = vector.extract_strided_slice %13 {offsets = [4, 0], sizes = [2, 192], strides = [1, 1]} : vector<8x192xf32> to vector<2x192xf32>
    %17 = vector.extract_strided_slice %13 {offsets = [6, 0], sizes = [2, 192], strides = [1, 1]} : vector<8x192xf32> to vector<2x192xf32>
    %c0_12 = arith.constant 0 : index
    %c0_13 = arith.constant 0 : index
    %c0_14 = arith.constant 0 : index
    %18 = vector.load %arg2[%c0_12, %c0_13, %c0_14] : memref<2x32x96xf32, #tpu.memory_space<vmem>>, vector<1x32x96xf32>
    %19 = vector.shape_cast %18 : vector<1x32x96xf32> to vector<32x96xf32>
    %c0_15 = arith.constant 0 : index
    %c0_16 = arith.constant 0 : index
    %c0_17 = arith.constant 0 : index
    %20 = vector.load %arg4[%c0_15, %c0_16, %c0_17] : memref<2x1x96xf32, #tpu.memory_space<vmem>>, vector<1x1x96xf32>
    %21 = vector.shape_cast %20 : vector<1x1x96xf32> to vector<1x96xf32>
    %cst_18 = arith.constant 0.000000e+00 : f32
    %22 = vector.broadcast %cst_18 : f32 to vector<2x32xf32>
    %cst_19 = arith.constant dense<0.000000e+00> : vector<2x96xf32>
    %23 = tpu.matmul %22, %19, %cst_19 {dimension_numbers = #tpu.dot_dimension_numbers<[1], [0], [0], [1], [0, 0, 1, 1], [], []>} : vector<2x32xf32>, vector<32x96xf32>, vector<2x96xf32> -> vector<2x96xf32>
    %24 = vector.broadcast %21 : vector<1x96xf32> to vector<2x96xf32>
    %25 = arith.addf %23, %24 : vector<2x96xf32>
    %26 = vector.extract_strided_slice %14 {offsets = [0, 0], sizes = [2, 32], strides = [1, 1]} : vector<2x192xf32> to vector<2x32xf32>
    %27 = vector.extract_strided_slice %25 {offsets = [0, 0], sizes = [2, 32], strides = [1, 1]} : vector<2x96xf32> to vector<2x32xf32>
    %28 = arith.addf %26, %27 : vector<2x32xf32>
    %cst_20 = arith.constant 5.000000e-01 : f32
    %29 = vector.broadcast %cst_20 : f32 to vector<2x32xf32>
    %30 = arith.mulf %29, %28 : vector<2x32xf32>
    %31 = math.tanh %30 : vector<2x32xf32>
    %cst_21 = arith.constant 1.000000e+00 : f32
    %32 = vector.broadcast %cst_21 : f32 to vector<2x32xf32>
    %33 = arith.addf %31, %32 : vector<2x32xf32>
    %cst_22 = arith.constant 5.000000e-01 : f32
    %34 = vector.broadcast %cst_22 : f32 to vector<2x32xf32>
    %35 = arith.mulf %34, %33 : vector<2x32xf32>
    %36 = vector.extract_strided_slice %14 {offsets = [0, 32], sizes = [2, 32], strides = [1, 1]} : vector<2x192xf32> to vector<2x32xf32>
    %37 = vector.extract_strided_slice %25 {offsets = [0, 32], sizes = [2, 32], strides = [1, 1]} : vector<2x96xf32> to vector<2x32xf32>
    %38 = arith.addf %36, %37 : vector<2x32xf32>
    %cst_23 = arith.constant 5.000000e-01 : f32
    %39 = vector.broadcast %cst_23 : f32 to vector<2x32xf32>
    %40 = arith.mulf %39, %38 : vector<2x32xf32>
    %41 = math.tanh %40 : vector<2x32xf32>
    %cst_24 = arith.constant 1.000000e+00 : f32
    %42 = vector.broadcast %cst_24 : f32 to vector<2x32xf32>
    %43 = arith.addf %41, %42 : vector<2x32xf32>
    %cst_25 = arith.constant 5.000000e-01 : f32
    %44 = vector.broadcast %cst_25 : f32 to vector<2x32xf32>
    %45 = arith.mulf %44, %43 : vector<2x32xf32>
    %46 = vector.extract_strided_slice %14 {offsets = [0, 64], sizes = [2, 32], strides = [1, 1]} : vector<2x192xf32> to vector<2x32xf32>
    %47 = vector.extract_strided_slice %25 {offsets = [0, 64], sizes = [2, 32], strides = [1, 1]} : vector<2x96xf32> to vector<2x32xf32>
    %48 = arith.mulf %35, %47 : vector<2x32xf32>
    %49 = arith.addf %46, %48 : vector<2x32xf32>
    %50 = math.tanh %49 : vector<2x32xf32>
    %cst_26 = arith.constant 1.000000e+00 : f32
    %51 = vector.broadcast %cst_26 : f32 to vector<2x32xf32>
    %52 = arith.subf %51, %45 : vector<2x32xf32>
    %53 = arith.mulf %52, %50 : vector<2x32xf32>
    %54 = arith.mulf %45, %22 : vector<2x32xf32>
    %55 = arith.addf %53, %54 : vector<2x32xf32>
    %cst_27 = arith.constant dense<0.000000e+00> : vector<2x96xf32>
    %56 = tpu.matmul %55, %19, %cst_27 {dimension_numbers = #tpu.dot_dimension_numbers<[1], [0], [0], [1], [0, 0, 1, 1], [], []>} : vector<2x32xf32>, vector<32x96xf32>, vector<2x96xf32> -> vector<2x96xf32>
    %57 = vector.broadcast %21 : vector<1x96xf32> to vector<2x96xf32>
    %58 = arith.addf %56, %57 : vector<2x96xf32>
    %59 = vector.extract_strided_slice %15 {offsets = [0, 0], sizes = [2, 32], strides = [1, 1]} : vector<2x192xf32> to vector<2x32xf32>
    %60 = vector.extract_strided_slice %58 {offsets = [0, 0], sizes = [2, 32], strides = [1, 1]} : vector<2x96xf32> to vector<2x32xf32>
    %61 = arith.addf %59, %60 : vector<2x32xf32>
    %cst_28 = arith.constant 5.000000e-01 : f32
    %62 = vector.broadcast %cst_28 : f32 to vector<2x32xf32>
    %63 = arith.mulf %62, %61 : vector<2x32xf32>
    %64 = math.tanh %63 : vector<2x32xf32>
    %cst_29 = arith.constant 1.000000e+00 : f32
    %65 = vector.broadcast %cst_29 : f32 to vector<2x32xf32>
    %66 = arith.addf %64, %65 : vector<2x32xf32>
    %cst_30 = arith.constant 5.000000e-01 : f32
    %67 = vector.broadcast %cst_30 : f32 to vector<2x32xf32>
    %68 = arith.mulf %67, %66 : vector<2x32xf32>
    %69 = vector.extract_strided_slice %15 {offsets = [0, 32], sizes = [2, 32], strides = [1, 1]} : vector<2x192xf32> to vector<2x32xf32>
    %70 = vector.extract_strided_slice %58 {offsets = [0, 32], sizes = [2, 32], strides = [1, 1]} : vector<2x96xf32> to vector<2x32xf32>
    %71 = arith.addf %69, %70 : vector<2x32xf32>
    %cst_31 = arith.constant 5.000000e-01 : f32
    %72 = vector.broadcast %cst_31 : f32 to vector<2x32xf32>
    %73 = arith.mulf %72, %71 : vector<2x32xf32>
    %74 = math.tanh %73 : vector<2x32xf32>
    %cst_32 = arith.constant 1.000000e+00 : f32
    %75 = vector.broadcast %cst_32 : f32 to vector<2x32xf32>
    %76 = arith.addf %74, %75 : vector<2x32xf32>
    %cst_33 = arith.constant 5.000000e-01 : f32
    %77 = vector.broadcast %cst_33 : f32 to vector<2x32xf32>
    %78 = arith.mulf %77, %76 : vector<2x32xf32>
    %79 = vector.extract_strided_slice %15 {offsets = [0, 64], sizes = [2, 32], strides = [1, 1]} : vector<2x192xf32> to vector<2x32xf32>
    %80 = vector.extract_strided_slice %58 {offsets = [0, 64], sizes = [2, 32], strides = [1, 1]} : vector<2x96xf32> to vector<2x32xf32>
    %81 = arith.mulf %68, %80 : vector<2x32xf32>
    %82 = arith.addf %79, %81 : vector<2x32xf32>
    %83 = math.tanh %82 : vector<2x32xf32>
    %cst_34 = arith.constant 1.000000e+00 : f32
    %84 = vector.broadcast %cst_34 : f32 to vector<2x32xf32>
    %85 = arith.subf %84, %78 : vector<2x32xf32>
    %86 = arith.mulf %85, %83 : vector<2x32xf32>
    %87 = arith.mulf %78, %55 : vector<2x32xf32>
    %88 = arith.addf %86, %87 : vector<2x32xf32>
    %cst_35 = arith.constant dense<0.000000e+00> : vector<2x96xf32>
    %89 = tpu.matmul %88, %19, %cst_35 {dimension_numbers = #tpu.dot_dimension_numbers<[1], [0], [0], [1], [0, 0, 1, 1], [], []>} : vector<2x32xf32>, vector<32x96xf32>, vector<2x96xf32> -> vector<2x96xf32>
    %90 = vector.broadcast %21 : vector<1x96xf32> to vector<2x96xf32>
    %91 = arith.addf %89, %90 : vector<2x96xf32>
    %92 = vector.extract_strided_slice %16 {offsets = [0, 0], sizes = [2, 32], strides = [1, 1]} : vector<2x192xf32> to vector<2x32xf32>
    %93 = vector.extract_strided_slice %91 {offsets = [0, 0], sizes = [2, 32], strides = [1, 1]} : vector<2x96xf32> to vector<2x32xf32>
    %94 = arith.addf %92, %93 : vector<2x32xf32>
    %cst_36 = arith.constant 5.000000e-01 : f32
    %95 = vector.broadcast %cst_36 : f32 to vector<2x32xf32>
    %96 = arith.mulf %95, %94 : vector<2x32xf32>
    %97 = math.tanh %96 : vector<2x32xf32>
    %cst_37 = arith.constant 1.000000e+00 : f32
    %98 = vector.broadcast %cst_37 : f32 to vector<2x32xf32>
    %99 = arith.addf %97, %98 : vector<2x32xf32>
    %cst_38 = arith.constant 5.000000e-01 : f32
    %100 = vector.broadcast %cst_38 : f32 to vector<2x32xf32>
    %101 = arith.mulf %100, %99 : vector<2x32xf32>
    %102 = vector.extract_strided_slice %16 {offsets = [0, 32], sizes = [2, 32], strides = [1, 1]} : vector<2x192xf32> to vector<2x32xf32>
    %103 = vector.extract_strided_slice %91 {offsets = [0, 32], sizes = [2, 32], strides = [1, 1]} : vector<2x96xf32> to vector<2x32xf32>
    %104 = arith.addf %102, %103 : vector<2x32xf32>
    %cst_39 = arith.constant 5.000000e-01 : f32
    %105 = vector.broadcast %cst_39 : f32 to vector<2x32xf32>
    %106 = arith.mulf %105, %104 : vector<2x32xf32>
    %107 = math.tanh %106 : vector<2x32xf32>
    %cst_40 = arith.constant 1.000000e+00 : f32
    %108 = vector.broadcast %cst_40 : f32 to vector<2x32xf32>
    %109 = arith.addf %107, %108 : vector<2x32xf32>
    %cst_41 = arith.constant 5.000000e-01 : f32
    %110 = vector.broadcast %cst_41 : f32 to vector<2x32xf32>
    %111 = arith.mulf %110, %109 : vector<2x32xf32>
    %112 = vector.extract_strided_slice %16 {offsets = [0, 64], sizes = [2, 32], strides = [1, 1]} : vector<2x192xf32> to vector<2x32xf32>
    %113 = vector.extract_strided_slice %91 {offsets = [0, 64], sizes = [2, 32], strides = [1, 1]} : vector<2x96xf32> to vector<2x32xf32>
    %114 = arith.mulf %101, %113 : vector<2x32xf32>
    %115 = arith.addf %112, %114 : vector<2x32xf32>
    %116 = math.tanh %115 : vector<2x32xf32>
    %cst_42 = arith.constant 1.000000e+00 : f32
    %117 = vector.broadcast %cst_42 : f32 to vector<2x32xf32>
    %118 = arith.subf %117, %111 : vector<2x32xf32>
    %119 = arith.mulf %118, %116 : vector<2x32xf32>
    %120 = arith.mulf %111, %88 : vector<2x32xf32>
    %121 = arith.addf %119, %120 : vector<2x32xf32>
    %cst_43 = arith.constant dense<0.000000e+00> : vector<2x96xf32>
    %122 = tpu.matmul %121, %19, %cst_43 {dimension_numbers = #tpu.dot_dimension_numbers<[1], [0], [0], [1], [0, 0, 1, 1], [], []>} : vector<2x32xf32>, vector<32x96xf32>, vector<2x96xf32> -> vector<2x96xf32>
    %123 = vector.broadcast %21 : vector<1x96xf32> to vector<2x96xf32>
    %124 = arith.addf %122, %123 : vector<2x96xf32>
    %125 = vector.extract_strided_slice %17 {offsets = [0, 0], sizes = [2, 32], strides = [1, 1]} : vector<2x192xf32> to vector<2x32xf32>
    %126 = vector.extract_strided_slice %124 {offsets = [0, 0], sizes = [2, 32], strides = [1, 1]} : vector<2x96xf32> to vector<2x32xf32>
    %127 = arith.addf %125, %126 : vector<2x32xf32>
    %cst_44 = arith.constant 5.000000e-01 : f32
    %128 = vector.broadcast %cst_44 : f32 to vector<2x32xf32>
    %129 = arith.mulf %128, %127 : vector<2x32xf32>
    %130 = math.tanh %129 : vector<2x32xf32>
    %cst_45 = arith.constant 1.000000e+00 : f32
    %131 = vector.broadcast %cst_45 : f32 to vector<2x32xf32>
    %132 = arith.addf %130, %131 : vector<2x32xf32>
    %cst_46 = arith.constant 5.000000e-01 : f32
    %133 = vector.broadcast %cst_46 : f32 to vector<2x32xf32>
    %134 = arith.mulf %133, %132 : vector<2x32xf32>
    %135 = vector.extract_strided_slice %17 {offsets = [0, 32], sizes = [2, 32], strides = [1, 1]} : vector<2x192xf32> to vector<2x32xf32>
    %136 = vector.extract_strided_slice %124 {offsets = [0, 32], sizes = [2, 32], strides = [1, 1]} : vector<2x96xf32> to vector<2x32xf32>
    %137 = arith.addf %135, %136 : vector<2x32xf32>
    %cst_47 = arith.constant 5.000000e-01 : f32
    %138 = vector.broadcast %cst_47 : f32 to vector<2x32xf32>
    %139 = arith.mulf %138, %137 : vector<2x32xf32>
    %140 = math.tanh %139 : vector<2x32xf32>
    %cst_48 = arith.constant 1.000000e+00 : f32
    %141 = vector.broadcast %cst_48 : f32 to vector<2x32xf32>
    %142 = arith.addf %140, %141 : vector<2x32xf32>
    %cst_49 = arith.constant 5.000000e-01 : f32
    %143 = vector.broadcast %cst_49 : f32 to vector<2x32xf32>
    %144 = arith.mulf %143, %142 : vector<2x32xf32>
    %145 = vector.extract_strided_slice %17 {offsets = [0, 64], sizes = [2, 32], strides = [1, 1]} : vector<2x192xf32> to vector<2x32xf32>
    %146 = vector.extract_strided_slice %124 {offsets = [0, 64], sizes = [2, 32], strides = [1, 1]} : vector<2x96xf32> to vector<2x32xf32>
    %147 = arith.mulf %134, %146 : vector<2x32xf32>
    %148 = arith.addf %145, %147 : vector<2x32xf32>
    %149 = math.tanh %148 : vector<2x32xf32>
    %cst_50 = arith.constant 1.000000e+00 : f32
    %150 = vector.broadcast %cst_50 : f32 to vector<2x32xf32>
    %151 = arith.subf %150, %144 : vector<2x32xf32>
    %152 = arith.mulf %151, %149 : vector<2x32xf32>
    %153 = arith.mulf %144, %121 : vector<2x32xf32>
    %154 = arith.addf %152, %153 : vector<2x32xf32>
    %c1_51 = arith.constant 1 : index
    %c0_52 = arith.constant 0 : index
    %c0_53 = arith.constant 0 : index
    %155 = vector.load %arg2[%c1_51, %c0_52, %c0_53] : memref<2x32x96xf32, #tpu.memory_space<vmem>>, vector<1x32x96xf32>
    %156 = vector.shape_cast %155 : vector<1x32x96xf32> to vector<32x96xf32>
    %c1_54 = arith.constant 1 : index
    %c0_55 = arith.constant 0 : index
    %c0_56 = arith.constant 0 : index
    %157 = vector.load %arg4[%c1_54, %c0_55, %c0_56] : memref<2x1x96xf32, #tpu.memory_space<vmem>>, vector<1x1x96xf32>
    %158 = vector.shape_cast %157 : vector<1x1x96xf32> to vector<1x96xf32>
    %cst_57 = arith.constant 0.000000e+00 : f32
    %159 = vector.broadcast %cst_57 : f32 to vector<2x32xf32>
    %cst_58 = arith.constant dense<0.000000e+00> : vector<2x96xf32>
    %160 = tpu.matmul %159, %156, %cst_58 {dimension_numbers = #tpu.dot_dimension_numbers<[1], [0], [0], [1], [0, 0, 1, 1], [], []>} : vector<2x32xf32>, vector<32x96xf32>, vector<2x96xf32> -> vector<2x96xf32>
    %161 = vector.broadcast %158 : vector<1x96xf32> to vector<2x96xf32>
    %162 = arith.addf %160, %161 : vector<2x96xf32>
    %163 = vector.extract_strided_slice %17 {offsets = [0, 96], sizes = [2, 32], strides = [1, 1]} : vector<2x192xf32> to vector<2x32xf32>
    %164 = vector.extract_strided_slice %162 {offsets = [0, 0], sizes = [2, 32], strides = [1, 1]} : vector<2x96xf32> to vector<2x32xf32>
    %165 = arith.addf %163, %164 : vector<2x32xf32>
    %cst_59 = arith.constant 5.000000e-01 : f32
    %166 = vector.broadcast %cst_59 : f32 to vector<2x32xf32>
    %167 = arith.mulf %166, %165 : vector<2x32xf32>
    %168 = math.tanh %167 : vector<2x32xf32>
    %cst_60 = arith.constant 1.000000e+00 : f32
    %169 = vector.broadcast %cst_60 : f32 to vector<2x32xf32>
    %170 = arith.addf %168, %169 : vector<2x32xf32>
    %cst_61 = arith.constant 5.000000e-01 : f32
    %171 = vector.broadcast %cst_61 : f32 to vector<2x32xf32>
    %172 = arith.mulf %171, %170 : vector<2x32xf32>
    %173 = vector.extract_strided_slice %17 {offsets = [0, 128], sizes = [2, 32], strides = [1, 1]} : vector<2x192xf32> to vector<2x32xf32>
    %174 = vector.extract_strided_slice %162 {offsets = [0, 32], sizes = [2, 32], strides = [1, 1]} : vector<2x96xf32> to vector<2x32xf32>
    %175 = arith.addf %173, %174 : vector<2x32xf32>
    %cst_62 = arith.constant 5.000000e-01 : f32
    %176 = vector.broadcast %cst_62 : f32 to vector<2x32xf32>
    %177 = arith.mulf %176, %175 : vector<2x32xf32>
    %178 = math.tanh %177 : vector<2x32xf32>
    %cst_63 = arith.constant 1.000000e+00 : f32
    %179 = vector.broadcast %cst_63 : f32 to vector<2x32xf32>
    %180 = arith.addf %178, %179 : vector<2x32xf32>
    %cst_64 = arith.constant 5.000000e-01 : f32
    %181 = vector.broadcast %cst_64 : f32 to vector<2x32xf32>
    %182 = arith.mulf %181, %180 : vector<2x32xf32>
    %183 = vector.extract_strided_slice %17 {offsets = [0, 160], sizes = [2, 32], strides = [1, 1]} : vector<2x192xf32> to vector<2x32xf32>
    %184 = vector.extract_strided_slice %162 {offsets = [0, 64], sizes = [2, 32], strides = [1, 1]} : vector<2x96xf32> to vector<2x32xf32>
    %185 = arith.mulf %172, %184 : vector<2x32xf32>
    %186 = arith.addf %183, %185 : vector<2x32xf32>
    %187 = math.tanh %186 : vector<2x32xf32>
    %cst_65 = arith.constant 1.000000e+00 : f32
    %188 = vector.broadcast %cst_65 : f32 to vector<2x32xf32>
    %189 = arith.subf %188, %182 : vector<2x32xf32>
    %190 = arith.mulf %189, %187 : vector<2x32xf32>
    %191 = arith.mulf %182, %159 : vector<2x32xf32>
    %192 = arith.addf %190, %191 : vector<2x32xf32>
    %cst_66 = arith.constant dense<0.000000e+00> : vector<2x96xf32>
    %193 = tpu.matmul %192, %156, %cst_66 {dimension_numbers = #tpu.dot_dimension_numbers<[1], [0], [0], [1], [0, 0, 1, 1], [], []>} : vector<2x32xf32>, vector<32x96xf32>, vector<2x96xf32> -> vector<2x96xf32>
    %194 = vector.broadcast %158 : vector<1x96xf32> to vector<2x96xf32>
    %195 = arith.addf %193, %194 : vector<2x96xf32>
    %196 = vector.extract_strided_slice %16 {offsets = [0, 96], sizes = [2, 32], strides = [1, 1]} : vector<2x192xf32> to vector<2x32xf32>
    %197 = vector.extract_strided_slice %195 {offsets = [0, 0], sizes = [2, 32], strides = [1, 1]} : vector<2x96xf32> to vector<2x32xf32>
    %198 = arith.addf %196, %197 : vector<2x32xf32>
    %cst_67 = arith.constant 5.000000e-01 : f32
    %199 = vector.broadcast %cst_67 : f32 to vector<2x32xf32>
    %200 = arith.mulf %199, %198 : vector<2x32xf32>
    %201 = math.tanh %200 : vector<2x32xf32>
    %cst_68 = arith.constant 1.000000e+00 : f32
    %202 = vector.broadcast %cst_68 : f32 to vector<2x32xf32>
    %203 = arith.addf %201, %202 : vector<2x32xf32>
    %cst_69 = arith.constant 5.000000e-01 : f32
    %204 = vector.broadcast %cst_69 : f32 to vector<2x32xf32>
    %205 = arith.mulf %204, %203 : vector<2x32xf32>
    %206 = vector.extract_strided_slice %16 {offsets = [0, 128], sizes = [2, 32], strides = [1, 1]} : vector<2x192xf32> to vector<2x32xf32>
    %207 = vector.extract_strided_slice %195 {offsets = [0, 32], sizes = [2, 32], strides = [1, 1]} : vector<2x96xf32> to vector<2x32xf32>
    %208 = arith.addf %206, %207 : vector<2x32xf32>
    %cst_70 = arith.constant 5.000000e-01 : f32
    %209 = vector.broadcast %cst_70 : f32 to vector<2x32xf32>
    %210 = arith.mulf %209, %208 : vector<2x32xf32>
    %211 = math.tanh %210 : vector<2x32xf32>
    %cst_71 = arith.constant 1.000000e+00 : f32
    %212 = vector.broadcast %cst_71 : f32 to vector<2x32xf32>
    %213 = arith.addf %211, %212 : vector<2x32xf32>
    %cst_72 = arith.constant 5.000000e-01 : f32
    %214 = vector.broadcast %cst_72 : f32 to vector<2x32xf32>
    %215 = arith.mulf %214, %213 : vector<2x32xf32>
    %216 = vector.extract_strided_slice %16 {offsets = [0, 160], sizes = [2, 32], strides = [1, 1]} : vector<2x192xf32> to vector<2x32xf32>
    %217 = vector.extract_strided_slice %195 {offsets = [0, 64], sizes = [2, 32], strides = [1, 1]} : vector<2x96xf32> to vector<2x32xf32>
    %218 = arith.mulf %205, %217 : vector<2x32xf32>
    %219 = arith.addf %216, %218 : vector<2x32xf32>
    %220 = math.tanh %219 : vector<2x32xf32>
    %cst_73 = arith.constant 1.000000e+00 : f32
    %221 = vector.broadcast %cst_73 : f32 to vector<2x32xf32>
    %222 = arith.subf %221, %215 : vector<2x32xf32>
    %223 = arith.mulf %222, %220 : vector<2x32xf32>
    %224 = arith.mulf %215, %192 : vector<2x32xf32>
    %225 = arith.addf %223, %224 : vector<2x32xf32>
    %cst_74 = arith.constant dense<0.000000e+00> : vector<2x96xf32>
    %226 = tpu.matmul %225, %156, %cst_74 {dimension_numbers = #tpu.dot_dimension_numbers<[1], [0], [0], [1], [0, 0, 1, 1], [], []>} : vector<2x32xf32>, vector<32x96xf32>, vector<2x96xf32> -> vector<2x96xf32>
    %227 = vector.broadcast %158 : vector<1x96xf32> to vector<2x96xf32>
    %228 = arith.addf %226, %227 : vector<2x96xf32>
    %229 = vector.extract_strided_slice %15 {offsets = [0, 96], sizes = [2, 32], strides = [1, 1]} : vector<2x192xf32> to vector<2x32xf32>
    %230 = vector.extract_strided_slice %228 {offsets = [0, 0], sizes = [2, 32], strides = [1, 1]} : vector<2x96xf32> to vector<2x32xf32>
    %231 = arith.addf %229, %230 : vector<2x32xf32>
    %cst_75 = arith.constant 5.000000e-01 : f32
    %232 = vector.broadcast %cst_75 : f32 to vector<2x32xf32>
    %233 = arith.mulf %232, %231 : vector<2x32xf32>
    %234 = math.tanh %233 : vector<2x32xf32>
    %cst_76 = arith.constant 1.000000e+00 : f32
    %235 = vector.broadcast %cst_76 : f32 to vector<2x32xf32>
    %236 = arith.addf %234, %235 : vector<2x32xf32>
    %cst_77 = arith.constant 5.000000e-01 : f32
    %237 = vector.broadcast %cst_77 : f32 to vector<2x32xf32>
    %238 = arith.mulf %237, %236 : vector<2x32xf32>
    %239 = vector.extract_strided_slice %15 {offsets = [0, 128], sizes = [2, 32], strides = [1, 1]} : vector<2x192xf32> to vector<2x32xf32>
    %240 = vector.extract_strided_slice %228 {offsets = [0, 32], sizes = [2, 32], strides = [1, 1]} : vector<2x96xf32> to vector<2x32xf32>
    %241 = arith.addf %239, %240 : vector<2x32xf32>
    %cst_78 = arith.constant 5.000000e-01 : f32
    %242 = vector.broadcast %cst_78 : f32 to vector<2x32xf32>
    %243 = arith.mulf %242, %241 : vector<2x32xf32>
    %244 = math.tanh %243 : vector<2x32xf32>
    %cst_79 = arith.constant 1.000000e+00 : f32
    %245 = vector.broadcast %cst_79 : f32 to vector<2x32xf32>
    %246 = arith.addf %244, %245 : vector<2x32xf32>
    %cst_80 = arith.constant 5.000000e-01 : f32
    %247 = vector.broadcast %cst_80 : f32 to vector<2x32xf32>
    %248 = arith.mulf %247, %246 : vector<2x32xf32>
    %249 = vector.extract_strided_slice %15 {offsets = [0, 160], sizes = [2, 32], strides = [1, 1]} : vector<2x192xf32> to vector<2x32xf32>
    %250 = vector.extract_strided_slice %228 {offsets = [0, 64], sizes = [2, 32], strides = [1, 1]} : vector<2x96xf32> to vector<2x32xf32>
    %251 = arith.mulf %238, %250 : vector<2x32xf32>
    %252 = arith.addf %249, %251 : vector<2x32xf32>
    %253 = math.tanh %252 : vector<2x32xf32>
    %cst_81 = arith.constant 1.000000e+00 : f32
    %254 = vector.broadcast %cst_81 : f32 to vector<2x32xf32>
    %255 = arith.subf %254, %248 : vector<2x32xf32>
    %256 = arith.mulf %255, %253 : vector<2x32xf32>
    %257 = arith.mulf %248, %225 : vector<2x32xf32>
    %258 = arith.addf %256, %257 : vector<2x32xf32>
    %cst_82 = arith.constant dense<0.000000e+00> : vector<2x96xf32>
    %259 = tpu.matmul %258, %156, %cst_82 {dimension_numbers = #tpu.dot_dimension_numbers<[1], [0], [0], [1], [0, 0, 1, 1], [], []>} : vector<2x32xf32>, vector<32x96xf32>, vector<2x96xf32> -> vector<2x96xf32>
    %260 = vector.broadcast %158 : vector<1x96xf32> to vector<2x96xf32>
    %261 = arith.addf %259, %260 : vector<2x96xf32>
    %262 = vector.extract_strided_slice %14 {offsets = [0, 96], sizes = [2, 32], strides = [1, 1]} : vector<2x192xf32> to vector<2x32xf32>
    %263 = vector.extract_strided_slice %261 {offsets = [0, 0], sizes = [2, 32], strides = [1, 1]} : vector<2x96xf32> to vector<2x32xf32>
    %264 = arith.addf %262, %263 : vector<2x32xf32>
    %cst_83 = arith.constant 5.000000e-01 : f32
    %265 = vector.broadcast %cst_83 : f32 to vector<2x32xf32>
    %266 = arith.mulf %265, %264 : vector<2x32xf32>
    %267 = math.tanh %266 : vector<2x32xf32>
    %cst_84 = arith.constant 1.000000e+00 : f32
    %268 = vector.broadcast %cst_84 : f32 to vector<2x32xf32>
    %269 = arith.addf %267, %268 : vector<2x32xf32>
    %cst_85 = arith.constant 5.000000e-01 : f32
    %270 = vector.broadcast %cst_85 : f32 to vector<2x32xf32>
    %271 = arith.mulf %270, %269 : vector<2x32xf32>
    %272 = vector.extract_strided_slice %14 {offsets = [0, 128], sizes = [2, 32], strides = [1, 1]} : vector<2x192xf32> to vector<2x32xf32>
    %273 = vector.extract_strided_slice %261 {offsets = [0, 32], sizes = [2, 32], strides = [1, 1]} : vector<2x96xf32> to vector<2x32xf32>
    %274 = arith.addf %272, %273 : vector<2x32xf32>
    %cst_86 = arith.constant 5.000000e-01 : f32
    %275 = vector.broadcast %cst_86 : f32 to vector<2x32xf32>
    %276 = arith.mulf %275, %274 : vector<2x32xf32>
    %277 = math.tanh %276 : vector<2x32xf32>
    %cst_87 = arith.constant 1.000000e+00 : f32
    %278 = vector.broadcast %cst_87 : f32 to vector<2x32xf32>
    %279 = arith.addf %277, %278 : vector<2x32xf32>
    %cst_88 = arith.constant 5.000000e-01 : f32
    %280 = vector.broadcast %cst_88 : f32 to vector<2x32xf32>
    %281 = arith.mulf %280, %279 : vector<2x32xf32>
    %282 = vector.extract_strided_slice %14 {offsets = [0, 160], sizes = [2, 32], strides = [1, 1]} : vector<2x192xf32> to vector<2x32xf32>
    %283 = vector.extract_strided_slice %261 {offsets = [0, 64], sizes = [2, 32], strides = [1, 1]} : vector<2x96xf32> to vector<2x32xf32>
    %284 = arith.mulf %271, %283 : vector<2x32xf32>
    %285 = arith.addf %282, %284 : vector<2x32xf32>
    %286 = math.tanh %285 : vector<2x32xf32>
    %cst_89 = arith.constant 1.000000e+00 : f32
    %287 = vector.broadcast %cst_89 : f32 to vector<2x32xf32>
    %288 = arith.subf %287, %281 : vector<2x32xf32>
    %289 = arith.mulf %288, %286 : vector<2x32xf32>
    %290 = arith.mulf %281, %258 : vector<2x32xf32>
    %291 = arith.addf %289, %290 : vector<2x32xf32>
    %292 = tpu.concatenate %55, %291 in 1 : vector<2x32xf32>, vector<2x32xf32> -> vector<2x64xf32>
    %293 = tpu.concatenate %88, %258 in 1 : vector<2x32xf32>, vector<2x32xf32> -> vector<2x64xf32>
    %294 = tpu.concatenate %121, %225 in 1 : vector<2x32xf32>, vector<2x32xf32> -> vector<2x64xf32>
    %295 = tpu.concatenate %154, %192 in 1 : vector<2x32xf32>, vector<2x32xf32> -> vector<2x64xf32>
    %296 = tpu.concatenate %292, %293, %294, %295 in 0 : vector<2x64xf32>, vector<2x64xf32>, vector<2x64xf32>, vector<2x64xf32> -> vector<8x64xf32>
    %c0_90 = arith.constant 0 : index
    %c0_91 = arith.constant 0 : index
    %297 = vector.load %arg5[%c0_90, %c0_91] : memref<64x192xf32, #tpu.memory_space<vmem>>, vector<64x192xf32>
    %cst_92 = arith.constant dense<0.000000e+00> : vector<8x192xf32>
    %298 = tpu.matmul %296, %297, %cst_92 {dimension_numbers = #tpu.dot_dimension_numbers<[1], [0], [0], [1], [0, 0, 1, 1], [], []>} : vector<8x64xf32>, vector<64x192xf32>, vector<8x192xf32> -> vector<8x192xf32>
    %c0_93 = arith.constant 0 : index
    %c0_94 = arith.constant 0 : index
    %299 = vector.load %arg7[%c0_93, %c0_94] : memref<1x192xf32, #tpu.memory_space<vmem>>, vector<1x192xf32>
    %300 = vector.broadcast %299 : vector<1x192xf32> to vector<8x192xf32>
    %301 = arith.addf %298, %300 : vector<8x192xf32>
    %302 = vector.extract_strided_slice %301 {offsets = [0, 0], sizes = [2, 192], strides = [1, 1]} : vector<8x192xf32> to vector<2x192xf32>
    %303 = vector.extract_strided_slice %301 {offsets = [2, 0], sizes = [2, 192], strides = [1, 1]} : vector<8x192xf32> to vector<2x192xf32>
    %304 = vector.extract_strided_slice %301 {offsets = [4, 0], sizes = [2, 192], strides = [1, 1]} : vector<8x192xf32> to vector<2x192xf32>
    %305 = vector.extract_strided_slice %301 {offsets = [6, 0], sizes = [2, 192], strides = [1, 1]} : vector<8x192xf32> to vector<2x192xf32>
    %c0_95 = arith.constant 0 : index
    %c0_96 = arith.constant 0 : index
    %c0_97 = arith.constant 0 : index
    %306 = vector.load %arg6[%c0_95, %c0_96, %c0_97] : memref<2x32x96xf32, #tpu.memory_space<vmem>>, vector<1x32x96xf32>
    %307 = vector.shape_cast %306 : vector<1x32x96xf32> to vector<32x96xf32>
    %c0_98 = arith.constant 0 : index
    %c0_99 = arith.constant 0 : index
    %c0_100 = arith.constant 0 : index
    %308 = vector.load %arg8[%c0_98, %c0_99, %c0_100] : memref<2x1x96xf32, #tpu.memory_space<vmem>>, vector<1x1x96xf32>
    %309 = vector.shape_cast %308 : vector<1x1x96xf32> to vector<1x96xf32>
    %cst_101 = arith.constant 0.000000e+00 : f32
    %310 = vector.broadcast %cst_101 : f32 to vector<2x32xf32>
    %cst_102 = arith.constant dense<0.000000e+00> : vector<2x96xf32>
    %311 = tpu.matmul %310, %307, %cst_102 {dimension_numbers = #tpu.dot_dimension_numbers<[1], [0], [0], [1], [0, 0, 1, 1], [], []>} : vector<2x32xf32>, vector<32x96xf32>, vector<2x96xf32> -> vector<2x96xf32>
    %312 = vector.broadcast %309 : vector<1x96xf32> to vector<2x96xf32>
    %313 = arith.addf %311, %312 : vector<2x96xf32>
    %314 = vector.extract_strided_slice %302 {offsets = [0, 0], sizes = [2, 32], strides = [1, 1]} : vector<2x192xf32> to vector<2x32xf32>
    %315 = vector.extract_strided_slice %313 {offsets = [0, 0], sizes = [2, 32], strides = [1, 1]} : vector<2x96xf32> to vector<2x32xf32>
    %316 = arith.addf %314, %315 : vector<2x32xf32>
    %cst_103 = arith.constant 5.000000e-01 : f32
    %317 = vector.broadcast %cst_103 : f32 to vector<2x32xf32>
    %318 = arith.mulf %317, %316 : vector<2x32xf32>
    %319 = math.tanh %318 : vector<2x32xf32>
    %cst_104 = arith.constant 1.000000e+00 : f32
    %320 = vector.broadcast %cst_104 : f32 to vector<2x32xf32>
    %321 = arith.addf %319, %320 : vector<2x32xf32>
    %cst_105 = arith.constant 5.000000e-01 : f32
    %322 = vector.broadcast %cst_105 : f32 to vector<2x32xf32>
    %323 = arith.mulf %322, %321 : vector<2x32xf32>
    %324 = vector.extract_strided_slice %302 {offsets = [0, 32], sizes = [2, 32], strides = [1, 1]} : vector<2x192xf32> to vector<2x32xf32>
    %325 = vector.extract_strided_slice %313 {offsets = [0, 32], sizes = [2, 32], strides = [1, 1]} : vector<2x96xf32> to vector<2x32xf32>
    %326 = arith.addf %324, %325 : vector<2x32xf32>
    %cst_106 = arith.constant 5.000000e-01 : f32
    %327 = vector.broadcast %cst_106 : f32 to vector<2x32xf32>
    %328 = arith.mulf %327, %326 : vector<2x32xf32>
    %329 = math.tanh %328 : vector<2x32xf32>
    %cst_107 = arith.constant 1.000000e+00 : f32
    %330 = vector.broadcast %cst_107 : f32 to vector<2x32xf32>
    %331 = arith.addf %329, %330 : vector<2x32xf32>
    %cst_108 = arith.constant 5.000000e-01 : f32
    %332 = vector.broadcast %cst_108 : f32 to vector<2x32xf32>
    %333 = arith.mulf %332, %331 : vector<2x32xf32>
    %334 = vector.extract_strided_slice %302 {offsets = [0, 64], sizes = [2, 32], strides = [1, 1]} : vector<2x192xf32> to vector<2x32xf32>
    %335 = vector.extract_strided_slice %313 {offsets = [0, 64], sizes = [2, 32], strides = [1, 1]} : vector<2x96xf32> to vector<2x32xf32>
    %336 = arith.mulf %323, %335 : vector<2x32xf32>
    %337 = arith.addf %334, %336 : vector<2x32xf32>
    %338 = math.tanh %337 : vector<2x32xf32>
    %cst_109 = arith.constant 1.000000e+00 : f32
    %339 = vector.broadcast %cst_109 : f32 to vector<2x32xf32>
    %340 = arith.subf %339, %333 : vector<2x32xf32>
    %341 = arith.mulf %340, %338 : vector<2x32xf32>
    %342 = arith.mulf %333, %310 : vector<2x32xf32>
    %343 = arith.addf %341, %342 : vector<2x32xf32>
    %cst_110 = arith.constant dense<0.000000e+00> : vector<2x96xf32>
    %344 = tpu.matmul %343, %307, %cst_110 {dimension_numbers = #tpu.dot_dimension_numbers<[1], [0], [0], [1], [0, 0, 1, 1], [], []>} : vector<2x32xf32>, vector<32x96xf32>, vector<2x96xf32> -> vector<2x96xf32>
    %345 = vector.broadcast %309 : vector<1x96xf32> to vector<2x96xf32>
    %346 = arith.addf %344, %345 : vector<2x96xf32>
    %347 = vector.extract_strided_slice %303 {offsets = [0, 0], sizes = [2, 32], strides = [1, 1]} : vector<2x192xf32> to vector<2x32xf32>
    %348 = vector.extract_strided_slice %346 {offsets = [0, 0], sizes = [2, 32], strides = [1, 1]} : vector<2x96xf32> to vector<2x32xf32>
    %349 = arith.addf %347, %348 : vector<2x32xf32>
    %cst_111 = arith.constant 5.000000e-01 : f32
    %350 = vector.broadcast %cst_111 : f32 to vector<2x32xf32>
    %351 = arith.mulf %350, %349 : vector<2x32xf32>
    %352 = math.tanh %351 : vector<2x32xf32>
    %cst_112 = arith.constant 1.000000e+00 : f32
    %353 = vector.broadcast %cst_112 : f32 to vector<2x32xf32>
    %354 = arith.addf %352, %353 : vector<2x32xf32>
    %cst_113 = arith.constant 5.000000e-01 : f32
    %355 = vector.broadcast %cst_113 : f32 to vector<2x32xf32>
    %356 = arith.mulf %355, %354 : vector<2x32xf32>
    %357 = vector.extract_strided_slice %303 {offsets = [0, 32], sizes = [2, 32], strides = [1, 1]} : vector<2x192xf32> to vector<2x32xf32>
    %358 = vector.extract_strided_slice %346 {offsets = [0, 32], sizes = [2, 32], strides = [1, 1]} : vector<2x96xf32> to vector<2x32xf32>
    %359 = arith.addf %357, %358 : vector<2x32xf32>
    %cst_114 = arith.constant 5.000000e-01 : f32
    %360 = vector.broadcast %cst_114 : f32 to vector<2x32xf32>
    %361 = arith.mulf %360, %359 : vector<2x32xf32>
    %362 = math.tanh %361 : vector<2x32xf32>
    %cst_115 = arith.constant 1.000000e+00 : f32
    %363 = vector.broadcast %cst_115 : f32 to vector<2x32xf32>
    %364 = arith.addf %362, %363 : vector<2x32xf32>
    %cst_116 = arith.constant 5.000000e-01 : f32
    %365 = vector.broadcast %cst_116 : f32 to vector<2x32xf32>
    %366 = arith.mulf %365, %364 : vector<2x32xf32>
    %367 = vector.extract_strided_slice %303 {offsets = [0, 64], sizes = [2, 32], strides = [1, 1]} : vector<2x192xf32> to vector<2x32xf32>
    %368 = vector.extract_strided_slice %346 {offsets = [0, 64], sizes = [2, 32], strides = [1, 1]} : vector<2x96xf32> to vector<2x32xf32>
    %369 = arith.mulf %356, %368 : vector<2x32xf32>
    %370 = arith.addf %367, %369 : vector<2x32xf32>
    %371 = math.tanh %370 : vector<2x32xf32>
    %cst_117 = arith.constant 1.000000e+00 : f32
    %372 = vector.broadcast %cst_117 : f32 to vector<2x32xf32>
    %373 = arith.subf %372, %366 : vector<2x32xf32>
    %374 = arith.mulf %373, %371 : vector<2x32xf32>
    %375 = arith.mulf %366, %343 : vector<2x32xf32>
    %376 = arith.addf %374, %375 : vector<2x32xf32>
    %cst_118 = arith.constant dense<0.000000e+00> : vector<2x96xf32>
    %377 = tpu.matmul %376, %307, %cst_118 {dimension_numbers = #tpu.dot_dimension_numbers<[1], [0], [0], [1], [0, 0, 1, 1], [], []>} : vector<2x32xf32>, vector<32x96xf32>, vector<2x96xf32> -> vector<2x96xf32>
    %378 = vector.broadcast %309 : vector<1x96xf32> to vector<2x96xf32>
    %379 = arith.addf %377, %378 : vector<2x96xf32>
    %380 = vector.extract_strided_slice %304 {offsets = [0, 0], sizes = [2, 32], strides = [1, 1]} : vector<2x192xf32> to vector<2x32xf32>
    %381 = vector.extract_strided_slice %379 {offsets = [0, 0], sizes = [2, 32], strides = [1, 1]} : vector<2x96xf32> to vector<2x32xf32>
    %382 = arith.addf %380, %381 : vector<2x32xf32>
    %cst_119 = arith.constant 5.000000e-01 : f32
    %383 = vector.broadcast %cst_119 : f32 to vector<2x32xf32>
    %384 = arith.mulf %383, %382 : vector<2x32xf32>
    %385 = math.tanh %384 : vector<2x32xf32>
    %cst_120 = arith.constant 1.000000e+00 : f32
    %386 = vector.broadcast %cst_120 : f32 to vector<2x32xf32>
    %387 = arith.addf %385, %386 : vector<2x32xf32>
    %cst_121 = arith.constant 5.000000e-01 : f32
    %388 = vector.broadcast %cst_121 : f32 to vector<2x32xf32>
    %389 = arith.mulf %388, %387 : vector<2x32xf32>
    %390 = vector.extract_strided_slice %304 {offsets = [0, 32], sizes = [2, 32], strides = [1, 1]} : vector<2x192xf32> to vector<2x32xf32>
    %391 = vector.extract_strided_slice %379 {offsets = [0, 32], sizes = [2, 32], strides = [1, 1]} : vector<2x96xf32> to vector<2x32xf32>
    %392 = arith.addf %390, %391 : vector<2x32xf32>
    %cst_122 = arith.constant 5.000000e-01 : f32
    %393 = vector.broadcast %cst_122 : f32 to vector<2x32xf32>
    %394 = arith.mulf %393, %392 : vector<2x32xf32>
    %395 = math.tanh %394 : vector<2x32xf32>
    %cst_123 = arith.constant 1.000000e+00 : f32
    %396 = vector.broadcast %cst_123 : f32 to vector<2x32xf32>
    %397 = arith.addf %395, %396 : vector<2x32xf32>
    %cst_124 = arith.constant 5.000000e-01 : f32
    %398 = vector.broadcast %cst_124 : f32 to vector<2x32xf32>
    %399 = arith.mulf %398, %397 : vector<2x32xf32>
    %400 = vector.extract_strided_slice %304 {offsets = [0, 64], sizes = [2, 32], strides = [1, 1]} : vector<2x192xf32> to vector<2x32xf32>
    %401 = vector.extract_strided_slice %379 {offsets = [0, 64], sizes = [2, 32], strides = [1, 1]} : vector<2x96xf32> to vector<2x32xf32>
    %402 = arith.mulf %389, %401 : vector<2x32xf32>
    %403 = arith.addf %400, %402 : vector<2x32xf32>
    %404 = math.tanh %403 : vector<2x32xf32>
    %cst_125 = arith.constant 1.000000e+00 : f32
    %405 = vector.broadcast %cst_125 : f32 to vector<2x32xf32>
    %406 = arith.subf %405, %399 : vector<2x32xf32>
    %407 = arith.mulf %406, %404 : vector<2x32xf32>
    %408 = arith.mulf %399, %376 : vector<2x32xf32>
    %409 = arith.addf %407, %408 : vector<2x32xf32>
    %cst_126 = arith.constant dense<0.000000e+00> : vector<2x96xf32>
    %410 = tpu.matmul %409, %307, %cst_126 {dimension_numbers = #tpu.dot_dimension_numbers<[1], [0], [0], [1], [0, 0, 1, 1], [], []>} : vector<2x32xf32>, vector<32x96xf32>, vector<2x96xf32> -> vector<2x96xf32>
    %411 = vector.broadcast %309 : vector<1x96xf32> to vector<2x96xf32>
    %412 = arith.addf %410, %411 : vector<2x96xf32>
    %413 = vector.extract_strided_slice %305 {offsets = [0, 0], sizes = [2, 32], strides = [1, 1]} : vector<2x192xf32> to vector<2x32xf32>
    %414 = vector.extract_strided_slice %412 {offsets = [0, 0], sizes = [2, 32], strides = [1, 1]} : vector<2x96xf32> to vector<2x32xf32>
    %415 = arith.addf %413, %414 : vector<2x32xf32>
    %cst_127 = arith.constant 5.000000e-01 : f32
    %416 = vector.broadcast %cst_127 : f32 to vector<2x32xf32>
    %417 = arith.mulf %416, %415 : vector<2x32xf32>
    %418 = math.tanh %417 : vector<2x32xf32>
    %cst_128 = arith.constant 1.000000e+00 : f32
    %419 = vector.broadcast %cst_128 : f32 to vector<2x32xf32>
    %420 = arith.addf %418, %419 : vector<2x32xf32>
    %cst_129 = arith.constant 5.000000e-01 : f32
    %421 = vector.broadcast %cst_129 : f32 to vector<2x32xf32>
    %422 = arith.mulf %421, %420 : vector<2x32xf32>
    %423 = vector.extract_strided_slice %305 {offsets = [0, 32], sizes = [2, 32], strides = [1, 1]} : vector<2x192xf32> to vector<2x32xf32>
    %424 = vector.extract_strided_slice %412 {offsets = [0, 32], sizes = [2, 32], strides = [1, 1]} : vector<2x96xf32> to vector<2x32xf32>
    %425 = arith.addf %423, %424 : vector<2x32xf32>
    %cst_130 = arith.constant 5.000000e-01 : f32
    %426 = vector.broadcast %cst_130 : f32 to vector<2x32xf32>
    %427 = arith.mulf %426, %425 : vector<2x32xf32>
    %428 = math.tanh %427 : vector<2x32xf32>
    %cst_131 = arith.constant 1.000000e+00 : f32
    %429 = vector.broadcast %cst_131 : f32 to vector<2x32xf32>
    %430 = arith.addf %428, %429 : vector<2x32xf32>
    %cst_132 = arith.constant 5.000000e-01 : f32
    %431 = vector.broadcast %cst_132 : f32 to vector<2x32xf32>
    %432 = arith.mulf %431, %430 : vector<2x32xf32>
    %433 = vector.extract_strided_slice %305 {offsets = [0, 64], sizes = [2, 32], strides = [1, 1]} : vector<2x192xf32> to vector<2x32xf32>
    %434 = vector.extract_strided_slice %412 {offsets = [0, 64], sizes = [2, 32], strides = [1, 1]} : vector<2x96xf32> to vector<2x32xf32>
    %435 = arith.mulf %422, %434 : vector<2x32xf32>
    %436 = arith.addf %433, %435 : vector<2x32xf32>
    %437 = math.tanh %436 : vector<2x32xf32>
    %cst_133 = arith.constant 1.000000e+00 : f32
    %438 = vector.broadcast %cst_133 : f32 to vector<2x32xf32>
    %439 = arith.subf %438, %432 : vector<2x32xf32>
    %440 = arith.mulf %439, %437 : vector<2x32xf32>
    %441 = arith.mulf %432, %409 : vector<2x32xf32>
    %442 = arith.addf %440, %441 : vector<2x32xf32>
    %c1_134 = arith.constant 1 : index
    %c0_135 = arith.constant 0 : index
    %c0_136 = arith.constant 0 : index
    %443 = vector.load %arg6[%c1_134, %c0_135, %c0_136] : memref<2x32x96xf32, #tpu.memory_space<vmem>>, vector<1x32x96xf32>
    %444 = vector.shape_cast %443 : vector<1x32x96xf32> to vector<32x96xf32>
    %c1_137 = arith.constant 1 : index
    %c0_138 = arith.constant 0 : index
    %c0_139 = arith.constant 0 : index
    %445 = vector.load %arg8[%c1_137, %c0_138, %c0_139] : memref<2x1x96xf32, #tpu.memory_space<vmem>>, vector<1x1x96xf32>
    %446 = vector.shape_cast %445 : vector<1x1x96xf32> to vector<1x96xf32>
    %cst_140 = arith.constant 0.000000e+00 : f32
    %447 = vector.broadcast %cst_140 : f32 to vector<2x32xf32>
    %cst_141 = arith.constant dense<0.000000e+00> : vector<2x96xf32>
    %448 = tpu.matmul %447, %444, %cst_141 {dimension_numbers = #tpu.dot_dimension_numbers<[1], [0], [0], [1], [0, 0, 1, 1], [], []>} : vector<2x32xf32>, vector<32x96xf32>, vector<2x96xf32> -> vector<2x96xf32>
    %449 = vector.broadcast %446 : vector<1x96xf32> to vector<2x96xf32>
    %450 = arith.addf %448, %449 : vector<2x96xf32>
    %451 = vector.extract_strided_slice %305 {offsets = [0, 96], sizes = [2, 32], strides = [1, 1]} : vector<2x192xf32> to vector<2x32xf32>
    %452 = vector.extract_strided_slice %450 {offsets = [0, 0], sizes = [2, 32], strides = [1, 1]} : vector<2x96xf32> to vector<2x32xf32>
    %453 = arith.addf %451, %452 : vector<2x32xf32>
    %cst_142 = arith.constant 5.000000e-01 : f32
    %454 = vector.broadcast %cst_142 : f32 to vector<2x32xf32>
    %455 = arith.mulf %454, %453 : vector<2x32xf32>
    %456 = math.tanh %455 : vector<2x32xf32>
    %cst_143 = arith.constant 1.000000e+00 : f32
    %457 = vector.broadcast %cst_143 : f32 to vector<2x32xf32>
    %458 = arith.addf %456, %457 : vector<2x32xf32>
    %cst_144 = arith.constant 5.000000e-01 : f32
    %459 = vector.broadcast %cst_144 : f32 to vector<2x32xf32>
    %460 = arith.mulf %459, %458 : vector<2x32xf32>
    %461 = vector.extract_strided_slice %305 {offsets = [0, 128], sizes = [2, 32], strides = [1, 1]} : vector<2x192xf32> to vector<2x32xf32>
    %462 = vector.extract_strided_slice %450 {offsets = [0, 32], sizes = [2, 32], strides = [1, 1]} : vector<2x96xf32> to vector<2x32xf32>
    %463 = arith.addf %461, %462 : vector<2x32xf32>
    %cst_145 = arith.constant 5.000000e-01 : f32
    %464 = vector.broadcast %cst_145 : f32 to vector<2x32xf32>
    %465 = arith.mulf %464, %463 : vector<2x32xf32>
    %466 = math.tanh %465 : vector<2x32xf32>
    %cst_146 = arith.constant 1.000000e+00 : f32
    %467 = vector.broadcast %cst_146 : f32 to vector<2x32xf32>
    %468 = arith.addf %466, %467 : vector<2x32xf32>
    %cst_147 = arith.constant 5.000000e-01 : f32
    %469 = vector.broadcast %cst_147 : f32 to vector<2x32xf32>
    %470 = arith.mulf %469, %468 : vector<2x32xf32>
    %471 = vector.extract_strided_slice %305 {offsets = [0, 160], sizes = [2, 32], strides = [1, 1]} : vector<2x192xf32> to vector<2x32xf32>
    %472 = vector.extract_strided_slice %450 {offsets = [0, 64], sizes = [2, 32], strides = [1, 1]} : vector<2x96xf32> to vector<2x32xf32>
    %473 = arith.mulf %460, %472 : vector<2x32xf32>
    %474 = arith.addf %471, %473 : vector<2x32xf32>
    %475 = math.tanh %474 : vector<2x32xf32>
    %cst_148 = arith.constant 1.000000e+00 : f32
    %476 = vector.broadcast %cst_148 : f32 to vector<2x32xf32>
    %477 = arith.subf %476, %470 : vector<2x32xf32>
    %478 = arith.mulf %477, %475 : vector<2x32xf32>
    %479 = arith.mulf %470, %447 : vector<2x32xf32>
    %480 = arith.addf %478, %479 : vector<2x32xf32>
    %cst_149 = arith.constant dense<0.000000e+00> : vector<2x96xf32>
    %481 = tpu.matmul %480, %444, %cst_149 {dimension_numbers = #tpu.dot_dimension_numbers<[1], [0], [0], [1], [0, 0, 1, 1], [], []>} : vector<2x32xf32>, vector<32x96xf32>, vector<2x96xf32> -> vector<2x96xf32>
    %482 = vector.broadcast %446 : vector<1x96xf32> to vector<2x96xf32>
    %483 = arith.addf %481, %482 : vector<2x96xf32>
    %484 = vector.extract_strided_slice %304 {offsets = [0, 96], sizes = [2, 32], strides = [1, 1]} : vector<2x192xf32> to vector<2x32xf32>
    %485 = vector.extract_strided_slice %483 {offsets = [0, 0], sizes = [2, 32], strides = [1, 1]} : vector<2x96xf32> to vector<2x32xf32>
    %486 = arith.addf %484, %485 : vector<2x32xf32>
    %cst_150 = arith.constant 5.000000e-01 : f32
    %487 = vector.broadcast %cst_150 : f32 to vector<2x32xf32>
    %488 = arith.mulf %487, %486 : vector<2x32xf32>
    %489 = math.tanh %488 : vector<2x32xf32>
    %cst_151 = arith.constant 1.000000e+00 : f32
    %490 = vector.broadcast %cst_151 : f32 to vector<2x32xf32>
    %491 = arith.addf %489, %490 : vector<2x32xf32>
    %cst_152 = arith.constant 5.000000e-01 : f32
    %492 = vector.broadcast %cst_152 : f32 to vector<2x32xf32>
    %493 = arith.mulf %492, %491 : vector<2x32xf32>
    %494 = vector.extract_strided_slice %304 {offsets = [0, 128], sizes = [2, 32], strides = [1, 1]} : vector<2x192xf32> to vector<2x32xf32>
    %495 = vector.extract_strided_slice %483 {offsets = [0, 32], sizes = [2, 32], strides = [1, 1]} : vector<2x96xf32> to vector<2x32xf32>
    %496 = arith.addf %494, %495 : vector<2x32xf32>
    %cst_153 = arith.constant 5.000000e-01 : f32
    %497 = vector.broadcast %cst_153 : f32 to vector<2x32xf32>
    %498 = arith.mulf %497, %496 : vector<2x32xf32>
    %499 = math.tanh %498 : vector<2x32xf32>
    %cst_154 = arith.constant 1.000000e+00 : f32
    %500 = vector.broadcast %cst_154 : f32 to vector<2x32xf32>
    %501 = arith.addf %499, %500 : vector<2x32xf32>
    %cst_155 = arith.constant 5.000000e-01 : f32
    %502 = vector.broadcast %cst_155 : f32 to vector<2x32xf32>
    %503 = arith.mulf %502, %501 : vector<2x32xf32>
    %504 = vector.extract_strided_slice %304 {offsets = [0, 160], sizes = [2, 32], strides = [1, 1]} : vector<2x192xf32> to vector<2x32xf32>
    %505 = vector.extract_strided_slice %483 {offsets = [0, 64], sizes = [2, 32], strides = [1, 1]} : vector<2x96xf32> to vector<2x32xf32>
    %506 = arith.mulf %493, %505 : vector<2x32xf32>
    %507 = arith.addf %504, %506 : vector<2x32xf32>
    %508 = math.tanh %507 : vector<2x32xf32>
    %cst_156 = arith.constant 1.000000e+00 : f32
    %509 = vector.broadcast %cst_156 : f32 to vector<2x32xf32>
    %510 = arith.subf %509, %503 : vector<2x32xf32>
    %511 = arith.mulf %510, %508 : vector<2x32xf32>
    %512 = arith.mulf %503, %480 : vector<2x32xf32>
    %513 = arith.addf %511, %512 : vector<2x32xf32>
    %cst_157 = arith.constant dense<0.000000e+00> : vector<2x96xf32>
    %514 = tpu.matmul %513, %444, %cst_157 {dimension_numbers = #tpu.dot_dimension_numbers<[1], [0], [0], [1], [0, 0, 1, 1], [], []>} : vector<2x32xf32>, vector<32x96xf32>, vector<2x96xf32> -> vector<2x96xf32>
    %515 = vector.broadcast %446 : vector<1x96xf32> to vector<2x96xf32>
    %516 = arith.addf %514, %515 : vector<2x96xf32>
    %517 = vector.extract_strided_slice %303 {offsets = [0, 96], sizes = [2, 32], strides = [1, 1]} : vector<2x192xf32> to vector<2x32xf32>
    %518 = vector.extract_strided_slice %516 {offsets = [0, 0], sizes = [2, 32], strides = [1, 1]} : vector<2x96xf32> to vector<2x32xf32>
    %519 = arith.addf %517, %518 : vector<2x32xf32>
    %cst_158 = arith.constant 5.000000e-01 : f32
    %520 = vector.broadcast %cst_158 : f32 to vector<2x32xf32>
    %521 = arith.mulf %520, %519 : vector<2x32xf32>
    %522 = math.tanh %521 : vector<2x32xf32>
    %cst_159 = arith.constant 1.000000e+00 : f32
    %523 = vector.broadcast %cst_159 : f32 to vector<2x32xf32>
    %524 = arith.addf %522, %523 : vector<2x32xf32>
    %cst_160 = arith.constant 5.000000e-01 : f32
    %525 = vector.broadcast %cst_160 : f32 to vector<2x32xf32>
    %526 = arith.mulf %525, %524 : vector<2x32xf32>
    %527 = vector.extract_strided_slice %303 {offsets = [0, 128], sizes = [2, 32], strides = [1, 1]} : vector<2x192xf32> to vector<2x32xf32>
    %528 = vector.extract_strided_slice %516 {offsets = [0, 32], sizes = [2, 32], strides = [1, 1]} : vector<2x96xf32> to vector<2x32xf32>
    %529 = arith.addf %527, %528 : vector<2x32xf32>
    %cst_161 = arith.constant 5.000000e-01 : f32
    %530 = vector.broadcast %cst_161 : f32 to vector<2x32xf32>
    %531 = arith.mulf %530, %529 : vector<2x32xf32>
    %532 = math.tanh %531 : vector<2x32xf32>
    %cst_162 = arith.constant 1.000000e+00 : f32
    %533 = vector.broadcast %cst_162 : f32 to vector<2x32xf32>
    %534 = arith.addf %532, %533 : vector<2x32xf32>
    %cst_163 = arith.constant 5.000000e-01 : f32
    %535 = vector.broadcast %cst_163 : f32 to vector<2x32xf32>
    %536 = arith.mulf %535, %534 : vector<2x32xf32>
    %537 = vector.extract_strided_slice %303 {offsets = [0, 160], sizes = [2, 32], strides = [1, 1]} : vector<2x192xf32> to vector<2x32xf32>
    %538 = vector.extract_strided_slice %516 {offsets = [0, 64], sizes = [2, 32], strides = [1, 1]} : vector<2x96xf32> to vector<2x32xf32>
    %539 = arith.mulf %526, %538 : vector<2x32xf32>
    %540 = arith.addf %537, %539 : vector<2x32xf32>
    %541 = math.tanh %540 : vector<2x32xf32>
    %cst_164 = arith.constant 1.000000e+00 : f32
    %542 = vector.broadcast %cst_164 : f32 to vector<2x32xf32>
    %543 = arith.subf %542, %536 : vector<2x32xf32>
    %544 = arith.mulf %543, %541 : vector<2x32xf32>
    %545 = arith.mulf %536, %513 : vector<2x32xf32>
    %546 = arith.addf %544, %545 : vector<2x32xf32>
    %cst_165 = arith.constant dense<0.000000e+00> : vector<2x96xf32>
    %547 = tpu.matmul %546, %444, %cst_165 {dimension_numbers = #tpu.dot_dimension_numbers<[1], [0], [0], [1], [0, 0, 1, 1], [], []>} : vector<2x32xf32>, vector<32x96xf32>, vector<2x96xf32> -> vector<2x96xf32>
    %548 = vector.broadcast %446 : vector<1x96xf32> to vector<2x96xf32>
    %549 = arith.addf %547, %548 : vector<2x96xf32>
    %550 = vector.extract_strided_slice %302 {offsets = [0, 96], sizes = [2, 32], strides = [1, 1]} : vector<2x192xf32> to vector<2x32xf32>
    %551 = vector.extract_strided_slice %549 {offsets = [0, 0], sizes = [2, 32], strides = [1, 1]} : vector<2x96xf32> to vector<2x32xf32>
    %552 = arith.addf %550, %551 : vector<2x32xf32>
    %cst_166 = arith.constant 5.000000e-01 : f32
    %553 = vector.broadcast %cst_166 : f32 to vector<2x32xf32>
    %554 = arith.mulf %553, %552 : vector<2x32xf32>
    %555 = math.tanh %554 : vector<2x32xf32>
    %cst_167 = arith.constant 1.000000e+00 : f32
    %556 = vector.broadcast %cst_167 : f32 to vector<2x32xf32>
    %557 = arith.addf %555, %556 : vector<2x32xf32>
    %cst_168 = arith.constant 5.000000e-01 : f32
    %558 = vector.broadcast %cst_168 : f32 to vector<2x32xf32>
    %559 = arith.mulf %558, %557 : vector<2x32xf32>
    %560 = vector.extract_strided_slice %302 {offsets = [0, 128], sizes = [2, 32], strides = [1, 1]} : vector<2x192xf32> to vector<2x32xf32>
    %561 = vector.extract_strided_slice %549 {offsets = [0, 32], sizes = [2, 32], strides = [1, 1]} : vector<2x96xf32> to vector<2x32xf32>
    %562 = arith.addf %560, %561 : vector<2x32xf32>
    %cst_169 = arith.constant 5.000000e-01 : f32
    %563 = vector.broadcast %cst_169 : f32 to vector<2x32xf32>
    %564 = arith.mulf %563, %562 : vector<2x32xf32>
    %565 = math.tanh %564 : vector<2x32xf32>
    %cst_170 = arith.constant 1.000000e+00 : f32
    %566 = vector.broadcast %cst_170 : f32 to vector<2x32xf32>
    %567 = arith.addf %565, %566 : vector<2x32xf32>
    %cst_171 = arith.constant 5.000000e-01 : f32
    %568 = vector.broadcast %cst_171 : f32 to vector<2x32xf32>
    %569 = arith.mulf %568, %567 : vector<2x32xf32>
    %570 = vector.extract_strided_slice %302 {offsets = [0, 160], sizes = [2, 32], strides = [1, 1]} : vector<2x192xf32> to vector<2x32xf32>
    %571 = vector.extract_strided_slice %549 {offsets = [0, 64], sizes = [2, 32], strides = [1, 1]} : vector<2x96xf32> to vector<2x32xf32>
    %572 = arith.mulf %559, %571 : vector<2x32xf32>
    %573 = arith.addf %570, %572 : vector<2x32xf32>
    %574 = math.tanh %573 : vector<2x32xf32>
    %cst_172 = arith.constant 1.000000e+00 : f32
    %575 = vector.broadcast %cst_172 : f32 to vector<2x32xf32>
    %576 = arith.subf %575, %569 : vector<2x32xf32>
    %577 = arith.mulf %576, %574 : vector<2x32xf32>
    %578 = arith.mulf %569, %546 : vector<2x32xf32>
    %579 = arith.addf %577, %578 : vector<2x32xf32>
    %580 = tpu.concatenate %343, %579 in 1 : vector<2x32xf32>, vector<2x32xf32> -> vector<2x64xf32>
    %581 = tpu.concatenate %376, %546 in 1 : vector<2x32xf32>, vector<2x32xf32> -> vector<2x64xf32>
    %582 = tpu.concatenate %409, %513 in 1 : vector<2x32xf32>, vector<2x32xf32> -> vector<2x64xf32>
    %583 = tpu.concatenate %442, %480 in 1 : vector<2x32xf32>, vector<2x32xf32> -> vector<2x64xf32>
    %584 = tpu.concatenate %580, %581, %582, %583 in 0 : vector<2x64xf32>, vector<2x64xf32>, vector<2x64xf32>, vector<2x64xf32> -> vector<8x64xf32>
    %c0_173 = arith.constant 0 : index
    %c0_174 = arith.constant 0 : index
    %585 = vector.load %arg9[%c0_173, %c0_174] : memref<64x192xf32, #tpu.memory_space<vmem>>, vector<64x192xf32>
    %cst_175 = arith.constant dense<0.000000e+00> : vector<8x192xf32>
    %586 = tpu.matmul %584, %585, %cst_175 {dimension_numbers = #tpu.dot_dimension_numbers<[1], [0], [0], [1], [0, 0, 1, 1], [], []>} : vector<8x64xf32>, vector<64x192xf32>, vector<8x192xf32> -> vector<8x192xf32>
    %c0_176 = arith.constant 0 : index
    %c0_177 = arith.constant 0 : index
    %587 = vector.load %arg11[%c0_176, %c0_177] : memref<1x192xf32, #tpu.memory_space<vmem>>, vector<1x192xf32>
    %588 = vector.broadcast %587 : vector<1x192xf32> to vector<8x192xf32>
    %589 = arith.addf %586, %588 : vector<8x192xf32>
    %590 = vector.extract_strided_slice %589 {offsets = [0, 0], sizes = [2, 192], strides = [1, 1]} : vector<8x192xf32> to vector<2x192xf32>
    %591 = vector.extract_strided_slice %589 {offsets = [2, 0], sizes = [2, 192], strides = [1, 1]} : vector<8x192xf32> to vector<2x192xf32>
    %592 = vector.extract_strided_slice %589 {offsets = [4, 0], sizes = [2, 192], strides = [1, 1]} : vector<8x192xf32> to vector<2x192xf32>
    %593 = vector.extract_strided_slice %589 {offsets = [6, 0], sizes = [2, 192], strides = [1, 1]} : vector<8x192xf32> to vector<2x192xf32>
    %c0_178 = arith.constant 0 : index
    %c0_179 = arith.constant 0 : index
    %c0_180 = arith.constant 0 : index
    %594 = vector.load %arg10[%c0_178, %c0_179, %c0_180] : memref<2x32x96xf32, #tpu.memory_space<vmem>>, vector<1x32x96xf32>
    %595 = vector.shape_cast %594 : vector<1x32x96xf32> to vector<32x96xf32>
    %c0_181 = arith.constant 0 : index
    %c0_182 = arith.constant 0 : index
    %c0_183 = arith.constant 0 : index
    %596 = vector.load %arg12[%c0_181, %c0_182, %c0_183] : memref<2x1x96xf32, #tpu.memory_space<vmem>>, vector<1x1x96xf32>
    %597 = vector.shape_cast %596 : vector<1x1x96xf32> to vector<1x96xf32>
    %cst_184 = arith.constant 0.000000e+00 : f32
    %598 = vector.broadcast %cst_184 : f32 to vector<2x32xf32>
    %cst_185 = arith.constant dense<0.000000e+00> : vector<2x96xf32>
    %599 = tpu.matmul %598, %595, %cst_185 {dimension_numbers = #tpu.dot_dimension_numbers<[1], [0], [0], [1], [0, 0, 1, 1], [], []>} : vector<2x32xf32>, vector<32x96xf32>, vector<2x96xf32> -> vector<2x96xf32>
    %600 = vector.broadcast %597 : vector<1x96xf32> to vector<2x96xf32>
    %601 = arith.addf %599, %600 : vector<2x96xf32>
    %602 = vector.extract_strided_slice %590 {offsets = [0, 0], sizes = [2, 32], strides = [1, 1]} : vector<2x192xf32> to vector<2x32xf32>
    %603 = vector.extract_strided_slice %601 {offsets = [0, 0], sizes = [2, 32], strides = [1, 1]} : vector<2x96xf32> to vector<2x32xf32>
    %604 = arith.addf %602, %603 : vector<2x32xf32>
    %cst_186 = arith.constant 5.000000e-01 : f32
    %605 = vector.broadcast %cst_186 : f32 to vector<2x32xf32>
    %606 = arith.mulf %605, %604 : vector<2x32xf32>
    %607 = math.tanh %606 : vector<2x32xf32>
    %cst_187 = arith.constant 1.000000e+00 : f32
    %608 = vector.broadcast %cst_187 : f32 to vector<2x32xf32>
    %609 = arith.addf %607, %608 : vector<2x32xf32>
    %cst_188 = arith.constant 5.000000e-01 : f32
    %610 = vector.broadcast %cst_188 : f32 to vector<2x32xf32>
    %611 = arith.mulf %610, %609 : vector<2x32xf32>
    %612 = vector.extract_strided_slice %590 {offsets = [0, 32], sizes = [2, 32], strides = [1, 1]} : vector<2x192xf32> to vector<2x32xf32>
    %613 = vector.extract_strided_slice %601 {offsets = [0, 32], sizes = [2, 32], strides = [1, 1]} : vector<2x96xf32> to vector<2x32xf32>
    %614 = arith.addf %612, %613 : vector<2x32xf32>
    %cst_189 = arith.constant 5.000000e-01 : f32
    %615 = vector.broadcast %cst_189 : f32 to vector<2x32xf32>
    %616 = arith.mulf %615, %614 : vector<2x32xf32>
    %617 = math.tanh %616 : vector<2x32xf32>
    %cst_190 = arith.constant 1.000000e+00 : f32
    %618 = vector.broadcast %cst_190 : f32 to vector<2x32xf32>
    %619 = arith.addf %617, %618 : vector<2x32xf32>
    %cst_191 = arith.constant 5.000000e-01 : f32
    %620 = vector.broadcast %cst_191 : f32 to vector<2x32xf32>
    %621 = arith.mulf %620, %619 : vector<2x32xf32>
    %622 = vector.extract_strided_slice %590 {offsets = [0, 64], sizes = [2, 32], strides = [1, 1]} : vector<2x192xf32> to vector<2x32xf32>
    %623 = vector.extract_strided_slice %601 {offsets = [0, 64], sizes = [2, 32], strides = [1, 1]} : vector<2x96xf32> to vector<2x32xf32>
    %624 = arith.mulf %611, %623 : vector<2x32xf32>
    %625 = arith.addf %622, %624 : vector<2x32xf32>
    %626 = math.tanh %625 : vector<2x32xf32>
    %cst_192 = arith.constant 1.000000e+00 : f32
    %627 = vector.broadcast %cst_192 : f32 to vector<2x32xf32>
    %628 = arith.subf %627, %621 : vector<2x32xf32>
    %629 = arith.mulf %628, %626 : vector<2x32xf32>
    %630 = arith.mulf %621, %598 : vector<2x32xf32>
    %631 = arith.addf %629, %630 : vector<2x32xf32>
    %cst_193 = arith.constant dense<0.000000e+00> : vector<2x96xf32>
    %632 = tpu.matmul %631, %595, %cst_193 {dimension_numbers = #tpu.dot_dimension_numbers<[1], [0], [0], [1], [0, 0, 1, 1], [], []>} : vector<2x32xf32>, vector<32x96xf32>, vector<2x96xf32> -> vector<2x96xf32>
    %633 = vector.broadcast %597 : vector<1x96xf32> to vector<2x96xf32>
    %634 = arith.addf %632, %633 : vector<2x96xf32>
    %635 = vector.extract_strided_slice %591 {offsets = [0, 0], sizes = [2, 32], strides = [1, 1]} : vector<2x192xf32> to vector<2x32xf32>
    %636 = vector.extract_strided_slice %634 {offsets = [0, 0], sizes = [2, 32], strides = [1, 1]} : vector<2x96xf32> to vector<2x32xf32>
    %637 = arith.addf %635, %636 : vector<2x32xf32>
    %cst_194 = arith.constant 5.000000e-01 : f32
    %638 = vector.broadcast %cst_194 : f32 to vector<2x32xf32>
    %639 = arith.mulf %638, %637 : vector<2x32xf32>
    %640 = math.tanh %639 : vector<2x32xf32>
    %cst_195 = arith.constant 1.000000e+00 : f32
    %641 = vector.broadcast %cst_195 : f32 to vector<2x32xf32>
    %642 = arith.addf %640, %641 : vector<2x32xf32>
    %cst_196 = arith.constant 5.000000e-01 : f32
    %643 = vector.broadcast %cst_196 : f32 to vector<2x32xf32>
    %644 = arith.mulf %643, %642 : vector<2x32xf32>
    %645 = vector.extract_strided_slice %591 {offsets = [0, 32], sizes = [2, 32], strides = [1, 1]} : vector<2x192xf32> to vector<2x32xf32>
    %646 = vector.extract_strided_slice %634 {offsets = [0, 32], sizes = [2, 32], strides = [1, 1]} : vector<2x96xf32> to vector<2x32xf32>
    %647 = arith.addf %645, %646 : vector<2x32xf32>
    %cst_197 = arith.constant 5.000000e-01 : f32
    %648 = vector.broadcast %cst_197 : f32 to vector<2x32xf32>
    %649 = arith.mulf %648, %647 : vector<2x32xf32>
    %650 = math.tanh %649 : vector<2x32xf32>
    %cst_198 = arith.constant 1.000000e+00 : f32
    %651 = vector.broadcast %cst_198 : f32 to vector<2x32xf32>
    %652 = arith.addf %650, %651 : vector<2x32xf32>
    %cst_199 = arith.constant 5.000000e-01 : f32
    %653 = vector.broadcast %cst_199 : f32 to vector<2x32xf32>
    %654 = arith.mulf %653, %652 : vector<2x32xf32>
    %655 = vector.extract_strided_slice %591 {offsets = [0, 64], sizes = [2, 32], strides = [1, 1]} : vector<2x192xf32> to vector<2x32xf32>
    %656 = vector.extract_strided_slice %634 {offsets = [0, 64], sizes = [2, 32], strides = [1, 1]} : vector<2x96xf32> to vector<2x32xf32>
    %657 = arith.mulf %644, %656 : vector<2x32xf32>
    %658 = arith.addf %655, %657 : vector<2x32xf32>
    %659 = math.tanh %658 : vector<2x32xf32>
    %cst_200 = arith.constant 1.000000e+00 : f32
    %660 = vector.broadcast %cst_200 : f32 to vector<2x32xf32>
    %661 = arith.subf %660, %654 : vector<2x32xf32>
    %662 = arith.mulf %661, %659 : vector<2x32xf32>
    %663 = arith.mulf %654, %631 : vector<2x32xf32>
    %664 = arith.addf %662, %663 : vector<2x32xf32>
    %cst_201 = arith.constant dense<0.000000e+00> : vector<2x96xf32>
    %665 = tpu.matmul %664, %595, %cst_201 {dimension_numbers = #tpu.dot_dimension_numbers<[1], [0], [0], [1], [0, 0, 1, 1], [], []>} : vector<2x32xf32>, vector<32x96xf32>, vector<2x96xf32> -> vector<2x96xf32>
    %666 = vector.broadcast %597 : vector<1x96xf32> to vector<2x96xf32>
    %667 = arith.addf %665, %666 : vector<2x96xf32>
    %668 = vector.extract_strided_slice %592 {offsets = [0, 0], sizes = [2, 32], strides = [1, 1]} : vector<2x192xf32> to vector<2x32xf32>
    %669 = vector.extract_strided_slice %667 {offsets = [0, 0], sizes = [2, 32], strides = [1, 1]} : vector<2x96xf32> to vector<2x32xf32>
    %670 = arith.addf %668, %669 : vector<2x32xf32>
    %cst_202 = arith.constant 5.000000e-01 : f32
    %671 = vector.broadcast %cst_202 : f32 to vector<2x32xf32>
    %672 = arith.mulf %671, %670 : vector<2x32xf32>
    %673 = math.tanh %672 : vector<2x32xf32>
    %cst_203 = arith.constant 1.000000e+00 : f32
    %674 = vector.broadcast %cst_203 : f32 to vector<2x32xf32>
    %675 = arith.addf %673, %674 : vector<2x32xf32>
    %cst_204 = arith.constant 5.000000e-01 : f32
    %676 = vector.broadcast %cst_204 : f32 to vector<2x32xf32>
    %677 = arith.mulf %676, %675 : vector<2x32xf32>
    %678 = vector.extract_strided_slice %592 {offsets = [0, 32], sizes = [2, 32], strides = [1, 1]} : vector<2x192xf32> to vector<2x32xf32>
    %679 = vector.extract_strided_slice %667 {offsets = [0, 32], sizes = [2, 32], strides = [1, 1]} : vector<2x96xf32> to vector<2x32xf32>
    %680 = arith.addf %678, %679 : vector<2x32xf32>
    %cst_205 = arith.constant 5.000000e-01 : f32
    %681 = vector.broadcast %cst_205 : f32 to vector<2x32xf32>
    %682 = arith.mulf %681, %680 : vector<2x32xf32>
    %683 = math.tanh %682 : vector<2x32xf32>
    %cst_206 = arith.constant 1.000000e+00 : f32
    %684 = vector.broadcast %cst_206 : f32 to vector<2x32xf32>
    %685 = arith.addf %683, %684 : vector<2x32xf32>
    %cst_207 = arith.constant 5.000000e-01 : f32
    %686 = vector.broadcast %cst_207 : f32 to vector<2x32xf32>
    %687 = arith.mulf %686, %685 : vector<2x32xf32>
    %688 = vector.extract_strided_slice %592 {offsets = [0, 64], sizes = [2, 32], strides = [1, 1]} : vector<2x192xf32> to vector<2x32xf32>
    %689 = vector.extract_strided_slice %667 {offsets = [0, 64], sizes = [2, 32], strides = [1, 1]} : vector<2x96xf32> to vector<2x32xf32>
    %690 = arith.mulf %677, %689 : vector<2x32xf32>
    %691 = arith.addf %688, %690 : vector<2x32xf32>
    %692 = math.tanh %691 : vector<2x32xf32>
    %cst_208 = arith.constant 1.000000e+00 : f32
    %693 = vector.broadcast %cst_208 : f32 to vector<2x32xf32>
    %694 = arith.subf %693, %687 : vector<2x32xf32>
    %695 = arith.mulf %694, %692 : vector<2x32xf32>
    %696 = arith.mulf %687, %664 : vector<2x32xf32>
    %697 = arith.addf %695, %696 : vector<2x32xf32>
    %cst_209 = arith.constant dense<0.000000e+00> : vector<2x96xf32>
    %698 = tpu.matmul %697, %595, %cst_209 {dimension_numbers = #tpu.dot_dimension_numbers<[1], [0], [0], [1], [0, 0, 1, 1], [], []>} : vector<2x32xf32>, vector<32x96xf32>, vector<2x96xf32> -> vector<2x96xf32>
    %699 = vector.broadcast %597 : vector<1x96xf32> to vector<2x96xf32>
    %700 = arith.addf %698, %699 : vector<2x96xf32>
    %701 = vector.extract_strided_slice %593 {offsets = [0, 0], sizes = [2, 32], strides = [1, 1]} : vector<2x192xf32> to vector<2x32xf32>
    %702 = vector.extract_strided_slice %700 {offsets = [0, 0], sizes = [2, 32], strides = [1, 1]} : vector<2x96xf32> to vector<2x32xf32>
    %703 = arith.addf %701, %702 : vector<2x32xf32>
    %cst_210 = arith.constant 5.000000e-01 : f32
    %704 = vector.broadcast %cst_210 : f32 to vector<2x32xf32>
    %705 = arith.mulf %704, %703 : vector<2x32xf32>
    %706 = math.tanh %705 : vector<2x32xf32>
    %cst_211 = arith.constant 1.000000e+00 : f32
    %707 = vector.broadcast %cst_211 : f32 to vector<2x32xf32>
    %708 = arith.addf %706, %707 : vector<2x32xf32>
    %cst_212 = arith.constant 5.000000e-01 : f32
    %709 = vector.broadcast %cst_212 : f32 to vector<2x32xf32>
    %710 = arith.mulf %709, %708 : vector<2x32xf32>
    %711 = vector.extract_strided_slice %593 {offsets = [0, 32], sizes = [2, 32], strides = [1, 1]} : vector<2x192xf32> to vector<2x32xf32>
    %712 = vector.extract_strided_slice %700 {offsets = [0, 32], sizes = [2, 32], strides = [1, 1]} : vector<2x96xf32> to vector<2x32xf32>
    %713 = arith.addf %711, %712 : vector<2x32xf32>
    %cst_213 = arith.constant 5.000000e-01 : f32
    %714 = vector.broadcast %cst_213 : f32 to vector<2x32xf32>
    %715 = arith.mulf %714, %713 : vector<2x32xf32>
    %716 = math.tanh %715 : vector<2x32xf32>
    %cst_214 = arith.constant 1.000000e+00 : f32
    %717 = vector.broadcast %cst_214 : f32 to vector<2x32xf32>
    %718 = arith.addf %716, %717 : vector<2x32xf32>
    %cst_215 = arith.constant 5.000000e-01 : f32
    %719 = vector.broadcast %cst_215 : f32 to vector<2x32xf32>
    %720 = arith.mulf %719, %718 : vector<2x32xf32>
    %721 = vector.extract_strided_slice %593 {offsets = [0, 64], sizes = [2, 32], strides = [1, 1]} : vector<2x192xf32> to vector<2x32xf32>
    %722 = vector.extract_strided_slice %700 {offsets = [0, 64], sizes = [2, 32], strides = [1, 1]} : vector<2x96xf32> to vector<2x32xf32>
    %723 = arith.mulf %710, %722 : vector<2x32xf32>
    %724 = arith.addf %721, %723 : vector<2x32xf32>
    %725 = math.tanh %724 : vector<2x32xf32>
    %cst_216 = arith.constant 1.000000e+00 : f32
    %726 = vector.broadcast %cst_216 : f32 to vector<2x32xf32>
    %727 = arith.subf %726, %720 : vector<2x32xf32>
    %728 = arith.mulf %727, %725 : vector<2x32xf32>
    %729 = arith.mulf %720, %697 : vector<2x32xf32>
    %730 = arith.addf %728, %729 : vector<2x32xf32>
    %c1_217 = arith.constant 1 : index
    %c0_218 = arith.constant 0 : index
    %c0_219 = arith.constant 0 : index
    %731 = vector.load %arg10[%c1_217, %c0_218, %c0_219] : memref<2x32x96xf32, #tpu.memory_space<vmem>>, vector<1x32x96xf32>
    %732 = vector.shape_cast %731 : vector<1x32x96xf32> to vector<32x96xf32>
    %c1_220 = arith.constant 1 : index
    %c0_221 = arith.constant 0 : index
    %c0_222 = arith.constant 0 : index
    %733 = vector.load %arg12[%c1_220, %c0_221, %c0_222] : memref<2x1x96xf32, #tpu.memory_space<vmem>>, vector<1x1x96xf32>
    %734 = vector.shape_cast %733 : vector<1x1x96xf32> to vector<1x96xf32>
    %cst_223 = arith.constant 0.000000e+00 : f32
    %735 = vector.broadcast %cst_223 : f32 to vector<2x32xf32>
    %cst_224 = arith.constant dense<0.000000e+00> : vector<2x96xf32>
    %736 = tpu.matmul %735, %732, %cst_224 {dimension_numbers = #tpu.dot_dimension_numbers<[1], [0], [0], [1], [0, 0, 1, 1], [], []>} : vector<2x32xf32>, vector<32x96xf32>, vector<2x96xf32> -> vector<2x96xf32>
    %737 = vector.broadcast %734 : vector<1x96xf32> to vector<2x96xf32>
    %738 = arith.addf %736, %737 : vector<2x96xf32>
    %739 = vector.extract_strided_slice %593 {offsets = [0, 96], sizes = [2, 32], strides = [1, 1]} : vector<2x192xf32> to vector<2x32xf32>
    %740 = vector.extract_strided_slice %738 {offsets = [0, 0], sizes = [2, 32], strides = [1, 1]} : vector<2x96xf32> to vector<2x32xf32>
    %741 = arith.addf %739, %740 : vector<2x32xf32>
    %cst_225 = arith.constant 5.000000e-01 : f32
    %742 = vector.broadcast %cst_225 : f32 to vector<2x32xf32>
    %743 = arith.mulf %742, %741 : vector<2x32xf32>
    %744 = math.tanh %743 : vector<2x32xf32>
    %cst_226 = arith.constant 1.000000e+00 : f32
    %745 = vector.broadcast %cst_226 : f32 to vector<2x32xf32>
    %746 = arith.addf %744, %745 : vector<2x32xf32>
    %cst_227 = arith.constant 5.000000e-01 : f32
    %747 = vector.broadcast %cst_227 : f32 to vector<2x32xf32>
    %748 = arith.mulf %747, %746 : vector<2x32xf32>
    %749 = vector.extract_strided_slice %593 {offsets = [0, 128], sizes = [2, 32], strides = [1, 1]} : vector<2x192xf32> to vector<2x32xf32>
    %750 = vector.extract_strided_slice %738 {offsets = [0, 32], sizes = [2, 32], strides = [1, 1]} : vector<2x96xf32> to vector<2x32xf32>
    %751 = arith.addf %749, %750 : vector<2x32xf32>
    %cst_228 = arith.constant 5.000000e-01 : f32
    %752 = vector.broadcast %cst_228 : f32 to vector<2x32xf32>
    %753 = arith.mulf %752, %751 : vector<2x32xf32>
    %754 = math.tanh %753 : vector<2x32xf32>
    %cst_229 = arith.constant 1.000000e+00 : f32
    %755 = vector.broadcast %cst_229 : f32 to vector<2x32xf32>
    %756 = arith.addf %754, %755 : vector<2x32xf32>
    %cst_230 = arith.constant 5.000000e-01 : f32
    %757 = vector.broadcast %cst_230 : f32 to vector<2x32xf32>
    %758 = arith.mulf %757, %756 : vector<2x32xf32>
    %759 = vector.extract_strided_slice %593 {offsets = [0, 160], sizes = [2, 32], strides = [1, 1]} : vector<2x192xf32> to vector<2x32xf32>
    %760 = vector.extract_strided_slice %738 {offsets = [0, 64], sizes = [2, 32], strides = [1, 1]} : vector<2x96xf32> to vector<2x32xf32>
    %761 = arith.mulf %748, %760 : vector<2x32xf32>
    %762 = arith.addf %759, %761 : vector<2x32xf32>
    %763 = math.tanh %762 : vector<2x32xf32>
    %cst_231 = arith.constant 1.000000e+00 : f32
    %764 = vector.broadcast %cst_231 : f32 to vector<2x32xf32>
    %765 = arith.subf %764, %758 : vector<2x32xf32>
    %766 = arith.mulf %765, %763 : vector<2x32xf32>
    %767 = arith.mulf %758, %735 : vector<2x32xf32>
    %768 = arith.addf %766, %767 : vector<2x32xf32>
    %cst_232 = arith.constant dense<0.000000e+00> : vector<2x96xf32>
    %769 = tpu.matmul %768, %732, %cst_232 {dimension_numbers = #tpu.dot_dimension_numbers<[1], [0], [0], [1], [0, 0, 1, 1], [], []>} : vector<2x32xf32>, vector<32x96xf32>, vector<2x96xf32> -> vector<2x96xf32>
    %770 = vector.broadcast %734 : vector<1x96xf32> to vector<2x96xf32>
    %771 = arith.addf %769, %770 : vector<2x96xf32>
    %772 = vector.extract_strided_slice %592 {offsets = [0, 96], sizes = [2, 32], strides = [1, 1]} : vector<2x192xf32> to vector<2x32xf32>
    %773 = vector.extract_strided_slice %771 {offsets = [0, 0], sizes = [2, 32], strides = [1, 1]} : vector<2x96xf32> to vector<2x32xf32>
    %774 = arith.addf %772, %773 : vector<2x32xf32>
    %cst_233 = arith.constant 5.000000e-01 : f32
    %775 = vector.broadcast %cst_233 : f32 to vector<2x32xf32>
    %776 = arith.mulf %775, %774 : vector<2x32xf32>
    %777 = math.tanh %776 : vector<2x32xf32>
    %cst_234 = arith.constant 1.000000e+00 : f32
    %778 = vector.broadcast %cst_234 : f32 to vector<2x32xf32>
    %779 = arith.addf %777, %778 : vector<2x32xf32>
    %cst_235 = arith.constant 5.000000e-01 : f32
    %780 = vector.broadcast %cst_235 : f32 to vector<2x32xf32>
    %781 = arith.mulf %780, %779 : vector<2x32xf32>
    %782 = vector.extract_strided_slice %592 {offsets = [0, 128], sizes = [2, 32], strides = [1, 1]} : vector<2x192xf32> to vector<2x32xf32>
    %783 = vector.extract_strided_slice %771 {offsets = [0, 32], sizes = [2, 32], strides = [1, 1]} : vector<2x96xf32> to vector<2x32xf32>
    %784 = arith.addf %782, %783 : vector<2x32xf32>
    %cst_236 = arith.constant 5.000000e-01 : f32
    %785 = vector.broadcast %cst_236 : f32 to vector<2x32xf32>
    %786 = arith.mulf %785, %784 : vector<2x32xf32>
    %787 = math.tanh %786 : vector<2x32xf32>
    %cst_237 = arith.constant 1.000000e+00 : f32
    %788 = vector.broadcast %cst_237 : f32 to vector<2x32xf32>
    %789 = arith.addf %787, %788 : vector<2x32xf32>
    %cst_238 = arith.constant 5.000000e-01 : f32
    %790 = vector.broadcast %cst_238 : f32 to vector<2x32xf32>
    %791 = arith.mulf %790, %789 : vector<2x32xf32>
    %792 = vector.extract_strided_slice %592 {offsets = [0, 160], sizes = [2, 32], strides = [1, 1]} : vector<2x192xf32> to vector<2x32xf32>
    %793 = vector.extract_strided_slice %771 {offsets = [0, 64], sizes = [2, 32], strides = [1, 1]} : vector<2x96xf32> to vector<2x32xf32>
    %794 = arith.mulf %781, %793 : vector<2x32xf32>
    %795 = arith.addf %792, %794 : vector<2x32xf32>
    %796 = math.tanh %795 : vector<2x32xf32>
    %cst_239 = arith.constant 1.000000e+00 : f32
    %797 = vector.broadcast %cst_239 : f32 to vector<2x32xf32>
    %798 = arith.subf %797, %791 : vector<2x32xf32>
    %799 = arith.mulf %798, %796 : vector<2x32xf32>
    %800 = arith.mulf %791, %768 : vector<2x32xf32>
    %801 = arith.addf %799, %800 : vector<2x32xf32>
    %cst_240 = arith.constant dense<0.000000e+00> : vector<2x96xf32>
    %802 = tpu.matmul %801, %732, %cst_240 {dimension_numbers = #tpu.dot_dimension_numbers<[1], [0], [0], [1], [0, 0, 1, 1], [], []>} : vector<2x32xf32>, vector<32x96xf32>, vector<2x96xf32> -> vector<2x96xf32>
    %803 = vector.broadcast %734 : vector<1x96xf32> to vector<2x96xf32>
    %804 = arith.addf %802, %803 : vector<2x96xf32>
    %805 = vector.extract_strided_slice %591 {offsets = [0, 96], sizes = [2, 32], strides = [1, 1]} : vector<2x192xf32> to vector<2x32xf32>
    %806 = vector.extract_strided_slice %804 {offsets = [0, 0], sizes = [2, 32], strides = [1, 1]} : vector<2x96xf32> to vector<2x32xf32>
    %807 = arith.addf %805, %806 : vector<2x32xf32>
    %cst_241 = arith.constant 5.000000e-01 : f32
    %808 = vector.broadcast %cst_241 : f32 to vector<2x32xf32>
    %809 = arith.mulf %808, %807 : vector<2x32xf32>
    %810 = math.tanh %809 : vector<2x32xf32>
    %cst_242 = arith.constant 1.000000e+00 : f32
    %811 = vector.broadcast %cst_242 : f32 to vector<2x32xf32>
    %812 = arith.addf %810, %811 : vector<2x32xf32>
    %cst_243 = arith.constant 5.000000e-01 : f32
    %813 = vector.broadcast %cst_243 : f32 to vector<2x32xf32>
    %814 = arith.mulf %813, %812 : vector<2x32xf32>
    %815 = vector.extract_strided_slice %591 {offsets = [0, 128], sizes = [2, 32], strides = [1, 1]} : vector<2x192xf32> to vector<2x32xf32>
    %816 = vector.extract_strided_slice %804 {offsets = [0, 32], sizes = [2, 32], strides = [1, 1]} : vector<2x96xf32> to vector<2x32xf32>
    %817 = arith.addf %815, %816 : vector<2x32xf32>
    %cst_244 = arith.constant 5.000000e-01 : f32
    %818 = vector.broadcast %cst_244 : f32 to vector<2x32xf32>
    %819 = arith.mulf %818, %817 : vector<2x32xf32>
    %820 = math.tanh %819 : vector<2x32xf32>
    %cst_245 = arith.constant 1.000000e+00 : f32
    %821 = vector.broadcast %cst_245 : f32 to vector<2x32xf32>
    %822 = arith.addf %820, %821 : vector<2x32xf32>
    %cst_246 = arith.constant 5.000000e-01 : f32
    %823 = vector.broadcast %cst_246 : f32 to vector<2x32xf32>
    %824 = arith.mulf %823, %822 : vector<2x32xf32>
    %825 = vector.extract_strided_slice %591 {offsets = [0, 160], sizes = [2, 32], strides = [1, 1]} : vector<2x192xf32> to vector<2x32xf32>
    %826 = vector.extract_strided_slice %804 {offsets = [0, 64], sizes = [2, 32], strides = [1, 1]} : vector<2x96xf32> to vector<2x32xf32>
    %827 = arith.mulf %814, %826 : vector<2x32xf32>
    %828 = arith.addf %825, %827 : vector<2x32xf32>
    %829 = math.tanh %828 : vector<2x32xf32>
    %cst_247 = arith.constant 1.000000e+00 : f32
    %830 = vector.broadcast %cst_247 : f32 to vector<2x32xf32>
    %831 = arith.subf %830, %824 : vector<2x32xf32>
    %832 = arith.mulf %831, %829 : vector<2x32xf32>
    %833 = arith.mulf %824, %801 : vector<2x32xf32>
    %834 = arith.addf %832, %833 : vector<2x32xf32>
    %cst_248 = arith.constant dense<0.000000e+00> : vector<2x96xf32>
    %835 = tpu.matmul %834, %732, %cst_248 {dimension_numbers = #tpu.dot_dimension_numbers<[1], [0], [0], [1], [0, 0, 1, 1], [], []>} : vector<2x32xf32>, vector<32x96xf32>, vector<2x96xf32> -> vector<2x96xf32>
    %836 = vector.broadcast %734 : vector<1x96xf32> to vector<2x96xf32>
    %837 = arith.addf %835, %836 : vector<2x96xf32>
    %838 = vector.extract_strided_slice %590 {offsets = [0, 96], sizes = [2, 32], strides = [1, 1]} : vector<2x192xf32> to vector<2x32xf32>
    %839 = vector.extract_strided_slice %837 {offsets = [0, 0], sizes = [2, 32], strides = [1, 1]} : vector<2x96xf32> to vector<2x32xf32>
    %840 = arith.addf %838, %839 : vector<2x32xf32>
    %cst_249 = arith.constant 5.000000e-01 : f32
    %841 = vector.broadcast %cst_249 : f32 to vector<2x32xf32>
    %842 = arith.mulf %841, %840 : vector<2x32xf32>
    %843 = math.tanh %842 : vector<2x32xf32>
    %cst_250 = arith.constant 1.000000e+00 : f32
    %844 = vector.broadcast %cst_250 : f32 to vector<2x32xf32>
    %845 = arith.addf %843, %844 : vector<2x32xf32>
    %cst_251 = arith.constant 5.000000e-01 : f32
    %846 = vector.broadcast %cst_251 : f32 to vector<2x32xf32>
    %847 = arith.mulf %846, %845 : vector<2x32xf32>
    %848 = vector.extract_strided_slice %590 {offsets = [0, 128], sizes = [2, 32], strides = [1, 1]} : vector<2x192xf32> to vector<2x32xf32>
    %849 = vector.extract_strided_slice %837 {offsets = [0, 32], sizes = [2, 32], strides = [1, 1]} : vector<2x96xf32> to vector<2x32xf32>
    %850 = arith.addf %848, %849 : vector<2x32xf32>
    %cst_252 = arith.constant 5.000000e-01 : f32
    %851 = vector.broadcast %cst_252 : f32 to vector<2x32xf32>
    %852 = arith.mulf %851, %850 : vector<2x32xf32>
    %853 = math.tanh %852 : vector<2x32xf32>
    %cst_253 = arith.constant 1.000000e+00 : f32
    %854 = vector.broadcast %cst_253 : f32 to vector<2x32xf32>
    %855 = arith.addf %853, %854 : vector<2x32xf32>
    %cst_254 = arith.constant 5.000000e-01 : f32
    %856 = vector.broadcast %cst_254 : f32 to vector<2x32xf32>
    %857 = arith.mulf %856, %855 : vector<2x32xf32>
    %858 = vector.extract_strided_slice %590 {offsets = [0, 160], sizes = [2, 32], strides = [1, 1]} : vector<2x192xf32> to vector<2x32xf32>
    %859 = vector.extract_strided_slice %837 {offsets = [0, 64], sizes = [2, 32], strides = [1, 1]} : vector<2x96xf32> to vector<2x32xf32>
    %860 = arith.mulf %847, %859 : vector<2x32xf32>
    %861 = arith.addf %858, %860 : vector<2x32xf32>
    %862 = math.tanh %861 : vector<2x32xf32>
    %cst_255 = arith.constant 1.000000e+00 : f32
    %863 = vector.broadcast %cst_255 : f32 to vector<2x32xf32>
    %864 = arith.subf %863, %857 : vector<2x32xf32>
    %865 = arith.mulf %864, %862 : vector<2x32xf32>
    %866 = arith.mulf %857, %834 : vector<2x32xf32>
    %867 = arith.addf %865, %866 : vector<2x32xf32>
    %868 = tpu.concatenate %631, %867 in 1 : vector<2x32xf32>, vector<2x32xf32> -> vector<2x64xf32>
    %869 = tpu.concatenate %664, %834 in 1 : vector<2x32xf32>, vector<2x32xf32> -> vector<2x64xf32>
    %870 = tpu.concatenate %697, %801 in 1 : vector<2x32xf32>, vector<2x32xf32> -> vector<2x64xf32>
    %871 = tpu.concatenate %730, %768 in 1 : vector<2x32xf32>, vector<2x32xf32> -> vector<2x64xf32>
    %872 = vector.extract_strided_slice %868 {offsets = [0, 0], sizes = [1, 64], strides = [1, 1]} : vector<2x64xf32> to vector<1x64xf32>
    %873 = vector.extract_strided_slice %869 {offsets = [0, 0], sizes = [1, 64], strides = [1, 1]} : vector<2x64xf32> to vector<1x64xf32>
    %874 = vector.extract_strided_slice %870 {offsets = [0, 0], sizes = [1, 64], strides = [1, 1]} : vector<2x64xf32> to vector<1x64xf32>
    %875 = vector.extract_strided_slice %871 {offsets = [0, 0], sizes = [1, 64], strides = [1, 1]} : vector<2x64xf32> to vector<1x64xf32>
    %876 = vector.extract_strided_slice %868 {offsets = [1, 0], sizes = [1, 64], strides = [1, 1]} : vector<2x64xf32> to vector<1x64xf32>
    %877 = vector.extract_strided_slice %869 {offsets = [1, 0], sizes = [1, 64], strides = [1, 1]} : vector<2x64xf32> to vector<1x64xf32>
    %878 = vector.extract_strided_slice %870 {offsets = [1, 0], sizes = [1, 64], strides = [1, 1]} : vector<2x64xf32> to vector<1x64xf32>
    %879 = vector.extract_strided_slice %871 {offsets = [1, 0], sizes = [1, 64], strides = [1, 1]} : vector<2x64xf32> to vector<1x64xf32>
    %880 = tpu.concatenate %872, %873, %874, %875, %876, %877, %878, %879 in 0 : vector<1x64xf32>, vector<1x64xf32>, vector<1x64xf32>, vector<1x64xf32>, vector<1x64xf32>, vector<1x64xf32>, vector<1x64xf32>, vector<1x64xf32> -> vector<8x64xf32>
    %c0_256 = arith.constant 0 : index
    %c0_257 = arith.constant 0 : index
    %c0_258 = arith.constant 0 : index
    %881 = vector.load %arg13[%c0_256, %c0_257, %c0_258] : memref<3x64x64xf32, #tpu.memory_space<vmem>>, vector<1x64x64xf32>
    %882 = vector.shape_cast %881 : vector<1x64x64xf32> to vector<64x64xf32>
    %cst_259 = arith.constant dense<0.000000e+00> : vector<8x64xf32>
    %883 = tpu.matmul %880, %882, %cst_259 {dimension_numbers = #tpu.dot_dimension_numbers<[1], [0], [0], [1], [0, 0, 1, 1], [], []>} : vector<8x64xf32>, vector<64x64xf32>, vector<8x64xf32> -> vector<8x64xf32>
    %c0_260 = arith.constant 0 : index
    %c0_261 = arith.constant 0 : index
    %c0_262 = arith.constant 0 : index
    %884 = vector.load %arg14[%c0_260, %c0_261, %c0_262] : memref<3x1x64xf32, #tpu.memory_space<vmem>>, vector<1x1x64xf32>
    %885 = vector.shape_cast %884 : vector<1x1x64xf32> to vector<1x64xf32>
    %886 = vector.broadcast %885 : vector<1x64xf32> to vector<8x64xf32>
    %887 = arith.addf %883, %886 : vector<8x64xf32>
    %cst_263 = arith.constant 0.000000e+00 : f32
    %888 = vector.broadcast %cst_263 : f32 to vector<8x64xf32>
    %889 = arith.maximumf %887, %888 : vector<8x64xf32>
    %c1_264 = arith.constant 1 : index
    %c0_265 = arith.constant 0 : index
    %c0_266 = arith.constant 0 : index
    %890 = vector.load %arg13[%c1_264, %c0_265, %c0_266] : memref<3x64x64xf32, #tpu.memory_space<vmem>>, vector<1x64x64xf32>
    %891 = vector.shape_cast %890 : vector<1x64x64xf32> to vector<64x64xf32>
    %cst_267 = arith.constant dense<0.000000e+00> : vector<8x64xf32>
    %892 = tpu.matmul %889, %891, %cst_267 {dimension_numbers = #tpu.dot_dimension_numbers<[1], [0], [0], [1], [0, 0, 1, 1], [], []>} : vector<8x64xf32>, vector<64x64xf32>, vector<8x64xf32> -> vector<8x64xf32>
    %c1_268 = arith.constant 1 : index
    %c0_269 = arith.constant 0 : index
    %c0_270 = arith.constant 0 : index
    %893 = vector.load %arg14[%c1_268, %c0_269, %c0_270] : memref<3x1x64xf32, #tpu.memory_space<vmem>>, vector<1x1x64xf32>
    %894 = vector.shape_cast %893 : vector<1x1x64xf32> to vector<1x64xf32>
    %895 = vector.broadcast %894 : vector<1x64xf32> to vector<8x64xf32>
    %896 = arith.addf %892, %895 : vector<8x64xf32>
    %cst_271 = arith.constant 0.000000e+00 : f32
    %897 = vector.broadcast %cst_271 : f32 to vector<8x64xf32>
    %898 = arith.maximumf %896, %897 : vector<8x64xf32>
    %c2_272 = arith.constant 2 : index
    %c0_273 = arith.constant 0 : index
    %c0_274 = arith.constant 0 : index
    %899 = vector.load %arg13[%c2_272, %c0_273, %c0_274] : memref<3x64x64xf32, #tpu.memory_space<vmem>>, vector<1x64x64xf32>
    %900 = vector.shape_cast %899 : vector<1x64x64xf32> to vector<64x64xf32>
    %cst_275 = arith.constant dense<0.000000e+00> : vector<8x64xf32>
    %901 = tpu.matmul %898, %900, %cst_275 {dimension_numbers = #tpu.dot_dimension_numbers<[1], [0], [0], [1], [0, 0, 1, 1], [], []>} : vector<8x64xf32>, vector<64x64xf32>, vector<8x64xf32> -> vector<8x64xf32>
    %c2_276 = arith.constant 2 : index
    %c0_277 = arith.constant 0 : index
    %c0_278 = arith.constant 0 : index
    %902 = vector.load %arg14[%c2_276, %c0_277, %c0_278] : memref<3x1x64xf32, #tpu.memory_space<vmem>>, vector<1x1x64xf32>
    %903 = vector.shape_cast %902 : vector<1x1x64xf32> to vector<1x64xf32>
    %904 = vector.broadcast %903 : vector<1x64xf32> to vector<8x64xf32>
    %905 = arith.addf %901, %904 : vector<8x64xf32>
    %cst_279 = arith.constant 0.000000e+00 : f32
    %906 = vector.broadcast %cst_279 : f32 to vector<8x64xf32>
    %907 = arith.maximumf %905, %906 : vector<8x64xf32>
    %c0_280 = arith.constant 0 : index
    %c0_281 = arith.constant 0 : index
    %908 = vector.load %arg15[%c0_280, %c0_281] : memref<64x42xf32, #tpu.memory_space<vmem>>, vector<64x42xf32>
    %cst_282 = arith.constant dense<0.000000e+00> : vector<8x42xf32>
    %909 = tpu.matmul %907, %908, %cst_282 {dimension_numbers = #tpu.dot_dimension_numbers<[1], [0], [0], [1], [0, 0, 1, 1], [], []>} : vector<8x64xf32>, vector<64x42xf32>, vector<8x42xf32> -> vector<8x42xf32>
    %c0_283 = arith.constant 0 : index
    %c0_284 = arith.constant 0 : index
    %910 = vector.load %arg16[%c0_283, %c0_284] : memref<1x42xf32, #tpu.memory_space<vmem>>, vector<1x42xf32>
    %911 = vector.broadcast %910 : vector<1x42xf32> to vector<8x42xf32>
    %912 = arith.addf %909, %911 : vector<8x42xf32>
    %cst_285 = arith.constant 5.000000e-01 : f32
    %913 = vector.broadcast %cst_285 : f32 to vector<8x42xf32>
    %914 = arith.mulf %913, %912 : vector<8x42xf32>
    %915 = math.tanh %914 : vector<8x42xf32>
    %cst_286 = arith.constant 1.000000e+00 : f32
    %916 = vector.broadcast %cst_286 : f32 to vector<8x42xf32>
    %917 = arith.addf %915, %916 : vector<8x42xf32>
    %cst_287 = arith.constant 5.000000e-01 : f32
    %918 = vector.broadcast %cst_287 : f32 to vector<8x42xf32>
    %919 = arith.mulf %918, %917 : vector<8x42xf32>
    %c0_288 = arith.constant 0 : index
    %c0_289 = arith.constant 0 : index
    %920 = vector.load %arg21[%c0_288, %c0_289] : memref<8x42xf32, #tpu.memory_space<vmem>>, vector<8x42xf32>
    tpu.vector_store %arg21[%c0_288, %c0_289], %919 {strides = array<i32>} : memref<8x42xf32, #tpu.memory_space<vmem>>, vector<8x42xf32>,
    %c0_290 = arith.constant 0 : index
    %c0_291 = arith.constant 0 : index
    %c0_292 = arith.constant 0 : index
    %921 = vector.load %arg17[%c0_290, %c0_291, %c0_292] : memref<3x64x64xf32, #tpu.memory_space<vmem>>, vector<1x64x64xf32>
    %922 = vector.shape_cast %921 : vector<1x64x64xf32> to vector<64x64xf32>
    %cst_293 = arith.constant dense<0.000000e+00> : vector<8x64xf32>
    %923 = tpu.matmul %880, %922, %cst_293 {dimension_numbers = #tpu.dot_dimension_numbers<[1], [0], [0], [1], [0, 0, 1, 1], [], []>} : vector<8x64xf32>, vector<64x64xf32>, vector<8x64xf32> -> vector<8x64xf32>
    %c0_294 = arith.constant 0 : index
    %c0_295 = arith.constant 0 : index
    %c0_296 = arith.constant 0 : index
    %924 = vector.load %arg18[%c0_294, %c0_295, %c0_296] : memref<3x1x64xf32, #tpu.memory_space<vmem>>, vector<1x1x64xf32>
    %925 = vector.shape_cast %924 : vector<1x1x64xf32> to vector<1x64xf32>
    %926 = vector.broadcast %925 : vector<1x64xf32> to vector<8x64xf32>
    %927 = arith.addf %923, %926 : vector<8x64xf32>
    %cst_297 = arith.constant 0.000000e+00 : f32
    %928 = vector.broadcast %cst_297 : f32 to vector<8x64xf32>
    %929 = arith.maximumf %927, %928 : vector<8x64xf32>
    %c1_298 = arith.constant 1 : index
    %c0_299 = arith.constant 0 : index
    %c0_300 = arith.constant 0 : index
    %930 = vector.load %arg17[%c1_298, %c0_299, %c0_300] : memref<3x64x64xf32, #tpu.memory_space<vmem>>, vector<1x64x64xf32>
    %931 = vector.shape_cast %930 : vector<1x64x64xf32> to vector<64x64xf32>
    %cst_301 = arith.constant dense<0.000000e+00> : vector<8x64xf32>
    %932 = tpu.matmul %929, %931, %cst_301 {dimension_numbers = #tpu.dot_dimension_numbers<[1], [0], [0], [1], [0, 0, 1, 1], [], []>} : vector<8x64xf32>, vector<64x64xf32>, vector<8x64xf32> -> vector<8x64xf32>
    %c1_302 = arith.constant 1 : index
    %c0_303 = arith.constant 0 : index
    %c0_304 = arith.constant 0 : index
    %933 = vector.load %arg18[%c1_302, %c0_303, %c0_304] : memref<3x1x64xf32, #tpu.memory_space<vmem>>, vector<1x1x64xf32>
    %934 = vector.shape_cast %933 : vector<1x1x64xf32> to vector<1x64xf32>
    %935 = vector.broadcast %934 : vector<1x64xf32> to vector<8x64xf32>
    %936 = arith.addf %932, %935 : vector<8x64xf32>
    %cst_305 = arith.constant 0.000000e+00 : f32
    %937 = vector.broadcast %cst_305 : f32 to vector<8x64xf32>
    %938 = arith.maximumf %936, %937 : vector<8x64xf32>
    %c2_306 = arith.constant 2 : index
    %c0_307 = arith.constant 0 : index
    %c0_308 = arith.constant 0 : index
    %939 = vector.load %arg17[%c2_306, %c0_307, %c0_308] : memref<3x64x64xf32, #tpu.memory_space<vmem>>, vector<1x64x64xf32>
    %940 = vector.shape_cast %939 : vector<1x64x64xf32> to vector<64x64xf32>
    %cst_309 = arith.constant dense<0.000000e+00> : vector<8x64xf32>
    %941 = tpu.matmul %938, %940, %cst_309 {dimension_numbers = #tpu.dot_dimension_numbers<[1], [0], [0], [1], [0, 0, 1, 1], [], []>} : vector<8x64xf32>, vector<64x64xf32>, vector<8x64xf32> -> vector<8x64xf32>
    %c2_310 = arith.constant 2 : index
    %c0_311 = arith.constant 0 : index
    %c0_312 = arith.constant 0 : index
    %942 = vector.load %arg18[%c2_310, %c0_311, %c0_312] : memref<3x1x64xf32, #tpu.memory_space<vmem>>, vector<1x1x64xf32>
    %943 = vector.shape_cast %942 : vector<1x1x64xf32> to vector<1x64xf32>
    %944 = vector.broadcast %943 : vector<1x64xf32> to vector<8x64xf32>
    %945 = arith.addf %941, %944 : vector<8x64xf32>
    %cst_313 = arith.constant 0.000000e+00 : f32
    %946 = vector.broadcast %cst_313 : f32 to vector<8x64xf32>
    %947 = arith.maximumf %945, %946 : vector<8x64xf32>
    %c0_314 = arith.constant 0 : index
    %c0_315 = arith.constant 0 : index
    %948 = vector.load %arg19[%c0_314, %c0_315] : memref<64x126xf32, #tpu.memory_space<vmem>>, vector<64x126xf32>
    %cst_316 = arith.constant dense<0.000000e+00> : vector<8x126xf32>
    %949 = tpu.matmul %947, %948, %cst_316 {dimension_numbers = #tpu.dot_dimension_numbers<[1], [0], [0], [1], [0, 0, 1, 1], [], []>} : vector<8x64xf32>, vector<64x126xf32>, vector<8x126xf32> -> vector<8x126xf32>
    %c0_317 = arith.constant 0 : index
    %c0_318 = arith.constant 0 : index
    %950 = vector.load %arg20[%c0_317, %c0_318] : memref<1x126xf32, #tpu.memory_space<vmem>>, vector<1x126xf32>
    %951 = vector.broadcast %950 : vector<1x126xf32> to vector<8x126xf32>
    %952 = arith.addf %949, %951 : vector<8x126xf32>
    %953 = math.tanh %952 : vector<8x126xf32>
    %c0_319 = arith.constant 0 : index
    %c0_320 = arith.constant 0 : index
    %954 = vector.load %arg22[%c0_319, %c0_320] : memref<8x126xf32, #tpu.memory_space<vmem>>, vector<8x126xf32>
    tpu.vector_store %arg22[%c0_319, %c0_320], %953 {strides = array<i32>} : memref<8x126xf32, #tpu.memory_space<vmem>>, vector<8x126xf32>,
    return
  }
}

</mosaic_0001>

<bundles_post_ra>
// kernel: seldnet_forward.5
= control target key start
LH: loop header
LB: loop body
LE: loop exit
PB: predicated region body
PF: predicated region fallthrough
CT: control target
= control target key end

     0   :  { %vm158_vm0 = vcmask 1043456   ;;  %vm61_vm1 = vcmask 293888   ;;  %vm1489_vm2 = vcmask 64512   ;;  %s2859_s1 = inlined_call_operand.vmem [shape: f32[36,8], index: 1, kind: input, shape index: {}]   ;;  %s2860_s0 = inlined_call_operand.vmem [shape: f32[4,256,36], index: 0, kind: input, shape index: {}]   ;;  %s2861_s2 = inlined_call_operand.vmem [shape: f32[1,8], index: 2, kind: input, shape index: {}]   ;;  %s2862_s3 = inlined_call_operand.vmem [shape: f32[1,8], index: 3, kind: input, shape index: {}]   ;;  %s2863_s4 = inlined_call_operand.vmem [shape: f32[1,8], index: 4, kind: input, shape index: {}]   ;;  %s2864_s5 = inlined_call_operand.vmem [shape: f32[256,8], index: 5, kind: output, shape index: {}]  }
   0x1   :  { %v56_v0 = vld [vmem:[%s2859_s1 + $0x20] sm:$0xf]  ;;  %v55_v1 = vld [vmem:[%s2859_s1 + $0x18] sm:$0xff]  ;;  %v54_v2 = vld [vmem:[%s2859_s1 + $0x10] sm:$0xff] }
   0x2   :  { %1656 = vmatpush.msk.msra.mxu2 %vm158_vm0, %v56_v0  ;;  %1721 = vmatpush.msk.msra.mxu3 %vm158_vm0, %v56_v0  ;;  %v53_v3 = vld [vmem:[%s2859_s1 + $0x8] sm:$0xff]  ;;  %v52_v4 = vld [vmem:[%s2859_s1] sm:$0xff]  ;;  %v1626_v13 = vld [vmem:[%s2860_s0 + $0x210] sm:$0xff] }
   0x3   :  { %1526 = vmatpush.msk.msra.mxu0 %vm158_vm0, %v56_v0  ;;  %1591 = vmatpush.msk.msra.mxu1 %vm158_vm0, %v56_v0  ;;  %v1624_v5 = vld [vmem:[%s2860_s0 + $0x200] sm:$0xff]  ;;  %v1625_v9 = vld [vmem:[%s2860_s0 + $0x208] sm:$0xff]  ;;  %v1691_v14 = vld [vmem:[%s2860_s0 + $0x310] sm:$0xff] }
   0x4   :  { %890 = vmatpush.msra.mxu2 %v55_v1  ;;  %1260 = vmatpush.msra.mxu3 %v55_v1  ;;  %v1689_v6 = vld [vmem:[%s2860_s0 + $0x300] sm:$0xff]  ;;  %v1690_v10 = vld [vmem:[%s2860_s0 + $0x308] sm:$0xff]  ;;  %v22_v15 = vld [vmem:[%s2860_s0 + $0x10] sm:$0xff] }
   0x5   :  { %174 = vmatpush.msra.mxu0 %v55_v1  ;;  %520 = vmatpush.msra.mxu1 %v55_v1  ;;  %v20_v7 = vld [vmem:[%s2860_s0] sm:$0xff]  ;;  %v21_v11 = vld [vmem:[%s2860_s0 + $0x8] sm:$0xff]  ;;  %v1561_v16 = vld [vmem:[%s2860_s0 + $0x110] sm:$0xff] }
   0x6   :  { %891 = vmatpush.msra.mxu2 %v54_v2  ;;  %1261 = vmatpush.msra.mxu3 %v54_v2  ;;  %v1559_v8 = vld [vmem:[%s2860_s0 + $0x100] sm:$0xff]  ;;  %v1560_v12 = vld [vmem:[%s2860_s0 + $0x108] sm:$0xff]  ;;  %v1627_v17 = vld [vmem:[%s2860_s0 + $0x218] sm:$0xff] }
   0x7   :  { %175 = vmatpush.msra.mxu0 %v54_v2  ;;  %521 = vmatpush.msra.mxu1 %v54_v2  ;;  %v1692_v18 = vld [vmem:[%s2860_s0 + $0x318] sm:$0xff]  ;;  %v1628_v21 = vld [vmem:[%s2860_s0 + $0x220] sm:$0xff]  ;;  %v1629_v25 = vld [vmem:[%s2860_s0 + $0x228] sm:$0xff] }
   0x8   :  { %892 = vmatpush.msra.mxu2 %v53_v3  ;;  %1262 = vmatpush.msra.mxu3 %v53_v3  ;;  %v23_v19 = vld [vmem:[%s2860_s0 + $0x18] sm:$0xff]  ;;  %v1693_v22 = vld [vmem:[%s2860_s0 + $0x320] sm:$0xff]  ;;  %v1694_v26 = vld [vmem:[%s2860_s0 + $0x328] sm:$0xff] }
   0x9   :  { %176 = vmatpush.msra.mxu0 %v53_v3  ;;  %522 = vmatpush.msra.mxu1 %v53_v3  ;;  %v1562_v20 = vld [vmem:[%s2860_s0 + $0x118] sm:$0xff]  ;;  %v24_v23 = vld [vmem:[%s2860_s0 + $0x20] sm:$0xff]  ;;  %v25_v27 = vld [vmem:[%s2860_s0 + $0x28] sm:$0xff] }
   0xa   :  { %893 = vmatpush.msra.mxu2 %v52_v4  ;;  %1263 = vmatpush.msra.mxu3 %v52_v4  ;;  %v1563_v24 = vld [vmem:[%s2860_s0 + $0x120] sm:$0xff]  ;;  %v1564_v28 = vld [vmem:[%s2860_s0 + $0x128] sm:$0xff]  ;;  %v1630_v29 = vld [vmem:[%s2860_s0 + $0x230] sm:$0xff] }
   0xb   :  { %1657 = vmatmul.msk.f32.vlgmr.msra.gmra.mxu2 %vm61_vm1, %v1624_v5  ;;  %1722 = vmatmul.msk.f32.vlgmr.msra.gmra.mxu3 %vm61_vm1, %v1689_v6  ;;  %v1695_v30 = vld [vmem:[%s2860_s0 + $0x330] sm:$0xff]  ;;  %v1631_v33 = vld [vmem:[%s2860_s0 + $0x238] sm:$0xff]  ;;  %v1632_v37 = vld [vmem:[%s2860_s0 + $0x240] sm:$0xff] }
   0xc   :  { %177 = vmatpush.msra.mxu0 %v52_v4  ;;  %523 = vmatpush.msra.mxu1 %v52_v4  ;;  %v26_v31 = vld [vmem:[%s2860_s0 + $0x30] sm:$0xff]  ;;  %v1696_v34 = vld [vmem:[%s2860_s0 + $0x338] sm:$0xff]  ;;  %v1697_v38 = vld [vmem:[%s2860_s0 + $0x340] sm:$0xff] }
   0xd   :  { %1527 = vmatmul.msk.f32.vlgmr.msra.gmra.mxu0 %vm61_vm1, %v20_v7  ;;  %1592 = vmatmul.msk.f32.vlgmr.msra.gmra.mxu1 %vm61_vm1, %v1559_v8  ;;  %v1565_v32 = vld [vmem:[%s2860_s0 + $0x130] sm:$0xff]  ;;  %v27_v35 = vld [vmem:[%s2860_s0 + $0x38] sm:$0xff]  ;;  %v28_v39 = vld [vmem:[%s2860_s0 + $0x40] sm:$0xff] }
   0xe   :  { %v1566_v36 = vld [vmem:[%s2860_s0 + $0x138] sm:$0xff]  ;;  %v1567_v40 = vld [vmem:[%s2860_s0 + $0x140] sm:$0xff]  ;;  %v1633_v41 = vld [vmem:[%s2860_s0 + $0x248] sm:$0xff] }
   0xf   :  { %v1698_v42 = vld [vmem:[%s2860_s0 + $0x348] sm:$0xff]  ;;  %v1634_v45 = vld [vmem:[%s2860_s0 + $0x250] sm:$0xff]  ;;  %v1635_v49 = vld [vmem:[%s2860_s0 + $0x258] sm:$0xff] }
  0x10   :  { %v29_v43 = vld [vmem:[%s2860_s0 + $0x48] sm:$0xff]  ;;  %v1699_v46 = vld [vmem:[%s2860_s0 + $0x350] sm:$0xff]  ;;  %v1700_v50 = vld [vmem:[%s2860_s0 + $0x358] sm:$0xff] }
  0x11   :  { %v1568_v44 = vld [vmem:[%s2860_s0 + $0x148] sm:$0xff]  ;;  %v30_v47 = vld [vmem:[%s2860_s0 + $0x50] sm:$0xff]  ;;  %v31_v51 = vld [vmem:[%s2860_s0 + $0x58] sm:$0xff] }
  0x12   :  { %v1569_v48 = vld [vmem:[%s2860_s0 + $0x150] sm:$0xff]  ;;  %v1570_v52 = vld [vmem:[%s2860_s0 + $0x158] sm:$0xff]  ;;  %v1636_v53 = vld [vmem:[%s2860_s0 + $0x260] sm:$0xff] }
  0x13   :  { %1658 = vmatmul.msk.f32.gmra.mxu2 %vm61_vm1, %v1625_v9  ;;  %1723 = vmatmul.msk.f32.gmra.mxu3 %vm61_vm1, %v1690_v10  ;;  %v1701_v54 = vld [vmem:[%s2860_s0 + $0x360] sm:$0xff]  ;;  %v1637_v57 = vld [vmem:[%s2860_s0 + $0x268] sm:$0xff]  ;;  %v1638_v61 = vld [vmem:[%s2860_s0 + $0x270] sm:$0xff] }
  0x14   :  { %v32_v55 = vld [vmem:[%s2860_s0 + $0x60] sm:$0xff]  ;;  %v1702_v58 = vld [vmem:[%s2860_s0 + $0x368] sm:$0xff]  ;;  %v1703_v62 = vld [vmem:[%s2860_s0 + $0x370] sm:$0xff] }
  0x15   :  { %1528 = vmatmul.msk.f32.gmra.mxu0 %vm61_vm1, %v21_v11  ;;  %1593 = vmatmul.msk.f32.gmra.mxu1 %vm61_vm1, %v1560_v12  ;;  %v1571_v56 = vld [vmem:[%s2860_s0 + $0x160] sm:$0xff]  ;;  %v33_v59 = vld [vmem:[%s2860_s0 + $0x68] sm:$0xff]  ;;  %v34_v63 = vld [vmem:[%s2860_s0 + $0x70] sm:$0xff] }
  0x16   :  { %v1572_v60 = vld [vmem:[%s2860_s0 + $0x168] sm:$0xff]  ;;  %v1573_v0 = vld [vmem:[%s2860_s0 + $0x170] sm:$0xff]  ;;  %v1639_v1 = vld [vmem:[%s2860_s0 + $0x278] sm:$0xff] }
  0x17   :  { %v1704_v2 = vld [vmem:[%s2860_s0 + $0x378] sm:$0xff]  ;;  %v2064_v5 = vld [vmem:[%s2861_s2] ss:$0 sm:$0xff] }
  0x18   :  { %v35_v3 = vld [vmem:[%s2860_s0 + $0x78] sm:$0xff]  ;;  %v1640_v6 = vld [vmem:[%s2860_s0 + $0x280] sm:$0xff] }
  0x19   :  { %v1574_v4 = vld [vmem:[%s2860_s0 + $0x178] sm:$0xff]  ;;  %v1705_v7 = vld [vmem:[%s2860_s0 + $0x380] sm:$0xff] }
  0x1a   :  { %v2075_v8 = vld [vmem:[%s2862_s3] ss:$0 sm:$0xff] }
  0x1b   :  { %1659 = vmatmul.msk.f32.gmra.mxu2 %vm61_vm1, %v1626_v13  ;;  %1724 = vmatmul.msk.f32.gmra.mxu3 %vm61_vm1, %v1691_v14  ;;  %v36_v11 = vld [vmem:[%s2860_s0 + $0x80] sm:$0xff] }
  0x1c   :  { %v1575_v12 = vld [vmem:[%s2860_s0 + $0x180] sm:$0xff] }
  0x1d   :  { %1529 = vmatmul.msk.f32.gmra.mxu0 %vm61_vm1, %v22_v15  ;;  %1594 = vmatmul.msk.f32.gmra.mxu1 %vm61_vm1, %v1561_v16  ;;  %v2088_v14 = vld [vmem:[%s2863_s4] ss:$0 sm:$0xff] }
  0x23   :  { %1660 = vmatmul.msk.f32.gmra.mxu2 %vm61_vm1, %v1627_v17  ;;  %1725 = vmatmul.msk.f32.gmra.mxu3 %vm61_vm1, %v1692_v18 }
  0x25   :  { %1530 = vmatmul.msk.f32.gmra.mxu0 %vm61_vm1, %v23_v19  ;;  %1595 = vmatmul.msk.f32.gmra.mxu1 %vm61_vm1, %v1562_v20 }
  0x2b   :  { %1661 = vmatmul.msk.f32.gmra.mxu2 %vm61_vm1, %v1628_v21  ;;  %1726 = vmatmul.msk.f32.gmra.mxu3 %vm61_vm1, %v1693_v22 }
  0x2d   :  { %1531 = vmatmul.msk.f32.gmra.mxu0 %vm61_vm1, %v24_v23  ;;  %1596 = vmatmul.msk.f32.gmra.mxu1 %vm61_vm1, %v1563_v24  ;;  %v1641_v24 = vld [vmem:[%s2860_s0 + $0x288] sm:$0xff] }
  0x33   :  { %1662 = vmatmul.msk.f32.gmra.mxu2 %vm61_vm1, %v1629_v25  ;;  %1727 = vmatmul.msk.f32.gmra.mxu3 %vm61_vm1, %v1694_v26 }
  0x35   :  { %1532 = vmatmul.msk.f32.gmra.mxu0 %vm61_vm1, %v25_v27  ;;  %1597 = vmatmul.msk.f32.gmra.mxu1 %vm61_vm1, %v1564_v28 }
  0x3b   :  { %1663 = vmatmul.msk.f32.gmra.mxu2 %vm61_vm1, %v1630_v29  ;;  %1728 = vmatmul.msk.f32.gmra.mxu3 %vm61_vm1, %v1695_v30  ;;  %v1706_v29 = vld [vmem:[%s2860_s0 + $0x388] sm:$0xff] }
  0x3d   :  { %1533 = vmatmul.msk.f32.gmra.mxu0 %vm61_vm1, %v26_v31  ;;  %1598 = vmatmul.msk.f32.gmra.mxu1 %vm61_vm1, %v1565_v32  ;;  %v37_v32 = vld [vmem:[%s2860_s0 + $0x88] sm:$0xff] }
  0x43   :  { %1664 = vmatmul.msk.f32.gmra.mxu2 %vm61_vm1, %v1631_v33  ;;  %1729 = vmatmul.msk.f32.gmra.mxu3 %vm61_vm1, %v1696_v34  ;;  %v1576_v33 = vld [vmem:[%s2860_s0 + $0x188] sm:$0xff] }
  0x45   :  { %1534 = vmatmul.msk.f32.gmra.mxu0 %vm61_vm1, %v27_v35  ;;  %1599 = vmatmul.msk.f32.gmra.mxu1 %vm61_vm1, %v1566_v36 }
  0x4b   :  { %1665 = vmatmul.msk.f32.gmra.mxu2 %vm61_vm1, %v1632_v37  ;;  %1730 = vmatmul.msk.f32.gmra.mxu3 %vm61_vm1, %v1697_v38 }
  0x4d   :  { %1535 = vmatmul.msk.f32.gmra.mxu0 %vm61_vm1, %v28_v39  ;;  %1600 = vmatmul.msk.f32.gmra.mxu1 %vm61_vm1, %v1567_v40 }
  0x53   :  { %1666 = vmatmul.msk.f32.gmra.mxu2 %vm61_vm1, %v1633_v41  ;;  %1731 = vmatmul.msk.f32.gmra.mxu3 %vm61_vm1, %v1698_v42 }
  0x55   :  { %1536 = vmatmul.msk.f32.gmra.mxu0 %vm61_vm1, %v29_v43  ;;  %1601 = vmatmul.msk.f32.gmra.mxu1 %vm61_vm1, %v1568_v44 }
  0x5b   :  { %1667 = vmatmul.msk.f32.gmra.mxu2 %vm61_vm1, %v1634_v45  ;;  %1732 = vmatmul.msk.f32.gmra.mxu3 %vm61_vm1, %v1699_v46 }
  0x5d   :  { %1537 = vmatmul.msk.f32.gmra.mxu0 %vm61_vm1, %v30_v47  ;;  %1602 = vmatmul.msk.f32.gmra.mxu1 %vm61_vm1, %v1569_v48 }
  0x63   :  { %1668 = vmatmul.msk.f32.gmra.mxu2 %vm61_vm1, %v1635_v49  ;;  %1733 = vmatmul.msk.f32.gmra.mxu3 %vm61_vm1, %v1700_v50  ;;  %v1642_v50 = vld [vmem:[%s2860_s0 + $0x290] sm:$0xff] }
  0x65   :  { %1538 = vmatmul.msk.f32.gmra.mxu0 %vm61_vm1, %v31_v51  ;;  %1603 = vmatmul.msk.f32.gmra.mxu1 %vm61_vm1, %v1570_v52 }
  0x6b   :  { %1669 = vmatmul.msk.f32.gmra.mxu2 %vm61_vm1, %v1636_v53  ;;  %1734 = vmatmul.msk.f32.gmra.mxu3 %vm61_vm1, %v1701_v54 }
  0x6d   :  { %1539 = vmatmul.msk.f32.gmra.mxu0 %vm61_vm1, %v32_v55  ;;  %1604 = vmatmul.msk.f32.gmra.mxu1 %vm61_vm1, %v1571_v56  ;;  %v1707_v55 = vld [vmem:[%s2860_s0 + $0x390] sm:$0xff] }
  0x73   :  { %1670 = vmatmul.msk.f32.gmra.mxu2 %vm61_vm1, %v1637_v57  ;;  %1735 = vmatmul.msk.f32.gmra.mxu3 %vm61_vm1, %v1702_v58 }
  0x75   :  { %1540 = vmatmul.msk.f32.gmra.mxu0 %vm61_vm1, %v33_v59  ;;  %1605 = vmatmul.msk.f32.gmra.mxu1 %vm61_vm1, %v1572_v60  ;;  %v38_v59 = vld [vmem:[%s2860_s0 + $0x90] sm:$0xff] }
  0x76   :  { %v1577_v60 = vld [vmem:[%s2860_s0 + $0x190] sm:$0xff] }
  0x7b   :  { %1671 = vmatmul.msk.f32.gmra.mxu2 %vm61_vm1, %v1638_v61  ;;  %1736 = vmatmul.msk.f32.gmra.mxu3 %vm61_vm1, %v1703_v62 }
  0x7d   :  { %1541 = vmatmul.msk.f32.gmra.mxu0 %vm61_vm1, %v34_v63  ;;  %1606 = vmatmul.msk.f32.gmra.mxu1 %vm61_vm1, %v1573_v0 }
  0x83   :  { %1672 = vmatmul.msk.f32.gmra.mxu2 %vm61_vm1, %v1639_v1  ;;  %1737 = vmatmul.msk.f32.gmra.mxu3 %vm61_vm1, %v1704_v2 }
  0x85   :  { %1542 = vmatmul.msk.f32.gmra.mxu0 %vm61_vm1, %v35_v3  ;;  %1607 = vmatmul.msk.f32.gmra.mxu1 %vm61_vm1, %v1574_v4 }
  0x8a   :  { %v179_v9 = vpop.f32.mrf.mxu0  ;;  %v525_v10 = vpop.f32.mrf.mxu1 }
  0x8b   :  { %1673 = vmatmul.msk.f32.gmra.mxu2 %vm61_vm1, %v1640_v6  ;;  %v180_v13 = vadd.f32 %v2064_v5, %v179_v9  ;;  %v526_v15 = vadd.f32 %v2064_v5, %v525_v10  ;;  %1738 = vmatmul.msk.f32.gmra.mxu3 %vm61_vm1, %v1705_v7 }
  0x8d   :  { %v279_v16 = vmul.f32 %v2075_v8, %v180_v13  ;;  %v621_v17 = vmul.f32 %v2075_v8, %v526_v15  ;;  %1543 = vmatmul.msk.f32.gmra.mxu0 %vm61_vm1, %v36_v11  ;;  %1608 = vmatmul.msk.f32.gmra.mxu1 %vm61_vm1, %v1575_v12 }
  0x8e   :  { %v895_v18 = vpop.f32.mrf.mxu2  ;;  %v1265_v19 = vpop.f32.mrf.mxu3 }
  0x8f   :  { %v315_v20 = vadd.f32 %v2088_v14, %v279_v16  ;;  %v653_v21 = vadd.f32 %v2088_v14, %v621_v17  ;;  %v896_v22 = vadd.f32 %v2064_v5, %v895_v18  ;;  %v1266_v23 = vadd.f32 %v2064_v5, %v1265_v19  ;;  %v1643_v16 = vld [vmem:[%s2860_s0 + $0x298] sm:$0xff] }
  0x91   :  { %v347_v25 = vmax.f32 %v315_v20, 0.0  ;;  %v685_v26 = vmax.f32 %v653_v21, 0.0  ;;  %v991_v27 = vmul.f32 %v2075_v8, %v896_v22  ;;  %v1361_v28 = vmul.f32 %v2075_v8, %v1266_v23  ;;  %v1708_v21 = vld [vmem:[%s2860_s0 + $0x398] sm:$0xff] }
  0x92   :  { %v182_v30 = vpop.f32.mrf.mxu0  ;;  %v528_v31 = vpop.f32.mrf.mxu1 }
  0x93   :  { %v717_v34 = vmax.f32 %v347_v25, %v685_v26  ;;  %v1023_v35 = vadd.f32 %v2088_v14, %v991_v27  ;;  %v1393_v36 = vadd.f32 %v2088_v14, %v1361_v28  ;;  %1674 = vmatmul.msk.f32.gmra.mxu2 %vm61_vm1, %v1641_v24  ;;  %v183_v37 = vadd.f32 %v2064_v5, %v182_v30  ;;  %v39_v25 = vld [vmem:[%s2860_s0 + $0x98] sm:$0xff] }
  0x94   :  { %v529_v38 = vadd.f32 %v2064_v5, %v528_v31  ;;  %1739 = vmatmul.msk.f32.gmra.mxu3 %vm61_vm1, %v1706_v29  ;;  %v1578_v26 = vld [vmem:[%s2860_s0 + $0x198] sm:$0xff] }
  0x95   :  { %v1055_v39 = vmax.f32 %v1023_v35, 0.0  ;;  %v1425_v40 = vmax.f32 %v1393_v36, 0.0  ;;  %v280_v41 = vmul.f32 %v2075_v8, %v183_v37  ;;  %1544 = vmatmul.msk.f32.gmra.mxu0 %vm61_vm1, %v37_v32  ;;  %1609 = vmatmul.msk.f32.gmra.mxu1 %vm61_vm1, %v1576_v33 }
  0x96   :  { %v622_v42 = vmul.f32 %v2075_v8, %v529_v38  ;;  %v898_v43 = vpop.f32.mrf.mxu2  ;;  %v1268_v44 = vpop.f32.mrf.mxu3 }
  0x97   :  { %v1087_v45 = vmax.f32 %v717_v34, %v1055_v39  ;;  %v316_v46 = vadd.f32 %v2088_v14, %v280_v41  ;;  %v899_v47 = vadd.f32 %v2064_v5, %v898_v43  ;;  %v1269_v48 = vadd.f32 %v2064_v5, %v1268_v44  ;;  %v1644_v43 = vld [vmem:[%s2860_s0 + $0x2a0] sm:$0xff] }
  0x98   :  { %v654_v49 = vadd.f32 %v2088_v14, %v622_v42 }
  0x99   :  { %v1457_v51 = vmax.f32 %v1087_v45, %v1425_v40  ;;  %v348_v52 = vmax.f32 %v316_v46, 0.0  ;;  %v992_v53 = vmul.f32 %v2075_v8, %v899_v47  ;;  %v1362_v54 = vmul.f32 %v2075_v8, %v1269_v48  ;;  %v1709_v48 = vld [vmem:[%s2860_s0 + $0x3a0] sm:$0xff] }
  0x9a   :  { %v686_v56 = vmax.f32 %v654_v49, 0.0  ;;  %v185_v57 = vpop.f32.mrf.mxu0  ;;  %v531_v58 = vpop.f32.mrf.mxu1 }
  0x9b   :  { %1490 = vst.msk [vmem:[%s2864_s5] sm:$0xff] %vm1489_vm2, %v1457_v51  ;;  %v1024_v61 = vadd.f32 %v2088_v14, %v992_v53  ;;  %v1394_v62 = vadd.f32 %v2088_v14, %v1362_v54  ;;  %1675 = vmatmul.msk.f32.gmra.mxu2 %vm61_vm1, %v1642_v50  ;;  %v186_v63 = vadd.f32 %v2064_v5, %v185_v57  ;;  %v1579_v53 = vld [vmem:[%s2860_s0 + $0x1a0] sm:$0xff] }
  0x9c   :  { %v718_v0 = vmax.f32 %v348_v52, %v686_v56  ;;  %v532_v1 = vadd.f32 %v2064_v5, %v531_v58  ;;  %1740 = vmatmul.msk.f32.gmra.mxu3 %vm61_vm1, %v1707_v55  ;;  %v40_v52 = vld [vmem:[%s2860_s0 + $0xa0] sm:$0xff] }
  0x9d   :  { %v1056_v2 = vmax.f32 %v1024_v61, 0.0  ;;  %v1426_v3 = vmax.f32 %v1394_v62, 0.0  ;;  %v281_v4 = vmul.f32 %v2075_v8, %v186_v63  ;;  %1545 = vmatmul.msk.f32.gmra.mxu0 %vm61_vm1, %v38_v59  ;;  %1610 = vmatmul.msk.f32.gmra.mxu1 %vm61_vm1, %v1577_v60 }
  0x9e   :  { %v623_v6 = vmul.f32 %v2075_v8, %v532_v1  ;;  %v901_v7 = vpop.f32.mrf.mxu2  ;;  %v1271_v9 = vpop.f32.mrf.mxu3 }
  0x9f   :  { %v1088_v10 = vmax.f32 %v718_v0, %v1056_v2  ;;  %v317_v11 = vadd.f32 %v2088_v14, %v281_v4  ;;  %v902_v12 = vadd.f32 %v2064_v5, %v901_v7  ;;  %v1272_v13 = vadd.f32 %v2064_v5, %v1271_v9  ;;  %v1645_v7 = vld [vmem:[%s2860_s0 + $0x2a8] sm:$0xff] }
  0xa0   :  { %v655_v15 = vadd.f32 %v2088_v14, %v623_v6 }
  0xa1   :  { %v1458_v17 = vmax.f32 %v1088_v10, %v1426_v3  ;;  %v349_v18 = vmax.f32 %v317_v11, 0.0  ;;  %v993_v19 = vmul.f32 %v2075_v8, %v902_v12  ;;  %v1363_v20 = vmul.f32 %v2075_v8, %v1272_v13  ;;  %v1710_v13 = vld [vmem:[%s2860_s0 + $0x3a8] sm:$0xff] }
  0xa2   :  { %v687_v22 = vmax.f32 %v655_v15, 0.0  ;;  %v188_v23 = vpop.f32.mrf.mxu0  ;;  %v534_v24 = vpop.f32.mrf.mxu1 }
  0xa3   :  { %1491 = vst.msk [vmem:[%s2864_s5 + $0x8] sm:$0xff] %vm1489_vm2, %v1458_v17  ;;  %v1025_v27 = vadd.f32 %v2088_v14, %v993_v19  ;;  %v1395_v28 = vadd.f32 %v2088_v14, %v1363_v20  ;;  %1676 = vmatmul.msk.f32.gmra.mxu2 %vm61_vm1, %v1643_v16  ;;  %v189_v29 = vadd.f32 %v2064_v5, %v188_v23  ;;  %v1580_v19 = vld [vmem:[%s2860_s0 + $0x1a8] sm:$0xff] }
  0xa4   :  { %v719_v30 = vmax.f32 %v349_v18, %v687_v22  ;;  %v535_v31 = vadd.f32 %v2064_v5, %v534_v24  ;;  %1741 = vmatmul.msk.f32.gmra.mxu3 %vm61_vm1, %v1708_v21  ;;  %v41_v18 = vld [vmem:[%s2860_s0 + $0xa8] sm:$0xff] }
  0xa5   :  { %v1057_v32 = vmax.f32 %v1025_v27, 0.0  ;;  %v1427_v33 = vmax.f32 %v1395_v28, 0.0  ;;  %v282_v34 = vmul.f32 %v2075_v8, %v189_v29  ;;  %1546 = vmatmul.msk.f32.gmra.mxu0 %vm61_vm1, %v39_v25  ;;  %1611 = vmatmul.msk.f32.gmra.mxu1 %vm61_vm1, %v1578_v26 }
  0xa6   :  { %v624_v35 = vmul.f32 %v2075_v8, %v535_v31  ;;  %v904_v36 = vpop.f32.mrf.mxu2  ;;  %v1274_v37 = vpop.f32.mrf.mxu3 }
  0xa7   :  { %v1089_v38 = vmax.f32 %v719_v30, %v1057_v32  ;;  %v318_v39 = vadd.f32 %v2088_v14, %v282_v34  ;;  %v905_v40 = vadd.f32 %v2064_v5, %v904_v36  ;;  %v1275_v41 = vadd.f32 %v2064_v5, %v1274_v37  ;;  %v1646_v36 = vld [vmem:[%s2860_s0 + $0x2b0] sm:$0xff] }
  0xa8   :  { %v656_v42 = vadd.f32 %v2088_v14, %v624_v35 }
  0xa9   :  { %v1459_v44 = vmax.f32 %v1089_v38, %v1427_v33  ;;  %v350_v45 = vmax.f32 %v318_v39, 0.0  ;;  %v994_v46 = vmul.f32 %v2075_v8, %v905_v40  ;;  %v1364_v47 = vmul.f32 %v2075_v8, %v1275_v41  ;;  %v1711_v41 = vld [vmem:[%s2860_s0 + $0x3b0] sm:$0xff] }
  0xaa   :  { %v688_v49 = vmax.f32 %v656_v42, 0.0  ;;  %v191_v50 = vpop.f32.mrf.mxu0  ;;  %v537_v51 = vpop.f32.mrf.mxu1 }
  0xab   :  { %1492 = vst.msk [vmem:[%s2864_s5 + $0x10] sm:$0xff] %vm1489_vm2, %v1459_v44  ;;  %v1026_v54 = vadd.f32 %v2088_v14, %v994_v46  ;;  %v1396_v55 = vadd.f32 %v2088_v14, %v1364_v47  ;;  %1677 = vmatmul.msk.f32.gmra.mxu2 %vm61_vm1, %v1644_v43  ;;  %v192_v56 = vadd.f32 %v2064_v5, %v191_v50  ;;  %v1581_v46 = vld [vmem:[%s2860_s0 + $0x1b0] sm:$0xff] }
  0xac   :  { %v720_v57 = vmax.f32 %v350_v45, %v688_v49  ;;  %v538_v58 = vadd.f32 %v2064_v5, %v537_v51  ;;  %1742 = vmatmul.msk.f32.gmra.mxu3 %vm61_vm1, %v1709_v48  ;;  %v42_v45 = vld [vmem:[%s2860_s0 + $0xb0] sm:$0xff] }
  0xad   :  { %v1058_v59 = vmax.f32 %v1026_v54, 0.0  ;;  %v1428_v60 = vmax.f32 %v1396_v55, 0.0  ;;  %v283_v61 = vmul.f32 %v2075_v8, %v192_v56  ;;  %1547 = vmatmul.msk.f32.gmra.mxu0 %vm61_vm1, %v40_v52  ;;  %1612 = vmatmul.msk.f32.gmra.mxu1 %vm61_vm1, %v1579_v53 }
  0xae   :  { %v625_v62 = vmul.f32 %v2075_v8, %v538_v58  ;;  %v907_v63 = vpop.f32.mrf.mxu2  ;;  %v1277_v0 = vpop.f32.mrf.mxu3 }
  0xaf   :  { %v1090_v1 = vmax.f32 %v720_v57, %v1058_v59  ;;  %v319_v2 = vadd.f32 %v2088_v14, %v283_v61  ;;  %v908_v3 = vadd.f32 %v2064_v5, %v907_v63  ;;  %v1278_v4 = vadd.f32 %v2064_v5, %v1277_v0  ;;  %v1647_v63 = vld [vmem:[%s2860_s0 + $0x2b8] sm:$0xff] }
  0xb0   :  { %v657_v6 = vadd.f32 %v2088_v14, %v625_v62 }
  0xb1   :  { %v1460_v9 = vmax.f32 %v1090_v1, %v1428_v60  ;;  %v351_v10 = vmax.f32 %v319_v2, 0.0  ;;  %v995_v11 = vmul.f32 %v2075_v8, %v908_v3  ;;  %v1365_v12 = vmul.f32 %v2075_v8, %v1278_v4  ;;  %v1712_v4 = vld [vmem:[%s2860_s0 + $0x3b8] sm:$0xff] }
  0xb2   :  { %v689_v15 = vmax.f32 %v657_v6, 0.0  ;;  %v194_v16 = vpop.f32.mrf.mxu0  ;;  %v540_v17 = vpop.f32.mrf.mxu1 }
  0xb3   :  { %1493 = vst.msk [vmem:[%s2864_s5 + $0x18] sm:$0xff] %vm1489_vm2, %v1460_v9  ;;  %v1027_v20 = vadd.f32 %v2088_v14, %v995_v11  ;;  %v1397_v21 = vadd.f32 %v2088_v14, %v1365_v12  ;;  %1678 = vmatmul.msk.f32.gmra.mxu2 %vm61_vm1, %v1645_v7  ;;  %v195_v22 = vadd.f32 %v2064_v5, %v194_v16  ;;  %v1582_v11 = vld [vmem:[%s2860_s0 + $0x1b8] sm:$0xff] }
  0xb4   :  { %v721_v23 = vmax.f32 %v351_v10, %v689_v15  ;;  %v541_v24 = vadd.f32 %v2064_v5, %v540_v17  ;;  %1743 = vmatmul.msk.f32.gmra.mxu3 %vm61_vm1, %v1710_v13  ;;  %v43_v10 = vld [vmem:[%s2860_s0 + $0xb8] sm:$0xff] }
  0xb5   :  { %v1059_v25 = vmax.f32 %v1027_v20, 0.0  ;;  %v1429_v26 = vmax.f32 %v1397_v21, 0.0  ;;  %v284_v27 = vmul.f32 %v2075_v8, %v195_v22  ;;  %1548 = vmatmul.msk.f32.gmra.mxu0 %vm61_vm1, %v41_v18  ;;  %1613 = vmatmul.msk.f32.gmra.mxu1 %vm61_vm1, %v1580_v19 }
  0xb6   :  { %v626_v28 = vmul.f32 %v2075_v8, %v541_v24  ;;  %v910_v29 = vpop.f32.mrf.mxu2  ;;  %v1280_v30 = vpop.f32.mrf.mxu3 }
  0xb7   :  { %v1091_v31 = vmax.f32 %v721_v23, %v1059_v25  ;;  %v320_v32 = vadd.f32 %v2088_v14, %v284_v27  ;;  %v911_v33 = vadd.f32 %v2064_v5, %v910_v29  ;;  %v1281_v34 = vadd.f32 %v2064_v5, %v1280_v30  ;;  %v1648_v29 = vld [vmem:[%s2860_s0 + $0x2c0] sm:$0xff] }
  0xb8   :  { %v658_v35 = vadd.f32 %v2088_v14, %v626_v28 }
  0xb9   :  { %v1461_v37 = vmax.f32 %v1091_v31, %v1429_v26  ;;  %v352_v38 = vmax.f32 %v320_v32, 0.0  ;;  %v996_v39 = vmul.f32 %v2075_v8, %v911_v33  ;;  %v1366_v40 = vmul.f32 %v2075_v8, %v1281_v34  ;;  %v1713_v34 = vld [vmem:[%s2860_s0 + $0x3c0] sm:$0xff] }
  0xba   :  { %v690_v42 = vmax.f32 %v658_v35, 0.0  ;;  %v197_v43 = vpop.f32.mrf.mxu0  ;;  %v543_v44 = vpop.f32.mrf.mxu1 }
  0xbb   :  { %1494 = vst.msk [vmem:[%s2864_s5 + $0x20] sm:$0xff] %vm1489_vm2, %v1461_v37  ;;  %v1028_v47 = vadd.f32 %v2088_v14, %v996_v39  ;;  %v1398_v48 = vadd.f32 %v2088_v14, %v1366_v40  ;;  %1679 = vmatmul.msk.f32.gmra.mxu2 %vm61_vm1, %v1646_v36  ;;  %v198_v49 = vadd.f32 %v2064_v5, %v197_v43  ;;  %v1583_v39 = vld [vmem:[%s2860_s0 + $0x1c0] sm:$0xff] }
  0xbc   :  { %v722_v50 = vmax.f32 %v352_v38, %v690_v42  ;;  %v544_v51 = vadd.f32 %v2064_v5, %v543_v44  ;;  %1744 = vmatmul.msk.f32.gmra.mxu3 %vm61_vm1, %v1711_v41  ;;  %v44_v38 = vld [vmem:[%s2860_s0 + $0xc0] sm:$0xff] }
  0xbd   :  { %v1060_v52 = vmax.f32 %v1028_v47, 0.0  ;;  %v1430_v53 = vmax.f32 %v1398_v48, 0.0  ;;  %v285_v54 = vmul.f32 %v2075_v8, %v198_v49  ;;  %1549 = vmatmul.msk.f32.gmra.mxu0 %vm61_vm1, %v42_v45  ;;  %1614 = vmatmul.msk.f32.gmra.mxu1 %vm61_vm1, %v1581_v46 }
  0xbe   :  { %v627_v55 = vmul.f32 %v2075_v8, %v544_v51  ;;  %v913_v56 = vpop.f32.mrf.mxu2  ;;  %v1283_v57 = vpop.f32.mrf.mxu3 }
  0xbf   :  { %v1092_v58 = vmax.f32 %v722_v50, %v1060_v52  ;;  %v321_v59 = vadd.f32 %v2088_v14, %v285_v54  ;;  %v914_v60 = vadd.f32 %v2064_v5, %v913_v56  ;;  %v1284_v61 = vadd.f32 %v2064_v5, %v1283_v57  ;;  %v1649_v56 = vld [vmem:[%s2860_s0 + $0x2c8] sm:$0xff] }
  0xc0   :  { %v659_v62 = vadd.f32 %v2088_v14, %v627_v55 }
  0xc1   :  { %v1462_v0 = vmax.f32 %v1092_v58, %v1430_v53  ;;  %v353_v1 = vmax.f32 %v321_v59, 0.0  ;;  %v997_v2 = vmul.f32 %v2075_v8, %v914_v60  ;;  %v1367_v3 = vmul.f32 %v2075_v8, %v1284_v61  ;;  %v1714_v61 = vld [vmem:[%s2860_s0 + $0x3c8] sm:$0xff] }
  0xc2   :  { %v691_v6 = vmax.f32 %v659_v62, 0.0  ;;  %v200_v7 = vpop.f32.mrf.mxu0  ;;  %v546_v9 = vpop.f32.mrf.mxu1 }
  0xc3   :  { %1495 = vst.msk [vmem:[%s2864_s5 + $0x28] sm:$0xff] %vm1489_vm2, %v1462_v0  ;;  %v1029_v12 = vadd.f32 %v2088_v14, %v997_v2  ;;  %v1399_v13 = vadd.f32 %v2088_v14, %v1367_v3  ;;  %1680 = vmatmul.msk.f32.gmra.mxu2 %vm61_vm1, %v1647_v63  ;;  %v201_v15 = vadd.f32 %v2064_v5, %v200_v7  ;;  %v1584_v2 = vld [vmem:[%s2860_s0 + $0x1c8] sm:$0xff] }
  0xc4   :  { %v723_v16 = vmax.f32 %v353_v1, %v691_v6  ;;  %v547_v17 = vadd.f32 %v2064_v5, %v546_v9  ;;  %1745 = vmatmul.msk.f32.gmra.mxu3 %vm61_vm1, %v1712_v4  ;;  %v45_v1 = vld [vmem:[%s2860_s0 + $0xc8] sm:$0xff] }
  0xc5   :  { %v1061_v18 = vmax.f32 %v1029_v12, 0.0  ;;  %v1431_v19 = vmax.f32 %v1399_v13, 0.0  ;;  %v286_v20 = vmul.f32 %v2075_v8, %v201_v15  ;;  %1550 = vmatmul.msk.f32.gmra.mxu0 %vm61_vm1, %v43_v10  ;;  %1615 = vmatmul.msk.f32.gmra.mxu1 %vm61_vm1, %v1582_v11 }
  0xc6   :  { %v628_v21 = vmul.f32 %v2075_v8, %v547_v17  ;;  %v916_v22 = vpop.f32.mrf.mxu2  ;;  %v1286_v23 = vpop.f32.mrf.mxu3 }
  0xc7   :  { %v1093_v24 = vmax.f32 %v723_v16, %v1061_v18  ;;  %v322_v25 = vadd.f32 %v2088_v14, %v286_v20  ;;  %v917_v26 = vadd.f32 %v2064_v5, %v916_v22  ;;  %v1287_v27 = vadd.f32 %v2064_v5, %v1286_v23  ;;  %v1650_v22 = vld [vmem:[%s2860_s0 + $0x2d0] sm:$0xff] }
  0xc8   :  { %v660_v28 = vadd.f32 %v2088_v14, %v628_v21 }
  0xc9   :  { %v1463_v30 = vmax.f32 %v1093_v24, %v1431_v19  ;;  %v354_v31 = vmax.f32 %v322_v25, 0.0  ;;  %v998_v32 = vmul.f32 %v2075_v8, %v917_v26  ;;  %v1368_v33 = vmul.f32 %v2075_v8, %v1287_v27  ;;  %v1715_v27 = vld [vmem:[%s2860_s0 + $0x3d0] sm:$0xff] }
  0xca   :  { %v692_v35 = vmax.f32 %v660_v28, 0.0  ;;  %v203_v36 = vpop.f32.mrf.mxu0  ;;  %v549_v37 = vpop.f32.mrf.mxu1 }
  0xcb   :  { %1496 = vst.msk [vmem:[%s2864_s5 + $0x30] sm:$0xff] %vm1489_vm2, %v1463_v30  ;;  %v1030_v40 = vadd.f32 %v2088_v14, %v998_v32  ;;  %v1400_v41 = vadd.f32 %v2088_v14, %v1368_v33  ;;  %1681 = vmatmul.msk.f32.gmra.mxu2 %vm61_vm1, %v1648_v29  ;;  %v204_v42 = vadd.f32 %v2064_v5, %v203_v36  ;;  %v1585_v32 = vld [vmem:[%s2860_s0 + $0x1d0] sm:$0xff] }
  0xcc   :  { %v724_v43 = vmax.f32 %v354_v31, %v692_v35  ;;  %v550_v44 = vadd.f32 %v2064_v5, %v549_v37  ;;  %1746 = vmatmul.msk.f32.gmra.mxu3 %vm61_vm1, %v1713_v34  ;;  %v46_v31 = vld [vmem:[%s2860_s0 + $0xd0] sm:$0xff] }
  0xcd   :  { %v1062_v45 = vmax.f32 %v1030_v40, 0.0  ;;  %v1432_v46 = vmax.f32 %v1400_v41, 0.0  ;;  %v287_v47 = vmul.f32 %v2075_v8, %v204_v42  ;;  %1551 = vmatmul.msk.f32.gmra.mxu0 %vm61_vm1, %v44_v38  ;;  %1616 = vmatmul.msk.f32.gmra.mxu1 %vm61_vm1, %v1583_v39 }
  0xce   :  { %v629_v48 = vmul.f32 %v2075_v8, %v550_v44  ;;  %v919_v49 = vpop.f32.mrf.mxu2  ;;  %v1289_v50 = vpop.f32.mrf.mxu3 }
  0xcf   :  { %v1094_v51 = vmax.f32 %v724_v43, %v1062_v45  ;;  %v323_v52 = vadd.f32 %v2088_v14, %v287_v47  ;;  %v920_v53 = vadd.f32 %v2064_v5, %v919_v49  ;;  %v1290_v54 = vadd.f32 %v2064_v5, %v1289_v50  ;;  %v1651_v49 = vld [vmem:[%s2860_s0 + $0x2d8] sm:$0xff] }
  0xd0   :  { %v661_v55 = vadd.f32 %v2088_v14, %v629_v48 }
  0xd1   :  { %v1464_v57 = vmax.f32 %v1094_v51, %v1432_v46  ;;  %v355_v58 = vmax.f32 %v323_v52, 0.0  ;;  %v999_v59 = vmul.f32 %v2075_v8, %v920_v53  ;;  %v1369_v60 = vmul.f32 %v2075_v8, %v1290_v54  ;;  %v1716_v54 = vld [vmem:[%s2860_s0 + $0x3d8] sm:$0xff] }
  0xd2   :  { %v693_v62 = vmax.f32 %v661_v55, 0.0  ;;  %v206_v63 = vpop.f32.mrf.mxu0  ;;  %v552_v0 = vpop.f32.mrf.mxu1 }
  0xd3   :  { %1497 = vst.msk [vmem:[%s2864_s5 + $0x38] sm:$0xff] %vm1489_vm2, %v1464_v57  ;;  %v1031_v3 = vadd.f32 %v2088_v14, %v999_v59  ;;  %v1401_v4 = vadd.f32 %v2088_v14, %v1369_v60  ;;  %1682 = vmatmul.msk.f32.gmra.mxu2 %vm61_vm1, %v1649_v56  ;;  %v207_v6 = vadd.f32 %v2064_v5, %v206_v63  ;;  %v1586_v59 = vld [vmem:[%s2860_s0 + $0x1d8] sm:$0xff] }
  0xd4   :  { %v725_v7 = vmax.f32 %v355_v58, %v693_v62  ;;  %v553_v9 = vadd.f32 %v2064_v5, %v552_v0  ;;  %1747 = vmatmul.msk.f32.gmra.mxu3 %vm61_vm1, %v1714_v61  ;;  %v47_v58 = vld [vmem:[%s2860_s0 + $0xd8] sm:$0xff] }
  0xd5   :  { %v1063_v10 = vmax.f32 %v1031_v3, 0.0  ;;  %v1433_v11 = vmax.f32 %v1401_v4, 0.0  ;;  %v288_v12 = vmul.f32 %v2075_v8, %v207_v6  ;;  %1552 = vmatmul.msk.f32.gmra.mxu0 %vm61_vm1, %v45_v1  ;;  %1617 = vmatmul.msk.f32.gmra.mxu1 %vm61_vm1, %v1584_v2 }
  0xd6   :  { %v630_v13 = vmul.f32 %v2075_v8, %v553_v9  ;;  %v922_v15 = vpop.f32.mrf.mxu2  ;;  %v1292_v16 = vpop.f32.mrf.mxu3 }
  0xd7   :  { %v1095_v17 = vmax.f32 %v725_v7, %v1063_v10  ;;  %v324_v18 = vadd.f32 %v2088_v14, %v288_v12  ;;  %v923_v19 = vadd.f32 %v2064_v5, %v922_v15  ;;  %v1293_v20 = vadd.f32 %v2064_v5, %v1292_v16  ;;  %v1652_v15 = vld [vmem:[%s2860_s0 + $0x2e0] sm:$0xff] }
  0xd8   :  { %v662_v21 = vadd.f32 %v2088_v14, %v630_v13 }
  0xd9   :  { %v1465_v23 = vmax.f32 %v1095_v17, %v1433_v11  ;;  %v356_v24 = vmax.f32 %v324_v18, 0.0  ;;  %v1000_v25 = vmul.f32 %v2075_v8, %v923_v19  ;;  %v1370_v26 = vmul.f32 %v2075_v8, %v1293_v20  ;;  %v1717_v20 = vld [vmem:[%s2860_s0 + $0x3e0] sm:$0xff] }
  0xda   :  { %v694_v28 = vmax.f32 %v662_v21, 0.0  ;;  %v209_v29 = vpop.f32.mrf.mxu0  ;;  %v555_v30 = vpop.f32.mrf.mxu1 }
  0xdb   :  { %1498 = vst.msk [vmem:[%s2864_s5 + $0x40] sm:$0xff] %vm1489_vm2, %v1465_v23  ;;  %v1032_v33 = vadd.f32 %v2088_v14, %v1000_v25  ;;  %v1402_v34 = vadd.f32 %v2088_v14, %v1370_v26  ;;  %1683 = vmatmul.msk.f32.gmra.mxu2 %vm61_vm1, %v1650_v22  ;;  %v210_v35 = vadd.f32 %v2064_v5, %v209_v29  ;;  %v1587_v25 = vld [vmem:[%s2860_s0 + $0x1e0] sm:$0xff] }
  0xdc   :  { %v726_v36 = vmax.f32 %v356_v24, %v694_v28  ;;  %v556_v37 = vadd.f32 %v2064_v5, %v555_v30  ;;  %1748 = vmatmul.msk.f32.gmra.mxu3 %vm61_vm1, %v1715_v27  ;;  %v48_v24 = vld [vmem:[%s2860_s0 + $0xe0] sm:$0xff] }
  0xdd   :  { %v1064_v38 = vmax.f32 %v1032_v33, 0.0  ;;  %v1434_v39 = vmax.f32 %v1402_v34, 0.0  ;;  %v289_v40 = vmul.f32 %v2075_v8, %v210_v35  ;;  %1553 = vmatmul.msk.f32.gmra.mxu0 %vm61_vm1, %v46_v31  ;;  %1618 = vmatmul.msk.f32.gmra.mxu1 %vm61_vm1, %v1585_v32 }
  0xde   :  { %v631_v41 = vmul.f32 %v2075_v8, %v556_v37  ;;  %v925_v42 = vpop.f32.mrf.mxu2  ;;  %v1295_v43 = vpop.f32.mrf.mxu3 }
  0xdf   :  { %v1096_v44 = vmax.f32 %v726_v36, %v1064_v38  ;;  %v325_v45 = vadd.f32 %v2088_v14, %v289_v40  ;;  %v926_v46 = vadd.f32 %v2064_v5, %v925_v42  ;;  %v1296_v47 = vadd.f32 %v2064_v5, %v1295_v43  ;;  %v1653_v42 = vld [vmem:[%s2860_s0 + $0x2e8] sm:$0xff] }
  0xe0   :  { %v663_v48 = vadd.f32 %v2088_v14, %v631_v41 }
  0xe1   :  { %v1466_v50 = vmax.f32 %v1096_v44, %v1434_v39  ;;  %v357_v51 = vmax.f32 %v325_v45, 0.0  ;;  %v1001_v52 = vmul.f32 %v2075_v8, %v926_v46  ;;  %v1371_v53 = vmul.f32 %v2075_v8, %v1296_v47  ;;  %v1718_v47 = vld [vmem:[%s2860_s0 + $0x3e8] sm:$0xff] }
  0xe2   :  { %v695_v55 = vmax.f32 %v663_v48, 0.0  ;;  %v212_v56 = vpop.f32.mrf.mxu0  ;;  %v558_v57 = vpop.f32.mrf.mxu1 }
  0xe3   :  { %1499 = vst.msk [vmem:[%s2864_s5 + $0x48] sm:$0xff] %vm1489_vm2, %v1466_v50  ;;  %v1033_v60 = vadd.f32 %v2088_v14, %v1001_v52  ;;  %v1403_v61 = vadd.f32 %v2088_v14, %v1371_v53  ;;  %1684 = vmatmul.msk.f32.gmra.mxu2 %vm61_vm1, %v1651_v49  ;;  %v213_v62 = vadd.f32 %v2064_v5, %v212_v56  ;;  %v1588_v52 = vld [vmem:[%s2860_s0 + $0x1e8] sm:$0xff] }
  0xe4   :  { %v727_v63 = vmax.f32 %v357_v51, %v695_v55  ;;  %v559_v0 = vadd.f32 %v2064_v5, %v558_v57  ;;  %1749 = vmatmul.msk.f32.gmra.mxu3 %vm61_vm1, %v1716_v54  ;;  %v49_v51 = vld [vmem:[%s2860_s0 + $0xe8] sm:$0xff] }
  0xe5   :  { %v1065_v1 = vmax.f32 %v1033_v60, 0.0  ;;  %v1435_v2 = vmax.f32 %v1403_v61, 0.0  ;;  %v290_v3 = vmul.f32 %v2075_v8, %v213_v62  ;;  %1554 = vmatmul.msk.f32.gmra.mxu0 %vm61_vm1, %v47_v58  ;;  %1619 = vmatmul.msk.f32.gmra.mxu1 %vm61_vm1, %v1586_v59 }
  0xe6   :  { %v632_v4 = vmul.f32 %v2075_v8, %v559_v0  ;;  %v928_v6 = vpop.f32.mrf.mxu2  ;;  %v1298_v7 = vpop.f32.mrf.mxu3 }
  0xe7   :  { %v1097_v9 = vmax.f32 %v727_v63, %v1065_v1  ;;  %v326_v10 = vadd.f32 %v2088_v14, %v290_v3  ;;  %v929_v11 = vadd.f32 %v2064_v5, %v928_v6  ;;  %v1299_v12 = vadd.f32 %v2064_v5, %v1298_v7  ;;  %v1654_v6 = vld [vmem:[%s2860_s0 + $0x2f0] sm:$0xff] }
  0xe8   :  { %v664_v13 = vadd.f32 %v2088_v14, %v632_v4 }
  0xe9   :  { %v1467_v16 = vmax.f32 %v1097_v9, %v1435_v2  ;;  %v358_v17 = vmax.f32 %v326_v10, 0.0  ;;  %v1002_v18 = vmul.f32 %v2075_v8, %v929_v11  ;;  %v1372_v19 = vmul.f32 %v2075_v8, %v1299_v12  ;;  %v1719_v12 = vld [vmem:[%s2860_s0 + $0x3f0] sm:$0xff] }
  0xea   :  { %v696_v21 = vmax.f32 %v664_v13, 0.0  ;;  %v215_v22 = vpop.f32.mrf.mxu0  ;;  %v561_v23 = vpop.f32.mrf.mxu1 }
  0xeb   :  { %1500 = vst.msk [vmem:[%s2864_s5 + $0x50] sm:$0xff] %vm1489_vm2, %v1467_v16  ;;  %v1034_v26 = vadd.f32 %v2088_v14, %v1002_v18  ;;  %v1404_v27 = vadd.f32 %v2088_v14, %v1372_v19  ;;  %1685 = vmatmul.msk.f32.gmra.mxu2 %vm61_vm1, %v1652_v15  ;;  %v216_v28 = vadd.f32 %v2064_v5, %v215_v22  ;;  %v1589_v18 = vld [vmem:[%s2860_s0 + $0x1f0] sm:$0xff] }
  0xec   :  { %v728_v29 = vmax.f32 %v358_v17, %v696_v21  ;;  %v562_v30 = vadd.f32 %v2064_v5, %v561_v23  ;;  %1750 = vmatmul.msk.f32.gmra.mxu3 %vm61_vm1, %v1717_v20  ;;  %v50_v17 = vld [vmem:[%s2860_s0 + $0xf0] sm:$0xff] }
  0xed   :  { %v1066_v31 = vmax.f32 %v1034_v26, 0.0  ;;  %v1436_v32 = vmax.f32 %v1404_v27, 0.0  ;;  %v291_v33 = vmul.f32 %v2075_v8, %v216_v28  ;;  %1555 = vmatmul.msk.f32.gmra.mxu0 %vm61_vm1, %v48_v24  ;;  %1620 = vmatmul.msk.f32.gmra.mxu1 %vm61_vm1, %v1587_v25 }
  0xee   :  { %v633_v34 = vmul.f32 %v2075_v8, %v562_v30  ;;  %v931_v35 = vpop.f32.mrf.mxu2  ;;  %v1301_v36 = vpop.f32.mrf.mxu3 }
  0xef   :  { %v1098_v37 = vmax.f32 %v728_v29, %v1066_v31  ;;  %v327_v38 = vadd.f32 %v2088_v14, %v291_v33  ;;  %v932_v39 = vadd.f32 %v2064_v5, %v931_v35  ;;  %v1302_v40 = vadd.f32 %v2064_v5, %v1301_v36  ;;  %v1655_v35 = vld [vmem:[%s2860_s0 + $0x2f8] sm:$0xff] }
  0xf0   :  { %v665_v41 = vadd.f32 %v2088_v14, %v633_v34 }
  0xf1   :  { %v1468_v43 = vmax.f32 %v1098_v37, %v1436_v32  ;;  %v359_v44 = vmax.f32 %v327_v38, 0.0  ;;  %v1003_v45 = vmul.f32 %v2075_v8, %v932_v39  ;;  %v1373_v46 = vmul.f32 %v2075_v8, %v1302_v40  ;;  %v1720_v40 = vld [vmem:[%s2860_s0 + $0x3f8] sm:$0xff] }
  0xf2   :  { %v697_v48 = vmax.f32 %v665_v41, 0.0  ;;  %v218_v49 = vpop.f32.mrf.mxu0  ;;  %v564_v50 = vpop.f32.mrf.mxu1 }
  0xf3   :  { %1501 = vst.msk [vmem:[%s2864_s5 + $0x58] sm:$0xff] %vm1489_vm2, %v1468_v43  ;;  %v1035_v53 = vadd.f32 %v2088_v14, %v1003_v45  ;;  %v1405_v54 = vadd.f32 %v2088_v14, %v1373_v46  ;;  %1686 = vmatmul.msk.f32.gmra.mxu2 %vm61_vm1, %v1653_v42  ;;  %v219_v55 = vadd.f32 %v2064_v5, %v218_v49  ;;  %v1590_v45 = vld [vmem:[%s2860_s0 + $0x1f8] sm:$0xff] }
  0xf4   :  { %v729_v56 = vmax.f32 %v359_v44, %v697_v48  ;;  %v565_v57 = vadd.f32 %v2064_v5, %v564_v50  ;;  %1751 = vmatmul.msk.f32.gmra.mxu3 %vm61_vm1, %v1718_v47  ;;  %v51_v44 = vld [vmem:[%s2860_s0 + $0xf8] sm:$0xff] }
  0xf5   :  { %v1067_v58 = vmax.f32 %v1035_v53, 0.0  ;;  %v1437_v59 = vmax.f32 %v1405_v54, 0.0  ;;  %v292_v60 = vmul.f32 %v2075_v8, %v219_v55  ;;  %1556 = vmatmul.msk.f32.gmra.mxu0 %vm61_vm1, %v49_v51  ;;  %1621 = vmatmul.msk.f32.gmra.mxu1 %vm61_vm1, %v1588_v52 }
  0xf6   :  { %v634_v61 = vmul.f32 %v2075_v8, %v565_v57  ;;  %v934_v62 = vpop.f32.mrf.mxu2  ;;  %v1304_v63 = vpop.f32.mrf.mxu3 }
  0xf7   :  { %v1099_v0 = vmax.f32 %v729_v56, %v1067_v58  ;;  %v328_v1 = vadd.f32 %v2088_v14, %v292_v60  ;;  %v935_v2 = vadd.f32 %v2064_v5, %v934_v62  ;;  %v1305_v3 = vadd.f32 %v2064_v5, %v1304_v63 }
  0xf8   :  { %v666_v4 = vadd.f32 %v2088_v14, %v634_v61 }
  0xf9   :  { %v1469_v7 = vmax.f32 %v1099_v0, %v1437_v59  ;;  %v360_v9 = vmax.f32 %v328_v1, 0.0  ;;  %v1004_v10 = vmul.f32 %v2075_v8, %v935_v2  ;;  %v1374_v11 = vmul.f32 %v2075_v8, %v1305_v3 }
  0xfa   :  { %v698_v13 = vmax.f32 %v666_v4, 0.0  ;;  %v221_v15 = vpop.f32.mrf.mxu0  ;;  %v567_v16 = vpop.f32.mrf.mxu1 }
  0xfb   :  { %1502 = vst.msk [vmem:[%s2864_s5 + $0x60] sm:$0xff] %vm1489_vm2, %v1469_v7  ;;  %v1036_v19 = vadd.f32 %v2088_v14, %v1004_v10  ;;  %v1406_v20 = vadd.f32 %v2088_v14, %v1374_v11  ;;  %1687 = vmatmul.msk.f32.gmra.mxu2 %vm61_vm1, %v1654_v6  ;;  %v222_v21 = vadd.f32 %v2064_v5, %v221_v15  ;;  %v2587_v7 = vld [vmem:[%s2861_s2] ss:$0 sm:$0xff] }
  0xfc   :  { %v730_v22 = vmax.f32 %v360_v9, %v698_v13  ;;  %v568_v23 = vadd.f32 %v2064_v5, %v567_v16  ;;  %1752 = vmatmul.msk.f32.gmra.mxu3 %vm61_vm1, %v1719_v12  ;;  %v2594_v13 = vld [vmem:[%s2862_s3] ss:$0 sm:$0xff] }
  0xfd   :  { %v1068_v24 = vmax.f32 %v1036_v19, 0.0  ;;  %v1438_v25 = vmax.f32 %v1406_v20, 0.0  ;;  %v293_v26 = vmul.f32 %v2075_v8, %v222_v21  ;;  %1557 = vmatmul.msk.f32.gmra.mxu0 %vm61_vm1, %v50_v17  ;;  %1622 = vmatmul.msk.f32.gmra.mxu1 %vm61_vm1, %v1589_v18  ;;  %v2601_v19 = vld [vmem:[%s2863_s4] ss:$0 sm:$0xff] }
  0xfe   :  { %v635_v27 = vmul.f32 %v2075_v8, %v568_v23  ;;  %v937_v28 = vpop.f32.mrf.mxu2  ;;  %v1307_v29 = vpop.f32.mrf.mxu3 }
  0xff   :  { %v1100_v30 = vmax.f32 %v730_v22, %v1068_v24  ;;  %v329_v31 = vadd.f32 %v2088_v14, %v293_v26  ;;  %v938_v32 = vadd.f32 %v2064_v5, %v937_v28  ;;  %v1308_v33 = vadd.f32 %v2064_v5, %v1307_v29 }
 0x100   :  { %v667_v34 = vadd.f32 %v2088_v14, %v635_v27 }
 0x101   :  { %v1470_v36 = vmax.f32 %v1100_v30, %v1438_v25  ;;  %v361_v37 = vmax.f32 %v329_v31, 0.0  ;;  %v1005_v38 = vmul.f32 %v2075_v8, %v938_v32  ;;  %v1375_v39 = vmul.f32 %v2075_v8, %v1308_v33 }
 0x102   :  { %v699_v41 = vmax.f32 %v667_v34, 0.0  ;;  %v224_v42 = vpop.f32.mrf.mxu0  ;;  %v570_v43 = vpop.f32.mrf.mxu1 }
 0x103   :  { %1503 = vst.msk [vmem:[%s2864_s5 + $0x68] sm:$0xff] %vm1489_vm2, %v1470_v36  ;;  %v1037_v46 = vadd.f32 %v2088_v14, %v1005_v38  ;;  %v1407_v47 = vadd.f32 %v2088_v14, %v1375_v39  ;;  %1688 = vmatmul.msk.f32.gmra.mxu2 %vm61_vm1, %v1655_v35  ;;  %v225_v48 = vadd.f32 %v2064_v5, %v224_v42 }
 0x104   :  { %v731_v49 = vmax.f32 %v361_v37, %v699_v41  ;;  %v571_v50 = vadd.f32 %v2064_v5, %v570_v43  ;;  %1753 = vmatmul.msk.f32.gmra.mxu3 %vm61_vm1, %v1720_v40 }
 0x105   :  { %v1069_v51 = vmax.f32 %v1037_v46, 0.0  ;;  %v1439_v52 = vmax.f32 %v1407_v47, 0.0  ;;  %v294_v53 = vmul.f32 %v2075_v8, %v225_v48  ;;  %1558 = vmatmul.msk.f32.gmra.mxu0 %vm61_vm1, %v51_v44  ;;  %1623 = vmatmul.msk.f32.gmra.mxu1 %vm61_vm1, %v1590_v45 }
 0x106   :  { %v636_v54 = vmul.f32 %v2075_v8, %v571_v50  ;;  %v940_v55 = vpop.f32.mrf.mxu2  ;;  %v1310_v56 = vpop.f32.mrf.mxu3 }
 0x107   :  { %v1101_v57 = vmax.f32 %v731_v49, %v1069_v51  ;;  %v330_v58 = vadd.f32 %v2088_v14, %v294_v53  ;;  %v941_v59 = vadd.f32 %v2064_v5, %v940_v55  ;;  %v1311_v60 = vadd.f32 %v2064_v5, %v1310_v56 }
 0x108   :  { %v668_v61 = vadd.f32 %v2088_v14, %v636_v54 }
 0x109   :  { %v1471_v62 = vmax.f32 %v1101_v57, %v1439_v52  ;;  %v362_v63 = vmax.f32 %v330_v58, 0.0  ;;  %v1006_v0 = vmul.f32 %v2075_v8, %v941_v59  ;;  %v1376_v1 = vmul.f32 %v2075_v8, %v1311_v60 }
 0x10a   :  { %v700_v2 = vmax.f32 %v668_v61, 0.0  ;;  %v227_v3 = vpop.f32.mrf.mxu0  ;;  %v573_v4 = vpop.f32.mrf.mxu1 }
 0x10b   :  { %1504 = vst.msk [vmem:[%s2864_s5 + $0x70] sm:$0xff] %vm1489_vm2, %v1471_v62  ;;  %v1038_v6 = vadd.f32 %v2088_v14, %v1006_v0  ;;  %v1408_v5 = vadd.f32 %v2088_v14, %v1376_v1  ;;  %v228_v9 = vadd.f32 %v2587_v7, %v227_v3  ;;  %v574_v8 = vadd.f32 %v2587_v7, %v573_v4 }
 0x10c   :  { %v732_v10 = vmax.f32 %v362_v63, %v700_v2 }
 0x10d   :  { %v1070_v11 = vmax.f32 %v1038_v6, 0.0  ;;  %v1440_v12 = vmax.f32 %v1408_v5, 0.0  ;;  %v295_v15 = vmul.f32 %v2594_v13, %v228_v9  ;;  %v637_v14 = vmul.f32 %v2594_v13, %v574_v8 }
 0x10e   :  { %v943_v16 = vpop.f32.mrf.mxu2  ;;  %v1313_v17 = vpop.f32.mrf.mxu3 }
 0x10f   :  { %v1102_v18 = vmax.f32 %v732_v10, %v1070_v11  ;;  %v331_v20 = vadd.f32 %v2601_v19, %v295_v15  ;;  %v669_v21 = vadd.f32 %v2601_v19, %v637_v14  ;;  %v944_v22 = vadd.f32 %v2587_v7, %v943_v16 }
 0x110   :  { %v1314_v23 = vadd.f32 %v2587_v7, %v1313_v17 }
 0x111   :  { %v1472_v24 = vmax.f32 %v1102_v18, %v1440_v12  ;;  %v363_v25 = vmax.f32 %v331_v20, 0.0  ;;  %v701_v26 = vmax.f32 %v669_v21, 0.0  ;;  %v1007_v27 = vmul.f32 %v2594_v13, %v944_v22 }
 0x112   :  { %v1377_v28 = vmul.f32 %v2594_v13, %v1314_v23  ;;  %v230_v29 = vpop.f32.mrf.mxu0  ;;  %v576_v30 = vpop.f32.mrf.mxu1 }
 0x113   :  { %1505 = vst.msk [vmem:[%s2864_s5 + $0x78] sm:$0xff] %vm1489_vm2, %v1472_v24  ;;  %v733_v31 = vmax.f32 %v363_v25, %v701_v26  ;;  %v1039_v32 = vadd.f32 %v2601_v19, %v1007_v27  ;;  %v231_v33 = vadd.f32 %v2587_v7, %v230_v29  ;;  %v577_v34 = vadd.f32 %v2587_v7, %v576_v30 }
 0x114   :  { %v1409_v35 = vadd.f32 %v2601_v19, %v1377_v28 }
 0x115   :  { %v1071_v36 = vmax.f32 %v1039_v32, 0.0  ;;  %v296_v37 = vmul.f32 %v2594_v13, %v231_v33  ;;  %v638_v38 = vmul.f32 %v2594_v13, %v577_v34 }
 0x116   :  { %v1441_v39 = vmax.f32 %v1409_v35, 0.0  ;;  %v946_v40 = vpop.f32.mrf.mxu2 }
 0x117   :  { %v1103_v41 = vmax.f32 %v733_v31, %v1071_v36  ;;  %v332_v42 = vadd.f32 %v2601_v19, %v296_v37  ;;  %v670_v43 = vadd.f32 %v2601_v19, %v638_v38  ;;  %v947_v44 = vadd.f32 %v2587_v7, %v946_v40  ;;  %v1316_v45 = vpop.f32.mrf.mxu3 }
 0x118   :  { %v1317_v46 = vadd.f32 %v2587_v7, %v1316_v45 }
 0x119   :  { %v1473_v47 = vmax.f32 %v1103_v41, %v1441_v39  ;;  %v364_v48 = vmax.f32 %v332_v42, 0.0  ;;  %v702_v49 = vmax.f32 %v670_v43, 0.0  ;;  %v1008_v50 = vmul.f32 %v2594_v13, %v947_v44 }
 0x11a   :  { %v1378_v51 = vmul.f32 %v2594_v13, %v1317_v46  ;;  %v233_v52 = vpop.f32.mrf.mxu0  ;;  %v579_v53 = vpop.f32.mrf.mxu1 }
 0x11b   :  { %1506 = vst.msk [vmem:[%s2864_s5 + $0x80] sm:$0xff] %vm1489_vm2, %v1473_v47  ;;  %v734_v54 = vmax.f32 %v364_v48, %v702_v49  ;;  %v1040_v55 = vadd.f32 %v2601_v19, %v1008_v50  ;;  %v234_v56 = vadd.f32 %v2587_v7, %v233_v52  ;;  %v580_v57 = vadd.f32 %v2587_v7, %v579_v53 }
 0x11c   :  { %v1410_v58 = vadd.f32 %v2601_v19, %v1378_v51 }
 0x11d   :  { %v1072_v59 = vmax.f32 %v1040_v55, 0.0  ;;  %v297_v60 = vmul.f32 %v2594_v13, %v234_v56  ;;  %v639_v61 = vmul.f32 %v2594_v13, %v580_v57 }
 0x11e   :  { %v1442_v62 = vmax.f32 %v1410_v58, 0.0  ;;  %v949_v63 = vpop.f32.mrf.mxu2 }
 0x11f   :  { %v1104_v0 = vmax.f32 %v734_v54, %v1072_v59  ;;  %v333_v1 = vadd.f32 %v2601_v19, %v297_v60  ;;  %v671_v2 = vadd.f32 %v2601_v19, %v639_v61  ;;  %v950_v3 = vadd.f32 %v2587_v7, %v949_v63  ;;  %v1319_v4 = vpop.f32.mrf.mxu3 }
 0x120   :  { %v1320_v6 = vadd.f32 %v2587_v7, %v1319_v4 }
 0x121   :  { %v1474_v5 = vmax.f32 %v1104_v0, %v1442_v62  ;;  %v365_v9 = vmax.f32 %v333_v1, 0.0  ;;  %v703_v8 = vmax.f32 %v671_v2, 0.0  ;;  %v1009_v10 = vmul.f32 %v2594_v13, %v950_v3 }
 0x122   :  { %v1379_v11 = vmul.f32 %v2594_v13, %v1320_v6  ;;  %v236_v12 = vpop.f32.mrf.mxu0  ;;  %v582_v15 = vpop.f32.mrf.mxu1 }
 0x123   :  { %1507 = vst.msk [vmem:[%s2864_s5 + $0x88] sm:$0xff] %vm1489_vm2, %v1474_v5  ;;  %v735_v14 = vmax.f32 %v365_v9, %v703_v8  ;;  %v1041_v16 = vadd.f32 %v2601_v19, %v1009_v10  ;;  %v237_v17 = vadd.f32 %v2587_v7, %v236_v12  ;;  %v583_v18 = vadd.f32 %v2587_v7, %v582_v15 }
 0x124   :  { %v1411_v20 = vadd.f32 %v2601_v19, %v1379_v11 }
 0x125   :  { %v1073_v21 = vmax.f32 %v1041_v16, 0.0  ;;  %v298_v22 = vmul.f32 %v2594_v13, %v237_v17  ;;  %v640_v23 = vmul.f32 %v2594_v13, %v583_v18 }
 0x126   :  { %v1443_v24 = vmax.f32 %v1411_v20, 0.0  ;;  %v952_v25 = vpop.f32.mrf.mxu2 }
 0x127   :  { %v1105_v26 = vmax.f32 %v735_v14, %v1073_v21  ;;  %v334_v27 = vadd.f32 %v2601_v19, %v298_v22  ;;  %v672_v28 = vadd.f32 %v2601_v19, %v640_v23  ;;  %v953_v29 = vadd.f32 %v2587_v7, %v952_v25  ;;  %v1322_v30 = vpop.f32.mrf.mxu3 }
 0x128   :  { %v1323_v31 = vadd.f32 %v2587_v7, %v1322_v30 }
 0x129   :  { %v1475_v32 = vmax.f32 %v1105_v26, %v1443_v24  ;;  %v366_v33 = vmax.f32 %v334_v27, 0.0  ;;  %v704_v34 = vmax.f32 %v672_v28, 0.0  ;;  %v1010_v35 = vmul.f32 %v2594_v13, %v953_v29 }
 0x12a   :  { %v1380_v36 = vmul.f32 %v2594_v13, %v1323_v31  ;;  %v239_v37 = vpop.f32.mrf.mxu0  ;;  %v585_v38 = vpop.f32.mrf.mxu1 }
 0x12b   :  { %1508 = vst.msk [vmem:[%s2864_s5 + $0x90] sm:$0xff] %vm1489_vm2, %v1475_v32  ;;  %v736_v39 = vmax.f32 %v366_v33, %v704_v34  ;;  %v1042_v40 = vadd.f32 %v2601_v19, %v1010_v35  ;;  %v240_v41 = vadd.f32 %v2587_v7, %v239_v37  ;;  %v586_v42 = vadd.f32 %v2587_v7, %v585_v38 }
 0x12c   :  { %v1412_v43 = vadd.f32 %v2601_v19, %v1380_v36 }
 0x12d   :  { %v1074_v44 = vmax.f32 %v1042_v40, 0.0  ;;  %v299_v45 = vmul.f32 %v2594_v13, %v240_v41  ;;  %v641_v46 = vmul.f32 %v2594_v13, %v586_v42 }
 0x12e   :  { %v1444_v47 = vmax.f32 %v1412_v43, 0.0  ;;  %v955_v48 = vpop.f32.mrf.mxu2 }
 0x12f   :  { %v1106_v49 = vmax.f32 %v736_v39, %v1074_v44  ;;  %v335_v50 = vadd.f32 %v2601_v19, %v299_v45  ;;  %v673_v51 = vadd.f32 %v2601_v19, %v641_v46  ;;  %v956_v52 = vadd.f32 %v2587_v7, %v955_v48  ;;  %v1325_v53 = vpop.f32.mrf.mxu3 }
 0x130   :  { %v1326_v54 = vadd.f32 %v2587_v7, %v1325_v53 }
 0x131   :  { %v1476_v55 = vmax.f32 %v1106_v49, %v1444_v47  ;;  %v367_v56 = vmax.f32 %v335_v50, 0.0  ;;  %v705_v57 = vmax.f32 %v673_v51, 0.0  ;;  %v1011_v58 = vmul.f32 %v2594_v13, %v956_v52 }
 0x132   :  { %v1381_v59 = vmul.f32 %v2594_v13, %v1326_v54  ;;  %v242_v60 = vpop.f32.mrf.mxu0  ;;  %v588_v61 = vpop.f32.mrf.mxu1 }
 0x133   :  { %1509 = vst.msk [vmem:[%s2864_s5 + $0x98] sm:$0xff] %vm1489_vm2, %v1476_v55  ;;  %v737_v62 = vmax.f32 %v367_v56, %v705_v57  ;;  %v1043_v63 = vadd.f32 %v2601_v19, %v1011_v58  ;;  %v243_v0 = vadd.f32 %v2587_v7, %v242_v60  ;;  %v589_v1 = vadd.f32 %v2587_v7, %v588_v61 }
 0x134   :  { %v1413_v2 = vadd.f32 %v2601_v19, %v1381_v59 }
 0x135   :  { %v1075_v3 = vmax.f32 %v1043_v63, 0.0  ;;  %v300_v4 = vmul.f32 %v2594_v13, %v243_v0  ;;  %v642_v6 = vmul.f32 %v2594_v13, %v589_v1 }
 0x136   :  { %v1445_v5 = vmax.f32 %v1413_v2, 0.0  ;;  %v958_v9 = vpop.f32.mrf.mxu2 }
 0x137   :  { %v1107_v8 = vmax.f32 %v737_v62, %v1075_v3  ;;  %v336_v10 = vadd.f32 %v2601_v19, %v300_v4  ;;  %v674_v11 = vadd.f32 %v2601_v19, %v642_v6  ;;  %v959_v12 = vadd.f32 %v2587_v7, %v958_v9  ;;  %v1328_v15 = vpop.f32.mrf.mxu3 }
 0x138   :  { %v1329_v14 = vadd.f32 %v2587_v7, %v1328_v15 }
 0x139   :  { %v1477_v16 = vmax.f32 %v1107_v8, %v1445_v5  ;;  %v368_v17 = vmax.f32 %v336_v10, 0.0  ;;  %v706_v18 = vmax.f32 %v674_v11, 0.0  ;;  %v1012_v20 = vmul.f32 %v2594_v13, %v959_v12 }
 0x13a   :  { %v1382_v21 = vmul.f32 %v2594_v13, %v1329_v14  ;;  %v245_v22 = vpop.f32.mrf.mxu0  ;;  %v591_v23 = vpop.f32.mrf.mxu1 }
 0x13b   :  { %1510 = vst.msk [vmem:[%s2864_s5 + $0xa0] sm:$0xff] %vm1489_vm2, %v1477_v16  ;;  %v738_v24 = vmax.f32 %v368_v17, %v706_v18  ;;  %v1044_v25 = vadd.f32 %v2601_v19, %v1012_v20  ;;  %v246_v26 = vadd.f32 %v2587_v7, %v245_v22  ;;  %v592_v27 = vadd.f32 %v2587_v7, %v591_v23 }
 0x13c   :  { %v1414_v28 = vadd.f32 %v2601_v19, %v1382_v21 }
 0x13d   :  { %v1076_v29 = vmax.f32 %v1044_v25, 0.0  ;;  %v301_v30 = vmul.f32 %v2594_v13, %v246_v26  ;;  %v643_v31 = vmul.f32 %v2594_v13, %v592_v27 }
 0x13e   :  { %v1446_v32 = vmax.f32 %v1414_v28, 0.0  ;;  %v961_v33 = vpop.f32.mrf.mxu2 }
 0x13f   :  { %v1108_v34 = vmax.f32 %v738_v24, %v1076_v29  ;;  %v337_v35 = vadd.f32 %v2601_v19, %v301_v30  ;;  %v675_v36 = vadd.f32 %v2601_v19, %v643_v31  ;;  %v962_v37 = vadd.f32 %v2587_v7, %v961_v33  ;;  %v1331_v38 = vpop.f32.mrf.mxu3 }
 0x140   :  { %v1332_v39 = vadd.f32 %v2587_v7, %v1331_v38 }
 0x141   :  { %v1478_v40 = vmax.f32 %v1108_v34, %v1446_v32  ;;  %v369_v41 = vmax.f32 %v337_v35, 0.0  ;;  %v707_v42 = vmax.f32 %v675_v36, 0.0  ;;  %v1013_v43 = vmul.f32 %v2594_v13, %v962_v37 }
 0x142   :  { %v1383_v44 = vmul.f32 %v2594_v13, %v1332_v39  ;;  %v248_v45 = vpop.f32.mrf.mxu0  ;;  %v594_v46 = vpop.f32.mrf.mxu1 }
 0x143   :  { %1511 = vst.msk [vmem:[%s2864_s5 + $0xa8] sm:$0xff] %vm1489_vm2, %v1478_v40  ;;  %v739_v47 = vmax.f32 %v369_v41, %v707_v42  ;;  %v1045_v48 = vadd.f32 %v2601_v19, %v1013_v43  ;;  %v249_v49 = vadd.f32 %v2587_v7, %v248_v45  ;;  %v595_v50 = vadd.f32 %v2587_v7, %v594_v46 }
 0x144   :  { %v1415_v51 = vadd.f32 %v2601_v19, %v1383_v44 }
 0x145   :  { %v1077_v52 = vmax.f32 %v1045_v48, 0.0  ;;  %v302_v53 = vmul.f32 %v2594_v13, %v249_v49  ;;  %v644_v54 = vmul.f32 %v2594_v13, %v595_v50 }
 0x146   :  { %v1447_v55 = vmax.f32 %v1415_v51, 0.0  ;;  %v964_v56 = vpop.f32.mrf.mxu2 }
 0x147   :  { %v1109_v57 = vmax.f32 %v739_v47, %v1077_v52  ;;  %v338_v58 = vadd.f32 %v2601_v19, %v302_v53  ;;  %v676_v59 = vadd.f32 %v2601_v19, %v644_v54  ;;  %v965_v60 = vadd.f32 %v2587_v7, %v964_v56  ;;  %v1334_v61 = vpop.f32.mrf.mxu3 }
 0x148   :  { %v1335_v62 = vadd.f32 %v2587_v7, %v1334_v61 }
 0x149   :  { %v1479_v63 = vmax.f32 %v1109_v57, %v1447_v55  ;;  %v370_v0 = vmax.f32 %v338_v58, 0.0  ;;  %v708_v1 = vmax.f32 %v676_v59, 0.0  ;;  %v1014_v2 = vmul.f32 %v2594_v13, %v965_v60 }
 0x14a   :  { %v1384_v3 = vmul.f32 %v2594_v13, %v1335_v62  ;;  %v251_v4 = vpop.f32.mrf.mxu0  ;;  %v597_v6 = vpop.f32.mrf.mxu1 }
 0x14b   :  { %1512 = vst.msk [vmem:[%s2864_s5 + $0xb0] sm:$0xff] %vm1489_vm2, %v1479_v63  ;;  %v740_v5 = vmax.f32 %v370_v0, %v708_v1  ;;  %v1046_v9 = vadd.f32 %v2601_v19, %v1014_v2  ;;  %v252_v8 = vadd.f32 %v2587_v7, %v251_v4  ;;  %v598_v10 = vadd.f32 %v2587_v7, %v597_v6 }
 0x14c   :  { %v1416_v11 = vadd.f32 %v2601_v19, %v1384_v3 }
 0x14d   :  { %v1078_v12 = vmax.f32 %v1046_v9, 0.0  ;;  %v303_v15 = vmul.f32 %v2594_v13, %v252_v8  ;;  %v645_v14 = vmul.f32 %v2594_v13, %v598_v10 }
 0x14e   :  { %v1448_v16 = vmax.f32 %v1416_v11, 0.0  ;;  %v967_v17 = vpop.f32.mrf.mxu2 }
 0x14f   :  { %v1110_v18 = vmax.f32 %v740_v5, %v1078_v12  ;;  %v339_v20 = vadd.f32 %v2601_v19, %v303_v15  ;;  %v677_v21 = vadd.f32 %v2601_v19, %v645_v14  ;;  %v968_v22 = vadd.f32 %v2587_v7, %v967_v17  ;;  %v1337_v23 = vpop.f32.mrf.mxu3 }
 0x150   :  { %v1338_v24 = vadd.f32 %v2587_v7, %v1337_v23 }
 0x151   :  { %v1480_v25 = vmax.f32 %v1110_v18, %v1448_v16  ;;  %v371_v26 = vmax.f32 %v339_v20, 0.0  ;;  %v709_v27 = vmax.f32 %v677_v21, 0.0  ;;  %v1015_v28 = vmul.f32 %v2594_v13, %v968_v22 }
 0x152   :  { %v1385_v29 = vmul.f32 %v2594_v13, %v1338_v24  ;;  %v254_v30 = vpop.f32.mrf.mxu0  ;;  %v600_v31 = vpop.f32.mrf.mxu1 }
 0x153   :  { %1513 = vst.msk [vmem:[%s2864_s5 + $0xb8] sm:$0xff] %vm1489_vm2, %v1480_v25  ;;  %v741_v32 = vmax.f32 %v371_v26, %v709_v27  ;;  %v1047_v33 = vadd.f32 %v2601_v19, %v1015_v28  ;;  %v255_v34 = vadd.f32 %v2587_v7, %v254_v30  ;;  %v601_v35 = vadd.f32 %v2587_v7, %v600_v31 }
 0x154   :  { %v1417_v36 = vadd.f32 %v2601_v19, %v1385_v29 }
 0x155   :  { %v1079_v37 = vmax.f32 %v1047_v33, 0.0  ;;  %v304_v38 = vmul.f32 %v2594_v13, %v255_v34  ;;  %v646_v39 = vmul.f32 %v2594_v13, %v601_v35 }
 0x156   :  { %v1449_v40 = vmax.f32 %v1417_v36, 0.0  ;;  %v970_v41 = vpop.f32.mrf.mxu2 }
 0x157   :  { %v1111_v42 = vmax.f32 %v741_v32, %v1079_v37  ;;  %v340_v43 = vadd.f32 %v2601_v19, %v304_v38  ;;  %v678_v44 = vadd.f32 %v2601_v19, %v646_v39  ;;  %v971_v45 = vadd.f32 %v2587_v7, %v970_v41  ;;  %v1340_v46 = vpop.f32.mrf.mxu3 }
 0x158   :  { %v1341_v47 = vadd.f32 %v2587_v7, %v1340_v46 }
 0x159   :  { %v1481_v48 = vmax.f32 %v1111_v42, %v1449_v40  ;;  %v372_v49 = vmax.f32 %v340_v43, 0.0  ;;  %v710_v50 = vmax.f32 %v678_v44, 0.0  ;;  %v1016_v51 = vmul.f32 %v2594_v13, %v971_v45 }
 0x15a   :  { %v1386_v52 = vmul.f32 %v2594_v13, %v1341_v47  ;;  %v257_v53 = vpop.f32.mrf.mxu0  ;;  %v603_v54 = vpop.f32.mrf.mxu1 }
 0x15b   :  { %1514 = vst.msk [vmem:[%s2864_s5 + $0xc0] sm:$0xff] %vm1489_vm2, %v1481_v48  ;;  %v742_v55 = vmax.f32 %v372_v49, %v710_v50  ;;  %v1048_v56 = vadd.f32 %v2601_v19, %v1016_v51  ;;  %v258_v57 = vadd.f32 %v2587_v7, %v257_v53  ;;  %v604_v58 = vadd.f32 %v2587_v7, %v603_v54 }
 0x15c   :  { %v1418_v59 = vadd.f32 %v2601_v19, %v1386_v52 }
 0x15d   :  { %v1080_v60 = vmax.f32 %v1048_v56, 0.0  ;;  %v305_v61 = vmul.f32 %v2594_v13, %v258_v57  ;;  %v647_v62 = vmul.f32 %v2594_v13, %v604_v58 }
 0x15e   :  { %v1450_v63 = vmax.f32 %v1418_v59, 0.0  ;;  %v973_v0 = vpop.f32.mrf.mxu2 }
 0x15f   :  { %v1112_v1 = vmax.f32 %v742_v55, %v1080_v60  ;;  %v341_v2 = vadd.f32 %v2601_v19, %v305_v61  ;;  %v679_v3 = vadd.f32 %v2601_v19, %v647_v62  ;;  %v974_v4 = vadd.f32 %v2587_v7, %v973_v0  ;;  %v1343_v6 = vpop.f32.mrf.mxu3 }
 0x160   :  { %v1344_v5 = vadd.f32 %v2587_v7, %v1343_v6 }
 0x161   :  { %v1482_v9 = vmax.f32 %v1112_v1, %v1450_v63  ;;  %v373_v8 = vmax.f32 %v341_v2, 0.0  ;;  %v711_v10 = vmax.f32 %v679_v3, 0.0  ;;  %v1017_v11 = vmul.f32 %v2594_v13, %v974_v4 }
 0x162   :  { %v1387_v12 = vmul.f32 %v2594_v13, %v1344_v5  ;;  %v260_v15 = vpop.f32.mrf.mxu0  ;;  %v606_v14 = vpop.f32.mrf.mxu1 }
 0x163   :  { %1515 = vst.msk [vmem:[%s2864_s5 + $0xc8] sm:$0xff] %vm1489_vm2, %v1482_v9  ;;  %v743_v16 = vmax.f32 %v373_v8, %v711_v10  ;;  %v1049_v17 = vadd.f32 %v2601_v19, %v1017_v11  ;;  %v261_v18 = vadd.f32 %v2587_v7, %v260_v15  ;;  %v607_v20 = vadd.f32 %v2587_v7, %v606_v14 }
 0x164   :  { %v1419_v21 = vadd.f32 %v2601_v19, %v1387_v12 }
 0x165   :  { %v1081_v22 = vmax.f32 %v1049_v17, 0.0  ;;  %v306_v23 = vmul.f32 %v2594_v13, %v261_v18  ;;  %v648_v24 = vmul.f32 %v2594_v13, %v607_v20 }
 0x166   :  { %v1451_v25 = vmax.f32 %v1419_v21, 0.0  ;;  %v976_v26 = vpop.f32.mrf.mxu2 }
 0x167   :  { %v1113_v27 = vmax.f32 %v743_v16, %v1081_v22  ;;  %v342_v28 = vadd.f32 %v2601_v19, %v306_v23  ;;  %v680_v29 = vadd.f32 %v2601_v19, %v648_v24  ;;  %v977_v30 = vadd.f32 %v2587_v7, %v976_v26  ;;  %v1346_v31 = vpop.f32.mrf.mxu3 }
 0x168   :  { %v1347_v32 = vadd.f32 %v2587_v7, %v1346_v31 }
 0x169   :  { %v1483_v33 = vmax.f32 %v1113_v27, %v1451_v25  ;;  %v374_v34 = vmax.f32 %v342_v28, 0.0  ;;  %v712_v35 = vmax.f32 %v680_v29, 0.0  ;;  %v1018_v36 = vmul.f32 %v2594_v13, %v977_v30 }
 0x16a   :  { %v1388_v37 = vmul.f32 %v2594_v13, %v1347_v32  ;;  %v263_v38 = vpop.f32.mrf.mxu0  ;;  %v609_v39 = vpop.f32.mrf.mxu1 }
 0x16b   :  { %1516 = vst.msk [vmem:[%s2864_s5 + $0xd0] sm:$0xff] %vm1489_vm2, %v1483_v33  ;;  %v744_v40 = vmax.f32 %v374_v34, %v712_v35  ;;  %v1050_v41 = vadd.f32 %v2601_v19, %v1018_v36  ;;  %v264_v42 = vadd.f32 %v2587_v7, %v263_v38  ;;  %v610_v43 = vadd.f32 %v2587_v7, %v609_v39 }
 0x16c   :  { %v1420_v44 = vadd.f32 %v2601_v19, %v1388_v37 }
 0x16d   :  { %v1082_v45 = vmax.f32 %v1050_v41, 0.0  ;;  %v307_v46 = vmul.f32 %v2594_v13, %v264_v42  ;;  %v649_v47 = vmul.f32 %v2594_v13, %v610_v43 }
 0x16e   :  { %v1452_v48 = vmax.f32 %v1420_v44, 0.0  ;;  %v979_v49 = vpop.f32.mrf.mxu2 }
 0x16f   :  { %v1114_v50 = vmax.f32 %v744_v40, %v1082_v45  ;;  %v343_v51 = vadd.f32 %v2601_v19, %v307_v46  ;;  %v681_v52 = vadd.f32 %v2601_v19, %v649_v47  ;;  %v980_v53 = vadd.f32 %v2587_v7, %v979_v49  ;;  %v1349_v54 = vpop.f32.mrf.mxu3 }
 0x170   :  { %v1350_v55 = vadd.f32 %v2587_v7, %v1349_v54 }
 0x171   :  { %v1484_v56 = vmax.f32 %v1114_v50, %v1452_v48  ;;  %v375_v57 = vmax.f32 %v343_v51, 0.0  ;;  %v713_v58 = vmax.f32 %v681_v52, 0.0  ;;  %v1019_v59 = vmul.f32 %v2594_v13, %v980_v53 }
 0x172   :  { %v1389_v60 = vmul.f32 %v2594_v13, %v1350_v55  ;;  %v266_v61 = vpop.f32.mrf.mxu0  ;;  %v612_v62 = vpop.f32.mrf.mxu1 }
 0x173   :  { %1517 = vst.msk [vmem:[%s2864_s5 + $0xd8] sm:$0xff] %vm1489_vm2, %v1484_v56  ;;  %v745_v63 = vmax.f32 %v375_v57, %v713_v58  ;;  %v1051_v0 = vadd.f32 %v2601_v19, %v1019_v59  ;;  %v267_v1 = vadd.f32 %v2587_v7, %v266_v61  ;;  %v613_v2 = vadd.f32 %v2587_v7, %v612_v62 }
 0x174   :  { %v1421_v3 = vadd.f32 %v2601_v19, %v1389_v60 }
 0x175   :  { %v1083_v4 = vmax.f32 %v1051_v0, 0.0  ;;  %v308_v6 = vmul.f32 %v2594_v13, %v267_v1  ;;  %v650_v5 = vmul.f32 %v2594_v13, %v613_v2 }
 0x176   :  { %v1453_v9 = vmax.f32 %v1421_v3, 0.0  ;;  %v982_v8 = vpop.f32.mrf.mxu2 }
 0x177   :  { %v1115_v10 = vmax.f32 %v745_v63, %v1083_v4  ;;  %v344_v11 = vadd.f32 %v2601_v19, %v308_v6  ;;  %v682_v12 = vadd.f32 %v2601_v19, %v650_v5  ;;  %v983_v15 = vadd.f32 %v2587_v7, %v982_v8  ;;  %v1352_v14 = vpop.f32.mrf.mxu3 }
 0x178   :  { %v1353_v16 = vadd.f32 %v2587_v7, %v1352_v14 }
 0x179   :  { %v1485_v17 = vmax.f32 %v1115_v10, %v1453_v9  ;;  %v376_v18 = vmax.f32 %v344_v11, 0.0  ;;  %v714_v20 = vmax.f32 %v682_v12, 0.0  ;;  %v1020_v21 = vmul.f32 %v2594_v13, %v983_v15 }
 0x17a   :  { %v1390_v22 = vmul.f32 %v2594_v13, %v1353_v16  ;;  %v269_v23 = vpop.f32.mrf.mxu0  ;;  %v615_v24 = vpop.f32.mrf.mxu1 }
 0x17b   :  { %1518 = vst.msk [vmem:[%s2864_s5 + $0xe0] sm:$0xff] %vm1489_vm2, %v1485_v17  ;;  %v746_v25 = vmax.f32 %v376_v18, %v714_v20  ;;  %v1052_v26 = vadd.f32 %v2601_v19, %v1020_v21  ;;  %v270_v27 = vadd.f32 %v2587_v7, %v269_v23  ;;  %v616_v28 = vadd.f32 %v2587_v7, %v615_v24 }
 0x17c   :  { %v1422_v29 = vadd.f32 %v2601_v19, %v1390_v22 }
 0x17d   :  { %v1084_v30 = vmax.f32 %v1052_v26, 0.0  ;;  %v309_v31 = vmul.f32 %v2594_v13, %v270_v27  ;;  %v651_v32 = vmul.f32 %v2594_v13, %v616_v28 }
 0x17e   :  { %v1454_v33 = vmax.f32 %v1422_v29, 0.0  ;;  %v985_v34 = vpop.f32.mrf.mxu2 }
 0x17f   :  { %v1116_v35 = vmax.f32 %v746_v25, %v1084_v30  ;;  %v345_v36 = vadd.f32 %v2601_v19, %v309_v31  ;;  %v683_v37 = vadd.f32 %v2601_v19, %v651_v32  ;;  %v986_v38 = vadd.f32 %v2587_v7, %v985_v34  ;;  %v1355_v39 = vpop.f32.mrf.mxu3 }
 0x180   :  { %v1356_v40 = vadd.f32 %v2587_v7, %v1355_v39 }
 0x181   :  { %v1486_v41 = vmax.f32 %v1116_v35, %v1454_v33  ;;  %v377_v42 = vmax.f32 %v345_v36, 0.0  ;;  %v715_v43 = vmax.f32 %v683_v37, 0.0  ;;  %v1021_v44 = vmul.f32 %v2594_v13, %v986_v38 }
 0x182   :  { %v1391_v45 = vmul.f32 %v2594_v13, %v1356_v40  ;;  %v272_v46 = vpop.f32.mrf.mxu0  ;;  %v618_v47 = vpop.f32.mrf.mxu1 }
 0x183   :  { %1519 = vst.msk [vmem:[%s2864_s5 + $0xe8] sm:$0xff] %vm1489_vm2, %v1486_v41  ;;  %v747_v48 = vmax.f32 %v377_v42, %v715_v43  ;;  %v1053_v49 = vadd.f32 %v2601_v19, %v1021_v44  ;;  %v273_v50 = vadd.f32 %v2587_v7, %v272_v46  ;;  %v619_v51 = vadd.f32 %v2587_v7, %v618_v47 }
 0x184   :  { %v1423_v52 = vadd.f32 %v2601_v19, %v1391_v45 }
 0x185   :  { %v1085_v53 = vmax.f32 %v1053_v49, 0.0  ;;  %v310_v54 = vmul.f32 %v2594_v13, %v273_v50  ;;  %v652_v55 = vmul.f32 %v2594_v13, %v619_v51 }
 0x186   :  { %v1455_v56 = vmax.f32 %v1423_v52, 0.0  ;;  %v988_v57 = vpop.f32.mrf.mxu2 }
 0x187   :  { %v1117_v58 = vmax.f32 %v747_v48, %v1085_v53  ;;  %v346_v59 = vadd.f32 %v2601_v19, %v310_v54  ;;  %v684_v60 = vadd.f32 %v2601_v19, %v652_v55  ;;  %v989_v61 = vadd.f32 %v2587_v7, %v988_v57  ;;  %v1358_v62 = vpop.f32.mrf.mxu3 }
 0x188   :  { %v1359_v63 = vadd.f32 %v2587_v7, %v1358_v62 }
 0x189   :  { %v1487_v0 = vmax.f32 %v1117_v58, %v1455_v56  ;;  %v378_v1 = vmax.f32 %v346_v59, 0.0  ;;  %v716_v2 = vmax.f32 %v684_v60, 0.0  ;;  %v1022_v3 = vmul.f32 %v2594_v13, %v989_v61 }
 0x18a   :  { %v1392_v4 = vmul.f32 %v2594_v13, %v1359_v63 }
 0x18b   :  { %1520 = vst.msk [vmem:[%s2864_s5 + $0xf0] sm:$0xff] %vm1489_vm2, %v1487_v0  ;;  %v748_v6 = vmax.f32 %v378_v1, %v716_v2  ;;  %v1054_v5 = vadd.f32 %v2601_v19, %v1022_v3 }
 0x18c   :  { %v1424_v9 = vadd.f32 %v2601_v19, %v1392_v4 }
 0x18d   :  { %v1086_v8 = vmax.f32 %v1054_v5, 0.0 }
 0x18e   :  { %v1456_v10 = vmax.f32 %v1424_v9, 0.0 }
 0x18f   :  { %v1118_v7 = vmax.f32 %v748_v6, %v1086_v8 }
 0x191   :  { %v1488_v11 = vmax.f32 %v1118_v7, %v1456_v10 }
 0x193   :  { %1521 = vst.msk [vmem:[%s2864_s5 + $0xf8] sm:$0xff] %vm1489_vm2, %v1488_v11 }

// kernel: seldnet_forward.6
= control target key start
LH: loop header
LB: loop body
LE: loop exit
PB: predicated region body
PF: predicated region fallthrough
CT: control target
= control target key end

     0   :  { %vm41_vm0 = vcmask 588800   ;;  %vm457_vm1 = vcmask 130048   ;;  %s857_s1 = inlined_call_operand.vmem [shape: f32[72,16], index: 1, kind: input, shape index: {}]   ;;  %s858_s2 = inlined_call_operand.vmem [shape: f32[1,16], index: 2, kind: input, shape index: {}]   ;;  %s859_s3 = inlined_call_operand.vmem [shape: f32[1,16], index: 3, kind: input, shape index: {}]   ;;  %s860_s4 = inlined_call_operand.vmem [shape: f32[1,16], index: 4, kind: input, shape index: {}]   ;;  %s861_s0 = inlined_call_operand.vmem [shape: f32[4,64,72], index: 0, kind: input, shape index: {}]   ;;  %s862_s5 = inlined_call_operand.vmem [shape: f32[64,16], index: 5, kind: output, shape index: {}]  }
   0x1   :  { %v36_v0 = vld [vmem:[%s857_s1 + $0x40] sm:$0xff]  ;;  %v35_v1 = vld [vmem:[%s857_s1 + $0x38] sm:$0xff]  ;;  %v34_v2 = vld [vmem:[%s857_s1 + $0x30] sm:$0xff] }
   0x2   :  { %285 = vmatpush.msra.mxu2 %v36_v0  ;;  %391 = vmatpush.msra.mxu3 %v36_v0  ;;  %v33_v3 = vld [vmem:[%s857_s1 + $0x28] sm:$0xff]  ;;  %v32_v4 = vld [vmem:[%s857_s1 + $0x20] sm:$0xff]  ;;  %v31_v5 = vld [vmem:[%s857_s1 + $0x18] sm:$0xff] }
   0x3   :  { %73 = vmatpush.msra.mxu0 %v36_v0  ;;  %179 = vmatpush.msra.mxu1 %v36_v0  ;;  %v30_v6 = vld [vmem:[%s857_s1 + $0x10] sm:$0xff]  ;;  %v29_v7 = vld [vmem:[%s857_s1 + $0x8] sm:$0xff]  ;;  %v28_v8 = vld [vmem:[%s857_s1] sm:$0xff] }
   0x4   :  { %286 = vmatpush.msra.mxu2 %v35_v1  ;;  %392 = vmatpush.msra.mxu3 %v35_v1  ;;  %v494_v9 = vld [vmem:[%s861_s0 + $0x80] sm:$0xff]  ;;  %v495_v13 = vld [vmem:[%s861_s0 + $0x88] sm:$0xff]  ;;  %v496_v17 = vld [vmem:[%s861_s0 + $0x90] sm:$0xff] }
   0x5   :  { %74 = vmatpush.msra.mxu0 %v35_v1  ;;  %180 = vmatpush.msra.mxu1 %v35_v1  ;;  %v510_v10 = vld [vmem:[%s861_s0 + $0xc0] sm:$0xff]  ;;  %v511_v14 = vld [vmem:[%s861_s0 + $0xc8] sm:$0xff]  ;;  %v512_v18 = vld [vmem:[%s861_s0 + $0xd0] sm:$0xff] }
   0x6   :  { %287 = vmatpush.msra.mxu2 %v34_v2  ;;  %393 = vmatpush.msra.mxu3 %v34_v2  ;;  %v20_v11 = vld [vmem:[%s861_s0] sm:$0xff]  ;;  %v21_v15 = vld [vmem:[%s861_s0 + $0x8] sm:$0xff]  ;;  %v22_v19 = vld [vmem:[%s861_s0 + $0x10] sm:$0xff] }
   0x7   :  { %75 = vmatpush.msra.mxu0 %v34_v2  ;;  %181 = vmatpush.msra.mxu1 %v34_v2  ;;  %v478_v12 = vld [vmem:[%s861_s0 + $0x40] sm:$0xff]  ;;  %v479_v16 = vld [vmem:[%s861_s0 + $0x48] sm:$0xff]  ;;  %v480_v20 = vld [vmem:[%s861_s0 + $0x50] sm:$0xff] }
   0x8   :  { %288 = vmatpush.msra.mxu2 %v33_v3  ;;  %394 = vmatpush.msra.mxu3 %v33_v3  ;;  %v497_v21 = vld [vmem:[%s861_s0 + $0x98] sm:$0xff]  ;;  %v498_v25 = vld [vmem:[%s861_s0 + $0xa0] sm:$0xff]  ;;  %v499_v29 = vld [vmem:[%s861_s0 + $0xa8] sm:$0xff] }
   0x9   :  { %76 = vmatpush.msra.mxu0 %v33_v3  ;;  %182 = vmatpush.msra.mxu1 %v33_v3  ;;  %v513_v22 = vld [vmem:[%s861_s0 + $0xd8] sm:$0xff]  ;;  %v514_v26 = vld [vmem:[%s861_s0 + $0xe0] sm:$0xff]  ;;  %v515_v30 = vld [vmem:[%s861_s0 + $0xe8] sm:$0xff] }
   0xa   :  { %289 = vmatpush.msra.mxu2 %v32_v4  ;;  %395 = vmatpush.msra.mxu3 %v32_v4  ;;  %v23_v23 = vld [vmem:[%s861_s0 + $0x18] sm:$0xff]  ;;  %v24_v27 = vld [vmem:[%s861_s0 + $0x20] sm:$0xff]  ;;  %v25_v31 = vld [vmem:[%s861_s0 + $0x28] sm:$0xff] }
   0xb   :  { %77 = vmatpush.msra.mxu0 %v32_v4  ;;  %183 = vmatpush.msra.mxu1 %v32_v4  ;;  %v481_v24 = vld [vmem:[%s861_s0 + $0x58] sm:$0xff]  ;;  %v482_v28 = vld [vmem:[%s861_s0 + $0x60] sm:$0xff]  ;;  %v483_v32 = vld [vmem:[%s861_s0 + $0x68] sm:$0xff] }
   0xc   :  { %290 = vmatpush.msra.mxu2 %v31_v5  ;;  %396 = vmatpush.msra.mxu3 %v31_v5  ;;  %v500_v33 = vld [vmem:[%s861_s0 + $0xb0] sm:$0xff]  ;;  %v501_v37 = vld [vmem:[%s861_s0 + $0xb8] sm:$0xff]  ;;  %v717_v41 = vld [vmem:[%s858_s2] ss:$0 sm:$0xff] }
   0xd   :  { %78 = vmatpush.msra.mxu0 %v31_v5  ;;  %184 = vmatpush.msra.mxu1 %v31_v5  ;;  %v516_v34 = vld [vmem:[%s861_s0 + $0xf0] sm:$0xff]  ;;  %v517_v38 = vld [vmem:[%s861_s0 + $0xf8] sm:$0xff]  ;;  %v722_v42 = vld [vmem:[%s859_s3] ss:$0 sm:$0xff] }
   0xe   :  { %291 = vmatpush.msra.mxu2 %v30_v6  ;;  %397 = vmatpush.msra.mxu3 %v30_v6  ;;  %v26_v35 = vld [vmem:[%s861_s0 + $0x30] sm:$0xff]  ;;  %v27_v39 = vld [vmem:[%s861_s0 + $0x38] sm:$0xff]  ;;  %v728_v46 = vld [vmem:[%s860_s4] ss:$0 sm:$0xff] }
   0xf   :  { %79 = vmatpush.msra.mxu0 %v30_v6  ;;  %185 = vmatpush.msra.mxu1 %v30_v6  ;;  %v484_v36 = vld [vmem:[%s861_s0 + $0x70] sm:$0xff]  ;;  %v485_v40 = vld [vmem:[%s861_s0 + $0x78] sm:$0xff] }
  0x10   :  { %292 = vmatpush.msra.mxu2 %v29_v7  ;;  %398 = vmatpush.msra.mxu3 %v29_v7 }
  0x11   :  { %80 = vmatpush.msra.mxu0 %v29_v7  ;;  %186 = vmatpush.msra.mxu1 %v29_v7 }
  0x12   :  { %293 = vmatpush.msra.mxu2 %v28_v8  ;;  %399 = vmatpush.msra.mxu3 %v28_v8 }
  0x13   :  { %502 = vmatmul.msk.f32.vlgmr.msra.gmra.mxu2 %vm41_vm0, %v494_v9  ;;  %518 = vmatmul.msk.f32.vlgmr.msra.gmra.mxu3 %vm41_vm0, %v510_v10 }
  0x14   :  { %81 = vmatpush.msra.mxu0 %v28_v8  ;;  %187 = vmatpush.msra.mxu1 %v28_v8 }
  0x15   :  { %470 = vmatmul.msk.f32.vlgmr.msra.gmra.mxu0 %vm41_vm0, %v20_v11  ;;  %486 = vmatmul.msk.f32.vlgmr.msra.gmra.mxu1 %vm41_vm0, %v478_v12 }
  0x1b   :  { %503 = vmatmul.msk.f32.gmra.mxu2 %vm41_vm0, %v495_v13  ;;  %519 = vmatmul.msk.f32.gmra.mxu3 %vm41_vm0, %v511_v14 }
  0x1d   :  { %471 = vmatmul.msk.f32.gmra.mxu0 %vm41_vm0, %v21_v15  ;;  %487 = vmatmul.msk.f32.gmra.mxu1 %vm41_vm0, %v479_v16 }
  0x23   :  { %504 = vmatmul.msk.f32.gmra.mxu2 %vm41_vm0, %v496_v17  ;;  %520 = vmatmul.msk.f32.gmra.mxu3 %vm41_vm0, %v512_v18 }
  0x25   :  { %472 = vmatmul.msk.f32.gmra.mxu0 %vm41_vm0, %v22_v19  ;;  %488 = vmatmul.msk.f32.gmra.mxu1 %vm41_vm0, %v480_v20 }
  0x2b   :  { %505 = vmatmul.msk.f32.gmra.mxu2 %vm41_vm0, %v497_v21  ;;  %521 = vmatmul.msk.f32.gmra.mxu3 %vm41_vm0, %v513_v22 }
  0x2d   :  { %473 = vmatmul.msk.f32.gmra.mxu0 %vm41_vm0, %v23_v23  ;;  %489 = vmatmul.msk.f32.gmra.mxu1 %vm41_vm0, %v481_v24 }
  0x33   :  { %506 = vmatmul.msk.f32.gmra.mxu2 %vm41_vm0, %v498_v25  ;;  %522 = vmatmul.msk.f32.gmra.mxu3 %vm41_vm0, %v514_v26 }
  0x35   :  { %474 = vmatmul.msk.f32.gmra.mxu0 %vm41_vm0, %v24_v27  ;;  %490 = vmatmul.msk.f32.gmra.mxu1 %vm41_vm0, %v482_v28 }
  0x3b   :  { %507 = vmatmul.msk.f32.gmra.mxu2 %vm41_vm0, %v499_v29  ;;  %523 = vmatmul.msk.f32.gmra.mxu3 %vm41_vm0, %v515_v30 }
  0x3d   :  { %475 = vmatmul.msk.f32.gmra.mxu0 %vm41_vm0, %v25_v31  ;;  %491 = vmatmul.msk.f32.gmra.mxu1 %vm41_vm0, %v483_v32 }
  0x43   :  { %508 = vmatmul.msk.f32.gmra.mxu2 %vm41_vm0, %v500_v33  ;;  %524 = vmatmul.msk.f32.gmra.mxu3 %vm41_vm0, %v516_v34 }
  0x45   :  { %476 = vmatmul.msk.f32.gmra.mxu0 %vm41_vm0, %v26_v35  ;;  %492 = vmatmul.msk.f32.gmra.mxu1 %vm41_vm0, %v484_v36 }
  0x4b   :  { %509 = vmatmul.msk.f32.gmra.mxu2 %vm41_vm0, %v501_v37  ;;  %525 = vmatmul.msk.f32.gmra.mxu3 %vm41_vm0, %v517_v38 }
  0x4d   :  { %477 = vmatmul.msk.f32.gmra.mxu0 %vm41_vm0, %v27_v39  ;;  %493 = vmatmul.msk.f32.gmra.mxu1 %vm41_vm0, %v485_v40 }
  0x92   :  { %v83_v43 = vpop.f32.mrf.mxu0  ;;  %v189_v44 = vpop.f32.mrf.mxu1 }
  0x93   :  { %v84_v45 = vadd.f32 %v717_v41, %v83_v43  ;;  %v190_v47 = vadd.f32 %v717_v41, %v189_v44 }
  0x95   :  { %v111_v48 = vmul.f32 %v722_v42, %v84_v45  ;;  %v213_v49 = vmul.f32 %v722_v42, %v190_v47 }
  0x96   :  { %v295_v50 = vpop.f32.mrf.mxu2  ;;  %v401_v51 = vpop.f32.mrf.mxu3 }
  0x97   :  { %v123_v52 = vadd.f32 %v728_v46, %v111_v48  ;;  %v221_v53 = vadd.f32 %v728_v46, %v213_v49  ;;  %v296_v54 = vadd.f32 %v717_v41, %v295_v50  ;;  %v402_v55 = vadd.f32 %v717_v41, %v401_v51 }
  0x99   :  { %v131_v56 = vmax.f32 %v123_v52, 0.0  ;;  %v229_v57 = vmax.f32 %v221_v53, 0.0  ;;  %v319_v58 = vmul.f32 %v722_v42, %v296_v54  ;;  %v425_v59 = vmul.f32 %v722_v42, %v402_v55 }
  0x9a   :  { %v86_v60 = vpop.f32.mrf.mxu0  ;;  %v192_v61 = vpop.f32.mrf.mxu1 }
  0x9b   :  { %v237_v62 = vmax.f32 %v131_v56, %v229_v57  ;;  %v327_v63 = vadd.f32 %v728_v46, %v319_v58  ;;  %v433_v0 = vadd.f32 %v728_v46, %v425_v59  ;;  %v87_v1 = vadd.f32 %v717_v41, %v86_v60 }
  0x9c   :  { %v193_v2 = vadd.f32 %v717_v41, %v192_v61 }
  0x9d   :  { %v335_v3 = vmax.f32 %v327_v63, 0.0  ;;  %v441_v4 = vmax.f32 %v433_v0, 0.0  ;;  %v112_v5 = vmul.f32 %v722_v42, %v87_v1 }
  0x9e   :  { %v214_v6 = vmul.f32 %v722_v42, %v193_v2  ;;  %v298_v7 = vpop.f32.mrf.mxu2  ;;  %v404_v8 = vpop.f32.mrf.mxu3 }
  0x9f   :  { %v343_v9 = vmax.f32 %v237_v62, %v335_v3  ;;  %v124_v10 = vadd.f32 %v728_v46, %v112_v5  ;;  %v299_v11 = vadd.f32 %v717_v41, %v298_v7  ;;  %v405_v12 = vadd.f32 %v717_v41, %v404_v8 }
  0xa0   :  { %v222_v13 = vadd.f32 %v728_v46, %v214_v6 }
  0xa1   :  { %v449_v14 = vmax.f32 %v343_v9, %v441_v4  ;;  %v132_v15 = vmax.f32 %v124_v10, 0.0  ;;  %v320_v16 = vmul.f32 %v722_v42, %v299_v11  ;;  %v426_v17 = vmul.f32 %v722_v42, %v405_v12 }
  0xa2   :  { %v230_v18 = vmax.f32 %v222_v13, 0.0  ;;  %v89_v19 = vpop.f32.mrf.mxu0  ;;  %v195_v20 = vpop.f32.mrf.mxu1 }
  0xa3   :  { %458 = vst.msk [vmem:[%s862_s5] sm:$0xff] %vm457_vm1, %v449_v14  ;;  %v328_v21 = vadd.f32 %v728_v46, %v320_v16  ;;  %v434_v22 = vadd.f32 %v728_v46, %v426_v17  ;;  %v90_v23 = vadd.f32 %v717_v41, %v89_v19  ;;  %v196_v24 = vadd.f32 %v717_v41, %v195_v20 }
  0xa4   :  { %v238_v25 = vmax.f32 %v132_v15, %v230_v18 }
  0xa5   :  { %v336_v26 = vmax.f32 %v328_v21, 0.0  ;;  %v442_v27 = vmax.f32 %v434_v22, 0.0  ;;  %v113_v28 = vmul.f32 %v722_v42, %v90_v23  ;;  %v215_v29 = vmul.f32 %v722_v42, %v196_v24 }
  0xa6   :  { %v301_v30 = vpop.f32.mrf.mxu2  ;;  %v407_v31 = vpop.f32.mrf.mxu3 }
  0xa7   :  { %v344_v32 = vmax.f32 %v238_v25, %v336_v26  ;;  %v125_v33 = vadd.f32 %v728_v46, %v113_v28  ;;  %v223_v34 = vadd.f32 %v728_v46, %v215_v29  ;;  %v302_v35 = vadd.f32 %v717_v41, %v301_v30 }
  0xa8   :  { %v408_v36 = vadd.f32 %v717_v41, %v407_v31 }
  0xa9   :  { %v450_v37 = vmax.f32 %v344_v32, %v442_v27  ;;  %v133_v38 = vmax.f32 %v125_v33, 0.0  ;;  %v231_v39 = vmax.f32 %v223_v34, 0.0  ;;  %v321_v40 = vmul.f32 %v722_v42, %v302_v35 }
  0xaa   :  { %v427_v43 = vmul.f32 %v722_v42, %v408_v36  ;;  %v92_v44 = vpop.f32.mrf.mxu0  ;;  %v198_v45 = vpop.f32.mrf.mxu1 }
  0xab   :  { %459 = vst.msk [vmem:[%s862_s5 + $0x8] sm:$0xff] %vm457_vm1, %v450_v37  ;;  %v239_v47 = vmax.f32 %v133_v38, %v231_v39  ;;  %v329_v48 = vadd.f32 %v728_v46, %v321_v40  ;;  %v93_v49 = vadd.f32 %v717_v41, %v92_v44  ;;  %v199_v50 = vadd.f32 %v717_v41, %v198_v45 }
  0xac   :  { %v435_v51 = vadd.f32 %v728_v46, %v427_v43 }
  0xad   :  { %v337_v52 = vmax.f32 %v329_v48, 0.0  ;;  %v114_v53 = vmul.f32 %v722_v42, %v93_v49  ;;  %v216_v54 = vmul.f32 %v722_v42, %v199_v50 }
  0xae   :  { %v443_v55 = vmax.f32 %v435_v51, 0.0  ;;  %v304_v56 = vpop.f32.mrf.mxu2  ;;  %v410_v57 = vpop.f32.mrf.mxu3 }
  0xaf   :  { %v345_v58 = vmax.f32 %v239_v47, %v337_v52  ;;  %v126_v59 = vadd.f32 %v728_v46, %v114_v53  ;;  %v224_v60 = vadd.f32 %v728_v46, %v216_v54  ;;  %v305_v61 = vadd.f32 %v717_v41, %v304_v56 }
  0xb0   :  { %v411_v62 = vadd.f32 %v717_v41, %v410_v57 }
  0xb1   :  { %v451_v63 = vmax.f32 %v345_v58, %v443_v55  ;;  %v134_v0 = vmax.f32 %v126_v59, 0.0  ;;  %v232_v1 = vmax.f32 %v224_v60, 0.0  ;;  %v322_v2 = vmul.f32 %v722_v42, %v305_v61 }
  0xb2   :  { %v428_v3 = vmul.f32 %v722_v42, %v411_v62  ;;  %v95_v4 = vpop.f32.mrf.mxu0  ;;  %v201_v5 = vpop.f32.mrf.mxu1 }
  0xb3   :  { %460 = vst.msk [vmem:[%s862_s5 + $0x10] sm:$0xff] %vm457_vm1, %v451_v63  ;;  %v240_v6 = vmax.f32 %v134_v0, %v232_v1  ;;  %v330_v7 = vadd.f32 %v728_v46, %v322_v2  ;;  %v96_v8 = vadd.f32 %v717_v41, %v95_v4  ;;  %v202_v9 = vadd.f32 %v717_v41, %v201_v5 }
  0xb4   :  { %v436_v10 = vadd.f32 %v728_v46, %v428_v3 }
  0xb5   :  { %v338_v11 = vmax.f32 %v330_v7, 0.0  ;;  %v115_v12 = vmul.f32 %v722_v42, %v96_v8  ;;  %v217_v13 = vmul.f32 %v722_v42, %v202_v9 }
  0xb6   :  { %v444_v14 = vmax.f32 %v436_v10, 0.0  ;;  %v307_v15 = vpop.f32.mrf.mxu2  ;;  %v413_v16 = vpop.f32.mrf.mxu3 }
  0xb7   :  { %v346_v17 = vmax.f32 %v240_v6, %v338_v11  ;;  %v127_v18 = vadd.f32 %v728_v46, %v115_v12  ;;  %v225_v19 = vadd.f32 %v728_v46, %v217_v13  ;;  %v308_v20 = vadd.f32 %v717_v41, %v307_v15 }
  0xb8   :  { %v414_v21 = vadd.f32 %v717_v41, %v413_v16 }
  0xb9   :  { %v452_v22 = vmax.f32 %v346_v17, %v444_v14  ;;  %v135_v23 = vmax.f32 %v127_v18, 0.0  ;;  %v233_v24 = vmax.f32 %v225_v19, 0.0  ;;  %v323_v25 = vmul.f32 %v722_v42, %v308_v20 }
  0xba   :  { %v429_v26 = vmul.f32 %v722_v42, %v414_v21  ;;  %v98_v27 = vpop.f32.mrf.mxu0  ;;  %v204_v28 = vpop.f32.mrf.mxu1 }
  0xbb   :  { %461 = vst.msk [vmem:[%s862_s5 + $0x18] sm:$0xff] %vm457_vm1, %v452_v22  ;;  %v241_v29 = vmax.f32 %v135_v23, %v233_v24  ;;  %v331_v30 = vadd.f32 %v728_v46, %v323_v25  ;;  %v99_v31 = vadd.f32 %v717_v41, %v98_v27  ;;  %v205_v32 = vadd.f32 %v717_v41, %v204_v28 }
  0xbc   :  { %v437_v33 = vadd.f32 %v728_v46, %v429_v26 }
  0xbd   :  { %v339_v34 = vmax.f32 %v331_v30, 0.0  ;;  %v116_v35 = vmul.f32 %v722_v42, %v99_v31  ;;  %v218_v36 = vmul.f32 %v722_v42, %v205_v32 }
  0xbe   :  { %v445_v37 = vmax.f32 %v437_v33, 0.0  ;;  %v310_v38 = vpop.f32.mrf.mxu2  ;;  %v416_v39 = vpop.f32.mrf.mxu3 }
  0xbf   :  { %v347_v40 = vmax.f32 %v241_v29, %v339_v34  ;;  %v128_v43 = vadd.f32 %v728_v46, %v116_v35  ;;  %v226_v44 = vadd.f32 %v728_v46, %v218_v36  ;;  %v311_v45 = vadd.f32 %v717_v41, %v310_v38 }
  0xc0   :  { %v417_v47 = vadd.f32 %v717_v41, %v416_v39 }
  0xc1   :  { %v453_v48 = vmax.f32 %v347_v40, %v445_v37  ;;  %v136_v49 = vmax.f32 %v128_v43, 0.0  ;;  %v234_v50 = vmax.f32 %v226_v44, 0.0  ;;  %v324_v51 = vmul.f32 %v722_v42, %v311_v45 }
  0xc2   :  { %v430_v52 = vmul.f32 %v722_v42, %v417_v47  ;;  %v101_v53 = vpop.f32.mrf.mxu0  ;;  %v207_v54 = vpop.f32.mrf.mxu1 }
  0xc3   :  { %462 = vst.msk [vmem:[%s862_s5 + $0x20] sm:$0xff] %vm457_vm1, %v453_v48  ;;  %v242_v55 = vmax.f32 %v136_v49, %v234_v50  ;;  %v332_v56 = vadd.f32 %v728_v46, %v324_v51  ;;  %v102_v57 = vadd.f32 %v717_v41, %v101_v53  ;;  %v208_v58 = vadd.f32 %v717_v41, %v207_v54 }
  0xc4   :  { %v438_v59 = vadd.f32 %v728_v46, %v430_v52 }
  0xc5   :  { %v340_v60 = vmax.f32 %v332_v56, 0.0  ;;  %v117_v61 = vmul.f32 %v722_v42, %v102_v57  ;;  %v219_v62 = vmul.f32 %v722_v42, %v208_v58 }
  0xc6   :  { %v446_v63 = vmax.f32 %v438_v59, 0.0  ;;  %v313_v0 = vpop.f32.mrf.mxu2  ;;  %v419_v1 = vpop.f32.mrf.mxu3 }
  0xc7   :  { %v348_v2 = vmax.f32 %v242_v55, %v340_v60  ;;  %v129_v3 = vadd.f32 %v728_v46, %v117_v61  ;;  %v227_v4 = vadd.f32 %v728_v46, %v219_v62  ;;  %v314_v5 = vadd.f32 %v717_v41, %v313_v0 }
  0xc8   :  { %v420_v6 = vadd.f32 %v717_v41, %v419_v1 }
  0xc9   :  { %v454_v7 = vmax.f32 %v348_v2, %v446_v63  ;;  %v137_v8 = vmax.f32 %v129_v3, 0.0  ;;  %v235_v9 = vmax.f32 %v227_v4, 0.0  ;;  %v325_v10 = vmul.f32 %v722_v42, %v314_v5 }
  0xca   :  { %v431_v11 = vmul.f32 %v722_v42, %v420_v6  ;;  %v104_v12 = vpop.f32.mrf.mxu0  ;;  %v210_v13 = vpop.f32.mrf.mxu1 }
  0xcb   :  { %463 = vst.msk [vmem:[%s862_s5 + $0x28] sm:$0xff] %vm457_vm1, %v454_v7  ;;  %v243_v14 = vmax.f32 %v137_v8, %v235_v9  ;;  %v333_v15 = vadd.f32 %v728_v46, %v325_v10  ;;  %v105_v16 = vadd.f32 %v717_v41, %v104_v12  ;;  %v211_v17 = vadd.f32 %v717_v41, %v210_v13 }
  0xcc   :  { %v439_v18 = vadd.f32 %v728_v46, %v431_v11 }
  0xcd   :  { %v341_v19 = vmax.f32 %v333_v15, 0.0  ;;  %v118_v20 = vmul.f32 %v722_v42, %v105_v16  ;;  %v220_v21 = vmul.f32 %v722_v42, %v211_v17 }
  0xce   :  { %v447_v22 = vmax.f32 %v439_v18, 0.0  ;;  %v316_v23 = vpop.f32.mrf.mxu2  ;;  %v422_v24 = vpop.f32.mrf.mxu3 }
  0xcf   :  { %v349_v25 = vmax.f32 %v243_v14, %v341_v19  ;;  %v130_v26 = vadd.f32 %v728_v46, %v118_v20  ;;  %v228_v27 = vadd.f32 %v728_v46, %v220_v21  ;;  %v317_v28 = vadd.f32 %v717_v41, %v316_v23 }
  0xd0   :  { %v423_v29 = vadd.f32 %v717_v41, %v422_v24 }
  0xd1   :  { %v455_v30 = vmax.f32 %v349_v25, %v447_v22  ;;  %v138_v31 = vmax.f32 %v130_v26, 0.0  ;;  %v236_v32 = vmax.f32 %v228_v27, 0.0  ;;  %v326_v33 = vmul.f32 %v722_v42, %v317_v28 }
  0xd2   :  { %v432_v34 = vmul.f32 %v722_v42, %v423_v29 }
  0xd3   :  { %464 = vst.msk [vmem:[%s862_s5 + $0x30] sm:$0xff] %vm457_vm1, %v455_v30  ;;  %v244_v35 = vmax.f32 %v138_v31, %v236_v32  ;;  %v334_v36 = vadd.f32 %v728_v46, %v326_v33 }
  0xd4   :  { %v440_v37 = vadd.f32 %v728_v46, %v432_v34 }
  0xd5   :  { %v342_v38 = vmax.f32 %v334_v36, 0.0 }
  0xd6   :  { %v448_v39 = vmax.f32 %v440_v37, 0.0 }
  0xd7   :  { %v350_v41 = vmax.f32 %v244_v35, %v342_v38 }
  0xd9   :  { %v456_v40 = vmax.f32 %v350_v41, %v448_v39 }
  0xdb   :  { %465 = vst.msk [vmem:[%s862_s5 + $0x38] sm:$0xff] %vm457_vm1, %v456_v40 }

// kernel: seldnet_forward.7
= control target key start
LH: loop header
LB: loop body
LE: loop exit
PB: predicated region body
PF: predicated region fallthrough
CT: control target
= control target key end

     0   :  { %vm46_vm0 = vcmask 130048   ;;  %vm308_vm1 = vcmask 261120   ;;  %s513_s1 = inlined_call_operand.vmem [shape: f32[144,32], index: 1, kind: input, shape index: {}]   ;;  %s514_s0 = inlined_call_operand.vmem [shape: f32[4,16,144], index: 0, kind: input, shape index: {}]   ;;  %s515_s2 = inlined_call_operand.vmem [shape: f32[1,32], index: 2, kind: input, shape index: {}]   ;;  %s516_s3 = inlined_call_operand.vmem [shape: f32[1,32], index: 3, kind: input, shape index: {}]   ;;  %s517_s4 = inlined_call_operand.vmem [shape: f32[1,32], index: 4, kind: input, shape index: {}]   ;;  %s518_s5 = inlined_call_operand.vmem [shape: f32[16,32], index: 5, kind: output, shape index: {}]  }
   0x1   :  { %v39_v0 = vld [vmem:[%s513_s1 + $0x78] sm:$0xff]  ;;  %v378_v1 = vld [vmem:[%s513_s1 + $0x88] sm:$0xff]  ;;  %v38_v2 = vld [vmem:[%s513_s1 + $0x70] sm:$0xff] }
   0x2   :  { %53 = vmatpush.msra.mxu0 %v39_v0  ;;  %90 = vmatpush.msra.mxu1 %v378_v1  ;;  %v387_v3 = vld [vmem:[%s513_s1 + $0x80] sm:$0xff]  ;;  %v37_v4 = vld [vmem:[%s513_s1 + $0x68] sm:$0xff]  ;;  %v320_v6 = vld [vmem:[%s514_s0 + $0x38] sm:$0xff] }
   0x3   :  { %124 = vmatpush.msra.mxu2 %v39_v0  ;;  %335 = vmatpush.msra.mxu3 %v378_v1  ;;  %v36_v5 = vld [vmem:[%s513_s1 + $0x60] sm:$0xff]  ;;  %v35_v7 = vld [vmem:[%s513_s1 + $0x58] sm:$0xff]  ;;  %v34_v8 = vld [vmem:[%s513_s1 + $0x50] sm:$0xff] }
   0x4   :  { %54 = vmatpush.msra.mxu0 %v38_v2  ;;  %91 = vmatpush.msra.mxu1 %v387_v3  ;;  %v33_v9 = vld [vmem:[%s513_s1 + $0x48] sm:$0xff]  ;;  %v32_v10 = vld [vmem:[%s513_s1 + $0x40] sm:$0xff]  ;;  %v31_v11 = vld [vmem:[%s513_s1 + $0x38] sm:$0xff] }
   0x5   :  { %125 = vmatpush.msra.mxu2 %v38_v2  ;;  %336 = vmatpush.msra.mxu3 %v387_v3  ;;  %v30_v12 = vld [vmem:[%s513_s1 + $0x30] sm:$0xff]  ;;  %v21_v13 = vld [vmem:[%s514_s0 + $0x8] sm:$0xff]  ;;  %v28_v16 = vld [vmem:[%s513_s1 + $0x20] sm:$0xff] }
   0x6   :  { %189 = vmatpush.msrb.mxu1 %v39_v0  ;;  %55 = vmatpush.msra.mxu0 %v37_v4  ;;  %v29_v14 = vld [vmem:[%s513_s1 + $0x28] sm:$0xff]  ;;  %v27_v17 = vld [vmem:[%s513_s1 + $0x18] sm:$0xff]  ;;  %v26_v18 = vld [vmem:[%s513_s1 + $0x10] sm:$0xff] }
   0x7   :  { %226 = vmatpush.msrb.mxu3 %v378_v1  ;;  %126 = vmatpush.msra.mxu2 %v37_v4  ;;  %v324_v15 = vld [vmem:[%s514_s0 + $0x48] sm:$0xff]  ;;  %v23_v19 = vld [vmem:[%s514_s0 + $0x18] sm:$0xff]  ;;  %v24_v22 = vld [vmem:[%s513_s1] sm:$0xff] }
   0x8   :  { %190 = vmatpush.msrb.mxu1 %v38_v2  ;;  %56 = vmatpush.msra.mxu0 %v36_v5  ;;  %v25_v20 = vld [vmem:[%s513_s1 + $0x8] sm:$0xff]  ;;  %v326_v21 = vld [vmem:[%s514_s0 + $0x58] sm:$0xff]  ;;  %v20_v23 = vld [vmem:[%s514_s0] sm:$0xff] }
   0x9   :  { %227 = vmatpush.msrb.mxu3 %v387_v3  ;;  %127 = vmatpush.msra.mxu2 %v36_v5  ;;  %v317_v24 = vld [vmem:[%s514_s0 + $0x20] sm:$0xff]  ;;  %v22_v27 = vld [vmem:[%s514_s0 + $0x10] sm:$0xff]  ;;  %v318_v31 = vld [vmem:[%s514_s0 + $0x28] sm:$0xff] }
   0xa   :  { %322 = vmatmul.msk.f32.vlgmr.msra.gmra.mxu3 %vm46_vm0, %v320_v6  ;;  %191 = vmatpush.msrb.mxu1 %v37_v4  ;;  %v323_v25 = vld [vmem:[%s514_s0 + $0x40] sm:$0xff]  ;;  %v319_v28 = vld [vmem:[%s514_s0 + $0x30] sm:$0xff]  ;;  %v330_v32 = vld [vmem:[%s514_s0 + $0x68] sm:$0xff] }
   0xb   :  { %254 = vmatpush.msra.mxu3 %v39_v0  ;;  %57 = vmatpush.msra.mxu0 %v35_v7  ;;  %v329_v26 = vld [vmem:[%s514_s0 + $0x60] sm:$0xff]  ;;  %v325_v29 = vld [vmem:[%s514_s0 + $0x50] sm:$0xff]  ;;  %v332_v33 = vld [vmem:[%s514_s0 + $0x78] sm:$0xff] }
   0xc   :  { %128 = vmatpush.msra.mxu2 %v35_v7  ;;  %192 = vmatpush.msrb.mxu1 %v36_v5  ;;  %v331_v30 = vld [vmem:[%s514_s0 + $0x70] sm:$0xff]  ;;  %v339_v42 = vld [vmem:[%s515_s2] ss:$0 sm:$0xff] }
   0xd   :  { %255 = vmatpush.msra.mxu3 %v38_v2  ;;  %58 = vmatpush.msra.mxu0 %v34_v8  ;;  %v340_v50 = vld [vmem:[%s516_s3] ss:$0 sm:$0xff] }
   0xe   :  { %129 = vmatpush.msra.mxu2 %v34_v8  ;;  %193 = vmatpush.msrb.mxu1 %v35_v7  ;;  %v341_v59 = vld [vmem:[%s517_s4] ss:$0 sm:$0xff] }
   0xf   :  { %256 = vmatpush.msra.mxu3 %v37_v4  ;;  %59 = vmatpush.msra.mxu0 %v33_v9 }
  0x10   :  { %130 = vmatpush.msra.mxu2 %v33_v9  ;;  %194 = vmatpush.msrb.mxu1 %v34_v8 }
  0x11   :  { %257 = vmatpush.msra.mxu3 %v36_v5  ;;  %60 = vmatpush.msra.mxu0 %v32_v10 }
  0x12   :  { %131 = vmatpush.msra.mxu2 %v32_v10  ;;  %195 = vmatpush.msrb.mxu1 %v33_v9 }
  0x13   :  { %258 = vmatpush.msra.mxu3 %v35_v7  ;;  %61 = vmatpush.msra.mxu0 %v31_v11 }
  0x14   :  { %132 = vmatpush.msra.mxu2 %v31_v11  ;;  %196 = vmatpush.msrb.mxu1 %v32_v10 }
  0x15   :  { %259 = vmatpush.msra.mxu3 %v34_v8  ;;  %62 = vmatpush.msra.mxu0 %v30_v12 }
  0x16   :  { %315 = vmatmul.msk.f32.vlgmr.msra.gmra.mxu1 %vm46_vm0, %v21_v13  ;;  %133 = vmatpush.msra.mxu2 %v30_v12 }
  0x17   :  { %260 = vmatpush.msra.mxu3 %v33_v9  ;;  %197 = vmatpush.msrb.mxu1 %v31_v11 }
  0x18   :  { %63 = vmatpush.msra.mxu0 %v29_v14  ;;  %134 = vmatpush.msra.mxu2 %v29_v14 }
  0x19   :  { %261 = vmatpush.msra.mxu3 %v32_v10  ;;  %198 = vmatpush.msrb.mxu1 %v30_v12 }
  0x1a   :  { %327 = vmatmul.msk.f32.vlgmr.msrb.gmra.mxu3 %vm46_vm0, %v324_v15  ;;  %64 = vmatpush.msra.mxu0 %v28_v16 }
  0x1b   :  { %135 = vmatpush.msra.mxu2 %v28_v16  ;;  %262 = vmatpush.msra.mxu3 %v31_v11 }
  0x1c   :  { %199 = vmatpush.msrb.mxu1 %v29_v14  ;;  %65 = vmatpush.msra.mxu0 %v27_v17 }
  0x1d   :  { %136 = vmatpush.msra.mxu2 %v27_v17  ;;  %263 = vmatpush.msra.mxu3 %v30_v12 }
  0x1e   :  { %200 = vmatpush.msrb.mxu1 %v28_v16  ;;  %66 = vmatpush.msra.mxu0 %v26_v18 }
  0x1f   :  { %316 = vmatmul.msk.f32.gmra.mxu1 %vm46_vm0, %v23_v19  ;;  %137 = vmatpush.msra.mxu2 %v26_v18 }
  0x20   :  { %264 = vmatpush.msra.mxu3 %v29_v14  ;;  %201 = vmatpush.msrb.mxu1 %v27_v17 }
  0x21   :  { %67 = vmatpush.msra.mxu0 %v25_v20  ;;  %138 = vmatpush.msra.mxu2 %v25_v20 }
  0x22   :  { %265 = vmatpush.msra.mxu3 %v28_v16  ;;  %202 = vmatpush.msrb.mxu1 %v26_v18 }
  0x23   :  { %328 = vmatmul.msk.f32.gmra.mxu3 %vm46_vm0, %v326_v21  ;;  %68 = vmatpush.msra.mxu0 %v24_v22 }
  0x24   :  { %139 = vmatpush.msra.mxu2 %v24_v22  ;;  %266 = vmatpush.msra.mxu3 %v27_v17 }
  0x25   :  { %69 = vmatmul.f32.vlgmr.msra.gmra.mxu0 %v20_v23  ;;  %140 = vmatmul.f32.vlgmr.msra.gmra.mxu2 %v317_v24 }
  0x26   :  { %161 = vmatpush.msrb.mxu2 %v378_v1  ;;  %203 = vmatpush.msrb.mxu1 %v25_v20 }
  0x27   :  { %267 = vmatpush.msra.mxu3 %v26_v18  ;;  %291 = vmatpush.msrb.mxu0 %v378_v1 }
  0x28   :  { %204 = vmatpush.msrb.mxu1 %v24_v22  ;;  %162 = vmatpush.msrb.mxu2 %v387_v3 }
  0x29   :  { %205 = vmatmul.f32.vlgmr.msrb.gmra.mxu1 %v323_v25  ;;  %268 = vmatpush.msra.mxu3 %v25_v20 }
  0x2a   :  { %337 = vmatpush.msra.mxu1 %v378_v1  ;;  %292 = vmatpush.msrb.mxu0 %v387_v3 }
  0x2b   :  { %269 = vmatpush.msra.mxu3 %v24_v22 }
  0x2c   :  { %270 = vmatmul.f32.vlgmr.msra.gmra.mxu3 %v329_v26  ;;  %338 = vmatpush.msra.mxu1 %v387_v3 }
  0x2d   :  { %72 = vmatmul.f32.gmra.mxu0 %v22_v27  ;;  %143 = vmatmul.f32.gmra.mxu2 %v319_v28 }
  0x31   :  { %208 = vmatmul.f32.gmra.mxu1 %v325_v29 }
  0x34   :  { %273 = vmatmul.f32.gmra.mxu3 %v331_v30 }
  0x35   :  { %321 = vmatmul.msk.f32.vlgmr.msrb.gmra.mxu2 %vm46_vm0, %v318_v31  ;;  %333 = vmatmul.msk.f32.vlgmr.msrb.gmra.mxu0 %vm46_vm0, %v330_v32 }
  0x39   :  { %334 = vmatmul.msk.f32.vlgmr.msra.gmra.mxu1 %vm46_vm0, %v332_v33 }
  0x8d   :  { %v167_v35 = vpop.f32.mrf.mxu3 }
  0x93   :  { %v93_v34 = vpop.f32.mrf.mxu1 }
  0x9c   :  { %v96_v36 = vpop.f32.mrf.mxu1 }
  0x9d   :  { %v229_v37 = vpop.f32.mrf.mxu3 }
  0xa2   :  { %v70_v38 = vpop.f32.mrf.mxu0 }
  0xa3   :  { %v71_v47 = vadd.f32 %v339_v42, %v70_v38 }
  0xa5   :  { %v94_v56 = vadd.f32 %v93_v34, %v71_v47 }
  0xa6   :  { %v206_v39 = vpop.f32.mrf.mxu1  ;;  %v232_v40 = vpop.f32.mrf.mxu3 }
  0xa7   :  { %v207_v52 = vadd.f32 %v339_v42, %v206_v39  ;;  %v103_v1 = vmul.f32 %v340_v50, %v94_v56 }
  0xa8   :  { %v141_v41 = vpop.f32.mrf.mxu2 }
  0xa9   :  { %v230_v61 = vadd.f32 %v229_v37, %v207_v52  ;;  %v142_v2 = vadd.f32 %v339_v42, %v141_v41  ;;  %v109_v15 = vadd.f32 %v341_v59, %v103_v1 }
  0xaa   :  { %v73_v43 = vpop.f32.mrf.mxu0 }
  0xab   :  { %v74_v44 = vadd.f32 %v339_v42, %v73_v43  ;;  %v235_v9 = vmul.f32 %v340_v50, %v230_v61  ;;  %v111_v24 = vmax.f32 %v109_v15, 0.0 }
  0xad   :  { %v97_v45 = vadd.f32 %v96_v36, %v74_v44  ;;  %v237_v20 = vadd.f32 %v341_v59, %v235_v9 }
  0xae   :  { %v209_v46 = vpop.f32.mrf.mxu1 }
  0xaf   :  { %v210_v48 = vadd.f32 %v339_v42, %v209_v46  ;;  %v271_v49 = vpop.f32.mrf.mxu3  ;;  %v104_v54 = vmul.f32 %v340_v50, %v97_v45  ;;  %v239_v29 = vmax.f32 %v237_v20, 0.0 }
  0xb0   :  { %v144_v51 = vpop.f32.mrf.mxu2  ;;  %v272_v57 = vadd.f32 %v339_v42, %v271_v49 }
  0xb1   :  { %v145_v53 = vadd.f32 %v339_v42, %v144_v51  ;;  %v233_v55 = vadd.f32 %v232_v40, %v210_v48  ;;  %v110_v63 = vadd.f32 %v341_v59, %v104_v54 }
  0xb2   :  { %v294_v60 = vpop.f32.mrf.mxu0 }
  0xb3   :  { %v168_v58 = vadd.f32 %v167_v35, %v145_v53  ;;  %v236_v0 = vmul.f32 %v340_v50, %v233_v55  ;;  %v295_v4 = vadd.f32 %v294_v60, %v272_v57  ;;  %v112_v12 = vmax.f32 %v110_v63, 0.0 }
  0xb5   :  { %v171_v62 = vmul.f32 %v340_v50, %v168_v58  ;;  %v238_v13 = vadd.f32 %v341_v59, %v236_v0  ;;  %v300_v16 = vmul.f32 %v340_v50, %v295_v4 }
  0xb6   :  { %v297_v6 = vpop.f32.mrf.mxu1 }
  0xb7   :  { %v173_v3 = vadd.f32 %v341_v59, %v171_v62  ;;  %v274_v5 = vpop.f32.mrf.mxu3  ;;  %v240_v22 = vmax.f32 %v238_v13, 0.0  ;;  %v302_v25 = vadd.f32 %v341_v59, %v300_v16 }
  0xb8   :  { %v275_v7 = vadd.f32 %v339_v42, %v274_v5  ;;  %v164_v8 = vpop.f32.mrf.mxu2 }
  0xb9   :  { %v175_v10 = vmax.f32 %v173_v3, 0.0  ;;  %v165_v11 = vadd.f32 %v164_v8, %v142_v2  ;;  %v304_v32 = vmax.f32 %v302_v25, 0.0 }
  0xba   :  { %v298_v14 = vadd.f32 %v297_v6, %v275_v7 }
  0xbb   :  { %v170_v17 = vmul.f32 %v340_v50, %v165_v11  ;;  %v177_v18 = vmax.f32 %v112_v12, %v175_v10 }
  0xbc   :  { %v301_v19 = vmul.f32 %v340_v50, %v298_v14 }
  0xbd   :  { %v172_v21 = vadd.f32 %v341_v59, %v170_v17  ;;  %v242_v27 = vmax.f32 %v177_v18, %v240_v22 }
  0xbe   :  { %v303_v23 = vadd.f32 %v341_v59, %v301_v19 }
  0xbf   :  { %v174_v26 = vmax.f32 %v172_v21, 0.0 }
  0xc0   :  { %v305_v28 = vmax.f32 %v303_v23, 0.0 }
  0xc1   :  { %v176_v30 = vmax.f32 %v111_v24, %v174_v26 }
  0xc2   :  { %v307_v31 = vmax.f32 %v242_v27, %v305_v28 }
  0xc3   :  { %v241_v33 = vmax.f32 %v176_v30, %v239_v29 }
  0xc4   :  { %310 = vst.msk [vmem:[%s518_s5 + $0x8] sm:$0xff] %vm308_vm1, %v307_v31 }
  0xc5   :  { %v306_v34 = vmax.f32 %v241_v33, %v304_v32 }
  0xc7   :  { %309 = vst.msk [vmem:[%s518_s5] sm:$0xff] %vm308_vm1, %v306_v34 }

// kernel: seldnet_forward.8
= control target key start
LH: loop header
LB: loop body
LE: loop exit
PB: predicated region body
PF: predicated region fallthrough
CT: control target
= control target key end

     0   :  { %vm66_vm0 = vcmask 261120   ;;  %vm156_vm1 = vcmask 523264   ;;  %s357_s1 = inlined_call_operand.vmem [shape: f32[288,64], index: 1, kind: input, shape index: {}]   ;;  %s358_s0 = inlined_call_operand.vmem [shape: f32[1,16,288], index: 0, kind: input, shape index: {}]   ;;  %s359_s2 = inlined_call_operand.vmem [shape: f32[1,64], index: 2, kind: input, shape index: {}]   ;;  %s360_s3 = inlined_call_operand.vmem [shape: f32[1,64], index: 3, kind: input, shape index: {}]   ;;  %s361_s4 = inlined_call_operand.vmem [shape: f32[1,64], index: 4, kind: input, shape index: {}]   ;;  %s362_s5 = inlined_call_operand.vmem [shape: f32[16,64], index: 5, kind: output, shape index: {}]  }
   0x1   :  { %v41_v0 = vld [vmem:[%s357_s1 + $0x78] sm:$0xff]  ;;  %v40_v2 = vld [vmem:[%s357_s1 + $0x70] sm:$0xff]  ;;  %v39_v4 = vld [vmem:[%s357_s1 + $0x68] sm:$0xff] }
   0x2   :  { %v57_v1 = vld [vmem:[%s357_s1 + $0xf8] sm:$0xff]  ;;  %73 = vmatpush.msra.mxu0 %v41_v0  ;;  %165 = vmatpush.msra.mxu3 %v41_v0  ;;  %v56_v3 = vld [vmem:[%s357_s1 + $0xf0] sm:$0xff]  ;;  %v55_v5 = vld [vmem:[%s357_s1 + $0xe8] sm:$0xff] }
   0x3   :  { %96 = vmatpush.msra.mxu1 %v57_v1  ;;  %v38_v6 = vld [vmem:[%s357_s1 + $0x60] sm:$0xff]  ;;  %v37_v8 = vld [vmem:[%s357_s1 + $0x58] sm:$0xff]  ;;  %v36_v11 = vld [vmem:[%s357_s1 + $0x50] sm:$0xff] }
   0x4   :  { %74 = vmatpush.msra.mxu0 %v40_v2  ;;  %166 = vmatpush.msra.mxu3 %v40_v2  ;;  %v54_v7 = vld [vmem:[%s357_s1 + $0xe0] sm:$0xff]  ;;  %v53_v9 = vld [vmem:[%s357_s1 + $0xd8] sm:$0xff]  ;;  %v60_v12 = vld [vmem:[%s357_s1 + $0x110] sm:$0xff] }
   0x5   :  { %97 = vmatpush.msra.mxu1 %v56_v3  ;;  %v61_v10 = vld [vmem:[%s357_s1 + $0x118] sm:$0xff]  ;;  %v52_v13 = vld [vmem:[%s357_s1 + $0xd0] sm:$0xff]  ;;  %v59_v14 = vld [vmem:[%s357_s1 + $0x108] sm:$0xff] }
   0x6   :  { %75 = vmatpush.msra.mxu0 %v39_v4  ;;  %167 = vmatpush.msra.mxu3 %v39_v4  ;;  %v35_v15 = vld [vmem:[%s357_s1 + $0x48] sm:$0xff]  ;;  %v58_v17 = vld [vmem:[%s357_s1 + $0x100] sm:$0xff]  ;;  %v22_v20 = vld [vmem:[%s358_s0 + $0x10] sm:$0xff] }
   0x7   :  { %98 = vmatpush.msra.mxu1 %v55_v5  ;;  %131 = vmatpush.msra.mxu2 %v61_v10  ;;  %v51_v16 = vld [vmem:[%s357_s1 + $0xc8] sm:$0xff]  ;;  %v34_v18 = vld [vmem:[%s357_s1 + $0x40] sm:$0xff]  ;;  %v33_v21 = vld [vmem:[%s357_s1 + $0x38] sm:$0xff] }
   0x8   :  { %76 = vmatpush.msra.mxu0 %v38_v6  ;;  %168 = vmatpush.msra.mxu3 %v38_v6  ;;  %v50_v19 = vld [vmem:[%s357_s1 + $0xc0] sm:$0xff]  ;;  %v49_v22 = vld [vmem:[%s357_s1 + $0xb8] sm:$0xff]  ;;  %v32_v23 = vld [vmem:[%s357_s1 + $0x30] sm:$0xff] }
   0x9   :  { %99 = vmatpush.msra.mxu1 %v54_v7  ;;  %132 = vmatpush.msra.mxu2 %v60_v12  ;;  %v48_v24 = vld [vmem:[%s357_s1 + $0xb0] sm:$0xff]  ;;  %v31_v25 = vld [vmem:[%s357_s1 + $0x28] sm:$0xff]  ;;  %v30_v27 = vld [vmem:[%s357_s1 + $0x20] sm:$0xff] }
   0xa   :  { %77 = vmatpush.msra.mxu0 %v37_v8  ;;  %169 = vmatpush.msra.mxu3 %v37_v8  ;;  %v47_v26 = vld [vmem:[%s357_s1 + $0xa8] sm:$0xff]  ;;  %v46_v28 = vld [vmem:[%s357_s1 + $0xa0] sm:$0xff]  ;;  %v29_v30 = vld [vmem:[%s357_s1 + $0x18] sm:$0xff] }
   0xb   :  { %100 = vmatpush.msra.mxu1 %v53_v9  ;;  %133 = vmatpush.msra.mxu2 %v59_v14  ;;  %v25_v29 = vld [vmem:[%s358_s0 + $0x28] sm:$0xff]  ;;  %v45_v31 = vld [vmem:[%s357_s1 + $0x98] sm:$0xff]  ;;  %v28_v32 = vld [vmem:[%s357_s1 + $0x10] sm:$0xff] }
   0xc   :  { %78 = vmatpush.msra.mxu0 %v36_v11  ;;  %170 = vmatpush.msra.mxu3 %v36_v11  ;;  %v44_v33 = vld [vmem:[%s357_s1 + $0x90] sm:$0xff]  ;;  %v27_v34 = vld [vmem:[%s357_s1 + $0x8] sm:$0xff]  ;;  %v26_v36 = vld [vmem:[%s357_s1] sm:$0xff] }
   0xd   :  { %101 = vmatpush.msra.mxu1 %v52_v13  ;;  %134 = vmatpush.msra.mxu2 %v58_v17  ;;  %v43_v35 = vld [vmem:[%s357_s1 + $0x88] sm:$0xff]  ;;  %v42_v37 = vld [vmem:[%s357_s1 + $0x80] sm:$0xff]  ;;  %v23_v39 = vld [vmem:[%s358_s0 + $0x18] sm:$0xff] }
   0xe   :  { %79 = vmatpush.msra.mxu0 %v35_v15  ;;  %171 = vmatpush.msra.mxu3 %v35_v15  ;;  %v20_v38 = vld [vmem:[%s358_s0] sm:$0xff]  ;;  %v21_v40 = vld [vmem:[%s358_s0 + $0x8] sm:$0xff] }
   0xf   :  { %102 = vmatpush.msra.mxu1 %v51_v16  ;;  %163 = vmatmul.msk.f32.vlgmr.msra.gmra.mxu2 %vm66_vm0, %v22_v20  ;;  %v24_v41 = vld [vmem:[%s358_s0 + $0x20] sm:$0xff] }
  0x10   :  { %80 = vmatpush.msra.mxu0 %v34_v18  ;;  %172 = vmatpush.msra.mxu3 %v34_v18  ;;  %v181_v42 = vld [vmem:[%s359_s2] ss:$0 sm:$0xff] }
  0x11   :  { %103 = vmatpush.msra.mxu1 %v50_v19  ;;  %v182_v48 = vld [vmem:[%s360_s3] ss:$0 sm:$0xff] }
  0x12   :  { %81 = vmatpush.msra.mxu0 %v33_v21  ;;  %173 = vmatpush.msra.mxu3 %v33_v21  ;;  %v183_v50 = vld [vmem:[%s361_s4] ss:$0 sm:$0xff] }
  0x13   :  { %104 = vmatpush.msra.mxu1 %v49_v22 }
  0x14   :  { %82 = vmatpush.msra.mxu0 %v32_v23  ;;  %174 = vmatpush.msra.mxu3 %v32_v23 }
  0x15   :  { %105 = vmatpush.msra.mxu1 %v48_v24 }
  0x16   :  { %83 = vmatpush.msra.mxu0 %v31_v25  ;;  %175 = vmatpush.msra.mxu3 %v31_v25 }
  0x17   :  { %106 = vmatpush.msra.mxu1 %v47_v26  ;;  %164 = vmatmul.msk.f32.gmra.mxu2 %vm66_vm0, %v25_v29 }
  0x18   :  { %84 = vmatpush.msra.mxu0 %v30_v27  ;;  %176 = vmatpush.msra.mxu3 %v30_v27 }
  0x19   :  { %107 = vmatpush.msra.mxu1 %v46_v28 }
  0x1a   :  { %85 = vmatpush.msra.mxu0 %v29_v30  ;;  %177 = vmatpush.msra.mxu3 %v29_v30 }
  0x1b   :  { %108 = vmatpush.msra.mxu1 %v45_v31 }
  0x1c   :  { %86 = vmatpush.msra.mxu0 %v28_v32  ;;  %178 = vmatpush.msra.mxu3 %v28_v32 }
  0x1d   :  { %109 = vmatpush.msra.mxu1 %v44_v33 }
  0x1e   :  { %87 = vmatpush.msra.mxu0 %v27_v34  ;;  %179 = vmatpush.msra.mxu3 %v27_v34 }
  0x1f   :  { %110 = vmatpush.msra.mxu1 %v43_v35 }
  0x20   :  { %88 = vmatpush.msra.mxu0 %v26_v36  ;;  %180 = vmatpush.msra.mxu3 %v26_v36 }
  0x21   :  { %111 = vmatpush.msra.mxu1 %v42_v37  ;;  %89 = vmatmul.f32.vlgmr.msra.gmra.mxu0 %v20_v38 }
  0x22   :  { %92 = vmatmul.f32.vlgmr.msra.gmra.mxu3 %v23_v39  ;;  %112 = vmatmul.f32.vlgmr.msra.gmra.mxu1 %v21_v40 }
  0x2a   :  { %115 = vmatmul.f32.gmra.mxu1 %v24_v41 }
  0x92   :  { %v136_v43 = vpop.f32.mrf.mxu2 }
  0x9a   :  { %v139_v56 = vpop.f32.mrf.mxu2 }
  0x9e   :  { %v90_v44 = vpop.f32.mrf.mxu0 }
  0x9f   :  { %v91_v45 = vadd.f32 %v181_v42, %v90_v44  ;;  %v113_v46 = vpop.f32.mrf.mxu1 }
  0xa1   :  { %v114_v47 = vadd.f32 %v113_v46, %v91_v45 }
  0xa3   :  { %v137_v49 = vadd.f32 %v136_v43, %v114_v47 }
  0xa5   :  { %v146_v51 = vmul.f32 %v182_v48, %v137_v49  ;;  %v93_v52 = vpop.f32.mrf.mxu3 }
  0xa6   :  { %v94_v53 = vadd.f32 %v181_v42, %v93_v52 }
  0xa7   :  { %v152_v54 = vadd.f32 %v183_v50, %v146_v51  ;;  %v116_v55 = vpop.f32.mrf.mxu1 }
  0xa8   :  { %v117_v57 = vadd.f32 %v116_v55, %v94_v53 }
  0xa9   :  { %v154_v58 = vmax.f32 %v152_v54, 0.0 }
  0xaa   :  { %v140_v59 = vadd.f32 %v139_v56, %v117_v57 }
  0xab   :  { %157 = vst.msk [vmem:[%s362_s5] sm:$0xff] %vm156_vm1, %v154_v58 }
  0xac   :  { %v147_v60 = vmul.f32 %v182_v48, %v140_v59 }
  0xae   :  { %v153_v61 = vadd.f32 %v183_v50, %v147_v60 }
  0xb0   :  { %v155_v62 = vmax.f32 %v153_v61, 0.0 }
  0xb2   :  { %158 = vst.msk [vmem:[%s362_s5 + $0x8] sm:$0xff] %vm156_vm1, %v155_v62 }

// kernel: seldnet_forward.9
= control target key start
LH: loop header
LB: loop body
LE: loop exit
PB: predicated region body
PF: predicated region fallthrough
CT: control target
= control target key end

     0   :  { %s3493_s0 = inlined_call_operand.vmem [shape: f32[4,2,128], index: 0, kind: input, shape index: {}]   ;;  %s3494_s1 = inlined_call_operand.vmem [shape: f32[128,192], index: 1, kind: input, shape index: {}]   ;;  %s3495_s2 = inlined_call_operand.vmem [shape: f32[2,32,96], index: 2, kind: input, shape index: {}]   ;;  %s3496_s3 = inlined_call_operand.vmem [shape: f32[1,192], index: 3, kind: input, shape index: {}]   ;;  %s3497_s4 = inlined_call_operand.vmem [shape: f32[2,1,96], index: 4, kind: input, shape index: {}]   ;;  %s3498_s5 = inlined_call_operand.vmem [shape: f32[64,192], index: 5, kind: input, shape index: {}]   ;;  %s3499_s6 = inlined_call_operand.vmem [shape: f32[2,32,96], index: 6, kind: input, shape index: {}]   ;;  %s3500_s7 = inlined_call_operand.vmem [shape: f32[1,192], index: 7, kind: input, shape index: {}]   ;;  %s3501_s8 = inlined_call_operand.vmem [shape: f32[2,1,96], index: 8, kind: input, shape index: {}]   ;;  %s3502_s9 = inlined_call_operand.vmem [shape: f32[64,192], index: 9, kind: input, shape index: {}]   ;;  %s3503_s10 = inlined_call_operand.vmem [shape: f32[2,32,96], index: 10, kind: input, shape index: {}]   ;;  %s3504_s11 = inlined_call_operand.vmem [shape: f32[1,192], index: 11, kind: input, shape index: {}]   ;;  %s3505_s12 = inlined_call_operand.vmem [shape: f32[2,1,96], index: 12, kind: input, shape index: {}]   ;;  %s3506_s13 = inlined_call_operand.vmem [shape: f32[3,64,64], index: 13, kind: input, shape index: {}]   ;;  %s3507_s14 = inlined_call_operand.vmem [shape: f32[3,1,64], index: 14, kind: input, shape index: {}]   ;;  %s3508_s15 = inlined_call_operand.vmem [shape: f32[64,42], index: 15, kind: input, shape index: {}]   ;;  %s3509_s16 = inlined_call_operand.vmem [shape: f32[1,42], index: 16, kind: input, shape index: {}]   ;;  %s3510_s17 = inlined_call_operand.vmem [shape: f32[3,64,64], index: 17, kind: input, shape index: {}]   ;;  %s3511_s18 = inlined_call_operand.vmem [shape: f32[3,1,64], index: 18, kind: input, shape index: {}]   ;;  %s3512_s19 = inlined_call_operand.vmem [shape: f32[64,126], index: 19, kind: input, shape index: {}]   ;;  %s3513_s20 = inlined_call_operand.vmem [shape: f32[1,126], index: 20, kind: input, shape index: {}]   ;;  %s3514_s21 = inlined_call_operand.hbm [shape: f32[8,42], index: 21, kind: output, shape index: {0}]   ;;  %s3515_s22 = inlined_call_operand.hbm [shape: f32[8,126], index: 22, kind: output, shape index: {1}]  }
   0x1   :  { %3522 = sst [smem:[#allocation8_spill]] %s3493_s0 }
   0x2   :  { %3523 = sst [smem:[#allocation9_spill]] %s3494_s1 }
   0x3   :  { %3524 = sst [smem:[#allocation10_spill]] %s3495_s2 }
   0x4   :  { %3525 = sst [smem:[#allocation11_spill]] %s3496_s3 }
   0x5   :  { %3526 = sst [smem:[#allocation12_spill]] %s3497_s4 }
   0x6   :  { %3527 = sst [smem:[#allocation13_spill]] %s3498_s5 }
   0x7   :  { %3528 = sst [smem:[#allocation14_spill]] %s3499_s6 }
   0x8   :  { %28 = vsyncpa [#allocation3], 0  ;;  %s3529_s29 = sld [smem:[#allocation9_spill]]  ;;  %v2389_v9 = vmov 0.0  }
   0x9   :  { %s3530_s0 = sld [smem:[#allocation10_spill]] }
   0xe   :  { %v124_v0 = vld [vmem:[%s3529_s29 + $0xf0] sm:$0xff]  ;;  %v122_v2 = vld [vmem:[%s3529_s29 + $0xe0] sm:$0xff] }
   0xf   :  { %v175_v1 = vld [vmem:[%s3530_s0 + $0x18] sm:$0xff]  ;;  %132 = vmatpush.msra.mxu0 %v124_v0  ;;  %v174_v3 = vld [vmem:[%s3530_s0 + $0x10] sm:$0xff]  ;;  %v173_v5 = vld [vmem:[%s3530_s0 + $0x8] sm:$0xff] }
  0x10   :  { %196 = vmatpush.msra.mxu2 %v175_v1  ;;  %v120_v4 = vld [vmem:[%s3529_s29 + $0xd0] sm:$0xff]  ;;  %245 = vmatpush.msra.mxu3 %v175_v1  ;;  %v118_v6 = vld [vmem:[%s3529_s29 + $0xc0] sm:$0xff] }
  0x11   :  { %133 = vmatpush.msra.mxu0 %v122_v2  ;;  %v172_v7 = vld [vmem:[%s3530_s0] sm:$0xff]  ;;  %v116_v8 = vld [vmem:[%s3529_s29 + $0xb0] sm:$0xff] }
  0x12   :  { %197 = vmatpush.msra.mxu2 %v174_v3  ;;  %246 = vmatpush.msra.mxu3 %v174_v3  ;;  %v114_v10 = vld [vmem:[%s3529_s29 + $0xa0] sm:$0xff]  ;;  %v112_v11 = vld [vmem:[%s3529_s29 + $0x90] sm:$0xff] }
  0x13   :  { %134 = vmatpush.msra.mxu0 %v120_v4  ;;  %v110_v12 = vld [vmem:[%s3529_s29 + $0x80] sm:$0xff]  ;;  %v108_v13 = vld [vmem:[%s3529_s29 + $0x70] sm:$0xff] }
  0x14   :  { %198 = vmatpush.msra.mxu2 %v173_v5  ;;  %247 = vmatpush.msra.mxu3 %v173_v5 }
  0x15   :  { %135 = vmatpush.msra.mxu0 %v118_v6 }
  0x16   :  { %199 = vmatpush.msra.mxu2 %v172_v7  ;;  %248 = vmatpush.msra.mxu3 %v172_v7 }
  0x17   :  { %200 = vmatmul.f32.vlgmr.msra.gmra.mxu2 %v2389_v9  ;;  %136 = vmatpush.msra.mxu0 %v116_v8 }
  0x18   :  { %299 = vmatpush.msrb.mxu2 %v175_v1  ;;  %353 = vmatpush.msrb.mxu3 %v175_v1 }
  0x19   :  { %137 = vmatpush.msra.mxu0 %v114_v10 }
  0x1a   :  { %300 = vmatpush.msrb.mxu2 %v174_v3  ;;  %354 = vmatpush.msrb.mxu3 %v174_v3 }
  0x1b   :  { %138 = vmatpush.msra.mxu0 %v112_v11 }
  0x1c   :  { %301 = vmatpush.msrb.mxu2 %v173_v5  ;;  %355 = vmatpush.msrb.mxu3 %v173_v5 }
  0x1d   :  { %29 = vsyncpa [#allocation5], 0  ;;  %139 = vmatpush.msra.mxu0 %v110_v12  ;;  %v106_v14 = vld [vmem:[%s3529_s29 + $0x60] sm:$0xff]  ;;  %s3531_s23 = sld [smem:[#allocation8_spill]]  ;;  %v104_v16 = vld [vmem:[%s3529_s29 + $0x50] sm:$0xff]  ;;  %vm88_vm0 = vcmask 1041408  }
  0x1e   :  { %302 = vmatpush.msrb.mxu2 %v172_v7  ;;  %356 = vmatpush.msrb.mxu3 %v172_v7  ;;  %v102_v19 = vld [vmem:[%s3529_s29 + $0x40] sm:$0xff]  ;;  %v100_v21 = vld [vmem:[%s3529_s29 + $0x30] sm:$0xff]  ;;  %vm90_vm1 = vcmask 1043456   ;;  %vm92_vm2 = vcmask 1045504   ;;  %s3532_s27 = sld [smem:[#allocation12_spill]]  ;;  %s2390_s3 = smov 64  }
  0x1f   :  { %140 = vmatpush.msra.mxu0 %v108_v13  ;;  %v98_v25 = vld [vmem:[%s3529_s29 + $0x20] sm:$0xff]  ;;  %v96_v27 = vld [vmem:[%s3529_s29 + $0x10] sm:$0xff]  ;;  %s3533_s4 = sld [smem:[#allocation11_spill]]  ;;  %s2391_s1 = smov 96   ;;  %vm180_vm3 = vcmask 261120   ;;  %v2626_v11 = vld [vmem:[%s3530_s0 + $0x38] sm:$0xff] }
  0x20   :  { %v94_v29 = vld [vmem:[%s3529_s29] sm:$0xff]  ;;  %v2631_v12 = vld [vmem:[%s3530_s0 + $0x30] sm:$0xff]  ;;  %411 = vmatpush.msra.mxu2 %v2626_v11  ;;  %v2638_v13 = vld [vmem:[%s3530_s0 + $0x28] sm:$0xff]  ;;  %s3535_s25 = sld [smem:[#allocation13_spill]]  ;;  %vm680_vm4 = vcmask 523264   ;;  %vm1766_vm5 = vcmask 1040384  }
  0x21   :  { %141 = vmatpush.msra.mxu0 %v106_v14  ;;  %v2645_v14 = vld [vmem:[%s3530_s0 + $0x20] sm:$0xff]  ;;  %vm1769_vm6 = vcmask 1042432   ;;  %vm1772_vm7 = vcmask 1044480   ;;  %vm1775_vm8 = vcmask 1046528   ;;  %vm1928_vm9 = vcmask 343040  }
  0x22   :  { %412 = vmatpush.msra.mxu2 %v2631_v12  ;;  %vm2075_vm10 = vcmask 1031168  }
  0x23   :  { %v2109_v15 = vld [vmem:[%s3531_s23 + $0x2] sm:$0x3]  ;;  %v2110_v17 = vld [vmem:[%s3531_s23 + $0x4] sm:$0x3]  ;;  %v72_v20 = vld [vmem:[%s3531_s23] sm:$0x3]  ;;  %142 = vmatpush.msra.mxu0 %v104_v16 }
  0x24   :  { %v80_v18 = vrot.slane %v2109_v15, 6  ;;  %v2111_v22 = vld [vmem:[%s3531_s23 + $0x6] sm:$0x3]  ;;  %v83_v23 = vrot.slane %v2110_v17, 4  ;;  %v2592_v31 = vld [vmem:[%s3532_s27] ss:$0 sm:$0xff]  ;;  %413 = vmatpush.msra.mxu2 %v2638_v13 }
  0x25   :  { %143 = vmatpush.msra.mxu0 %v102_v19  ;;  %v86_v26 = vrot.slane %v2111_v22, 2  ;;  %v2599_v34 = vld [vmem:[%s3533_s4] sm:$0x3]  ;;  %v125_v16 = vld [vmem:[%s3529_s29 + $0xf8] sm:$0xff]  ;;  %v123_v17 = vld [vmem:[%s3529_s29 + $0xe8] sm:$0xff]  ;;  %s3534_s4 = sld [smem:[#allocation14_spill]] }
  0x26   :  { %v89_v24 = vsel %vm88_vm0, %v72_v20, %v80_v18  ;;  %v128_v35 = vperm.slane %v2599_v34, 0  ;;  %414 = vmatpush.msra.mxu2 %v2645_v14  ;;  %152 = vmatpush.msra.mxu1 %v125_v16  ;;  %v121_v18 = vld [vmem:[%s3529_s29 + $0xd8] sm:$0xff]  ;;  %v119_v19 = vld [vmem:[%s3529_s29 + $0xc8] sm:$0xff]  ;;  %s2095_s23 = sshll.u32 %s3515_s22, 4  ;;  %s2096_s23 = int_to_ptr.hbm [resolvable:$true] %s2095_s23 }
  0x27   :  { %144 = vmatpush.msra.mxu0 %v100_v21  ;;  %v91_v28 = vsel %vm90_vm1, %v89_v24, %v83_v23  ;;  %v117_v20 = vld [vmem:[%s3529_s29 + $0xb8] sm:$0xff]  ;;  %v115_v21 = vld [vmem:[%s3529_s29 + $0xa8] sm:$0xff] }
  0x28   :  { %v2586_v30 = vsel %vm92_vm2, %v91_v28, %v86_v26  ;;  %153 = vmatpush.msra.mxu1 %v123_v17  ;;  %v113_v22 = vld [vmem:[%s3529_s29 + $0x98] sm:$0xff]  ;;  %v111_v23 = vld [vmem:[%s3529_s29 + $0x88] sm:$0xff] }
  0x29   :  { %145 = vmatpush.msra.mxu0 %v98_v25  ;;  %v109_v24 = vld [vmem:[%s3529_s29 + $0x78] sm:$0xff]  ;;  %v107_v25 = vld [vmem:[%s3529_s29 + $0x68] sm:$0xff] }
  0x2a   :  { %154 = vmatpush.msra.mxu1 %v121_v18  ;;  %v105_v26 = vld [vmem:[%s3529_s29 + $0x58] sm:$0xff] }
  0x2b   :  { %146 = vmatpush.msra.mxu0 %v96_v27 }
  0x2c   :  { %155 = vmatpush.msra.mxu1 %v119_v19 }
  0x2d   :  { %147 = vmatpush.msra.mxu0 %v94_v29  ;;  %v103_v29 = vld [vmem:[%s3529_s29 + $0x48] sm:$0xff] }
  0x2e   :  { %148 = vmatmul.f32.vlgmr.msra.gmra.mxu0 %v2586_v30  ;;  %156 = vmatpush.msra.mxu1 %v117_v20 }
  0x30   :  { %157 = vmatpush.msra.mxu1 %v115_v21 }
  0x32   :  { %158 = vmatpush.msra.mxu1 %v113_v22 }
  0x34   :  { %159 = vmatpush.msra.mxu1 %v111_v23 }
  0x36   :  { %160 = vmatpush.msra.mxu1 %v109_v24 }
  0x38   :  { %161 = vmatpush.msra.mxu1 %v107_v25 }
  0x3a   :  { %162 = vmatpush.msra.mxu1 %v105_v26 }
  0x3c   :  { %163 = vmatpush.msra.mxu1 %v103_v29 }
  0x9a   :  { %v201_v32 = vpop.f32.mrf.mxu2 }
  0x9b   :  { %v202_v33 = vadd.f32 %v2592_v31, %v201_v32 }
  0x9d   :  { %210 = vrot.lane.b32.xlu0 %v202_v33, %s2390_s3 }
  0xab   :  { %v149_v36 = vpop.f32.mrf.mxu0 }
  0xac   :  { %v2602_v37 = vadd.f32 %v149_v36, %v128_v35  ;;  %v2701_v35 = vld [vmem:[%s3532_s27 + $0x1] ss:$0 sm:$0xff]  ;;  %v99_v36 = vld [vmem:[%s3529_s29 + $0x28] sm:$0xff]  ;;  %s2392_s27 = smov 32  }
  0xae   :  { %v204_v38 = vadd.f32 %v202_v33, %v2602_v37  ;;  %v101_v33 = vld [vmem:[%s3529_s29 + $0x38] sm:$0xff] }
  0xaf   :  { %164 = vmatpush.msra.mxu1 %v101_v33 }
  0xb0   :  { %v205_v39 = vmul.f32 0.5, %v204_v38  ;;  %v97_v38 = vld [vmem:[%s3529_s29 + $0x18] sm:$0xff] }
  0xb1   :  { %165 = vmatpush.msra.mxu1 %v99_v36 }
  0xb2   :  { %2213 = vtanh.f32 %v205_v39 }
  0xb3   :  { %166 = vmatpush.msra.mxu1 %v97_v38 }
  0xb8   :  { %v2214_v40 = vpop.eup %2213 }
  0xb9   :  { %v207_v41 = vadd.f32 1.0, %v2214_v40 }
  0xbb   :  { %v208_v42 = vmul.f32 0.5, %v207_v41  ;;  %v95_v41 = vld [vmem:[%s3529_s29 + $0x8] sm:$0xff] }
  0xbc   :  { %167 = vmatpush.msra.mxu1 %v95_v41 }
  0xbd   :  { %v220_v48 = vsub.f32 1.0, %v208_v42  ;;  %v226_v50 = vmul.f32 0.0, %v208_v42  ;;  %168 = vmatmul.f32.vlgmr.msra.gmra.mxu1 %v2586_v30 }
 0x10f   :  { %v211_v43 = vpop.permute.xlu0 %210 }
 0x110   :  { %v213_v44 = vmul.f32 %v211_v43, %v208_v42 }
 0x112   :  { %215 = vrot.lane.b32.xlu0 %v213_v44, %s2390_s3 }
 0x184   :  { %v216_v45 = vpop.permute.xlu0 %215 }
 0x185   :  { %v218_v46 = vadd.f32 %v216_v45, %v2602_v37 }
 0x187   :  { %2215 = vtanh.f32 %v218_v46 }
 0x18d   :  { %v2216_v47 = vpop.eup %2215 }
 0x18e   :  { %222 = vrot.lane.b32.xlu1 %v2216_v47, %s2391_s1 }
 0x200   :  { %v223_v49 = vpop.permute.xlu1 %222 }
 0x201   :  { %v225_v51 = vmul.f32 %v223_v49, %v220_v48 }
 0x203   :  { %v227_v52 = vadd.f32 %v226_v50, %v225_v51 }
 0x205   :  { %229 = vrot.lane.b32.xlu1 %v227_v52, %s2391_s1  ;;  %v277_v3 = vrot.slane %v227_v52, 6 }
 0x277   :  { %v2609_v53 = vpop.permute.xlu1 %229 }
 0x278   :  { %2112 = vmatmul.msk.f32.vlgmr.msra.gmra.mxu3 %vm180_vm3, %v2609_v53 }
 0x279   :  { %468 = vmatpush.msra.mxu3 %v2626_v11 }
 0x27b   :  { %469 = vmatpush.msra.mxu3 %v2631_v12 }
 0x27d   :  { %470 = vmatpush.msra.mxu3 %v2638_v13 }
 0x27f   :  { %471 = vmatpush.msra.mxu3 %v2645_v14 }
 0x2fb   :  { %v250_v54 = vpop.f32.mrf.mxu3 }
 0x2fc   :  { %v251_v55 = vadd.f32 %v2592_v31, %v250_v54 }
 0x2fe   :  { %v254_v56 = vrot.slane %v251_v55, 6 }
 0x300   :  { %261 = vrot.lane.b32.xlu2 %v254_v56, %s2390_s3  ;;  %v256_v57 = vadd.f32 %v254_v56, %v2602_v37 }
 0x302   :  { %v257_v58 = vmul.f32 0.5, %v256_v57 }
 0x304   :  { %2217 = vtanh.f32 %v257_v58 }
 0x30a   :  { %v2218_v59 = vpop.eup %2217 }
 0x30b   :  { %v259_v60 = vadd.f32 1.0, %v2218_v59 }
 0x30d   :  { %v260_v61 = vmul.f32 0.5, %v259_v60 }
 0x30f   :  { %v271_v4 = vsub.f32 1.0, %v260_v61  ;;  %v279_v7 = vmul.f32 %v277_v3, %v260_v61 }
 0x35a   :  { %v262_v62 = vpop.permute.xlu2 %261 }
 0x35b   :  { %v264_v63 = vmul.f32 %v262_v62, %v260_v61  ;;  %v129_v61 = vperm.slane %v2599_v34, 1  ;;  %v169_v62 = vpop.f32.mrf.mxu1 }
 0x35d   :  { %266 = vrot.lane.b32.xlu2 %v264_v63, %s2390_s3  ;;  %v2723_v63 = vadd.f32 %v169_v62, %v129_v61 }
 0x3b7   :  { %v267_v0 = vpop.permute.xlu2 %266 }
 0x3b8   :  { %v269_v1 = vadd.f32 %v267_v0, %v2602_v37 }
 0x3ba   :  { %2219 = vtanh.f32 %v269_v1 }
 0x3c0   :  { %v2220_v2 = vpop.eup %2219 }
 0x3c1   :  { %273 = vrot.lane.b32.xlu0 %v2220_v2, %s2391_s1 }
 0x433   :  { %v274_v5 = vpop.permute.xlu0 %273 }
 0x434   :  { %v276_v6 = vmul.f32 %v274_v5, %v271_v4 }
 0x436   :  { %v2619_v8 = vadd.f32 %v279_v7, %v276_v6 }
 0x438   :  { %v282_v10 = vrot.slane %v2619_v8, 2  ;;  %v331_v4 = vrot.slane %v2619_v8, 6 }
 0x43a   :  { %283 = vrot.lane.b32.xlu1 %v282_v10, %s2391_s1 }
 0x4ac   :  { %v284_v15 = vpop.permute.xlu1 %283 }
 0x4ad   :  { %2113 = vmatmul.msk.f32.vlgmr.msrb.gmra.mxu2 %vm180_vm3, %v284_v15 }
 0x4ae   :  { %527 = vmatpush.msrb.mxu2 %v2626_v11 }
 0x4b0   :  { %528 = vmatpush.msrb.mxu2 %v2631_v12 }
 0x4b2   :  { %529 = vmatpush.msrb.mxu2 %v2638_v13 }
 0x4b4   :  { %530 = vmatpush.msrb.mxu2 %v2645_v14 }
 0x4b5   :  { %415 = vmatmul.f32.vlgmr.msra.gmra.mxu2 %v2389_v9 }
 0x530   :  { %v304_v27 = vpop.f32.mrf.mxu2 }
 0x531   :  { %v305_v28 = vadd.f32 %v2592_v31, %v304_v27 }
 0x533   :  { %v308_v32 = vrot.slane %v305_v28, 4 }
 0x535   :  { %315 = vrot.lane.b32.xlu2 %v308_v32, %s2390_s3  ;;  %v310_v43 = vadd.f32 %v308_v32, %v2602_v37 }
 0x537   :  { %v311_v44 = vmul.f32 0.5, %v310_v43 }
 0x538   :  { %v416_v39 = vpop.f32.mrf.mxu2 }
 0x539   :  { %v417_v40 = vadd.f32 %v2701_v35, %v416_v39  ;;  %2221 = vtanh.f32 %v311_v44 }
 0x53b   :  { %v420_v42 = vrot.slane %v417_v40, 2 }
 0x53d   :  { %421 = vrot.lane.b32.xlu0 %v420_v42, %s2391_s1  ;;  %434 = vrot.lane.b32.xlu2 %v420_v42, %s2392_s27 }
 0x53f   :  { %v2222_v45 = vpop.eup %2221 }
 0x540   :  { %v313_v46 = vadd.f32 1.0, %v2222_v45 }
 0x542   :  { %v314_v47 = vmul.f32 0.5, %v313_v46 }
 0x544   :  { %v325_v3 = vsub.f32 1.0, %v314_v47  ;;  %v333_v6 = vmul.f32 %v331_v4, %v314_v47 }
 0x58f   :  { %v316_v48 = vpop.permute.xlu2 %315 }
 0x590   :  { %v318_v49 = vmul.f32 %v316_v48, %v314_v47 }
 0x592   :  { %320 = vrot.lane.b32.xlu1 %v318_v49, %s2390_s3 }
 0x597   :  { %v435_v55 = vpop.permute.xlu2 %434 }
 0x5af   :  { %v422_v50 = vpop.permute.xlu0 %421 }
 0x5b0   :  { %v424_v51 = vadd.f32 %v422_v50, %v2602_v37  ;;  %v429_v15 = vadd.f32 %v422_v50, %v2723_v63 }
 0x5b2   :  { %v425_v52 = vmul.f32 0.5, %v424_v51  ;;  %v430_v16 = vmul.f32 0.5, %v429_v15 }
 0x5b4   :  { %2223 = vtanh.f32 %v425_v52 }
 0x5ba   :  { %v2224_v30 = vpop.eup %2223 }
 0x5bb   :  { %v427_v54 = vadd.f32 1.0, %v2224_v30 }
 0x5bd   :  { %v428_v56 = vmul.f32 0.5, %v427_v54 }
 0x5bf   :  { %v437_v57 = vmul.f32 %v435_v55, %v428_v56 }
 0x5c1   :  { %439 = vrot.lane.b32.xlu0 %v437_v57, %s2390_s3 }
 0x604   :  { %v321_v58 = vpop.permute.xlu1 %320 }
 0x605   :  { %v323_v59 = vadd.f32 %v321_v58, %v2602_v37 }
 0x607   :  { %2225 = vtanh.f32 %v323_v59 }
 0x60d   :  { %v2226_v60 = vpop.eup %2225 }
 0x60e   :  { %327 = vrot.lane.b32.xlu1 %v2226_v60, %s2391_s1 }
 0x633   :  { %v440_v0 = vpop.permute.xlu0 %439 }
 0x634   :  { %v442_v1 = vadd.f32 %v440_v0, %v2723_v63 }
 0x636   :  { %2227 = vtanh.f32 %v442_v1 }
 0x637   :  { %2229 = vtanh.f32 %v430_v16 }
 0x63c   :  { %v2228_v2 = vpop.eup %2227 }
 0x63d   :  { %446 = vrot.lane.b32.xlu0 %v2228_v2, %s2391_s1  ;;  %v2230_v17 = vpop.eup %2229 }
 0x63e   :  { %v432_v18 = vadd.f32 1.0, %v2230_v17 }
 0x640   :  { %v433_v19 = vmul.f32 0.5, %v432_v18 }
 0x642   :  { %v444_v21 = vsub.f32 1.0, %v433_v19  ;;  %v450_v24 = vmul.f32 0.0, %v433_v19 }
 0x680   :  { %v328_v5 = vpop.permute.xlu1 %327 }
 0x681   :  { %v330_v7 = vmul.f32 %v328_v5, %v325_v3 }
 0x683   :  { %v2728_v10 = vadd.f32 %v333_v6, %v330_v7 }
 0x685   :  { %v336_v34 = vrot.slane %v2728_v10, 4 }
 0x687   :  { %337 = vrot.lane.b32.xlu2 %v336_v34, %s2391_s1 }
 0x6af   :  { %v447_v20 = vpop.permute.xlu0 %446 }
 0x6b0   :  { %v449_v22 = vmul.f32 %v447_v20, %v444_v21 }
 0x6b2   :  { %v2735_v25 = vadd.f32 %v450_v24, %v449_v22 }
 0x6b4   :  { %v453_v26 = vrot.slane %v2735_v25, 6  ;;  %v507_v49 = vrot.slane %v2735_v25, 2 }
 0x6e1   :  { %v338_v23 = vpop.permute.xlu2 %337 }
 0x6e2   :  { %2114 = vmatmul.msk.f32.vlgmr.msrb.gmra.mxu3 %vm180_vm3, %v338_v23 }
 0x6e3   :  { %586 = vmatpush.msrb.mxu3 %v2626_v11 }
 0x6e5   :  { %587 = vmatpush.msrb.mxu3 %v2631_v12 }
 0x6e7   :  { %588 = vmatpush.msrb.mxu3 %v2638_v13 }
 0x6e9   :  { %589 = vmatpush.msrb.mxu3 %v2645_v14 }
 0x6ea   :  { %2120 = vmatmul.msk.f32.vlgmr.msra.gmra.mxu3 %vm180_vm3, %v453_v26 }
 0x765   :  { %v358_v27 = vpop.f32.mrf.mxu3 }
 0x766   :  { %v359_v6 = vadd.f32 %v2592_v31, %v358_v27 }
 0x768   :  { %v362_v7 = vrot.slane %v359_v6, 2 }
 0x76a   :  { %v364_v26 = vadd.f32 %v362_v7, %v2602_v37 }
 0x76c   :  { %v365_v27 = vmul.f32 0.5, %v364_v26  ;;  %v2883_v26 = vld [vmem:[%s3534_s4 + $0x20] sm:$0xff] }
 0x76d   :  { %v473_v28 = vpop.f32.mrf.mxu3 }
 0x76e   :  { %v474_v29 = vadd.f32 %v2701_v35, %v473_v28 }
 0x770   :  { %v477_v32 = vrot.slane %v474_v29, 4 }
 0x772   :  { %491 = vrot.lane.b32.xlu2 %v477_v32, %s2392_s27  ;;  %478 = vrot.lane.b32.xlu1 %v477_v32, %s2391_s1 }
 0x7cc   :  { %v492_v14 = vpop.permute.xlu2 %491 }
 0x7e4   :  { %v479_v11 = vpop.permute.xlu1 %478 }
 0x7e5   :  { %v481_v12 = vadd.f32 %v479_v11, %v2602_v37  ;;  %v486_v43 = vadd.f32 %v479_v11, %v2723_v63 }
 0x7e7   :  { %v482_v33 = vmul.f32 0.5, %v481_v12  ;;  %v487_v44 = vmul.f32 0.5, %v486_v43 }
 0x7e9   :  { %2231 = vtanh.f32 %v482_v33 }
 0x7ef   :  { %v2232_v13 = vpop.eup %2231 }
 0x7f0   :  { %v484_v36 = vadd.f32 1.0, %v2232_v13 }
 0x7f2   :  { %v485_v38 = vmul.f32 0.5, %v484_v36 }
 0x7f4   :  { %v494_v39 = vmul.f32 %v492_v14, %v485_v38 }
 0x7f6   :  { %496 = vrot.lane.b32.xlu0 %v494_v39, %s2390_s3 }
 0x868   :  { %v497_v40 = vpop.permute.xlu0 %496 }
 0x869   :  { %v499_v41 = vadd.f32 %v497_v40, %v2723_v63 }
 0x86b   :  { %2233 = vtanh.f32 %v499_v41 }
 0x86c   :  { %2235 = vtanh.f32 %v487_v44 }
 0x871   :  { %v2234_v42 = vpop.eup %2233 }
 0x872   :  { %503 = vrot.lane.b32.xlu1 %v2234_v42, %s2391_s1  ;;  %v2236_v45 = vpop.eup %2235 }
 0x873   :  { %v489_v46 = vadd.f32 1.0, %v2236_v45 }
 0x875   :  { %v490_v47 = vmul.f32 0.5, %v489_v46 }
 0x877   :  { %v501_v48 = vsub.f32 1.0, %v490_v47  ;;  %v509_v51 = vmul.f32 %v507_v49, %v490_v47  ;;  %v385_v49 = vrot.slane %v2728_v10, 6 }
 0x8e4   :  { %v504_v50 = vpop.permute.xlu1 %503 }
 0x8e5   :  { %v506_v52 = vmul.f32 %v504_v50, %v501_v48 }
 0x8e7   :  { %v2751_v30 = vadd.f32 %v509_v51, %v506_v52 }
 0x8e9   :  { %v512_v54 = vrot.slane %v2751_v30, 4  ;;  %v566_v20 = vrot.slane %v2751_v30, 2 }
 0x8eb   :  { %2121 = vmatmul.msk.f32.vlgmr.msrb.gmra.mxu2 %vm180_vm3, %v512_v54 }
 0x96e   :  { %v532_v55 = vpop.f32.mrf.mxu2 }
 0x96f   :  { %v533_v56 = vadd.f32 %v2701_v35, %v532_v55 }
 0x971   :  { %v536_v57 = vrot.slane %v533_v56, 6 }
 0x973   :  { %550 = vrot.lane.b32.xlu0 %v536_v57, %s2392_s27  ;;  %537 = vrot.lane.b32.xlu2 %v536_v57, %s2391_s1 }
 0x9cd   :  { %v538_v58 = vpop.permute.xlu2 %537 }
 0x9ce   :  { %v540_v59 = vadd.f32 %v538_v58, %v2602_v37  ;;  %v545_v34 = vadd.f32 %v538_v58, %v2723_v63 }
 0x9d0   :  { %v541_v60 = vmul.f32 0.5, %v540_v59  ;;  %v546_v15 = vmul.f32 0.5, %v545_v34  ;;  %v727_v59 = vld [vmem:[%s3534_s4 + $0x18] sm:$0xff]  ;;  %v666_v34 = vld [vmem:[%s3535_s25 + $0x40] sm:$0xff] }
 0x9d1   :  { %744 = vmatpush.msra.mxu2 %v727_v59  ;;  %793 = vmatpush.msra.mxu3 %v727_v59 }
 0x9d2   :  { %2237 = vtanh.f32 %v541_v60  ;;  %v726_v60 = vld [vmem:[%s3534_s4 + $0x10] sm:$0xff] }
 0x9d3   :  { %745 = vmatpush.msra.mxu2 %v726_v60  ;;  %794 = vmatpush.msra.mxu3 %v726_v60 }
 0x9d8   :  { %v2238_v61 = vpop.eup %2237 }
 0x9d9   :  { %v543_v62 = vadd.f32 1.0, %v2238_v61  ;;  %v670_v61 = vld [vmem:[%s3535_s25 + $0x60] sm:$0xff] }
 0x9db   :  { %v544_v0 = vmul.f32 0.5, %v543_v62  ;;  %v671_v62 = vld [vmem:[%s3535_s25 + $0x68] sm:$0xff] }
 0x9e5   :  { %v551_v1 = vpop.permute.xlu0 %550 }
 0x9e6   :  { %v553_v2 = vmul.f32 %v551_v1, %v544_v0  ;;  %v668_v0 = vld [vmem:[%s3535_s25 + $0x50] sm:$0xff]  ;;  %v669_v1 = vld [vmem:[%s3535_s25 + $0x58] sm:$0xff] }
 0x9e8   :  { %555 = vrot.lane.b32.xlu1 %v553_v2, %s2390_s3 }
 0xa5a   :  { %v556_v3 = vpop.permute.xlu1 %555 }
 0xa5b   :  { %v558_v4 = vadd.f32 %v556_v3, %v2723_v63  ;;  %v724_v3 = vld [vmem:[%s3534_s4] sm:$0xff] }
 0xa5d   :  { %2239 = vtanh.f32 %v558_v4 }
 0xa5e   :  { %2241 = vtanh.f32 %v546_v15  ;;  %v667_v15 = vld [vmem:[%s3535_s25 + $0x48] sm:$0xff] }
 0xa5f   :  { %2243 = vtanh.f32 %v365_v27 }
 0xa63   :  { %v2240_v5 = vpop.eup %2239 }
 0xa64   :  { %562 = vrot.lane.b32.xlu2 %v2240_v5, %s2391_s1  ;;  %v2242_v16 = vpop.eup %2241 }
 0xa65   :  { %v548_v17 = vadd.f32 1.0, %v2242_v16  ;;  %v2244_v28 = vpop.eup %2243  ;;  %v664_v16 = vld [vmem:[%s3535_s25 + $0x30] sm:$0xff] }
 0xa66   :  { %v367_v11 = vadd.f32 1.0, %v2244_v28 }
 0xa67   :  { %v549_v18 = vmul.f32 0.5, %v548_v17  ;;  %v665_v17 = vld [vmem:[%s3535_s25 + $0x38] sm:$0xff] }
 0xa68   :  { %v368_v33 = vmul.f32 0.5, %v367_v11 }
 0xa69   :  { %v560_v19 = vsub.f32 1.0, %v549_v18  ;;  %v568_v22 = vmul.f32 %v566_v20, %v549_v18  ;;  %v663_v18 = vld [vmem:[%s3535_s25 + $0x28] sm:$0xff]  ;;  %v661_v20 = vld [vmem:[%s3535_s25 + $0x18] sm:$0xff] }
 0xa6a   :  { %v379_v48 = vsub.f32 1.0, %v368_v33 }
 0xa6c   :  { %369 = vrot.lane.b32.xlu2 %v362_v7, %s2390_s3 }
 0xabe   :  { %v563_v21 = vpop.permute.xlu2 %562 }
 0xabf   :  { %v565_v23 = vmul.f32 %v563_v21, %v560_v19  ;;  %v660_v19 = vld [vmem:[%s3535_s25 + $0x10] sm:$0xff]  ;;  %v658_v21 = vld [vmem:[%s3535_s25] sm:$0xff] }
 0xac1   :  { %v2766_v24 = vadd.f32 %v568_v22, %v565_v23  ;;  %v659_v22 = vld [vmem:[%s3535_s25 + $0x8] sm:$0xff]  ;;  %v2863_v23 = vld [vmem:[%s3534_s4 + $0x38] sm:$0xff] }
 0xac3   :  { %v571_v31 = vrot.slane %v2766_v24, 2 }
 0xac5   :  { %2122 = vmatmul.msk.f32.vlgmr.msrb.gmra.mxu3 %vm180_vm3, %v571_v31 }
 0xac6   :  { %v370_v12 = vpop.permute.xlu2 %369 }
 0xac7   :  { %v372_v13 = vmul.f32 %v370_v12, %v368_v33 }
 0xb48   :  { %v591_v29 = vpop.f32.mrf.mxu3 }
 0xb49   :  { %v592_v32 = vadd.f32 %v2701_v35, %v591_v29 }
 0xb4b   :  { %608 = vrot.lane.b32.xlu1 %v592_v32, %s2392_s27  ;;  %595 = vrot.lane.b32.xlu0 %v592_v32, %s2391_s1 }
 0xb53   :  { %374 = vrot.lane.b32.xlu1 %v372_v13, %s2390_s3 }
 0xb5b   :  { %640 = vrot.lane.b32.xlu1 %v2728_v10, %s2391_s1 }
 0xbbd   :  { %v596_v36 = vpop.permute.xlu0 %595  ;;  %v609_v14 = vpop.permute.xlu1 %608 }
 0xbbe   :  { %v598_v38 = vadd.f32 %v596_v36, %v2602_v37  ;;  %v603_v55 = vadd.f32 %v596_v36, %v2723_v63 }
 0xbc0   :  { %v599_v39 = vmul.f32 0.5, %v598_v38  ;;  %v604_v56 = vmul.f32 0.5, %v603_v55 }
 0xbc2   :  { %2245 = vtanh.f32 %v599_v39 }
 0xbc5   :  { %v375_v41 = vpop.permute.xlu1 %374 }
 0xbc6   :  { %v377_v43 = vadd.f32 %v375_v41, %v2602_v37  ;;  %v387_v37 = vmul.f32 %v385_v49, %v368_v33 }
 0xbc8   :  { %v2246_v35 = vpop.eup %2245  ;;  %2247 = vtanh.f32 %v377_v43  ;;  %v674_v43 = vld [vmem:[%s3500_s7] sm:$0x3] }
 0xbc9   :  { %v601_v40 = vadd.f32 1.0, %v2246_v35 }
 0xbcb   :  { %v602_v42 = vmul.f32 0.5, %v601_v40 }
 0xbcd   :  { %v611_v44 = vmul.f32 %v609_v14, %v602_v42  ;;  %v641_v27 = vpop.permute.xlu1 %640 }
 0xbce   :  { %v2248_v45 = vpop.eup %2247 }
 0xbcf   :  { %613 = vrot.lane.b32.xlu0 %v611_v44, %s2390_s3  ;;  %v676_v44 = vperm.slane %v674_v43, 0 }
 0xbd7   :  { %381 = vrot.lane.b32.xlu0 %v2248_v45, %s2391_s1 }
 0xbdf   :  { %636 = vrot.lane.b32.xlu0 %v2766_v24, %s2392_s27  ;;  %v2868_v24 = vld [vmem:[%s3534_s4 + $0x30] sm:$0xff] }
 0xc41   :  { %v614_v46 = vpop.permute.xlu0 %613 }
 0xc42   :  { %v616_v47 = vadd.f32 %v614_v46, %v2723_v63  ;;  %v673_v63 = vld [vmem:[%s3535_s25 + $0x78] sm:$0xff] }
 0xc43   :  { %712 = vmatpush.msrb.mxu1 %v673_v63 }
 0xc44   :  { %2249 = vtanh.f32 %v616_v47 }
 0xc45   :  { %2251 = vtanh.f32 %v604_v56  ;;  %713 = vmatpush.msrb.mxu1 %v671_v62 }
 0xc47   :  { %714 = vmatpush.msrb.mxu1 %v669_v1 }
 0xc49   :  { %v382_v50 = vpop.permute.xlu0 %381  ;;  %715 = vmatpush.msrb.mxu1 %v667_v15 }
 0xc4a   :  { %v2250_v51 = vpop.eup %2249  ;;  %v384_v52 = vmul.f32 %v382_v50, %v379_v48  ;;  %v2919_v48 = vld [vmem:[%s3501_s8 + $0x1] ss:$0 sm:$0xff] }
 0xc4b   :  { %620 = vrot.lane.b32.xlu2 %v2250_v51, %s2391_s1  ;;  %v2252_v10 = vpop.eup %2251  ;;  %716 = vmatpush.msrb.mxu1 %v665_v17 }
 0xc4c   :  { %v388_v54 = vadd.f32 %v387_v37, %v384_v52  ;;  %v606_v57 = vadd.f32 1.0, %v2252_v10 }
 0xc4d   :  { %717 = vmatpush.msrb.mxu1 %v663_v18 }
 0xc4e   :  { %648 = vrot.lane.b32.xlu0 %v388_v54, %s2391_s1  ;;  %v607_v58 = vmul.f32 0.5, %v606_v57 }
 0xc4f   :  { %718 = vmatpush.msrb.mxu1 %v661_v20 }
 0xc50   :  { %v618_v2 = vsub.f32 1.0, %v607_v58  ;;  %v625_v5 = vmul.f32 %v607_v58, %v571_v31  ;;  %v2875_v31 = vld [vmem:[%s3534_s4 + $0x28] sm:$0xff] }
 0xc51   :  { %719 = vmatpush.msrb.mxu1 %v659_v22  ;;  %v637_v29 = vpop.permute.xlu0 %636 }
 0xc53   :  { %633 = vrot.lane.b32.xlu2 %v2619_v8, %s2391_s1  ;;  %v672_v8 = vld [vmem:[%s3535_s25 + $0x70] sm:$0xff]  ;;  %1016 = vmatpush.msra.mxu1 %v2863_v23 }
 0xc54   :  { %692 = vmatpush.msrb.mxu0 %v672_v8 }
 0xc55   :  { %1017 = vmatpush.msra.mxu1 %v2868_v24 }
 0xc56   :  { %693 = vmatpush.msrb.mxu0 %v670_v61 }
 0xc57   :  { %1018 = vmatpush.msra.mxu1 %v2875_v31 }
 0xc58   :  { %694 = vmatpush.msrb.mxu0 %v668_v0 }
 0xc59   :  { %1019 = vmatpush.msra.mxu1 %v2883_v26 }
 0xc5a   :  { %695 = vmatpush.msrb.mxu0 %v666_v34 }
 0xc5b   :  { %643 = vrot.lane.b32.xlu2 %v2751_v30, %s2392_s27  ;;  %v725_v30 = vld [vmem:[%s3534_s4 + $0x8] sm:$0xff] }
 0xc5c   :  { %746 = vmatpush.msra.mxu2 %v725_v30  ;;  %795 = vmatpush.msra.mxu3 %v725_v30 }
 0xc5d   :  { %696 = vmatpush.msrb.mxu0 %v664_v16 }
 0xc5e   :  { %747 = vmatpush.msra.mxu2 %v724_v3  ;;  %796 = vmatpush.msra.mxu3 %v724_v3 }
 0xc5f   :  { %748 = vmatmul.f32.vlgmr.msra.gmra.mxu2 %v2389_v9 }
 0xc60   :  { %901 = vmatpush.msrb.mxu3 %v727_v59  ;;  %847 = vmatpush.msrb.mxu2 %v727_v59 }
 0xc62   :  { %902 = vmatpush.msrb.mxu3 %v726_v60  ;;  %848 = vmatpush.msrb.mxu2 %v726_v60 }
 0xc64   :  { %903 = vmatpush.msrb.mxu3 %v725_v30  ;;  %849 = vmatpush.msrb.mxu2 %v725_v30 }
 0xc66   :  { %904 = vmatpush.msrb.mxu3 %v724_v3  ;;  %850 = vmatpush.msrb.mxu2 %v724_v3 }
 0xc68   :  { %1075 = vmatpush.msra.mxu2 %v2863_v23 }
 0xc6a   :  { %1076 = vmatpush.msra.mxu2 %v2868_v24 }
 0xc6c   :  { %1077 = vmatpush.msra.mxu2 %v2875_v31 }
 0xc6e   :  { %1078 = vmatpush.msra.mxu2 %v2883_v26 }
 0xca5   :  { %v621_v4 = vpop.permute.xlu2 %620 }
 0xca6   :  { %v623_v6 = vmul.f32 %v621_v4, %v618_v2 }
 0xca8   :  { %v626_v7 = vadd.f32 %v625_v5, %v623_v6  ;;  %v677_v6 = vperm.slane %v674_v43, 1 }
 0xcaa   :  { %629 = vrot.lane.b32.xlu1 %v626_v7, %s2392_s27 }
 0xcad   :  { %v634_v28 = vpop.permute.xlu2 %633 }
 0xcae   :  { %v639_v12 = vsel %vm180_vm3, %v634_v28, %v637_v29 }
 0xcb2   :  { %651 = vrot.lane.b32.xlu1 %v2735_v25, %s2392_s27  ;;  %v662_v25 = vld [vmem:[%s3535_s25 + $0x20] sm:$0xff] }
 0xcb3   :  { %697 = vmatpush.msrb.mxu0 %v662_v25 }
 0xcb5   :  { %698 = vmatpush.msrb.mxu0 %v660_v19  ;;  %v644_v33 = vpop.permute.xlu2 %643 }
 0xcb6   :  { %v646_v36 = vsel %vm180_vm3, %v641_v27, %v644_v33 }
 0xcb7   :  { %699 = vmatpush.msrb.mxu0 %v658_v21 }
 0xcb9   :  { %959 = vmatpush.msra.mxu0 %v2863_v23 }
 0xcbb   :  { %960 = vmatpush.msra.mxu0 %v2868_v24 }
 0xcbd   :  { %961 = vmatpush.msra.mxu0 %v2875_v31 }
 0xcbf   :  { %962 = vmatpush.msra.mxu0 %v2883_v26 }
 0xcc0   :  { %v649_v38 = vpop.permute.xlu0 %648 }
 0xce2   :  { %v749_v41 = vpop.f32.mrf.mxu2 }
 0xd1c   :  { %v630_v32 = vpop.permute.xlu1 %629 }
 0xd1d   :  { %v632_v11 = vsel %vm180_vm3, %v2609_v53, %v630_v32  ;;  %v2905_v53 = vld [vmem:[%s3501_s8] ss:$0 sm:$0xff] }
 0xd1e   :  { %v655_v13 = vsel %vm88_vm0, %v632_v11, %v639_v12  ;;  %v750_v42 = vadd.f32 %v2905_v53, %v749_v41 }
 0xd1f   :  { %v656_v35 = vsel %vm90_vm1, %v655_v13, %v646_v36 }
 0xd20   :  { %758 = vrot.lane.b32.xlu2 %v750_v42, %s2390_s3 }
 0xd24   :  { %v652_v14 = vpop.permute.xlu1 %651 }
 0xd25   :  { %v654_v39 = vsel %vm180_vm3, %v649_v38, %v652_v14 }
 0xd26   :  { %v657_v40 = vsel %vm92_vm2, %v656_v35, %v654_v39 }
 0xd27   :  { %2123 = vmatmul.msk.f32.vlgmr.msrb.gmra.mxu0 %vm680_vm4, %v657_v40  ;;  %2124 = vmatmul.msk.f32.vlgmr.msrb.gmra.mxu1 %vm680_vm4, %v657_v40 }
 0xd2f   :  { %963 = vmatmul.f32.vlgmr.msra.gmra.mxu0 %v2389_v9 }
 0xd7a   :  { %v759_v55 = vpop.permute.xlu2 %758 }
 0xda4   :  { %v701_v45 = vpop.f32.mrf.mxu0  ;;  %v721_v34 = vpop.f32.mrf.mxu1 }
 0xda5   :  { %v2913_v46 = vadd.f32 %v701_v45, %v676_v44  ;;  %v2933_v15 = vadd.f32 %v721_v34, %v677_v6 }
 0xda7   :  { %v752_v47 = vadd.f32 %v750_v42, %v2913_v46 }
 0xda9   :  { %v753_v49 = vmul.f32 0.5, %v752_v47 }
 0xdab   :  { %2253 = vtanh.f32 %v753_v49 }
 0xdac   :  { %v964_v50 = vpop.f32.mrf.mxu0 }
 0xdad   :  { %v965_v51 = vadd.f32 %v2919_v48, %v964_v50 }
 0xdaf   :  { %v968_v37 = vrot.slane %v965_v51, 2 }
 0xdb1   :  { %v2254_v52 = vpop.eup %2253  ;;  %969 = vrot.lane.b32.xlu1 %v968_v37, %s2391_s1 }
 0xdb2   :  { %v755_v54 = vadd.f32 1.0, %v2254_v52 }
 0xdb4   :  { %v756_v56 = vmul.f32 0.5, %v755_v54 }
 0xdb6   :  { %v761_v10 = vmul.f32 %v759_v55, %v756_v56  ;;  %v768_v2 = vsub.f32 1.0, %v756_v56  ;;  %v774_v4 = vmul.f32 0.0, %v756_v56 }
 0xdb8   :  { %763 = vrot.lane.b32.xlu0 %v761_v10, %s2390_s3 }
 0xdc0   :  { %982 = vrot.lane.b32.xlu0 %v968_v37, %s2392_s27 }
 0xe23   :  { %v970_v57 = vpop.permute.xlu1 %969 }
 0xe24   :  { %v972_v58 = vadd.f32 %v970_v57, %v2913_v46  ;;  %v977_v18 = vadd.f32 %v970_v57, %v2933_v15 }
 0xe26   :  { %v973_v59 = vmul.f32 0.5, %v972_v58  ;;  %v978_v19 = vmul.f32 0.5, %v977_v18 }
 0xe28   :  { %2255 = vtanh.f32 %v973_v59 }
 0xe2a   :  { %v764_v60 = vpop.permute.xlu0 %763 }
 0xe2b   :  { %v766_v8 = vadd.f32 %v764_v60, %v2913_v46 }
 0xe2d   :  { %2257 = vtanh.f32 %v766_v8 }
 0xe2e   :  { %v2256_v63 = vpop.eup %2255 }
 0xe2f   :  { %v975_v30 = vadd.f32 1.0, %v2256_v63 }
 0xe31   :  { %v976_v62 = vmul.f32 0.5, %v975_v30 }
 0xe32   :  { %v983_v0 = vpop.permute.xlu0 %982 }
 0xe33   :  { %v2258_v61 = vpop.eup %2257  ;;  %v985_v1 = vmul.f32 %v983_v0, %v976_v62 }
 0xe34   :  { %770 = vrot.lane.b32.xlu2 %v2258_v61, %s2391_s1 }
 0xe3c   :  { %987 = vrot.lane.b32.xlu2 %v985_v1, %s2390_s3 }
 0xe8e   :  { %v771_v3 = vpop.permute.xlu2 %770 }
 0xe8f   :  { %v773_v5 = vmul.f32 %v771_v3, %v768_v2 }
 0xe91   :  { %v2929_v7 = vadd.f32 %v774_v4, %v773_v5 }
 0xe93   :  { %777 = vrot.lane.b32.xlu1 %v2929_v7, %s2391_s1  ;;  %v825_v58 = vrot.slane %v2929_v7, 6 }
 0xe96   :  { %v988_v16 = vpop.permute.xlu2 %987 }
 0xe97   :  { %v990_v17 = vadd.f32 %v988_v16, %v2933_v15 }
 0xe99   :  { %2259 = vtanh.f32 %v990_v17 }
 0xe9a   :  { %2261 = vtanh.f32 %v978_v19 }
 0xe9f   :  { %v2260_v25 = vpop.eup %2259 }
 0xea0   :  { %994 = vrot.lane.b32.xlu0 %v2260_v25, %s2391_s1  ;;  %v2262_v21 = vpop.eup %2261 }
 0xea1   :  { %v980_v22 = vadd.f32 1.0, %v2262_v21 }
 0xea3   :  { %v981_v27 = vmul.f32 0.5, %v980_v22 }
 0xea5   :  { %v992_v28 = vsub.f32 1.0, %v981_v27  ;;  %v998_v32 = vmul.f32 0.0, %v981_v27 }
 0xf05   :  { %v2938_v20 = vpop.permute.xlu1 %777 }
 0xf06   :  { %2125 = vmatmul.msk.f32.vlgmr.msra.gmra.mxu3 %vm180_vm3, %v2938_v20 }
 0xf07   :  { %1134 = vmatpush.msra.mxu3 %v2863_v23 }
 0xf09   :  { %1135 = vmatpush.msra.mxu3 %v2868_v24 }
 0xf0b   :  { %1136 = vmatpush.msra.mxu3 %v2875_v31 }
 0xf0d   :  { %1137 = vmatpush.msra.mxu3 %v2883_v26 }
 0xf12   :  { %v995_v29 = vpop.permute.xlu0 %994 }
 0xf13   :  { %v997_v11 = vmul.f32 %v995_v29, %v992_v28 }
 0xf15   :  { %v2946_v12 = vadd.f32 %v998_v32, %v997_v11 }
 0xf17   :  { %v1001_v33 = vrot.slane %v2946_v12, 6  ;;  %v1055_v6 = vrot.slane %v2946_v12, 2 }
 0xf19   :  { %2133 = vmatmul.msk.f32.vlgmr.msra.gmra.mxu1 %vm180_vm3, %v1001_v33 }
 0xf89   :  { %v798_v13 = vpop.f32.mrf.mxu3 }
 0xf8a   :  { %v799_v23 = vadd.f32 %v2905_v53, %v798_v13 }
 0xf8c   :  { %v802_v36 = vrot.slane %v799_v23, 6 }
 0xf8e   :  { %809 = vrot.lane.b32.xlu1 %v802_v36, %s2390_s3  ;;  %v804_v38 = vadd.f32 %v802_v36, %v2913_v46 }
 0xf90   :  { %v805_v14 = vmul.f32 0.5, %v804_v38 }
 0xf92   :  { %2263 = vtanh.f32 %v805_v14 }
 0xf96   :  { %v1021_v24 = vpop.f32.mrf.mxu1 }
 0xf97   :  { %v1022_v31 = vadd.f32 %v2919_v48, %v1021_v24 }
 0xf98   :  { %v2264_v39 = vpop.eup %2263 }
 0xf99   :  { %v1025_v26 = vrot.slane %v1022_v31, 4  ;;  %v807_v35 = vadd.f32 1.0, %v2264_v39 }
 0xf9b   :  { %1039 = vrot.lane.b32.xlu1 %v1025_v26, %s2392_s27  ;;  %1026 = vrot.lane.b32.xlu0 %v1025_v26, %s2391_s1  ;;  %v808_v40 = vmul.f32 0.5, %v807_v35 }
 0xf9d   :  { %v819_v59 = vsub.f32 1.0, %v808_v40  ;;  %v827_v8 = vmul.f32 %v825_v58, %v808_v40 }
0x1000   :  { %v810_v41 = vpop.permute.xlu1 %809 }
0x1001   :  { %v812_v42 = vmul.f32 %v810_v41, %v808_v40 }
0x1003   :  { %814 = vrot.lane.b32.xlu2 %v812_v42, %s2390_s3 }
0x100d   :  { %v1027_v43 = vpop.permute.xlu0 %1026  ;;  %v1040_v51 = vpop.permute.xlu1 %1039 }
0x100e   :  { %v1029_v44 = vadd.f32 %v1027_v43, %v2913_v46  ;;  %v1034_v62 = vadd.f32 %v1027_v43, %v2933_v15 }
0x1010   :  { %v1030_v45 = vmul.f32 0.5, %v1029_v44  ;;  %v1035_v0 = vmul.f32 0.5, %v1034_v62 }
0x1012   :  { %2265 = vtanh.f32 %v1030_v45 }
0x1018   :  { %v2266_v47 = vpop.eup %2265 }
0x1019   :  { %v1032_v49 = vadd.f32 1.0, %v2266_v47 }
0x101b   :  { %v1033_v50 = vmul.f32 0.5, %v1032_v49 }
0x101d   :  { %v1042_v37 = vmul.f32 %v1040_v51, %v1033_v50 }
0x101f   :  { %1044 = vrot.lane.b32.xlu0 %v1042_v37, %s2390_s3 }
0x105d   :  { %v815_v52 = vpop.permute.xlu2 %814 }
0x105e   :  { %v817_v54 = vadd.f32 %v815_v52, %v2913_v46 }
0x1060   :  { %2267 = vtanh.f32 %v817_v54 }
0x1066   :  { %v2268_v55 = vpop.eup %2267 }
0x1067   :  { %821 = vrot.lane.b32.xlu2 %v2268_v55, %s2391_s1 }
0x1091   :  { %v1045_v56 = vpop.permute.xlu0 %1044 }
0x1092   :  { %v1047_v10 = vadd.f32 %v1045_v56, %v2933_v15 }
0x1094   :  { %2269 = vtanh.f32 %v1047_v10 }
0x1095   :  { %2271 = vtanh.f32 %v1035_v0 }
0x109a   :  { %v2270_v57 = vpop.eup %2269 }
0x109b   :  { %1051 = vrot.lane.b32.xlu2 %v2270_v57, %s2391_s1  ;;  %v2272_v1 = vpop.eup %2271 }
0x109c   :  { %v1037_v2 = vadd.f32 1.0, %v2272_v1 }
0x109e   :  { %v1038_v3 = vmul.f32 0.5, %v1037_v2 }
0x10a0   :  { %v1049_v5 = vsub.f32 1.0, %v1038_v3  ;;  %v1057_v16 = vmul.f32 %v1055_v6, %v1038_v3 }
0x10c1   :  { %v822_v60 = vpop.permute.xlu2 %821 }
0x10c2   :  { %v824_v63 = vmul.f32 %v822_v60, %v819_v59 }
0x10c4   :  { %v2964_v30 = vadd.f32 %v827_v8, %v824_v63 }
0x10c6   :  { %v830_v61 = vrot.slane %v2964_v30, 2  ;;  %v879_v50 = vrot.slane %v2964_v30, 6 }
0x10c8   :  { %831 = vrot.lane.b32.xlu1 %v830_v61, %s2391_s1 }
0x10f5   :  { %v1052_v4 = vpop.permute.xlu2 %1051 }
0x10f6   :  { %v1054_v7 = vmul.f32 %v1052_v4, %v1049_v5 }
0x10f8   :  { %v2971_v17 = vadd.f32 %v1057_v16, %v1054_v7 }
0x10fa   :  { %v1060_v25 = vrot.slane %v2971_v17, 4  ;;  %v1114_v63 = vrot.slane %v2971_v17, 2 }
0x113a   :  { %v832_v34 = vpop.permute.xlu1 %831 }
0x113b   :  { %2126 = vmatmul.msk.f32.vlgmr.msrb.gmra.mxu2 %vm180_vm3, %v832_v34 }
0x1143   :  { %2134 = vmatmul.msk.f32.vlgmr.msra.gmra.mxu2 %vm180_vm3, %v1060_v25 }
0x11be   :  { %v852_v18 = vpop.f32.mrf.mxu2 }
0x11bf   :  { %v853_v19 = vadd.f32 %v2905_v53, %v852_v18 }
0x11c1   :  { %v856_v21 = vrot.slane %v853_v19, 4 }
0x11c3   :  { %863 = vrot.lane.b32.xlu0 %v856_v21, %s2390_s3  ;;  %v858_v29 = vadd.f32 %v856_v21, %v2913_v46 }
0x11c5   :  { %v859_v32 = vmul.f32 0.5, %v858_v29 }
0x11c6   :  { %v1080_v22 = vpop.f32.mrf.mxu2 }
0x11c7   :  { %v1081_v27 = vadd.f32 %v2919_v48, %v1080_v22  ;;  %2273 = vtanh.f32 %v859_v32 }
0x11c9   :  { %v1084_v28 = vrot.slane %v1081_v27, 6 }
0x11cb   :  { %1098 = vrot.lane.b32.xlu0 %v1084_v28, %s2392_s27  ;;  %1085 = vrot.lane.b32.xlu1 %v1084_v28, %s2391_s1 }
0x11cd   :  { %v2274_v11 = vpop.eup %2273 }
0x11ce   :  { %v861_v33 = vadd.f32 1.0, %v2274_v11 }
0x11d0   :  { %v862_v13 = vmul.f32 0.5, %v861_v33 }
0x11d2   :  { %v873_v49 = vsub.f32 1.0, %v862_v13  ;;  %v881_v37 = vmul.f32 %v879_v50, %v862_v13 }
0x1235   :  { %v864_v23 = vpop.permute.xlu0 %863 }
0x1236   :  { %v866_v36 = vmul.f32 %v864_v23, %v862_v13 }
0x1238   :  { %868 = vrot.lane.b32.xlu2 %v866_v36, %s2390_s3 }
0x123d   :  { %v1086_v24 = vpop.permute.xlu1 %1085  ;;  %v1099_v35 = vpop.permute.xlu0 %1098 }
0x123e   :  { %v1088_v31 = vadd.f32 %v1086_v24, %v2913_v46  ;;  %v1093_v56 = vadd.f32 %v1086_v24, %v2933_v15 }
0x1240   :  { %v1089_v26 = vmul.f32 0.5, %v1088_v31  ;;  %v1094_v10 = vmul.f32 0.5, %v1093_v56  ;;  %v1218_v56 = vld [vmem:[%s3502_s9 + $0x60] sm:$0xff] }
0x1242   :  { %2275 = vtanh.f32 %v1089_v26 }
0x1248   :  { %v2276_v38 = vpop.eup %2275 }
0x1249   :  { %v1091_v14 = vadd.f32 1.0, %v2276_v38 }
0x124b   :  { %v1092_v39 = vmul.f32 0.5, %v1091_v14 }
0x124d   :  { %v1101_v40 = vmul.f32 %v1099_v35, %v1092_v39 }
0x124f   :  { %1103 = vrot.lane.b32.xlu1 %v1101_v40, %s2390_s3 }
0x1292   :  { %v869_v41 = vpop.permute.xlu2 %868 }
0x1293   :  { %v871_v42 = vadd.f32 %v869_v41, %v2913_v46 }
0x1295   :  { %2277 = vtanh.f32 %v871_v42 }
0x129b   :  { %v2278_v43 = vpop.eup %2277 }
0x129c   :  { %875 = vrot.lane.b32.xlu2 %v2278_v43, %s2391_s1 }
0x12c1   :  { %v1104_v44 = vpop.permute.xlu1 %1103 }
0x12c2   :  { %v1106_v45 = vadd.f32 %v1104_v44, %v2933_v15 }
0x12c4   :  { %2279 = vtanh.f32 %v1106_v45 }
0x12c5   :  { %2281 = vtanh.f32 %v1094_v10  ;;  %v1219_v10 = vld [vmem:[%s3502_s9 + $0x68] sm:$0xff] }
0x12ca   :  { %v2280_v47 = vpop.eup %2279 }
0x12cb   :  { %1110 = vrot.lane.b32.xlu1 %v2280_v47, %s2391_s1  ;;  %v2282_v57 = vpop.eup %2281 }
0x12cc   :  { %v1096_v58 = vadd.f32 1.0, %v2282_v57  ;;  %v1217_v57 = vld [vmem:[%s3502_s9 + $0x58] sm:$0xff] }
0x12ce   :  { %v1097_v59 = vmul.f32 0.5, %v1096_v58  ;;  %v1214_v58 = vld [vmem:[%s3502_s9 + $0x40] sm:$0xff] }
0x12d0   :  { %v1108_v8 = vsub.f32 1.0, %v1097_v59  ;;  %v1116_v0 = vmul.f32 %v1114_v63, %v1097_v59  ;;  %v1215_v59 = vld [vmem:[%s3502_s9 + $0x48] sm:$0xff]  ;;  %v1210_v63 = vld [vmem:[%s3502_s9 + $0x20] sm:$0xff] }
0x12f6   :  { %v876_v51 = vpop.permute.xlu2 %875 }
0x12f7   :  { %v878_v52 = vmul.f32 %v876_v51, %v873_v49 }
0x12f9   :  { %v2989_v54 = vadd.f32 %v881_v37, %v878_v52 }
0x12fb   :  { %v884_v55 = vrot.slane %v2989_v54, 4  ;;  %v933_v41 = vrot.slane %v2989_v54, 6 }
0x12fd   :  { %885 = vrot.lane.b32.xlu0 %v884_v55, %s2391_s1  ;;  %v1221_v55 = vld [vmem:[%s3502_s9 + $0x78] sm:$0xff] }
0x12fe   :  { %1259 = vmatpush.msrb.mxu1 %v1221_v55 }
0x1300   :  { %1260 = vmatpush.msrb.mxu1 %v1219_v10 }
0x1302   :  { %1261 = vmatpush.msrb.mxu1 %v1217_v57 }
0x1304   :  { %1262 = vmatpush.msrb.mxu1 %v1215_v59 }
0x133d   :  { %v1111_v60 = vpop.permute.xlu1 %1110 }
0x133e   :  { %v1113_v61 = vmul.f32 %v1111_v60, %v1108_v8  ;;  %v1212_v60 = vld [vmem:[%s3502_s9 + $0x30] sm:$0xff]  ;;  %v1213_v8 = vld [vmem:[%s3502_s9 + $0x38] sm:$0xff] }
0x133f   :  { %1263 = vmatpush.msrb.mxu1 %v1213_v8 }
0x1340   :  { %v2996_v1 = vadd.f32 %v1116_v0, %v1113_v61  ;;  %v1211_v61 = vld [vmem:[%s3502_s9 + $0x28] sm:$0xff]  ;;  %v1209_v0 = vld [vmem:[%s3502_s9 + $0x18] sm:$0xff] }
0x1341   :  { %1264 = vmatpush.msrb.mxu1 %v1211_v61 }
0x1342   :  { %v1119_v2 = vrot.slane %v2996_v1, 2 }
0x1343   :  { %1265 = vmatpush.msrb.mxu1 %v1209_v0 }
0x136f   :  { %v886_v62 = vpop.permute.xlu0 %885 }
0x1370   :  { %2127 = vmatmul.msk.f32.vlgmr.msrb.gmra.mxu3 %vm180_vm3, %v886_v62  ;;  %v1208_v62 = vld [vmem:[%s3502_s9 + $0x10] sm:$0xff] }
0x1378   :  { %2135 = vmatmul.msk.f32.vlgmr.msra.gmra.mxu3 %vm180_vm3, %v1119_v2 }
0x13f3   :  { %v906_v3 = vpop.f32.mrf.mxu3 }
0x13f4   :  { %v907_v4 = vadd.f32 %v2905_v53, %v906_v3  ;;  %v3095_v3 = vld [vmem:[%s3503_s10 + $0x38] sm:$0xff] }
0x13f6   :  { %v910_v5 = vrot.slane %v907_v4, 2  ;;  %v3100_v4 = vld [vmem:[%s3503_s10 + $0x30] sm:$0xff] }
0x13f8   :  { %917 = vrot.lane.b32.xlu1 %v910_v5, %s2390_s3  ;;  %v912_v34 = vadd.f32 %v910_v5, %v2913_v46  ;;  %v3107_v5 = vld [vmem:[%s3503_s10 + $0x28] sm:$0xff] }
0x13fa   :  { %v913_v16 = vmul.f32 0.5, %v912_v34 }
0x13fb   :  { %v1139_v6 = vpop.f32.mrf.mxu3 }
0x13fc   :  { %v1140_v7 = vadd.f32 %v2919_v48, %v1139_v6  ;;  %2283 = vtanh.f32 %v913_v16  ;;  %v3115_v6 = vld [vmem:[%s3503_s10 + $0x20] sm:$0xff] }
0x13fe   :  { %1156 = vrot.lane.b32.xlu0 %v1140_v7, %s2392_s27  ;;  %1143 = vrot.lane.b32.xlu2 %v1140_v7, %s2391_s1 }
0x1402   :  { %v2284_v21 = vpop.eup %2283 }
0x1403   :  { %v915_v53 = vadd.f32 1.0, %v2284_v21 }
0x1405   :  { %v916_v27 = vmul.f32 0.5, %v915_v53 }
0x1407   :  { %v927_v40 = vsub.f32 1.0, %v916_v27  ;;  %v935_v43 = vmul.f32 %v933_v41, %v916_v27 }
0x1458   :  { %v1144_v25 = vpop.permute.xlu2 %1143 }
0x1459   :  { %v1146_v18 = vadd.f32 %v1144_v25, %v2913_v46  ;;  %v1151_v38 = vadd.f32 %v1144_v25, %v2933_v15 }
0x145b   :  { %v1147_v19 = vmul.f32 0.5, %v1146_v18  ;;  %v1152_v14 = vmul.f32 0.5, %v1151_v38  ;;  %v3127_v18 = vld [vmem:[%s3505_s12] ss:$0 sm:$0xff] }
0x145d   :  { %2285 = vtanh.f32 %v1147_v19 }
0x1463   :  { %v2286_v22 = vpop.eup %2285 }
0x1464   :  { %v1149_v48 = vadd.f32 1.0, %v2286_v22 }
0x1466   :  { %v1150_v32 = vmul.f32 0.5, %v1149_v48 }
0x146a   :  { %v918_v28 = vpop.permute.xlu1 %917 }
0x146b   :  { %v920_v29 = vmul.f32 %v918_v28, %v916_v27 }
0x146d   :  { %922 = vrot.lane.b32.xlu0 %v920_v29, %s2390_s3 }
0x1470   :  { %v1157_v11 = vpop.permute.xlu0 %1156 }
0x1471   :  { %v1159_v33 = vmul.f32 %v1157_v11, %v1150_v32 }
0x1473   :  { %1161 = vrot.lane.b32.xlu2 %v1159_v33, %s2390_s3 }
0x1475   :  { %1188 = vrot.lane.b32.xlu0 %v2989_v54, %s2391_s1  ;;  %v1220_v54 = vld [vmem:[%s3502_s9 + $0x70] sm:$0xff] }
0x1476   :  { %1239 = vmatpush.msrb.mxu0 %v1220_v54 }
0x1478   :  { %1240 = vmatpush.msrb.mxu0 %v1218_v56 }
0x14cd   :  { %v1162_v13 = vpop.permute.xlu2 %1161 }
0x14ce   :  { %v1164_v23 = vadd.f32 %v1162_v13, %v2933_v15  ;;  %v1271_v15 = vld [vmem:[%s3503_s10] sm:$0xff] }
0x14cf   :  { %v1222_v13 = vld [vmem:[%s3504_s11] sm:$0x3] }
0x14d0   :  { %2287 = vtanh.f32 %v1164_v23  ;;  %v1224_v23 = vperm.slane %v1222_v13, 0 }
0x14d6   :  { %v2288_v36 = vpop.eup %2287 }
0x14d7   :  { %1168 = vrot.lane.b32.xlu1 %v2288_v36, %s2391_s1 }
0x14df   :  { %1181 = vrot.lane.b32.xlu1 %v2964_v30, %s2391_s1  ;;  %v923_v24 = vpop.permute.xlu0 %922  ;;  %v1274_v30 = vld [vmem:[%s3503_s10 + $0x18] sm:$0xff] }
0x14e0   :  { %v925_v31 = vadd.f32 %v923_v24, %v2913_v46  ;;  %1291 = vmatpush.msrb.mxu2 %v1274_v30  ;;  %1340 = vmatpush.msrb.mxu3 %v1274_v30  ;;  %v1273_v46 = vld [vmem:[%s3503_s10 + $0x10] sm:$0xff] }
0x14e2   :  { %2289 = vtanh.f32 %v925_v31  ;;  %1292 = vmatpush.msrb.mxu2 %v1273_v46  ;;  %1341 = vmatpush.msrb.mxu3 %v1273_v46 }
0x14e3   :  { %2291 = vtanh.f32 %v1152_v14 }
0x14e7   :  { %1191 = vrot.lane.b32.xlu1 %v2971_v17, %s2392_s27  ;;  %v1272_v17 = vld [vmem:[%s3503_s10 + $0x8] sm:$0xff]  ;;  %v1189_v7 = vpop.permute.xlu0 %1188 }
0x14e8   :  { %v2290_v26 = vpop.eup %2289  ;;  %1293 = vmatpush.msrb.mxu2 %v1272_v17  ;;  %1342 = vmatpush.msrb.mxu3 %v1272_v17 }
0x14e9   :  { %929 = vrot.lane.b32.xlu2 %v2290_v26, %s2391_s1  ;;  %v2292_v39 = vpop.eup %2291  ;;  %v3151_v26 = vld [vmem:[%s3505_s12 + $0x1] ss:$0 sm:$0xff] }
0x14ea   :  { %1294 = vmatpush.msrb.mxu2 %v1271_v15  ;;  %1343 = vmatpush.msrb.mxu3 %v1271_v15  ;;  %v1154_v35 = vadd.f32 1.0, %v2292_v39 }
0x14eb   :  { %1295 = vmatmul.f32.vlgmr.msrb.gmra.mxu2 %v2389_v9 }
0x14ec   :  { %1448 = vmatpush.msra.mxu3 %v1274_v30  ;;  %1394 = vmatpush.msra.mxu2 %v1274_v30  ;;  %v1155_v45 = vmul.f32 0.5, %v1154_v35 }
0x14ee   :  { %1449 = vmatpush.msra.mxu3 %v1273_v46  ;;  %1395 = vmatpush.msra.mxu2 %v1273_v46  ;;  %v1166_v49 = vsub.f32 1.0, %v1155_v45  ;;  %v1173_v51 = vmul.f32 %v1155_v45, %v1119_v2  ;;  %v1207_v2 = vld [vmem:[%s3502_s9 + $0x8] sm:$0xff] }
0x14ef   :  { %1266 = vmatpush.msrb.mxu1 %v1207_v2 }
0x14f0   :  { %1450 = vmatpush.msra.mxu3 %v1272_v17  ;;  %1396 = vmatpush.msra.mxu2 %v1272_v17 }
0x14f1   :  { %1184 = vrot.lane.b32.xlu2 %v2996_v1, %s2392_s27  ;;  %v1206_v1 = vld [vmem:[%s3502_s9] sm:$0xff]  ;;  %1563 = vmatpush.msra.mxu1 %v3095_v3 }
0x14f2   :  { %1451 = vmatpush.msra.mxu3 %v1271_v15  ;;  %1397 = vmatpush.msra.mxu2 %v1271_v15 }
0x14f3   :  { %1564 = vmatpush.msra.mxu1 %v3100_v4 }
0x14f4   :  { %1622 = vmatpush.msrb.mxu2 %v3095_v3 }
0x14f5   :  { %1565 = vmatpush.msra.mxu1 %v3107_v5 }
0x14f6   :  { %1623 = vmatpush.msrb.mxu2 %v3100_v4 }
0x14f7   :  { %1566 = vmatpush.msra.mxu1 %v3115_v6 }
0x14f8   :  { %1624 = vmatpush.msrb.mxu2 %v3107_v5 }
0x14fa   :  { %1625 = vmatpush.msrb.mxu2 %v3115_v6 }
0x1543   :  { %v930_v42 = vpop.permute.xlu2 %929 }
0x1544   :  { %v932_v44 = vmul.f32 %v930_v42, %v927_v40 }
0x1546   :  { %v936_v47 = vadd.f32 %v935_v43, %v932_v44 }
0x1548   :  { %1196 = vrot.lane.b32.xlu2 %v936_v47, %s2391_s1 }
0x1549   :  { %v1169_v50 = vpop.permute.xlu1 %1168 }
0x154a   :  { %v1171_v37 = vmul.f32 %v1169_v50, %v1166_v49 }
0x154b   :  { %v1185_v16 = vpop.permute.xlu2 %1184 }
0x154c   :  { %v1174_v52 = vadd.f32 %v1173_v51, %v1171_v37 }
0x154e   :  { %1177 = vrot.lane.b32.xlu0 %v1174_v52, %s2392_s27 }
0x1551   :  { %v1182_v34 = vpop.permute.xlu1 %1181 }
0x1552   :  { %v1187_v22 = vsel %vm180_vm3, %v1182_v34, %v1185_v16 }
0x1556   :  { %1199 = vrot.lane.b32.xlu0 %v2946_v12, %s2392_s27  ;;  %v1216_v12 = vld [vmem:[%s3502_s9 + $0x50] sm:$0xff]  ;;  %s2084_s9 = sshll.u32 %s3514_s21, 4  ;;  %s2085_s9 = int_to_ptr.hbm [resolvable:$true] %s2084_s9 }
0x1557   :  { %1241 = vmatpush.msrb.mxu0 %v1216_v12  ;;  %v1225_v12 = vperm.slane %v1222_v13, 1 }
0x1559   :  { %1242 = vmatpush.msrb.mxu0 %v1214_v58  ;;  %v1192_v27 = vpop.permute.xlu1 %1191 }
0x155a   :  { %v1194_v29 = vsel %vm180_vm3, %v1189_v7, %v1192_v27 }
0x155b   :  { %1243 = vmatpush.msrb.mxu0 %v1212_v60 }
0x155d   :  { %1244 = vmatpush.msrb.mxu0 %v1210_v63 }
0x155f   :  { %1245 = vmatpush.msrb.mxu0 %v1208_v62 }
0x1561   :  { %1246 = vmatpush.msrb.mxu0 %v1206_v1 }
0x1563   :  { %1506 = vmatpush.msra.mxu0 %v3095_v3 }
0x1565   :  { %1507 = vmatpush.msra.mxu0 %v3100_v4 }
0x1567   :  { %1508 = vmatpush.msra.mxu0 %v3107_v5 }
0x1569   :  { %1509 = vmatpush.msra.mxu0 %v3115_v6 }
0x156e   :  { %v1296_v21 = vpop.f32.mrf.mxu2 }
0x156f   :  { %v1297_v53 = vadd.f32 %v3127_v18, %v1296_v21 }
0x1571   :  { %1305 = vrot.lane.b32.xlu1 %v1297_v53, %s2390_s3 }
0x15a2   :  { %v1197_v48 = vpop.permute.xlu2 %1196 }
0x15c0   :  { %v1178_v25 = vpop.permute.xlu0 %1177 }
0x15c1   :  { %v1180_v19 = vsel %vm180_vm3, %v2938_v20, %v1178_v25 }
0x15c2   :  { %v1203_v28 = vsel %vm88_vm0, %v1180_v19, %v1187_v22 }
0x15c3   :  { %v1204_v11 = vsel %vm90_vm1, %v1203_v28, %v1194_v29 }
0x15c8   :  { %v1200_v32 = vpop.permute.xlu0 %1199 }
0x15c9   :  { %v1202_v33 = vsel %vm180_vm3, %v1197_v48, %v1200_v32 }
0x15ca   :  { %v1205_v20 = vsel %vm92_vm2, %v1204_v11, %v1202_v33 }
0x15cb   :  { %2136 = vmatmul.msk.f32.vlgmr.msrb.gmra.mxu0 %vm680_vm4, %v1205_v20  ;;  %2137 = vmatmul.msk.f32.vlgmr.msrb.gmra.mxu1 %vm680_vm4, %v1205_v20 }
0x15d3   :  { %1510 = vmatmul.f32.vlgmr.msra.gmra.mxu0 %v2389_v9 }
0x15e3   :  { %v1306_v15 = vpop.permute.xlu1 %1305 }
0x1648   :  { %v1248_v36 = vpop.f32.mrf.mxu0  ;;  %v1268_v57 = vpop.f32.mrf.mxu1 }
0x1649   :  { %v3145_v24 = vadd.f32 %v1248_v36, %v1224_v23  ;;  %v3165_v58 = vadd.f32 %v1268_v57, %v1225_v12 }
0x164b   :  { %v1299_v31 = vadd.f32 %v1297_v53, %v3145_v24 }
0x164d   :  { %v1300_v38 = vmul.f32 0.5, %v1299_v31 }
0x164f   :  { %2293 = vtanh.f32 %v1300_v38 }
0x1650   :  { %v1511_v14 = vpop.f32.mrf.mxu0 }
0x1651   :  { %v1512_v9 = vadd.f32 %v3151_v26, %v1511_v14 }
0x1653   :  { %v1515_v30 = vrot.slane %v1512_v9, 2 }
0x1655   :  { %v2294_v46 = vpop.eup %2293  ;;  %1516 = vrot.lane.b32.xlu0 %v1515_v30, %s2391_s1 }
0x1656   :  { %v1302_v17 = vadd.f32 1.0, %v2294_v46 }
0x1658   :  { %v1303_v39 = vmul.f32 0.5, %v1302_v17 }
0x165a   :  { %v1308_v35 = vmul.f32 %v1306_v15, %v1303_v39  ;;  %v1315_v52 = vsub.f32 1.0, %v1303_v39  ;;  %v1321_v55 = vmul.f32 0.0, %v1303_v39 }
0x165c   :  { %1310 = vrot.lane.b32.xlu2 %v1308_v35, %s2390_s3 }
0x1664   :  { %1529 = vrot.lane.b32.xlu2 %v1515_v30, %s2392_s27 }
0x16b6   :  { %v1311_v40 = vpop.permute.xlu2 %1310 }
0x16b7   :  { %v1313_v41 = vadd.f32 %v1311_v40, %v3145_v24 }
0x16b9   :  { %2295 = vtanh.f32 %v1313_v41 }
0x16be   :  { %v1530_v50 = vpop.permute.xlu2 %1529 }
0x16bf   :  { %v2296_v42 = vpop.eup %2295 }
0x16c0   :  { %1317 = vrot.lane.b32.xlu1 %v2296_v42, %s2391_s1 }
0x16c7   :  { %v1517_v43 = vpop.permute.xlu0 %1516 }
0x16c8   :  { %v1519_v44 = vadd.f32 %v1517_v43, %v3145_v24  ;;  %v1524_v63 = vadd.f32 %v1517_v43, %v3165_v58 }
0x16ca   :  { %v1520_v45 = vmul.f32 0.5, %v1519_v44  ;;  %v1525_v61 = vmul.f32 0.5, %v1524_v63 }
0x16cc   :  { %2297 = vtanh.f32 %v1520_v45 }
0x16d2   :  { %v2298_v47 = vpop.eup %2297 }
0x16d3   :  { %v1522_v49 = vadd.f32 1.0, %v2298_v47 }
0x16d5   :  { %v1523_v51 = vmul.f32 0.5, %v1522_v49 }
0x16d7   :  { %v1532_v37 = vmul.f32 %v1530_v50, %v1523_v51 }
0x16d9   :  { %1534 = vrot.lane.b32.xlu1 %v1532_v37, %s2390_s3 }
0x1732   :  { %v1318_v54 = vpop.permute.xlu1 %1317 }
0x1733   :  { %v1320_v56 = vmul.f32 %v1318_v54, %v1315_v52 }
0x1735   :  { %v3161_v10 = vadd.f32 %v1321_v55, %v1320_v56 }
0x1737   :  { %1324 = vrot.lane.b32.xlu0 %v3161_v10, %s2391_s1  ;;  %v1372_v40 = vrot.slane %v3161_v10, 6 }
0x174b   :  { %v1535_v59 = vpop.permute.xlu1 %1534 }
0x174c   :  { %v1537_v60 = vadd.f32 %v1535_v59, %v3165_v58 }
0x174e   :  { %2299 = vtanh.f32 %v1537_v60 }
0x174f   :  { %2301 = vtanh.f32 %v1525_v61 }
0x1754   :  { %v2300_v8 = vpop.eup %2299 }
0x1755   :  { %1541 = vrot.lane.b32.xlu2 %v2300_v8, %s2391_s1  ;;  %v2302_v62 = vpop.eup %2301 }
0x1756   :  { %v1527_v0 = vadd.f32 1.0, %v2302_v62 }
0x1758   :  { %v1528_v2 = vmul.f32 0.5, %v1527_v0 }
0x175a   :  { %v1539_v7 = vsub.f32 1.0, %v1528_v2  ;;  %v1545_v16 = vmul.f32 0.0, %v1528_v2 }
0x17a9   :  { %v3170_v1 = vpop.permute.xlu0 %1324 }
0x17aa   :  { %2138 = vmatmul.msk.f32.vlgmr.msrb.gmra.mxu3 %vm180_vm3, %v3170_v1 }
0x17ab   :  { %1681 = vmatpush.msrb.mxu3 %v3095_v3 }
0x17ad   :  { %1682 = vmatpush.msrb.mxu3 %v3100_v4 }
0x17af   :  { %v1542_v34 = vpop.permute.xlu2 %1541  ;;  %1683 = vmatpush.msrb.mxu3 %v3107_v5 }
0x17b0   :  { %v1544_v25 = vmul.f32 %v1542_v34, %v1539_v7 }
0x17b1   :  { %1684 = vmatpush.msrb.mxu3 %v3115_v6 }
0x17b2   :  { %v3178_v19 = vadd.f32 %v1545_v16, %v1544_v25 }
0x17b4   :  { %v1548_v21 = vrot.slane %v3178_v19, 6  ;;  %v1602_v56 = vrot.slane %v3178_v19, 2 }
0x17b6   :  { %2146 = vmatmul.msk.f32.vlgmr.msra.gmra.mxu1 %vm180_vm3, %v1548_v21 }
0x182d   :  { %v1345_v53 = vpop.f32.mrf.mxu3 }
0x182e   :  { %v1346_v22 = vadd.f32 %v3127_v18, %v1345_v53 }
0x1830   :  { %v1349_v3 = vrot.slane %v1346_v22, 6 }
0x1832   :  { %1356 = vrot.lane.b32.xlu0 %v1349_v3, %s2390_s3  ;;  %v1351_v6 = vadd.f32 %v1349_v3, %v3145_v24 }
0x1833   :  { %v1568_v4 = vpop.f32.mrf.mxu1 }
0x1834   :  { %v1569_v27 = vadd.f32 %v3151_v26, %v1568_v4  ;;  %v1352_v28 = vmul.f32 0.5, %v1351_v6 }
0x1836   :  { %v1572_v5 = vrot.slane %v1569_v27, 4  ;;  %2303 = vtanh.f32 %v1352_v28 }
0x1838   :  { %1573 = vrot.lane.b32.xlu2 %v1572_v5, %s2391_s1 }
0x183a   :  { %1586 = vrot.lane.b32.xlu0 %v1572_v5, %s2392_s27 }
0x183c   :  { %v2304_v11 = vpop.eup %2303 }
0x183d   :  { %v1354_v33 = vadd.f32 1.0, %v2304_v11 }
0x183f   :  { %v1355_v20 = vmul.f32 0.5, %v1354_v33 }
0x1841   :  { %v1366_v41 = vsub.f32 1.0, %v1355_v20  ;;  %v1374_v43 = vmul.f32 %v1372_v40, %v1355_v20 }
0x1892   :  { %v1574_v29 = vpop.permute.xlu2 %1573 }
0x1893   :  { %v1576_v48 = vadd.f32 %v1574_v29, %v3145_v24  ;;  %v1581_v49 = vadd.f32 %v1574_v29, %v3165_v58 }
0x1895   :  { %v1577_v32 = vmul.f32 0.5, %v1576_v48  ;;  %v1582_v50 = vmul.f32 0.5, %v1581_v49 }
0x1897   :  { %2305 = vtanh.f32 %v1577_v32 }
0x189d   :  { %v2306_v13 = vpop.eup %2305 }
0x189e   :  { %v1579_v31 = vadd.f32 1.0, %v2306_v13 }
0x18a0   :  { %v1580_v38 = vmul.f32 0.5, %v1579_v31 }
0x18a4   :  { %v1357_v23 = vpop.permute.xlu0 %1356 }
0x18a5   :  { %v1359_v36 = vmul.f32 %v1357_v23, %v1355_v20 }
0x18a7   :  { %1361 = vrot.lane.b32.xlu1 %v1359_v36, %s2390_s3 }
0x18ac   :  { %v1587_v14 = vpop.permute.xlu0 %1586 }
0x18ad   :  { %v1589_v9 = vmul.f32 %v1587_v14, %v1580_v38 }
0x18af   :  { %1591 = vrot.lane.b32.xlu2 %v1589_v9, %s2390_s3 }
0x1909   :  { %v1592_v17 = vpop.permute.xlu2 %1591 }
0x190a   :  { %v1594_v15 = vadd.f32 %v1592_v17, %v3165_v58 }
0x1919   :  { %v1362_v30 = vpop.permute.xlu1 %1361 }
0x191a   :  { %v1364_v46 = vadd.f32 %v1362_v30, %v3145_v24 }
0x191c   :  { %2307 = vtanh.f32 %v1364_v46 }
0x191d   :  { %2309 = vtanh.f32 %v1594_v15 }
0x191e   :  { %2311 = vtanh.f32 %v1582_v50 }
0x1922   :  { %v2308_v39 = vpop.eup %2307 }
0x1923   :  { %1368 = vrot.lane.b32.xlu1 %v2308_v39, %s2391_s1  ;;  %v2310_v35 = vpop.eup %2309 }
0x1924   :  { %v2312_v51 = vpop.eup %2311 }
0x1925   :  { %v1584_v37 = vadd.f32 1.0, %v2312_v51 }
0x1927   :  { %v1585_v52 = vmul.f32 0.5, %v1584_v37 }
0x1929   :  { %v1596_v55 = vsub.f32 1.0, %v1585_v52  ;;  %v1604_v57 = vmul.f32 %v1602_v56, %v1585_v52 }
0x192b   :  { %1598 = vrot.lane.b32.xlu1 %v2310_v35, %s2391_s1 }
0x1995   :  { %v1369_v42 = vpop.permute.xlu1 %1368 }
0x1996   :  { %v1371_v44 = vmul.f32 %v1369_v42, %v1366_v41 }
0x1998   :  { %v3196_v45 = vadd.f32 %v1374_v43, %v1371_v44 }
0x199a   :  { %v1377_v47 = vrot.slane %v3196_v45, 2  ;;  %v1426_v31 = vrot.slane %v3196_v45, 6 }
0x199c   :  { %1378 = vrot.lane.b32.xlu0 %v1377_v47, %s2391_s1 }
0x199d   :  { %v1599_v54 = vpop.permute.xlu1 %1598 }
0x199e   :  { %v1601_v10 = vmul.f32 %v1599_v54, %v1596_v55 }
0x19a0   :  { %v3203_v59 = vadd.f32 %v1604_v57, %v1601_v10 }
0x19a2   :  { %v1607_v60 = vrot.slane %v3203_v59, 4  ;;  %v1661_v43 = vrot.slane %v3203_v59, 2 }
0x1a0e   :  { %v1379_v12 = vpop.permute.xlu0 %1378 }
0x1a0f   :  { %2139 = vmatmul.msk.f32.vlgmr.msra.gmra.mxu2 %vm180_vm3, %v1379_v12 }
0x1a17   :  { %2147 = vmatmul.msk.f32.vlgmr.msrb.gmra.mxu2 %vm180_vm3, %v1607_v60 }
0x1a92   :  { %v1399_v8 = vpop.f32.mrf.mxu2 }
0x1a93   :  { %v1400_v63 = vadd.f32 %v3127_v18, %v1399_v8 }
0x1a95   :  { %v1403_v61 = vrot.slane %v1400_v63, 4 }
0x1a97   :  { %1410 = vrot.lane.b32.xlu2 %v1403_v61, %s2390_s3  ;;  %v1405_v7 = vadd.f32 %v1403_v61, %v3145_v24 }
0x1a99   :  { %v1406_v34 = vmul.f32 0.5, %v1405_v7 }
0x1a9a   :  { %v1627_v62 = vpop.f32.mrf.mxu2 }
0x1a9b   :  { %v1628_v0 = vadd.f32 %v3151_v26, %v1627_v62  ;;  %2313 = vtanh.f32 %v1406_v34 }
0x1a9d   :  { %v1631_v2 = vrot.slane %v1628_v0, 6 }
0x1a9f   :  { %1645 = vrot.lane.b32.xlu2 %v1631_v2, %s2392_s27  ;;  %1632 = vrot.lane.b32.xlu0 %v1631_v2, %s2391_s1 }
0x1aa1   :  { %v2314_v16 = vpop.eup %2313 }
0x1aa2   :  { %v1408_v25 = vadd.f32 1.0, %v2314_v16 }
0x1aa4   :  { %v1409_v21 = vmul.f32 0.5, %v1408_v25 }
0x1aa6   :  { %v1420_v36 = vsub.f32 1.0, %v1409_v21  ;;  %v1428_v14 = vmul.f32 %v1426_v31, %v1409_v21  ;;  %v1782_v31 = vld [vmem:[%s3506_s13 + $0x28] sm:$0xff] }
0x1af1   :  { %v1411_v53 = vpop.permute.xlu2 %1410 }
0x1af2   :  { %v1413_v22 = vmul.f32 %v1411_v53, %v1409_v21 }
0x1af4   :  { %1415 = vrot.lane.b32.xlu1 %v1413_v22, %s2390_s3 }
0x1af9   :  { %v1646_v29 = vpop.permute.xlu2 %1645 }
0x1b11   :  { %v1633_v3 = vpop.permute.xlu0 %1632 }
0x1b12   :  { %v1635_v4 = vadd.f32 %v1633_v3, %v3145_v24  ;;  %v1640_v17 = vadd.f32 %v1633_v3, %v3165_v58 }
0x1b14   :  { %v1636_v27 = vmul.f32 0.5, %v1635_v4  ;;  %v1641_v15 = vmul.f32 0.5, %v1640_v17  ;;  %v1937_v17 = vld [vmem:[%s3510_s17 + $0x38] sm:$0xff] }
0x1b16   :  { %2315 = vtanh.f32 %v1636_v27 }
0x1b1c   :  { %v2316_v5 = vpop.eup %2315 }
0x1b1d   :  { %v1638_v6 = vadd.f32 1.0, %v2316_v5 }
0x1b1f   :  { %v1639_v28 = vmul.f32 0.5, %v1638_v6 }
0x1b21   :  { %v1648_v48 = vmul.f32 %v1646_v29, %v1639_v28 }
0x1b23   :  { %1650 = vrot.lane.b32.xlu0 %v1648_v48, %s2390_s3 }
0x1b66   :  { %v1416_v32 = vpop.permute.xlu1 %1415 }
0x1b67   :  { %v1418_v11 = vadd.f32 %v1416_v32, %v3145_v24 }
0x1b69   :  { %2317 = vtanh.f32 %v1418_v11 }
0x1b6f   :  { %v2318_v33 = vpop.eup %2317 }
0x1b70   :  { %1422 = vrot.lane.b32.xlu1 %v2318_v33, %s2391_s1 }
0x1b95   :  { %v1651_v20 = vpop.permute.xlu0 %1650 }
0x1b96   :  { %v1653_v13 = vadd.f32 %v1651_v20, %v3165_v58 }
0x1b98   :  { %2319 = vtanh.f32 %v1653_v13 }
0x1b99   :  { %2321 = vtanh.f32 %v1641_v15  ;;  %v1936_v15 = vld [vmem:[%s3510_s17 + $0x30] sm:$0xff] }
0x1b9e   :  { %v2320_v23 = vpop.eup %2319 }
0x1b9f   :  { %1657 = vrot.lane.b32.xlu0 %v2320_v23, %s2391_s1  ;;  %v2322_v39 = vpop.eup %2321 }
0x1ba0   :  { %v1643_v35 = vadd.f32 1.0, %v2322_v39  ;;  %v1935_v39 = vld [vmem:[%s3510_s17 + $0x28] sm:$0xff] }
0x1ba2   :  { %v1644_v40 = vmul.f32 0.5, %v1643_v35  ;;  %v1934_v35 = vld [vmem:[%s3510_s17 + $0x20] sm:$0xff] }
0x1ba4   :  { %v1655_v42 = vsub.f32 1.0, %v1644_v40  ;;  %v1663_v49 = vmul.f32 %v1661_v43, %v1644_v40  ;;  %v1933_v40 = vld [vmem:[%s3510_s17 + $0x18] sm:$0xff]  ;;  %v1931_v43 = vld [vmem:[%s3510_s17 + $0x8] sm:$0xff] }
0x1be2   :  { %v1423_v38 = vpop.permute.xlu1 %1422 }
0x1be3   :  { %v1425_v9 = vmul.f32 %v1423_v38, %v1420_v36  ;;  %v1783_v36 = vld [vmem:[%s3506_s13 + $0x30] sm:$0xff]  ;;  %v1781_v38 = vld [vmem:[%s3506_s13 + $0x20] sm:$0xff] }
0x1be5   :  { %v3221_v30 = vadd.f32 %v1428_v14, %v1425_v9  ;;  %v1780_v14 = vld [vmem:[%s3506_s13 + $0x18] sm:$0xff]  ;;  %v1779_v9 = vld [vmem:[%s3506_s13 + $0x10] sm:$0xff] }
0x1be7   :  { %v1431_v46 = vrot.slane %v3221_v30, 4  ;;  %v1480_v4 = vrot.slane %v3221_v30, 6 }
0x1be9   :  { %1432 = vrot.lane.b32.xlu2 %v1431_v46, %s2391_s1  ;;  %v1777_v46 = vld [vmem:[%s3506_s13] sm:$0xff] }
0x1c11   :  { %v1658_v41 = vpop.permute.xlu0 %1657 }
0x1c12   :  { %v1660_v44 = vmul.f32 %v1658_v41, %v1655_v42  ;;  %v1932_v42 = vld [vmem:[%s3510_s17 + $0x10] sm:$0xff] }
0x1c14   :  { %v1664_v50 = vadd.f32 %v1663_v49, %v1660_v44  ;;  %v1930_v44 = vld [vmem:[%s3510_s17] sm:$0xff]  ;;  %v2156_v49 = vld [vmem:[%s3506_s13 + $0x70] sm:$0xff] }
0x1c16   :  { %v1666_v51 = vrot.slane %v1664_v50, 2 }
0x1c43   :  { %v1433_v47 = vpop.permute.xlu2 %1432 }
0x1c44   :  { %2140 = vmatmul.msk.f32.vlgmr.msra.gmra.mxu3 %vm180_vm3, %v1433_v47  ;;  %v2157_v47 = vld [vmem:[%s3506_s13 + $0x78] sm:$0xff] }
0x1c45   :  { %1838 = vmatpush.msrb.mxu1 %v2157_v47  ;;  %v1895_v47 = vld [vmem:[%s3508_s15 + $0x30] sm:$0xff] }
0x1c47   :  { %1839 = vmatpush.msrb.mxu1 %v2156_v49  ;;  %v1894_v49 = vld [vmem:[%s3508_s15 + $0x28] sm:$0xff] }
0x1c4c   :  { %2148 = vmatmul.msk.f32.vlgmr.msrb.gmra.mxu3 %vm180_vm3, %v1666_v51 }
0x1cc7   :  { %v1453_v37 = vpop.f32.mrf.mxu3 }
0x1cc8   :  { %v1454_v52 = vadd.f32 %v3127_v18, %v1453_v37 }
0x1cca   :  { %v1457_v54 = vrot.slane %v1454_v52, 2  ;;  %v2154_v52 = vld [vmem:[%s3506_s13 + $0x60] sm:$0xff] }
0x1ccc   :  { %1464 = vrot.lane.b32.xlu2 %v1457_v54, %s2390_s3  ;;  %v1459_v10 = vadd.f32 %v1457_v54, %v3145_v24  ;;  %v2153_v54 = vld [vmem:[%s3506_s13 + $0x58] sm:$0xff] }
0x1cce   :  { %v1460_v12 = vmul.f32 0.5, %v1459_v10  ;;  %v2151_v10 = vld [vmem:[%s3506_s13 + $0x48] sm:$0xff] }
0x1ccf   :  { %v1686_v55 = vpop.f32.mrf.mxu3 }
0x1cd0   :  { %v1687_v56 = vadd.f32 %v3151_v26, %v1686_v55  ;;  %2323 = vtanh.f32 %v1460_v12 }
0x1cd2   :  { %1703 = vrot.lane.b32.xlu0 %v1687_v56, %s2392_s27  ;;  %1690 = vrot.lane.b32.xlu1 %v1687_v56, %s2391_s1  ;;  %v2152_v56 = vld [vmem:[%s3506_s13 + $0x50] sm:$0xff] }
0x1cd6   :  { %v2324_v57 = vpop.eup %2323 }
0x1cd7   :  { %v1462_v60 = vadd.f32 1.0, %v2324_v57 }
0x1cd9   :  { %v1463_v8 = vmul.f32 0.5, %v1462_v60  ;;  %v2150_v60 = vld [vmem:[%s3506_s13 + $0x40] sm:$0xff] }
0x1cdb   :  { %v1482_v5 = vmul.f32 %v1480_v4, %v1463_v8  ;;  %v2176_v4 = vld [vmem:[%s3510_s17 + $0x60] sm:$0xff] }
0x1d26   :  { %v1465_v63 = vpop.permute.xlu2 %1464 }
0x1d27   :  { %v1467_v61 = vmul.f32 %v1465_v63, %v1463_v8 }
0x1d29   :  { %1469 = vrot.lane.b32.xlu1 %v1467_v61, %s2390_s3  ;;  %v2179_v61 = vld [vmem:[%s3510_s17 + $0x78] sm:$0xff] }
0x1d44   :  { %v1691_v18 = vpop.permute.xlu1 %1690  ;;  %v1704_v34 = vpop.permute.xlu0 %1703 }
0x1d45   :  { %v1693_v62 = vadd.f32 %v1691_v18, %v3145_v24 }
0x1d47   :  { %v1694_v0 = vmul.f32 0.5, %v1693_v62 }
0x1d49   :  { %2325 = vtanh.f32 %v1694_v0 }
0x1d4f   :  { %v2326_v26 = vpop.eup %2325 }
0x1d50   :  { %v1696_v2 = vadd.f32 1.0, %v2326_v26 }
0x1d52   :  { %v1697_v7 = vmul.f32 0.5, %v1696_v2 }
0x1d54   :  { %v1706_v16 = vmul.f32 %v1704_v34, %v1697_v7 }
0x1d56   :  { %1708 = vrot.lane.b32.xlu2 %v1706_v16, %s2390_s3 }
0x1d5e   :  { %1728 = vrot.lane.b32.xlu2 %v3196_v45, %s2391_s1 }
0x1d66   :  { %1738 = vrot.lane.b32.xlu2 %v3203_v59, %s2392_s27 }
0x1d6e   :  { %1746 = vrot.lane.b32.xlu2 %v3178_v19, %s2392_s27  ;;  %v1698_v19 = vadd.f32 %v1691_v18, %v3165_v58 }
0x1d70   :  { %v1699_v59 = vmul.f32 0.5, %v1698_v19 }
0x1d9b   :  { %v1470_v25 = vpop.permute.xlu1 %1469 }
0x1d9c   :  { %v1472_v21 = vadd.f32 %v1470_v25, %v3145_v24  ;;  %v1474_v24 = vsub.f32 1.0, %v1463_v8 }
0x1d9e   :  { %2327 = vtanh.f32 %v1472_v21 }
0x1da4   :  { %v2328_v53 = vpop.eup %2327 }
0x1da5   :  { %1476 = vrot.lane.b32.xlu0 %v2328_v53, %s2391_s1 }
0x1dad   :  { %1731 = vrot.lane.b32.xlu0 %v1664_v50, %s2392_s27  ;;  %v2155_v50 = vld [vmem:[%s3506_s13 + $0x68] sm:$0xff] }
0x1dae   :  { %1840 = vmatpush.msrb.mxu1 %v2155_v50  ;;  %v1893_v50 = vld [vmem:[%s3508_s15 + $0x20] sm:$0xff] }
0x1db0   :  { %v1709_v22 = vpop.permute.xlu2 %1708  ;;  %1841 = vmatpush.msrb.mxu1 %v2154_v52  ;;  %v1890_v52 = vld [vmem:[%s3508_s15 + $0x8] sm:$0xff] }
0x1db1   :  { %v1711_v3 = vadd.f32 %v1709_v22, %v3165_v58  ;;  %v1784_v58 = vld [vmem:[%s3506_s13 + $0x38] sm:$0xff] }
0x1db2   :  { %1800 = vmatpush.msrb.mxu0 %v1784_v58  ;;  %1842 = vmatpush.msrb.mxu1 %v2153_v54  ;;  %v2189_v58 = vld [vmem:[%s3510_s17 + $0xb8] sm:$0xff]  ;;  %v1889_v54 = vld [vmem:[%s3508_s15] sm:$0xff] }
0x1db3   :  { %2329 = vtanh.f32 %v1711_v3 }
0x1db4   :  { %2331 = vtanh.f32 %v1699_v59  ;;  %1801 = vmatpush.msrb.mxu0 %v1783_v36  ;;  %1843 = vmatpush.msrb.mxu1 %v2152_v56  ;;  %v2205_v36 = vld [vmem:[%s3507_s14] ss:$0 sm:$0xff]  ;;  %v2207_v56 = vld [vmem:[%s3507_s14 + $0x1] ss:$0 sm:$0xff] }
0x1db6   :  { %1802 = vmatpush.msrb.mxu0 %v1782_v31  ;;  %1844 = vmatpush.msrb.mxu1 %v2151_v10 }
0x1db8   :  { %1803 = vmatpush.msrb.mxu0 %v1781_v38  ;;  %v1729_v41 = vpop.permute.xlu2 %1728  ;;  %1845 = vmatpush.msrb.mxu1 %v2150_v60  ;;  %v2208_v60 = vld [vmem:[%s3511_s18 + $0x1] ss:$0 sm:$0xff] }
0x1db9   :  { %v2330_v45 = vpop.eup %2329 }
0x1dba   :  { %1715 = vrot.lane.b32.xlu1 %v2330_v45, %s2391_s1  ;;  %v2332_v29 = vpop.eup %2331  ;;  %1804 = vmatpush.msrb.mxu0 %v1780_v14 }
0x1dbb   :  { %v1701_v48 = vadd.f32 1.0, %v2332_v29  ;;  %1988 = vmatpush.msra.mxu1 %v2179_v61  ;;  %v2167_v29 = vld [vmem:[%s3506_s13 + $0xb8] sm:$0xff] }
0x1dbc   :  { %1805 = vmatpush.msrb.mxu0 %v1779_v9  ;;  %1876 = vmatpush.msra.mxu2 %v2167_v29  ;;  %v2206_v9 = vld [vmem:[%s3511_s18] ss:$0 sm:$0xff] }
0x1dbd   :  { %v1702_v32 = vmul.f32 0.5, %v1701_v48  ;;  %v2166_v48 = vld [vmem:[%s3506_s13 + $0xb0] sm:$0xff] }
0x1dbe   :  { %1877 = vmatpush.msra.mxu2 %v2166_v48 }
0x1dbf   :  { %v1713_v11 = vsub.f32 1.0, %v1702_v32  ;;  %v1720_v20 = vmul.f32 %v1702_v32, %v1666_v51  ;;  %v2165_v32 = vld [vmem:[%s3506_s13 + $0xa8] sm:$0xff] }
0x1dc0   :  { %v1739_v51 = vpop.permute.xlu2 %1738  ;;  %1878 = vmatpush.msra.mxu2 %v2165_v32 }
0x1dc2   :  { %1735 = vrot.lane.b32.xlu1 %v3221_v30, %s2391_s1  ;;  %v1778_v30 = vld [vmem:[%s3506_s13 + $0x8] sm:$0xff] }
0x1dc3   :  { %1806 = vmatpush.msrb.mxu0 %v1778_v30 }
0x1dc5   :  { %1807 = vmatpush.msrb.mxu0 %v1777_v46 }
0x1dc7   :  { %1950 = vmatpush.msra.mxu0 %v1937_v17 }
0x1dc8   :  { %v1747_v8 = vpop.permute.xlu2 %1746 }
0x1dc9   :  { %1951 = vmatpush.msra.mxu0 %v1936_v15  ;;  %v2188_v15 = vld [vmem:[%s3510_s17 + $0xb0] sm:$0xff] }
0x1dcb   :  { %1952 = vmatpush.msra.mxu0 %v1935_v39  ;;  %v2187_v39 = vld [vmem:[%s3510_s17 + $0xa8] sm:$0xff] }
0x1dcd   :  { %1953 = vmatpush.msra.mxu0 %v1934_v35  ;;  %v2186_v35 = vld [vmem:[%s3510_s17 + $0xa0] sm:$0xff] }
0x1dcf   :  { %1954 = vmatpush.msra.mxu0 %v1933_v40  ;;  %v2185_v40 = vld [vmem:[%s3510_s17 + $0x98] sm:$0xff] }
0x1dd1   :  { %1955 = vmatpush.msra.mxu0 %v1932_v42  ;;  %v2183_v42 = vld [vmem:[%s3510_s17 + $0x88] sm:$0xff] }
0x1dd3   :  { %1956 = vmatpush.msra.mxu0 %v1931_v43  ;;  %v2182_v43 = vld [vmem:[%s3510_s17 + $0x80] sm:$0xff] }
0x1dd5   :  { %1957 = vmatpush.msra.mxu0 %v1930_v44  ;;  %v1896_v44 = vld [vmem:[%s3508_s15 + $0x38] sm:$0xff] }
0x1dd6   :  { %1912 = vmatpush.msra.mxu3 %v1896_v44 }
0x1dd8   :  { %1913 = vmatpush.msra.mxu3 %v1895_v47 }
0x1dda   :  { %1914 = vmatpush.msra.mxu3 %v1894_v49 }
0x1ddc   :  { %1915 = vmatpush.msra.mxu3 %v1893_v50 }
0x1e17   :  { %v1477_v27 = vpop.permute.xlu0 %1476 }
0x1e18   :  { %v1479_v6 = vmul.f32 %v1477_v27, %v1474_v24  ;;  %v2177_v24 = vld [vmem:[%s3510_s17 + $0x68] sm:$0xff]  ;;  %v2175_v27 = vld [vmem:[%s3510_s17 + $0x58] sm:$0xff] }
0x1e1a   :  { %v1483_v28 = vadd.f32 %v1482_v5, %v1479_v6  ;;  %v2174_v5 = vld [vmem:[%s3510_s17 + $0x50] sm:$0xff]  ;;  %v2173_v6 = vld [vmem:[%s3510_s17 + $0x48] sm:$0xff] }
0x1e1c   :  { %1743 = vrot.lane.b32.xlu1 %v1483_v28, %s2391_s1  ;;  %v2172_v28 = vld [vmem:[%s3510_s17 + $0x40] sm:$0xff] }
0x1e1f   :  { %v1732_v55 = vpop.permute.xlu0 %1731 }
0x1e20   :  { %v1734_v57 = vsel %vm180_vm3, %v1729_v41, %v1732_v55  ;;  %v2184_v41 = vld [vmem:[%s3510_s17 + $0x90] sm:$0xff]  ;;  %v2046_v55 = vld [vmem:[%s3512_s19 + $0x38] sm:$0xff] }
0x1e21   :  { %v1751_v62 = vrot.slane %v1734_v57, 1  ;;  %v1762_v21 = vrot.slane %v1734_v57, 6 }
0x1e2c   :  { %v1716_v33 = vpop.permute.xlu1 %1715 }
0x1e2d   :  { %v1718_v13 = vmul.f32 %v1716_v33, %v1713_v11  ;;  %v2164_v11 = vld [vmem:[%s3506_s13 + $0xa0] sm:$0xff]  ;;  %v2163_v33 = vld [vmem:[%s3506_s13 + $0x98] sm:$0xff] }
0x1e2e   :  { %1879 = vmatpush.msra.mxu2 %v2164_v11 }
0x1e2f   :  { %v1721_v23 = vadd.f32 %v1720_v20, %v1718_v13  ;;  %v2162_v20 = vld [vmem:[%s3506_s13 + $0x90] sm:$0xff]  ;;  %v2161_v13 = vld [vmem:[%s3506_s13 + $0x88] sm:$0xff] }
0x1e30   :  { %1880 = vmatpush.msra.mxu2 %v2163_v33 }
0x1e31   :  { %1724 = vrot.lane.b32.xlu0 %v1721_v23, %s2392_s27  ;;  %v2160_v23 = vld [vmem:[%s3506_s13 + $0x80] sm:$0xff] }
0x1e32   :  { %1881 = vmatpush.msra.mxu2 %v2162_v20 }
0x1e34   :  { %v1736_v37 = vpop.permute.xlu1 %1735  ;;  %1882 = vmatpush.msra.mxu2 %v2161_v13 }
0x1e35   :  { %v1741_v63 = vsel %vm180_vm3, %v1736_v37, %v1739_v51  ;;  %v1892_v51 = vld [vmem:[%s3508_s15 + $0x18] sm:$0xff]  ;;  %v1891_v37 = vld [vmem:[%s3508_s15 + $0x10] sm:$0xff] }
0x1e36   :  { %v1754_v26 = vrot.slane %v1741_v63, 2  ;;  %v1764_v22 = vrot.slane %v1741_v63, 7  ;;  %1883 = vmatpush.msra.mxu2 %v2160_v23  ;;  %1916 = vmatpush.msra.mxu3 %v1892_v51 }
0x1e38   :  { %2026 = vmatpush.msrb.mxu2 %v2189_v58  ;;  %1917 = vmatpush.msra.mxu3 %v1891_v37 }
0x1e3a   :  { %2027 = vmatpush.msrb.mxu2 %v2188_v15  ;;  %1918 = vmatpush.msra.mxu3 %v1890_v52 }
0x1e3c   :  { %2028 = vmatpush.msrb.mxu2 %v2187_v39  ;;  %1919 = vmatpush.msra.mxu3 %v1889_v54 }
0x1e3e   :  { %2029 = vmatpush.msrb.mxu2 %v2186_v35  ;;  %2062 = vmatpush.msrb.mxu3 %v2046_v55 }
0x1e40   :  { %2030 = vmatpush.msrb.mxu2 %v2185_v40 }
0x1e42   :  { %2031 = vmatpush.msrb.mxu2 %v2184_v41 }
0x1e44   :  { %2032 = vmatpush.msrb.mxu2 %v2183_v42 }
0x1e46   :  { %2033 = vmatpush.msrb.mxu2 %v2182_v43 }
0x1e8e   :  { %v1744_v12 = vpop.permute.xlu1 %1743 }
0x1e8f   :  { %v1749_v18 = vsel %vm180_vm3, %v1744_v12, %v1747_v8 }
0x1e90   :  { %v1757_v7 = vrot.slane %v1749_v18, 3 }
0x1ea3   :  { %v1725_v0 = vpop.permute.xlu0 %1724 }
0x1ea4   :  { %v1727_v2 = vsel %vm180_vm3, %v3170_v1, %v1725_v0  ;;  %v2178_v1 = vld [vmem:[%s3510_s17 + $0x70] sm:$0xff]  ;;  %v2043_v0 = vld [vmem:[%s3512_s19 + $0x20] sm:$0xff] }
0x1ea5   :  { %v1760_v34 = vrot.slane %v1727_v2, 5  ;;  %v1767_v16 = vsel %vm1766_vm5, %v1727_v2, %v1751_v62  ;;  %1989 = vmatpush.msra.mxu1 %v2178_v1  ;;  %v2044_v62 = vld [vmem:[%s3512_s19 + $0x28] sm:$0xff]  ;;  %v2041_v2 = vld [vmem:[%s3512_s19 + $0x10] sm:$0xff] }
0x1ea6   :  { %v1768_v25 = vsel %vm88_vm0, %v1767_v16, %v1754_v26  ;;  %v2042_v26 = vld [vmem:[%s3512_s19 + $0x18] sm:$0xff]  ;;  %v2209_v16 = vld [vmem:[%s3507_s14 + $0x2] ss:$0 sm:$0xff] }
0x1ea7   :  { %v1770_v53 = vsel %vm1769_vm6, %v1768_v25, %v1757_v7  ;;  %1990 = vmatpush.msra.mxu1 %v2177_v24  ;;  %v2040_v7 = vld [vmem:[%s3512_s19 + $0x8] sm:$0xff] }
0x1ea8   :  { %v1771_v3 = vsel %vm90_vm1, %v1770_v53, %v1760_v34  ;;  %v2039_v34 = vld [vmem:[%s3512_s19] sm:$0xff] }
0x1ea9   :  { %v1773_v45 = vsel %vm1772_vm7, %v1771_v3, %v1762_v21  ;;  %1991 = vmatpush.msra.mxu1 %v2176_v4 }
0x1eaa   :  { %v1774_v19 = vsel %vm92_vm2, %v1773_v45, %v1764_v22  ;;  %v2210_v22 = vld [vmem:[%s3511_s18 + $0x2] ss:$0 sm:$0xff]  ;;  %s2393_s18 = smov [#allocation2]  }
0x1eab   :  { %v1776_v59 = vsel %vm1775_vm8, %v1774_v19, %v1749_v18  ;;  %1992 = vmatpush.msra.mxu1 %v2175_v27  ;;  %v2045_v18 = vld [vmem:[%s3512_s19 + $0x30] sm:$0xff]  ;;  %v2212_v27 = vld [vmem:[%s3513_s20] ss:$0 sm:$0xff]  ;;  %s2082_s8 = sshll.u32 %s2393_s18, 4  ;;  %s2083_s8 = int_to_ptr.vmem [resolvable:$true] %s2082_s8 }
0x1eac   :  { %2149 = vmatmul.msk.f32.vlgmr.msrb.gmra.mxu0 %vm680_vm4, %v1776_v59  ;;  %2063 = vmatpush.msrb.mxu3 %v2045_v18 }
0x1ead   :  { %1993 = vmatpush.msra.mxu1 %v2174_v5 }
0x1eae   :  { %2064 = vmatpush.msrb.mxu3 %v2044_v62 }
0x1eaf   :  { %1994 = vmatpush.msra.mxu1 %v2173_v6 }
0x1eb0   :  { %2065 = vmatpush.msrb.mxu3 %v2043_v0 }
0x1eb1   :  { %1995 = vmatpush.msra.mxu1 %v2172_v28 }
0x1eb2   :  { %2066 = vmatpush.msrb.mxu3 %v2042_v26 }
0x1eb4   :  { %2171 = vmatmul.msk.f32.vlgmr.msra.gmra.mxu0 %vm680_vm4, %v1776_v59  ;;  %2067 = vmatpush.msrb.mxu3 %v2041_v2  ;;  %v2211_v59 = vld [vmem:[%s3509_s16] ss:$0 sm:$0xff]  ;;  %s2394_s16 = smov [#allocation4]  }
0x1eb5   :  { %s2093_s15 = sshll.u32 %s2394_s16, 4  ;;  %s2094_s15 = int_to_ptr.vmem [resolvable:$true] %s2093_s15 }
0x1eb6   :  { %2068 = vmatpush.msrb.mxu3 %v2040_v7 }
0x1eb8   :  { %2069 = vmatpush.msrb.mxu3 %v2039_v34 }
0x1f29   :  { %v1809_v31 = vpop.f32.mrf.mxu0 }
0x1f2a   :  { %v1810_v38 = vadd.f32 %v2205_v36, %v1809_v31 }
0x1f2c   :  { %v1812_v14 = vmax.f32 %v1810_v38, 0.0 }
0x1f2e   :  { %2159 = vmatmul.msk.f32.vlgmr.msrb.gmra.mxu1 %vm680_vm4, %v1812_v14 }
0x1f31   :  { %v1959_v30 = vpop.f32.mrf.mxu0 }
0x1f32   :  { %v1960_v46 = vadd.f32 %v2206_v9, %v1959_v30 }
0x1f34   :  { %v1962_v17 = vmax.f32 %v1960_v46, 0.0 }
0x1f36   :  { %2181 = vmatmul.msk.f32.vlgmr.msra.gmra.mxu1 %vm680_vm4, %v1962_v17 }
0x1fab   :  { %v1847_v10 = vpop.f32.mrf.mxu1 }
0x1fac   :  { %v1848_v12 = vadd.f32 %v2207_v56, %v1847_v10 }
0x1fae   :  { %v1850_v57 = vmax.f32 %v1848_v12, 0.0 }
0x1fb0   :  { %2169 = vmatmul.msk.f32.vlgmr.msra.gmra.mxu2 %vm680_vm4, %v1850_v57 }
0x1fb3   :  { %v1997_v8 = vpop.f32.mrf.mxu1 }
0x1fb4   :  { %v1998_v63 = vadd.f32 %v2208_v60, %v1997_v8 }
0x1fb6   :  { %v2000_v61 = vmax.f32 %v1998_v63, 0.0 }
0x1fb8   :  { %2191 = vmatmul.msk.f32.vlgmr.msrb.gmra.mxu2 %vm680_vm4, %v2000_v61 }
0x2033   :  { %v1885_v25 = vpop.f32.mrf.mxu2 }
0x2034   :  { %v1886_v21 = vadd.f32 %v2209_v16, %v1885_v25 }
0x2036   :  { %v1888_v53 = vmax.f32 %v1886_v21, 0.0 }
0x2038   :  { %2170 = vmatmul.msk.f32.vlgmr.msra.gmra.mxu3 %vm680_vm4, %v1888_v53 }
0x203b   :  { %v2035_v3 = vpop.f32.mrf.mxu2 }
0x203c   :  { %v2036_v45 = vadd.f32 %v2210_v22, %v2035_v3 }
0x203e   :  { %v2038_v19 = vmax.f32 %v2036_v45, 0.0 }
0x2040   :  { %2192 = vmatmul.msk.f32.vlgmr.msrb.gmra.mxu3 %vm680_vm4, %v2038_v19 }
0x20bb   :  { %v1921_v1 = vpop.f32.mrf.mxu3 }
0x20bc   :  { %v1922_v24 = vadd.f32 %v2211_v59, %v1921_v1 }
0x20be   :  { %v1924_v4 = vmul.f32 0.5, %v1922_v24 }
0x20c0   :  { %2333 = vtanh.f32 %v1924_v4 }
0x20c3   :  { %v2071_v5 = vpop.f32.mrf.mxu3 }
0x20c4   :  { %v2072_v6 = vadd.f32 %v2212_v27, %v2071_v5 }
0x20c6   :  { %v2334_v28 = vpop.eup %2333  ;;  %2335 = vtanh.f32 %v2072_v6 }
0x20c7   :  { %v1926_v29 = vadd.f32 1.0, %v2334_v28 }
0x20c9   :  { %v1927_v48 = vmul.f32 0.5, %v1926_v29 }
0x20cb   :  { %1929 = vst.msk [vmem:[#allocation2] sm:$0xff] %vm1928_vm9, %v1927_v48 }
0x20cc   :  { %v2336_v32 = vpop.eup %2335  ;;  %2087 = dma.vmem_to_hbm [thread:$0]  %s2083_s8, 128, %s2085_s9, [#allocation3]  }
0x20cd   :  { %2076 = vst.msk [vmem:[#allocation4] sm:$0xff] %vm2075_vm10, %v2336_v32 }
0x20ce   :  { %2098 = dma.vmem_to_hbm [thread:$0]  %s2094_s15, 128, %s2096_s23, [#allocation5]  }
0x20cf   :  { %2385 = dma.done.wait [#allocation3], 128  }
0x20d0   :  { %2386 = vsyncadd [#allocation3], 4294967168 }
0x20d1   :  { %2387 = dma.done.wait [#allocation5], 128  }
0x20d2   :  { %2388 = vsyncadd [#allocation5], 4294967168 }
0x20d3   :  { %2107 = vsyncpa [#allocation3], 1 }
0x20d4   :  { %2108 = vsyncpa [#allocation5], 1 }

</bundles_post_ra>
